<compile_context>
chip_gen: v7x
topology: tpu7x:2x2x1
jax: 0.10.0
libtpu: 0.0.40
codegen_flags: <defaults>
</compile_context>

<pallas_src>
import functools

import jax
import jax.numpy as jnp
from jax import lax
from jax.experimental import pallas as pl
from jax.experimental.pallas import tpu as pltpu

_LANE = 128  # TPU lane-tile width


def _srcnn_kernel(x_ref, w1_ref, b1_ref, w2_ref, b2_ref, w3_ref, b3_ref,
                  o_ref,
                  flat1_ref, p1_ref, flat3_ref,
                  *, H, W, K1, K3, top1, top3):
    """One image per grid step; all intermediates stay in VMEM."""
    HW = H * W
    Cin = x_ref.shape[1]
    C2 = flat3_ref.shape[0]
    Cout = o_ref.shape[1]
    pad1, pad3 = K1 // 2, K3 // 2
    f32 = jnp.float32

    # x-coordinate (image column) of every output pixel, along the lane axis.
    xcol = lax.broadcasted_iota(jnp.int32, (1, HW), 1) % W

    # ---------------- conv1 (9x9, pad 4) + ReLU ----------------
    # Lane-padded flat image: flat1[c, top1 + y*W + x] = img[c, y, x].
    # Zero only the pad columns (NOT pl.when-guarded: with a "parallel" batch
    # axis each TensorCore has its own private scratch).
    flat1_ref[:, :top1] = jnp.zeros((Cin, top1), f32)
    flat1_ref[:, top1 + HW:] = jnp.zeros(
        (Cin, flat1_ref.shape[1] - top1 - HW), f32)
    flat1_ref[:, top1:top1 + HW] = x_ref[0].astype(f32)    # lane-aligned copy

    # im2col patch matrix: p1T[(kh*K1 + kw)*Cin + c, p] = padded[c, p + off].
    for kw in range(K1):
        dx = kw - pad1
        keep = None if dx == 0 else ((xcol + dx >= 0) & (xcol + dx < W))
        for kh in range(K1):
            off = (kh - pad1) * W + dx
            sl = flat1_ref[:, top1 + off: top1 + off + HW]   # (Cin, HW)
            if keep is not None:
                sl = jnp.where(keep, sl, 0.0)
            tap = kh * K1 + kw
            p1_ref[tap * Cin:(tap + 1) * Cin, :] = sl

    # One tall-N MXU matmul: (C1, 162) @ (162, HW) -> (C1, HW).
    a1 = jnp.dot(w1_ref[...], p1_ref[...], preferred_element_type=f32)
    a1 = jnp.maximum(a1 + b1_ref[...], 0.0)

    # ---------------- conv2 (1x1) + ReLU ----------------
    a2 = jnp.dot(w2_ref[...], a1, preferred_element_type=f32)   # (C2, HW)
    a2 = jnp.maximum(a2 + b2_ref[...], 0.0)

    # ---------------- conv3 (5x5, pad 2): tap-accumulated, no p3 ------------
    flat3_ref[:, :top3] = jnp.zeros((C2, top3), f32)
    flat3_ref[:, top3 + HW:] = jnp.zeros(
        (C2, flat3_ref.shape[1] - top3 - HW), f32)
    flat3_ref[:, top3:top3 + HW] = a2                        # lane-aligned copy

    cout_pad = w3_ref.shape[0]          # Cout padded to 8 sublanes (wrapper)
    acc = jnp.zeros((cout_pad, HW), f32)
    for kw in range(K3):
        dx = kw - pad3
        keep = None if dx == 0 else ((xcol + dx >= 0) & (xcol + dx < W))
        for kh in range(K3):
            tap = kh * K3 + kw
            off = (kh - pad3) * W + dx
            w_tap = w3_ref[:, tap * C2:(tap + 1) * C2]        # (8, C2)
            sl = flat3_ref[:, top3 + off: top3 + off + HW]    # (C2, HW)
            contrib = jnp.dot(w_tap, sl, preferred_element_type=f32)  # (8, HW)
            if keep is not None:
                contrib = jnp.where(keep, contrib, 0.0)
            acc = acc + contrib

    # Lane-dense (Cout, HW) store; no ReLU on conv3.
    o_ref[0] = (acc + b3_ref[...])[:Cout]


def _srcnn_forward_impl(params, x_nchw):
    B, Cin, H, W = x_nchw.shape
    HW = H * W
    w1, b1 = params["conv1"]
    w2, b2 = params["conv2"]
    w3, b3 = params["conv3"]
    K1, K3 = w1.shape[0], w3.shape[0]
    C1, C2, Cout = w1.shape[-1], w2.shape[-1], w3.shape[-1]
    COUT_PAD = 8          # pad conv3's M (=Cout) to a full sublane tile

    # NCHW -> (B, Cin, H*W): pure reshape, pixels land on the lane axis.
    x_flat = x_nchw.reshape(B, Cin, HW).astype(jnp.float32)

    # Transposed weight matrices: rows = out channels, cols = (kh, kw, cin).
    w1m = jnp.transpose(w1, (3, 0, 1, 2)).reshape(
        C1, K1 * K1 * Cin).astype(jnp.float32)
    b1m = b1.reshape(C1, 1).astype(jnp.float32)
    w2m = jnp.transpose(w2.reshape(C1, C2)).astype(jnp.float32)        # (C2, C1)
    b2m = b2.reshape(C2, 1).astype(jnp.float32)
    w3m = jnp.transpose(w3, (3, 0, 1, 2)).reshape(
        Cout, K3 * K3 * C2).astype(jnp.float32)
    w3m = jnp.concatenate(
        [w3m, jnp.zeros((COUT_PAD - Cout, K3 * K3 * C2), jnp.float32)], axis=0)
    b3m = jnp.concatenate(
        [b3.reshape(Cout, 1).astype(jnp.float32),
         jnp.zeros((COUT_PAD - Cout, 1), jnp.float32)], axis=0)

    # Lane-tile-aligned leading/trailing pad columns (>= pad*W + pad each).
    def _pad_cols(K):
        need = (K // 2) * W + (K // 2)
        return pl.cdiv(need, _LANE) * _LANE

    top1, top3 = _pad_cols(K1), _pad_cols(K3)
    L1 = top1 + HW + top1
    L3 = top3 + HW + top3

    kernel = functools.partial(_srcnn_kernel, H=H, W=W, K1=K1, K3=K3,
                               top1=top1, top3=top3)

    # TODO(synk): on single-TensorCore v5e/v6e, fold the batch into the lane
    # (N) dimension instead of grid=(B,) to amortize per-step overhead; the
    # 2-wide "parallel" grid is kept so images shard across v7x's two cores.
    out_flat = pl.pallas_call(
        kernel,
        out_shape=jax.ShapeDtypeStruct((B, Cout, HW), jnp.float32),
        grid=(B,),
        in_specs=[
            pl.BlockSpec((1, Cin, HW), lambda b: (b, 0, 0)),
            pl.BlockSpec(w1m.shape, lambda b: (0, 0)),   # grid-invariant:
            pl.BlockSpec(b1m.shape, lambda b: (0, 0)),   #   DMA'd once
            pl.BlockSpec(w2m.shape, lambda b: (0, 0)),
            pl.BlockSpec(b2m.shape, lambda b: (0, 0)),
            pl.BlockSpec(w3m.shape, lambda b: (0, 0)),
            pl.BlockSpec(b3m.shape, lambda b: (0, 0)),
        ],
        out_specs=pl.BlockSpec((1, Cout, HW), lambda b: (b, 0, 0)),
        scratch_shapes=[
            pltpu.VMEM((Cin, L1), jnp.float32),            # flat1T  (2, 512)
            pltpu.VMEM((K1 * K1 * Cin, HW), jnp.float32),  # p1T     (162, 256)
            pltpu.VMEM((C2, L3), jnp.float32),             # flat3T  (64, 512)
        ],
        compiler_params=pltpu.CompilerParams(
            dimension_semantics=("parallel",)),
    )(x_flat, w1m, b1m, w2m, b2m, w3m, b3m)

    # (B, Cout, H*W) -> NCHW: pure reshape, no transpose dispatch.
    return out_flat.reshape(B, Cout, H, W)


srcnn_forward = jax.jit(_srcnn_forward_impl)


def init_srcnn_params(key):
    """Deterministic init matching PyTorch Conv2d shapes (stored as HWIO)."""
    def conv_init(k, kh, kw, cin, cout):
        kw_key, kb_key = jax.random.split(k)
        fan_in = cin * kh * kw
        bound = 1.0 / jnp.sqrt(fan_in)
        w = jax.random.uniform(kw_key, (kh, kw, cin, cout), jnp.float32,
                               minval=-bound, maxval=bound)
        b = jax.random.uniform(kb_key, (cout,), jnp.float32,
                               minval=-bound, maxval=bound)
        return w, b

    k1, k2, k3 = jax.random.split(key, 3)
    return {
        "conv1": conv_init(k1, 9, 9, 2, 128),
        "conv2": conv_init(k2, 1, 1, 128, 64),
        "conv3": conv_init(k3, 5, 5, 64, 2),
    }


def _reference_forward(params, x_nchw):
    """Pure-JAX reference (lax.conv, HIGHEST precision) for correctness."""
    x = jnp.transpose(x_nchw, (0, 2, 3, 1))
    dn = lax.conv_dimension_numbers(x.shape, params["conv1"][0].shape,
                                    ("NHWC", "HWIO", "NHWC"))

    def conv(x, w, b, pad):
        y = lax.conv_general_dilated(x, w, (1, 1), [(pad, pad), (pad, pad)],
                                     dimension_numbers=dn,
                                     precision=lax.Precision.HIGHEST)
        return y + b[None, None, None, :]

    w1, b1 = params["conv1"]
    w2, b2 = params["conv2"]
    w3, b3 = params["conv3"]
    x = jnp.maximum(conv(x, w1, b1, 4), 0.0)
    x = jnp.maximum(conv(x, w2, b2, 0), 0.0)
    x = conv(x, w3, b3, 2)
    return jnp.transpose(x, (0, 3, 1, 2))


if __name__ == "__main__":
    key = jax.random.PRNGKey(0)
    pkey, xkey = jax.random.split(key)
    params = init_srcnn_params(pkey)

    # NCHW input: batch=2, channels=2 (SRCNN input channels), 16x16 spatial.
    x = jax.random.normal(xkey, (2, 2, 16, 16), jnp.float32)

    out = jax.block_until_ready(srcnn_forward(params, x))

    ref = _reference_forward(params, x)
    assert out.shape == (2, 2, 16, 16)
    assert jnp.allclose(out, ref, atol=2e-3, rtol=2e-3), "mismatch vs JAX reference"

    print("KERNEL_OK")
</pallas_src>

<mosaic_0001>
module attributes {stable_mosaic.version = 11 : i64} {
  func.func @_srcnn_kernel(%arg0: i32, %arg1: memref<1x2x256xf32, #tpu.memory_space<vmem>>, %arg2: memref<128x162xf32, #tpu.memory_space<vmem>>, %arg3: memref<128x1xf32, #tpu.memory_space<vmem>>, %arg4: memref<64x128xf32, #tpu.memory_space<vmem>>, %arg5: memref<64x1xf32, #tpu.memory_space<vmem>>, %arg6: memref<8x1600xf32, #tpu.memory_space<vmem>>, %arg7: memref<8x1xf32, #tpu.memory_space<vmem>>, %arg8: memref<1x2x256xf32, #tpu.memory_space<vmem>>, %arg9: memref<2x512xf32, #tpu.memory_space<vmem>>, %arg10: memref<162x256xf32, #tpu.memory_space<vmem>>, %arg11: memref<64x512xf32, #tpu.memory_space<vmem>>) attributes {dimension_semantics = [#tpu.dimension_semantics<parallel>], iteration_bounds = array<i64: 2>, scalar_prefetch = 0 : i64, scratch_operands = 3 : i64, tpu.core_type = #tpu.core_type<tc>, window_params = [{transform_indices = @transform_0, window_bounds = array<i64: 1, 2, 256>}, {pipeline_mode = #tpu.pipeline_mode<synchronous>, transform_indices = @transform_1, window_bounds = array<i64: 128, 162>}, {pipeline_mode = #tpu.pipeline_mode<synchronous>, transform_indices = @transform_2, window_bounds = array<i64: 128, 1>}, {pipeline_mode = #tpu.pipeline_mode<synchronous>, transform_indices = @transform_3, window_bounds = array<i64: 64, 128>}, {pipeline_mode = #tpu.pipeline_mode<synchronous>, transform_indices = @transform_4, window_bounds = array<i64: 64, 1>}, {pipeline_mode = #tpu.pipeline_mode<synchronous>, transform_indices = @transform_5, window_bounds = array<i64: 8, 1600>}, {pipeline_mode = #tpu.pipeline_mode<synchronous>, transform_indices = @transform_6, window_bounds = array<i64: 8, 1>}, {transform_indices = @transform_7, window_bounds = array<i64: 1, 2, 256>}]} {
    %0 = tpu.iota {dimensions = array<i32: 1>} : vector<1x256xi32>
    %c16_i32 = arith.constant 16 : i32
    %c0_i32 = arith.constant 0 : i32
    %1 = arith.cmpi eq, %c16_i32, %c0_i32 : i32
    %c1_i32 = arith.constant 1 : i32
    %2 = arith.select %1, %c1_i32, %c16_i32 : i32
    %3 = vector.broadcast %2 : i32 to vector<1x256xi32>
    %4 = arith.remsi %0, %3 : vector<1x256xi32>
    %c0_i32_0 = arith.constant 0 : i32
    %5 = vector.broadcast %c0_i32_0 : i32 to vector<1x256xi32>
    %6 = arith.cmpi ne, %4, %5 : vector<1x256xi32>
    %c0_i32_1 = arith.constant 0 : i32
    %7 = vector.broadcast %c0_i32_1 : i32 to vector<1x256xi32>
    %8 = arith.cmpi slt, %4, %7 : vector<1x256xi32>
    %c0_i32_2 = arith.constant 0 : i32
    %9 = arith.cmpi slt, %2, %c0_i32_2 : i32
    %10 = vector.broadcast %9 : i1 to vector<1x256xi1>
    %11 = vector.broadcast %10 : vector<1x256xi1> to vector<1x256xi1>
    %12 = arith.xori %8, %11 : vector<1x256xi1>
    %13 = arith.andi %12, %6 : vector<1x256xi1>
    %14 = vector.broadcast %2 : i32 to vector<1x256xi32>
    %15 = arith.addi %4, %14 : vector<1x256xi32>
    %16 = arith.select %13, %15, %4 : vector<1x256xi1>, vector<1x256xi32>
    %cst = arith.constant 0.000000e+00 : f32
    %17 = vector.broadcast %cst : f32 to vector<2x128xf32>
    %c0 = arith.constant 0 : index
    %c0_3 = arith.constant 0 : index
    %18 = vector.load %arg9[%c0, %c0_3] : memref<2x512xf32, #tpu.memory_space<vmem>>, vector<2x128xf32>
    tpu.vector_store %arg9[%c0, %c0_3], %17 {strides = array<i32>} : memref<2x512xf32, #tpu.memory_space<vmem>>, vector<2x128xf32>,
    %cst_4 = arith.constant 0.000000e+00 : f32
    %19 = vector.broadcast %cst_4 : f32 to vector<2x128xf32>
    %c0_5 = arith.constant 0 : index
    %c384 = arith.constant 384 : index
    %20 = vector.load %arg9[%c0_5, %c384] : memref<2x512xf32, #tpu.memory_space<vmem>>, vector<2x128xf32>
    tpu.vector_store %arg9[%c0_5, %c384], %19 {strides = array<i32>} : memref<2x512xf32, #tpu.memory_space<vmem>>, vector<2x128xf32>,
    %c0_6 = arith.constant 0 : index
    %c0_7 = arith.constant 0 : index
    %c0_8 = arith.constant 0 : index
    %21 = vector.load %arg1[%c0_6, %c0_7, %c0_8] : memref<1x2x256xf32, #tpu.memory_space<vmem>>, vector<1x2x256xf32>
    %22 = vector.shape_cast %21 : vector<1x2x256xf32> to vector<2x256xf32>
    %c0_9 = arith.constant 0 : index
    %c128 = arith.constant 128 : index
    %23 = vector.load %arg9[%c0_9, %c128] : memref<2x512xf32, #tpu.memory_space<vmem>>, vector<2x256xf32>
    tpu.vector_store %arg9[%c0_9, %c128], %22 {strides = array<i32>} : memref<2x512xf32, #tpu.memory_space<vmem>>, vector<2x256xf32>,
    %c-4_i32 = arith.constant -4 : i32
    %24 = vector.broadcast %c-4_i32 : i32 to vector<1x256xi32>
    %25 = arith.addi %16, %24 : vector<1x256xi32>
    %c0_i32_10 = arith.constant 0 : i32
    %26 = vector.broadcast %c0_i32_10 : i32 to vector<1x256xi32>
    %27 = arith.cmpi sge, %25, %26 : vector<1x256xi32>
    %c-4_i32_11 = arith.constant -4 : i32
    %28 = vector.broadcast %c-4_i32_11 : i32 to vector<1x256xi32>
    %29 = arith.addi %16, %28 : vector<1x256xi32>
    %c16_i32_12 = arith.constant 16 : i32
    %30 = vector.broadcast %c16_i32_12 : i32 to vector<1x256xi32>
    %31 = arith.cmpi slt, %29, %30 : vector<1x256xi32>
    %32 = arith.andi %27, %31 : vector<1x256xi1>
    %c0_13 = arith.constant 0 : index
    %c60 = arith.constant 60 : index
    %33 = vector.load %arg9[%c0_13, %c60] : memref<2x512xf32, #tpu.memory_space<vmem>>, vector<2x256xf32>
    %cst_14 = arith.constant 0.000000e+00 : f32
    %34 = vector.shape_cast %32 : vector<1x256xi1> to vector<1x256xi1>
    %35 = vector.broadcast %34 : vector<1x256xi1> to vector<2x256xi1>
    %36 = vector.broadcast %cst_14 : f32 to vector<2x256xf32>
    %37 = arith.select %35, %33, %36 : vector<2x256xi1>, vector<2x256xf32>
    %c0_15 = arith.constant 0 : index
    %c0_16 = arith.constant 0 : index
    %38 = vector.load %arg10[%c0_15, %c0_16] : memref<162x256xf32, #tpu.memory_space<vmem>>, vector<2x256xf32>
    tpu.vector_store %arg10[%c0_15, %c0_16], %37 {strides = array<i32>} : memref<162x256xf32, #tpu.memory_space<vmem>>, vector<2x256xf32>,
    %c0_17 = arith.constant 0 : index
    %c76 = arith.constant 76 : index
    %39 = vector.load %arg9[%c0_17, %c76] : memref<2x512xf32, #tpu.memory_space<vmem>>, vector<2x256xf32>
    %cst_18 = arith.constant 0.000000e+00 : f32
    %40 = vector.shape_cast %32 : vector<1x256xi1> to vector<1x256xi1>
    %41 = vector.broadcast %40 : vector<1x256xi1> to vector<2x256xi1>
    %42 = vector.broadcast %cst_18 : f32 to vector<2x256xf32>
    %43 = arith.select %41, %39, %42 : vector<2x256xi1>, vector<2x256xf32>
    %c18 = arith.constant 18 : index
    %c0_19 = arith.constant 0 : index
    %44 = vector.load %arg10[%c18, %c0_19] : memref<162x256xf32, #tpu.memory_space<vmem>>, vector<2x256xf32>
    tpu.vector_store %arg10[%c18, %c0_19], %43 {strides = array<i32>} : memref<162x256xf32, #tpu.memory_space<vmem>>, vector<2x256xf32>,
    %c0_20 = arith.constant 0 : index
    %c92 = arith.constant 92 : index
    %45 = vector.load %arg9[%c0_20, %c92] : memref<2x512xf32, #tpu.memory_space<vmem>>, vector<2x256xf32>
    %cst_21 = arith.constant 0.000000e+00 : f32
    %46 = vector.shape_cast %32 : vector<1x256xi1> to vector<1x256xi1>
    %47 = vector.broadcast %46 : vector<1x256xi1> to vector<2x256xi1>
    %48 = vector.broadcast %cst_21 : f32 to vector<2x256xf32>
    %49 = arith.select %47, %45, %48 : vector<2x256xi1>, vector<2x256xf32>
    %c36 = arith.constant 36 : index
    %c0_22 = arith.constant 0 : index
    %50 = vector.load %arg10[%c36, %c0_22] : memref<162x256xf32, #tpu.memory_space<vmem>>, vector<2x256xf32>
    tpu.vector_store %arg10[%c36, %c0_22], %49 {strides = array<i32>} : memref<162x256xf32, #tpu.memory_space<vmem>>, vector<2x256xf32>,
    %c0_23 = arith.constant 0 : index
    %c108 = arith.constant 108 : index
    %51 = vector.load %arg9[%c0_23, %c108] : memref<2x512xf32, #tpu.memory_space<vmem>>, vector<2x256xf32>
    %cst_24 = arith.constant 0.000000e+00 : f32
    %52 = vector.shape_cast %32 : vector<1x256xi1> to vector<1x256xi1>
    %53 = vector.broadcast %52 : vector<1x256xi1> to vector<2x256xi1>
    %54 = vector.broadcast %cst_24 : f32 to vector<2x256xf32>
    %55 = arith.select %53, %51, %54 : vector<2x256xi1>, vector<2x256xf32>
    %c54 = arith.constant 54 : index
    %c0_25 = arith.constant 0 : index
    %56 = vector.load %arg10[%c54, %c0_25] : memref<162x256xf32, #tpu.memory_space<vmem>>, vector<2x256xf32>
    tpu.vector_store %arg10[%c54, %c0_25], %55 {strides = array<i32>} : memref<162x256xf32, #tpu.memory_space<vmem>>, vector<2x256xf32>,
    %c0_26 = arith.constant 0 : index
    %c124 = arith.constant 124 : index
    %57 = vector.load %arg9[%c0_26, %c124] : memref<2x512xf32, #tpu.memory_space<vmem>>, vector<2x256xf32>
    %cst_27 = arith.constant 0.000000e+00 : f32
    %58 = vector.shape_cast %32 : vector<1x256xi1> to vector<1x256xi1>
    %59 = vector.broadcast %58 : vector<1x256xi1> to vector<2x256xi1>
    %60 = vector.broadcast %cst_27 : f32 to vector<2x256xf32>
    %61 = arith.select %59, %57, %60 : vector<2x256xi1>, vector<2x256xf32>
    %c72 = arith.constant 72 : index
    %c0_28 = arith.constant 0 : index
    %62 = vector.load %arg10[%c72, %c0_28] : memref<162x256xf32, #tpu.memory_space<vmem>>, vector<2x256xf32>
    tpu.vector_store %arg10[%c72, %c0_28], %61 {strides = array<i32>} : memref<162x256xf32, #tpu.memory_space<vmem>>, vector<2x256xf32>,
    %c0_29 = arith.constant 0 : index
    %c140 = arith.constant 140 : index
    %63 = vector.load %arg9[%c0_29, %c140] : memref<2x512xf32, #tpu.memory_space<vmem>>, vector<2x256xf32>
    %cst_30 = arith.constant 0.000000e+00 : f32
    %64 = vector.shape_cast %32 : vector<1x256xi1> to vector<1x256xi1>
    %65 = vector.broadcast %64 : vector<1x256xi1> to vector<2x256xi1>
    %66 = vector.broadcast %cst_30 : f32 to vector<2x256xf32>
    %67 = arith.select %65, %63, %66 : vector<2x256xi1>, vector<2x256xf32>
    %c90 = arith.constant 90 : index
    %c0_31 = arith.constant 0 : index
    %68 = vector.load %arg10[%c90, %c0_31] : memref<162x256xf32, #tpu.memory_space<vmem>>, vector<2x256xf32>
    tpu.vector_store %arg10[%c90, %c0_31], %67 {strides = array<i32>} : memref<162x256xf32, #tpu.memory_space<vmem>>, vector<2x256xf32>,
    %c0_32 = arith.constant 0 : index
    %c156 = arith.constant 156 : index
    %69 = vector.load %arg9[%c0_32, %c156] : memref<2x512xf32, #tpu.memory_space<vmem>>, vector<2x256xf32>
    %cst_33 = arith.constant 0.000000e+00 : f32
    %70 = vector.shape_cast %32 : vector<1x256xi1> to vector<1x256xi1>
    %71 = vector.broadcast %70 : vector<1x256xi1> to vector<2x256xi1>
    %72 = vector.broadcast %cst_33 : f32 to vector<2x256xf32>
    %73 = arith.select %71, %69, %72 : vector<2x256xi1>, vector<2x256xf32>
    %c108_34 = arith.constant 108 : index
    %c0_35 = arith.constant 0 : index
    %74 = vector.load %arg10[%c108_34, %c0_35] : memref<162x256xf32, #tpu.memory_space<vmem>>, vector<2x256xf32>
    tpu.vector_store %arg10[%c108_34, %c0_35], %73 {strides = array<i32>} : memref<162x256xf32, #tpu.memory_space<vmem>>, vector<2x256xf32>,
    %c0_36 = arith.constant 0 : index
    %c172 = arith.constant 172 : index
    %75 = vector.load %arg9[%c0_36, %c172] : memref<2x512xf32, #tpu.memory_space<vmem>>, vector<2x256xf32>
    %cst_37 = arith.constant 0.000000e+00 : f32
    %76 = vector.shape_cast %32 : vector<1x256xi1> to vector<1x256xi1>
    %77 = vector.broadcast %76 : vector<1x256xi1> to vector<2x256xi1>
    %78 = vector.broadcast %cst_37 : f32 to vector<2x256xf32>
    %79 = arith.select %77, %75, %78 : vector<2x256xi1>, vector<2x256xf32>
    %c126 = arith.constant 126 : index
    %c0_38 = arith.constant 0 : index
    %80 = vector.load %arg10[%c126, %c0_38] : memref<162x256xf32, #tpu.memory_space<vmem>>, vector<2x256xf32>
    tpu.vector_store %arg10[%c126, %c0_38], %79 {strides = array<i32>} : memref<162x256xf32, #tpu.memory_space<vmem>>, vector<2x256xf32>,
    %c0_39 = arith.constant 0 : index
    %c188 = arith.constant 188 : index
    %81 = vector.load %arg9[%c0_39, %c188] : memref<2x512xf32, #tpu.memory_space<vmem>>, vector<2x256xf32>
    %cst_40 = arith.constant 0.000000e+00 : f32
    %82 = vector.shape_cast %32 : vector<1x256xi1> to vector<1x256xi1>
    %83 = vector.broadcast %82 : vector<1x256xi1> to vector<2x256xi1>
    %84 = vector.broadcast %cst_40 : f32 to vector<2x256xf32>
    %85 = arith.select %83, %81, %84 : vector<2x256xi1>, vector<2x256xf32>
    %c144 = arith.constant 144 : index
    %c0_41 = arith.constant 0 : index
    %86 = vector.load %arg10[%c144, %c0_41] : memref<162x256xf32, #tpu.memory_space<vmem>>, vector<2x256xf32>
    tpu.vector_store %arg10[%c144, %c0_41], %85 {strides = array<i32>} : memref<162x256xf32, #tpu.memory_space<vmem>>, vector<2x256xf32>,
    %c-3_i32 = arith.constant -3 : i32
    %87 = vector.broadcast %c-3_i32 : i32 to vector<1x256xi32>
    %88 = arith.addi %16, %87 : vector<1x256xi32>
    %c0_i32_42 = arith.constant 0 : i32
    %89 = vector.broadcast %c0_i32_42 : i32 to vector<1x256xi32>
    %90 = arith.cmpi sge, %88, %89 : vector<1x256xi32>
    %c-3_i32_43 = arith.constant -3 : i32
    %91 = vector.broadcast %c-3_i32_43 : i32 to vector<1x256xi32>
    %92 = arith.addi %16, %91 : vector<1x256xi32>
    %c16_i32_44 = arith.constant 16 : i32
    %93 = vector.broadcast %c16_i32_44 : i32 to vector<1x256xi32>
    %94 = arith.cmpi slt, %92, %93 : vector<1x256xi32>
    %95 = arith.andi %90, %94 : vector<1x256xi1>
    %c0_45 = arith.constant 0 : index
    %c61 = arith.constant 61 : index
    %96 = vector.load %arg9[%c0_45, %c61] : memref<2x512xf32, #tpu.memory_space<vmem>>, vector<2x256xf32>
    %cst_46 = arith.constant 0.000000e+00 : f32
    %97 = vector.shape_cast %95 : vector<1x256xi1> to vector<1x256xi1>
    %98 = vector.broadcast %97 : vector<1x256xi1> to vector<2x256xi1>
    %99 = vector.broadcast %cst_46 : f32 to vector<2x256xf32>
    %100 = arith.select %98, %96, %99 : vector<2x256xi1>, vector<2x256xf32>
    %c2 = arith.constant 2 : index
    %c0_47 = arith.constant 0 : index
    %101 = vector.load %arg10[%c2, %c0_47] : memref<162x256xf32, #tpu.memory_space<vmem>>, vector<2x256xf32>
    tpu.vector_store %arg10[%c2, %c0_47], %100 {strides = array<i32>} : memref<162x256xf32, #tpu.memory_space<vmem>>, vector<2x256xf32>,
    %c0_48 = arith.constant 0 : index
    %c77 = arith.constant 77 : index
    %102 = vector.load %arg9[%c0_48, %c77] : memref<2x512xf32, #tpu.memory_space<vmem>>, vector<2x256xf32>
    %cst_49 = arith.constant 0.000000e+00 : f32
    %103 = vector.shape_cast %95 : vector<1x256xi1> to vector<1x256xi1>
    %104 = vector.broadcast %103 : vector<1x256xi1> to vector<2x256xi1>
    %105 = vector.broadcast %cst_49 : f32 to vector<2x256xf32>
    %106 = arith.select %104, %102, %105 : vector<2x256xi1>, vector<2x256xf32>
    %c20 = arith.constant 20 : index
    %c0_50 = arith.constant 0 : index
    %107 = vector.load %arg10[%c20, %c0_50] : memref<162x256xf32, #tpu.memory_space<vmem>>, vector<2x256xf32>
    tpu.vector_store %arg10[%c20, %c0_50], %106 {strides = array<i32>} : memref<162x256xf32, #tpu.memory_space<vmem>>, vector<2x256xf32>,
    %c0_51 = arith.constant 0 : index
    %c93 = arith.constant 93 : index
    %108 = vector.load %arg9[%c0_51, %c93] : memref<2x512xf32, #tpu.memory_space<vmem>>, vector<2x256xf32>
    %cst_52 = arith.constant 0.000000e+00 : f32
    %109 = vector.shape_cast %95 : vector<1x256xi1> to vector<1x256xi1>
    %110 = vector.broadcast %109 : vector<1x256xi1> to vector<2x256xi1>
    %111 = vector.broadcast %cst_52 : f32 to vector<2x256xf32>
    %112 = arith.select %110, %108, %111 : vector<2x256xi1>, vector<2x256xf32>
    %c38 = arith.constant 38 : index
    %c0_53 = arith.constant 0 : index
    %113 = vector.load %arg10[%c38, %c0_53] : memref<162x256xf32, #tpu.memory_space<vmem>>, vector<2x256xf32>
    tpu.vector_store %arg10[%c38, %c0_53], %112 {strides = array<i32>} : memref<162x256xf32, #tpu.memory_space<vmem>>, vector<2x256xf32>,
    %c0_54 = arith.constant 0 : index
    %c109 = arith.constant 109 : index
    %114 = vector.load %arg9[%c0_54, %c109] : memref<2x512xf32, #tpu.memory_space<vmem>>, vector<2x256xf32>
    %cst_55 = arith.constant 0.000000e+00 : f32
    %115 = vector.shape_cast %95 : vector<1x256xi1> to vector<1x256xi1>
    %116 = vector.broadcast %115 : vector<1x256xi1> to vector<2x256xi1>
    %117 = vector.broadcast %cst_55 : f32 to vector<2x256xf32>
    %118 = arith.select %116, %114, %117 : vector<2x256xi1>, vector<2x256xf32>
    %c56 = arith.constant 56 : index
    %c0_56 = arith.constant 0 : index
    %119 = vector.load %arg10[%c56, %c0_56] : memref<162x256xf32, #tpu.memory_space<vmem>>, vector<2x256xf32>
    tpu.vector_store %arg10[%c56, %c0_56], %118 {strides = array<i32>} : memref<162x256xf32, #tpu.memory_space<vmem>>, vector<2x256xf32>,
    %c0_57 = arith.constant 0 : index
    %c125 = arith.constant 125 : index
    %120 = vector.load %arg9[%c0_57, %c125] : memref<2x512xf32, #tpu.memory_space<vmem>>, vector<2x256xf32>
    %cst_58 = arith.constant 0.000000e+00 : f32
    %121 = vector.shape_cast %95 : vector<1x256xi1> to vector<1x256xi1>
    %122 = vector.broadcast %121 : vector<1x256xi1> to vector<2x256xi1>
    %123 = vector.broadcast %cst_58 : f32 to vector<2x256xf32>
    %124 = arith.select %122, %120, %123 : vector<2x256xi1>, vector<2x256xf32>
    %c74 = arith.constant 74 : index
    %c0_59 = arith.constant 0 : index
    %125 = vector.load %arg10[%c74, %c0_59] : memref<162x256xf32, #tpu.memory_space<vmem>>, vector<2x256xf32>
    tpu.vector_store %arg10[%c74, %c0_59], %124 {strides = array<i32>} : memref<162x256xf32, #tpu.memory_space<vmem>>, vector<2x256xf32>,
    %c0_60 = arith.constant 0 : index
    %c141 = arith.constant 141 : index
    %126 = vector.load %arg9[%c0_60, %c141] : memref<2x512xf32, #tpu.memory_space<vmem>>, vector<2x256xf32>
    %cst_61 = arith.constant 0.000000e+00 : f32
    %127 = vector.shape_cast %95 : vector<1x256xi1> to vector<1x256xi1>
    %128 = vector.broadcast %127 : vector<1x256xi1> to vector<2x256xi1>
    %129 = vector.broadcast %cst_61 : f32 to vector<2x256xf32>
    %130 = arith.select %128, %126, %129 : vector<2x256xi1>, vector<2x256xf32>
    %c92_62 = arith.constant 92 : index
    %c0_63 = arith.constant 0 : index
    %131 = vector.load %arg10[%c92_62, %c0_63] : memref<162x256xf32, #tpu.memory_space<vmem>>, vector<2x256xf32>
    tpu.vector_store %arg10[%c92_62, %c0_63], %130 {strides = array<i32>} : memref<162x256xf32, #tpu.memory_space<vmem>>, vector<2x256xf32>,
    %c0_64 = arith.constant 0 : index
    %c157 = arith.constant 157 : index
    %132 = vector.load %arg9[%c0_64, %c157] : memref<2x512xf32, #tpu.memory_space<vmem>>, vector<2x256xf32>
    %cst_65 = arith.constant 0.000000e+00 : f32
    %133 = vector.shape_cast %95 : vector<1x256xi1> to vector<1x256xi1>
    %134 = vector.broadcast %133 : vector<1x256xi1> to vector<2x256xi1>
    %135 = vector.broadcast %cst_65 : f32 to vector<2x256xf32>
    %136 = arith.select %134, %132, %135 : vector<2x256xi1>, vector<2x256xf32>
    %c110 = arith.constant 110 : index
    %c0_66 = arith.constant 0 : index
    %137 = vector.load %arg10[%c110, %c0_66] : memref<162x256xf32, #tpu.memory_space<vmem>>, vector<2x256xf32>
    tpu.vector_store %arg10[%c110, %c0_66], %136 {strides = array<i32>} : memref<162x256xf32, #tpu.memory_space<vmem>>, vector<2x256xf32>,
    %c0_67 = arith.constant 0 : index
    %c173 = arith.constant 173 : index
    %138 = vector.load %arg9[%c0_67, %c173] : memref<2x512xf32, #tpu.memory_space<vmem>>, vector<2x256xf32>
    %cst_68 = arith.constant 0.000000e+00 : f32
    %139 = vector.shape_cast %95 : vector<1x256xi1> to vector<1x256xi1>
    %140 = vector.broadcast %139 : vector<1x256xi1> to vector<2x256xi1>
    %141 = vector.broadcast %cst_68 : f32 to vector<2x256xf32>
    %142 = arith.select %140, %138, %141 : vector<2x256xi1>, vector<2x256xf32>
    %c128_69 = arith.constant 128 : index
    %c0_70 = arith.constant 0 : index
    %143 = vector.load %arg10[%c128_69, %c0_70] : memref<162x256xf32, #tpu.memory_space<vmem>>, vector<2x256xf32>
    tpu.vector_store %arg10[%c128_69, %c0_70], %142 {strides = array<i32>} : memref<162x256xf32, #tpu.memory_space<vmem>>, vector<2x256xf32>,
    %c0_71 = arith.constant 0 : index
    %c189 = arith.constant 189 : index
    %144 = vector.load %arg9[%c0_71, %c189] : memref<2x512xf32, #tpu.memory_space<vmem>>, vector<2x256xf32>
    %cst_72 = arith.constant 0.000000e+00 : f32
    %145 = vector.shape_cast %95 : vector<1x256xi1> to vector<1x256xi1>
    %146 = vector.broadcast %145 : vector<1x256xi1> to vector<2x256xi1>
    %147 = vector.broadcast %cst_72 : f32 to vector<2x256xf32>
    %148 = arith.select %146, %144, %147 : vector<2x256xi1>, vector<2x256xf32>
    %c146 = arith.constant 146 : index
    %c0_73 = arith.constant 0 : index
    %149 = vector.load %arg10[%c146, %c0_73] : memref<162x256xf32, #tpu.memory_space<vmem>>, vector<2x256xf32>
    tpu.vector_store %arg10[%c146, %c0_73], %148 {strides = array<i32>} : memref<162x256xf32, #tpu.memory_space<vmem>>, vector<2x256xf32>,
    %c-2_i32 = arith.constant -2 : i32
    %150 = vector.broadcast %c-2_i32 : i32 to vector<1x256xi32>
    %151 = arith.addi %16, %150 : vector<1x256xi32>
    %c0_i32_74 = arith.constant 0 : i32
    %152 = vector.broadcast %c0_i32_74 : i32 to vector<1x256xi32>
    %153 = arith.cmpi sge, %151, %152 : vector<1x256xi32>
    %c-2_i32_75 = arith.constant -2 : i32
    %154 = vector.broadcast %c-2_i32_75 : i32 to vector<1x256xi32>
    %155 = arith.addi %16, %154 : vector<1x256xi32>
    %c16_i32_76 = arith.constant 16 : i32
    %156 = vector.broadcast %c16_i32_76 : i32 to vector<1x256xi32>
    %157 = arith.cmpi slt, %155, %156 : vector<1x256xi32>
    %158 = arith.andi %153, %157 : vector<1x256xi1>
    %c0_77 = arith.constant 0 : index
    %c62 = arith.constant 62 : index
    %159 = vector.load %arg9[%c0_77, %c62] : memref<2x512xf32, #tpu.memory_space<vmem>>, vector<2x256xf32>
    %cst_78 = arith.constant 0.000000e+00 : f32
    %160 = vector.shape_cast %158 : vector<1x256xi1> to vector<1x256xi1>
    %161 = vector.broadcast %160 : vector<1x256xi1> to vector<2x256xi1>
    %162 = vector.broadcast %cst_78 : f32 to vector<2x256xf32>
    %163 = arith.select %161, %159, %162 : vector<2x256xi1>, vector<2x256xf32>
    %c4 = arith.constant 4 : index
    %c0_79 = arith.constant 0 : index
    %164 = vector.load %arg10[%c4, %c0_79] : memref<162x256xf32, #tpu.memory_space<vmem>>, vector<2x256xf32>
    tpu.vector_store %arg10[%c4, %c0_79], %163 {strides = array<i32>} : memref<162x256xf32, #tpu.memory_space<vmem>>, vector<2x256xf32>,
    %c0_80 = arith.constant 0 : index
    %c78 = arith.constant 78 : index
    %165 = vector.load %arg9[%c0_80, %c78] : memref<2x512xf32, #tpu.memory_space<vmem>>, vector<2x256xf32>
    %cst_81 = arith.constant 0.000000e+00 : f32
    %166 = vector.shape_cast %158 : vector<1x256xi1> to vector<1x256xi1>
    %167 = vector.broadcast %166 : vector<1x256xi1> to vector<2x256xi1>
    %168 = vector.broadcast %cst_81 : f32 to vector<2x256xf32>
    %169 = arith.select %167, %165, %168 : vector<2x256xi1>, vector<2x256xf32>
    %c22 = arith.constant 22 : index
    %c0_82 = arith.constant 0 : index
    %170 = vector.load %arg10[%c22, %c0_82] : memref<162x256xf32, #tpu.memory_space<vmem>>, vector<2x256xf32>
    tpu.vector_store %arg10[%c22, %c0_82], %169 {strides = array<i32>} : memref<162x256xf32, #tpu.memory_space<vmem>>, vector<2x256xf32>,
    %c0_83 = arith.constant 0 : index
    %c94 = arith.constant 94 : index
    %171 = vector.load %arg9[%c0_83, %c94] : memref<2x512xf32, #tpu.memory_space<vmem>>, vector<2x256xf32>
    %cst_84 = arith.constant 0.000000e+00 : f32
    %172 = vector.shape_cast %158 : vector<1x256xi1> to vector<1x256xi1>
    %173 = vector.broadcast %172 : vector<1x256xi1> to vector<2x256xi1>
    %174 = vector.broadcast %cst_84 : f32 to vector<2x256xf32>
    %175 = arith.select %173, %171, %174 : vector<2x256xi1>, vector<2x256xf32>
    %c40 = arith.constant 40 : index
    %c0_85 = arith.constant 0 : index
    %176 = vector.load %arg10[%c40, %c0_85] : memref<162x256xf32, #tpu.memory_space<vmem>>, vector<2x256xf32>
    tpu.vector_store %arg10[%c40, %c0_85], %175 {strides = array<i32>} : memref<162x256xf32, #tpu.memory_space<vmem>>, vector<2x256xf32>,
    %c0_86 = arith.constant 0 : index
    %c110_87 = arith.constant 110 : index
    %177 = vector.load %arg9[%c0_86, %c110_87] : memref<2x512xf32, #tpu.memory_space<vmem>>, vector<2x256xf32>
    %cst_88 = arith.constant 0.000000e+00 : f32
    %178 = vector.shape_cast %158 : vector<1x256xi1> to vector<1x256xi1>
    %179 = vector.broadcast %178 : vector<1x256xi1> to vector<2x256xi1>
    %180 = vector.broadcast %cst_88 : f32 to vector<2x256xf32>
    %181 = arith.select %179, %177, %180 : vector<2x256xi1>, vector<2x256xf32>
    %c58 = arith.constant 58 : index
    %c0_89 = arith.constant 0 : index
    %182 = vector.load %arg10[%c58, %c0_89] : memref<162x256xf32, #tpu.memory_space<vmem>>, vector<2x256xf32>
    tpu.vector_store %arg10[%c58, %c0_89], %181 {strides = array<i32>} : memref<162x256xf32, #tpu.memory_space<vmem>>, vector<2x256xf32>,
    %c0_90 = arith.constant 0 : index
    %c126_91 = arith.constant 126 : index
    %183 = vector.load %arg9[%c0_90, %c126_91] : memref<2x512xf32, #tpu.memory_space<vmem>>, vector<2x256xf32>
    %cst_92 = arith.constant 0.000000e+00 : f32
    %184 = vector.shape_cast %158 : vector<1x256xi1> to vector<1x256xi1>
    %185 = vector.broadcast %184 : vector<1x256xi1> to vector<2x256xi1>
    %186 = vector.broadcast %cst_92 : f32 to vector<2x256xf32>
    %187 = arith.select %185, %183, %186 : vector<2x256xi1>, vector<2x256xf32>
    %c76_93 = arith.constant 76 : index
    %c0_94 = arith.constant 0 : index
    %188 = vector.load %arg10[%c76_93, %c0_94] : memref<162x256xf32, #tpu.memory_space<vmem>>, vector<2x256xf32>
    tpu.vector_store %arg10[%c76_93, %c0_94], %187 {strides = array<i32>} : memref<162x256xf32, #tpu.memory_space<vmem>>, vector<2x256xf32>,
    %c0_95 = arith.constant 0 : index
    %c142 = arith.constant 142 : index
    %189 = vector.load %arg9[%c0_95, %c142] : memref<2x512xf32, #tpu.memory_space<vmem>>, vector<2x256xf32>
    %cst_96 = arith.constant 0.000000e+00 : f32
    %190 = vector.shape_cast %158 : vector<1x256xi1> to vector<1x256xi1>
    %191 = vector.broadcast %190 : vector<1x256xi1> to vector<2x256xi1>
    %192 = vector.broadcast %cst_96 : f32 to vector<2x256xf32>
    %193 = arith.select %191, %189, %192 : vector<2x256xi1>, vector<2x256xf32>
    %c94_97 = arith.constant 94 : index
    %c0_98 = arith.constant 0 : index
    %194 = vector.load %arg10[%c94_97, %c0_98] : memref<162x256xf32, #tpu.memory_space<vmem>>, vector<2x256xf32>
    tpu.vector_store %arg10[%c94_97, %c0_98], %193 {strides = array<i32>} : memref<162x256xf32, #tpu.memory_space<vmem>>, vector<2x256xf32>,
    %c0_99 = arith.constant 0 : index
    %c158 = arith.constant 158 : index
    %195 = vector.load %arg9[%c0_99, %c158] : memref<2x512xf32, #tpu.memory_space<vmem>>, vector<2x256xf32>
    %cst_100 = arith.constant 0.000000e+00 : f32
    %196 = vector.shape_cast %158 : vector<1x256xi1> to vector<1x256xi1>
    %197 = vector.broadcast %196 : vector<1x256xi1> to vector<2x256xi1>
    %198 = vector.broadcast %cst_100 : f32 to vector<2x256xf32>
    %199 = arith.select %197, %195, %198 : vector<2x256xi1>, vector<2x256xf32>
    %c112 = arith.constant 112 : index
    %c0_101 = arith.constant 0 : index
    %200 = vector.load %arg10[%c112, %c0_101] : memref<162x256xf32, #tpu.memory_space<vmem>>, vector<2x256xf32>
    tpu.vector_store %arg10[%c112, %c0_101], %199 {strides = array<i32>} : memref<162x256xf32, #tpu.memory_space<vmem>>, vector<2x256xf32>,
    %c0_102 = arith.constant 0 : index
    %c174 = arith.constant 174 : index
    %201 = vector.load %arg9[%c0_102, %c174] : memref<2x512xf32, #tpu.memory_space<vmem>>, vector<2x256xf32>
    %cst_103 = arith.constant 0.000000e+00 : f32
    %202 = vector.shape_cast %158 : vector<1x256xi1> to vector<1x256xi1>
    %203 = vector.broadcast %202 : vector<1x256xi1> to vector<2x256xi1>
    %204 = vector.broadcast %cst_103 : f32 to vector<2x256xf32>
    %205 = arith.select %203, %201, %204 : vector<2x256xi1>, vector<2x256xf32>
    %c130 = arith.constant 130 : index
    %c0_104 = arith.constant 0 : index
    %206 = vector.load %arg10[%c130, %c0_104] : memref<162x256xf32, #tpu.memory_space<vmem>>, vector<2x256xf32>
    tpu.vector_store %arg10[%c130, %c0_104], %205 {strides = array<i32>} : memref<162x256xf32, #tpu.memory_space<vmem>>, vector<2x256xf32>,
    %c0_105 = arith.constant 0 : index
    %c190 = arith.constant 190 : index
    %207 = vector.load %arg9[%c0_105, %c190] : memref<2x512xf32, #tpu.memory_space<vmem>>, vector<2x256xf32>
    %cst_106 = arith.constant 0.000000e+00 : f32
    %208 = vector.shape_cast %158 : vector<1x256xi1> to vector<1x256xi1>
    %209 = vector.broadcast %208 : vector<1x256xi1> to vector<2x256xi1>
    %210 = vector.broadcast %cst_106 : f32 to vector<2x256xf32>
    %211 = arith.select %209, %207, %210 : vector<2x256xi1>, vector<2x256xf32>
    %c148 = arith.constant 148 : index
    %c0_107 = arith.constant 0 : index
    %212 = vector.load %arg10[%c148, %c0_107] : memref<162x256xf32, #tpu.memory_space<vmem>>, vector<2x256xf32>
    tpu.vector_store %arg10[%c148, %c0_107], %211 {strides = array<i32>} : memref<162x256xf32, #tpu.memory_space<vmem>>, vector<2x256xf32>,
    %c-1_i32 = arith.constant -1 : i32
    %213 = vector.broadcast %c-1_i32 : i32 to vector<1x256xi32>
    %214 = arith.addi %16, %213 : vector<1x256xi32>
    %c0_i32_108 = arith.constant 0 : i32
    %215 = vector.broadcast %c0_i32_108 : i32 to vector<1x256xi32>
    %216 = arith.cmpi sge, %214, %215 : vector<1x256xi32>
    %c-1_i32_109 = arith.constant -1 : i32
    %217 = vector.broadcast %c-1_i32_109 : i32 to vector<1x256xi32>
    %218 = arith.addi %16, %217 : vector<1x256xi32>
    %c16_i32_110 = arith.constant 16 : i32
    %219 = vector.broadcast %c16_i32_110 : i32 to vector<1x256xi32>
    %220 = arith.cmpi slt, %218, %219 : vector<1x256xi32>
    %221 = arith.andi %216, %220 : vector<1x256xi1>
    %c0_111 = arith.constant 0 : index
    %c63 = arith.constant 63 : index
    %222 = vector.load %arg9[%c0_111, %c63] : memref<2x512xf32, #tpu.memory_space<vmem>>, vector<2x256xf32>
    %cst_112 = arith.constant 0.000000e+00 : f32
    %223 = vector.shape_cast %221 : vector<1x256xi1> to vector<1x256xi1>
    %224 = vector.broadcast %223 : vector<1x256xi1> to vector<2x256xi1>
    %225 = vector.broadcast %cst_112 : f32 to vector<2x256xf32>
    %226 = arith.select %224, %222, %225 : vector<2x256xi1>, vector<2x256xf32>
    %c6 = arith.constant 6 : index
    %c0_113 = arith.constant 0 : index
    %227 = vector.load %arg10[%c6, %c0_113] : memref<162x256xf32, #tpu.memory_space<vmem>>, vector<2x256xf32>
    tpu.vector_store %arg10[%c6, %c0_113], %226 {strides = array<i32>} : memref<162x256xf32, #tpu.memory_space<vmem>>, vector<2x256xf32>,
    %c0_114 = arith.constant 0 : index
    %c79 = arith.constant 79 : index
    %228 = vector.load %arg9[%c0_114, %c79] : memref<2x512xf32, #tpu.memory_space<vmem>>, vector<2x256xf32>
    %cst_115 = arith.constant 0.000000e+00 : f32
    %229 = vector.shape_cast %221 : vector<1x256xi1> to vector<1x256xi1>
    %230 = vector.broadcast %229 : vector<1x256xi1> to vector<2x256xi1>
    %231 = vector.broadcast %cst_115 : f32 to vector<2x256xf32>
    %232 = arith.select %230, %228, %231 : vector<2x256xi1>, vector<2x256xf32>
    %c24 = arith.constant 24 : index
    %c0_116 = arith.constant 0 : index
    %233 = vector.load %arg10[%c24, %c0_116] : memref<162x256xf32, #tpu.memory_space<vmem>>, vector<2x256xf32>
    tpu.vector_store %arg10[%c24, %c0_116], %232 {strides = array<i32>} : memref<162x256xf32, #tpu.memory_space<vmem>>, vector<2x256xf32>,
    %c0_117 = arith.constant 0 : index
    %c95 = arith.constant 95 : index
    %234 = vector.load %arg9[%c0_117, %c95] : memref<2x512xf32, #tpu.memory_space<vmem>>, vector<2x256xf32>
    %cst_118 = arith.constant 0.000000e+00 : f32
    %235 = vector.shape_cast %221 : vector<1x256xi1> to vector<1x256xi1>
    %236 = vector.broadcast %235 : vector<1x256xi1> to vector<2x256xi1>
    %237 = vector.broadcast %cst_118 : f32 to vector<2x256xf32>
    %238 = arith.select %236, %234, %237 : vector<2x256xi1>, vector<2x256xf32>
    %c42 = arith.constant 42 : index
    %c0_119 = arith.constant 0 : index
    %239 = vector.load %arg10[%c42, %c0_119] : memref<162x256xf32, #tpu.memory_space<vmem>>, vector<2x256xf32>
    tpu.vector_store %arg10[%c42, %c0_119], %238 {strides = array<i32>} : memref<162x256xf32, #tpu.memory_space<vmem>>, vector<2x256xf32>,
    %c0_120 = arith.constant 0 : index
    %c111 = arith.constant 111 : index
    %240 = vector.load %arg9[%c0_120, %c111] : memref<2x512xf32, #tpu.memory_space<vmem>>, vector<2x256xf32>
    %cst_121 = arith.constant 0.000000e+00 : f32
    %241 = vector.shape_cast %221 : vector<1x256xi1> to vector<1x256xi1>
    %242 = vector.broadcast %241 : vector<1x256xi1> to vector<2x256xi1>
    %243 = vector.broadcast %cst_121 : f32 to vector<2x256xf32>
    %244 = arith.select %242, %240, %243 : vector<2x256xi1>, vector<2x256xf32>
    %c60_122 = arith.constant 60 : index
    %c0_123 = arith.constant 0 : index
    %245 = vector.load %arg10[%c60_122, %c0_123] : memref<162x256xf32, #tpu.memory_space<vmem>>, vector<2x256xf32>
    tpu.vector_store %arg10[%c60_122, %c0_123], %244 {strides = array<i32>} : memref<162x256xf32, #tpu.memory_space<vmem>>, vector<2x256xf32>,
    %c0_124 = arith.constant 0 : index
    %c127 = arith.constant 127 : index
    %246 = vector.load %arg9[%c0_124, %c127] : memref<2x512xf32, #tpu.memory_space<vmem>>, vector<2x256xf32>
    %cst_125 = arith.constant 0.000000e+00 : f32
    %247 = vector.shape_cast %221 : vector<1x256xi1> to vector<1x256xi1>
    %248 = vector.broadcast %247 : vector<1x256xi1> to vector<2x256xi1>
    %249 = vector.broadcast %cst_125 : f32 to vector<2x256xf32>
    %250 = arith.select %248, %246, %249 : vector<2x256xi1>, vector<2x256xf32>
    %c78_126 = arith.constant 78 : index
    %c0_127 = arith.constant 0 : index
    %251 = vector.load %arg10[%c78_126, %c0_127] : memref<162x256xf32, #tpu.memory_space<vmem>>, vector<2x256xf32>
    tpu.vector_store %arg10[%c78_126, %c0_127], %250 {strides = array<i32>} : memref<162x256xf32, #tpu.memory_space<vmem>>, vector<2x256xf32>,
    %c0_128 = arith.constant 0 : index
    %c143 = arith.constant 143 : index
    %252 = vector.load %arg9[%c0_128, %c143] : memref<2x512xf32, #tpu.memory_space<vmem>>, vector<2x256xf32>
    %cst_129 = arith.constant 0.000000e+00 : f32
    %253 = vector.shape_cast %221 : vector<1x256xi1> to vector<1x256xi1>
    %254 = vector.broadcast %253 : vector<1x256xi1> to vector<2x256xi1>
    %255 = vector.broadcast %cst_129 : f32 to vector<2x256xf32>
    %256 = arith.select %254, %252, %255 : vector<2x256xi1>, vector<2x256xf32>
    %c96 = arith.constant 96 : index
    %c0_130 = arith.constant 0 : index
    %257 = vector.load %arg10[%c96, %c0_130] : memref<162x256xf32, #tpu.memory_space<vmem>>, vector<2x256xf32>
    tpu.vector_store %arg10[%c96, %c0_130], %256 {strides = array<i32>} : memref<162x256xf32, #tpu.memory_space<vmem>>, vector<2x256xf32>,
    %c0_131 = arith.constant 0 : index
    %c159 = arith.constant 159 : index
    %258 = vector.load %arg9[%c0_131, %c159] : memref<2x512xf32, #tpu.memory_space<vmem>>, vector<2x256xf32>
    %cst_132 = arith.constant 0.000000e+00 : f32
    %259 = vector.shape_cast %221 : vector<1x256xi1> to vector<1x256xi1>
    %260 = vector.broadcast %259 : vector<1x256xi1> to vector<2x256xi1>
    %261 = vector.broadcast %cst_132 : f32 to vector<2x256xf32>
    %262 = arith.select %260, %258, %261 : vector<2x256xi1>, vector<2x256xf32>
    %c114 = arith.constant 114 : index
    %c0_133 = arith.constant 0 : index
    %263 = vector.load %arg10[%c114, %c0_133] : memref<162x256xf32, #tpu.memory_space<vmem>>, vector<2x256xf32>
    tpu.vector_store %arg10[%c114, %c0_133], %262 {strides = array<i32>} : memref<162x256xf32, #tpu.memory_space<vmem>>, vector<2x256xf32>,
    %c0_134 = arith.constant 0 : index
    %c175 = arith.constant 175 : index
    %264 = vector.load %arg9[%c0_134, %c175] : memref<2x512xf32, #tpu.memory_space<vmem>>, vector<2x256xf32>
    %cst_135 = arith.constant 0.000000e+00 : f32
    %265 = vector.shape_cast %221 : vector<1x256xi1> to vector<1x256xi1>
    %266 = vector.broadcast %265 : vector<1x256xi1> to vector<2x256xi1>
    %267 = vector.broadcast %cst_135 : f32 to vector<2x256xf32>
    %268 = arith.select %266, %264, %267 : vector<2x256xi1>, vector<2x256xf32>
    %c132 = arith.constant 132 : index
    %c0_136 = arith.constant 0 : index
    %269 = vector.load %arg10[%c132, %c0_136] : memref<162x256xf32, #tpu.memory_space<vmem>>, vector<2x256xf32>
    tpu.vector_store %arg10[%c132, %c0_136], %268 {strides = array<i32>} : memref<162x256xf32, #tpu.memory_space<vmem>>, vector<2x256xf32>,
    %c0_137 = arith.constant 0 : index
    %c191 = arith.constant 191 : index
    %270 = vector.load %arg9[%c0_137, %c191] : memref<2x512xf32, #tpu.memory_space<vmem>>, vector<2x256xf32>
    %cst_138 = arith.constant 0.000000e+00 : f32
    %271 = vector.shape_cast %221 : vector<1x256xi1> to vector<1x256xi1>
    %272 = vector.broadcast %271 : vector<1x256xi1> to vector<2x256xi1>
    %273 = vector.broadcast %cst_138 : f32 to vector<2x256xf32>
    %274 = arith.select %272, %270, %273 : vector<2x256xi1>, vector<2x256xf32>
    %c150 = arith.constant 150 : index
    %c0_139 = arith.constant 0 : index
    %275 = vector.load %arg10[%c150, %c0_139] : memref<162x256xf32, #tpu.memory_space<vmem>>, vector<2x256xf32>
    tpu.vector_store %arg10[%c150, %c0_139], %274 {strides = array<i32>} : memref<162x256xf32, #tpu.memory_space<vmem>>, vector<2x256xf32>,
    %c0_140 = arith.constant 0 : index
    %c64 = arith.constant 64 : index
    %276 = vector.load %arg9[%c0_140, %c64] : memref<2x512xf32, #tpu.memory_space<vmem>>, vector<2x256xf32>
    %c8 = arith.constant 8 : index
    %c0_141 = arith.constant 0 : index
    %277 = vector.load %arg10[%c8, %c0_141] : memref<162x256xf32, #tpu.memory_space<vmem>>, vector<2x256xf32>
    tpu.vector_store %arg10[%c8, %c0_141], %276 {strides = array<i32>} : memref<162x256xf32, #tpu.memory_space<vmem>>, vector<2x256xf32>,
    %c0_142 = arith.constant 0 : index
    %c80 = arith.constant 80 : index
    %278 = vector.load %arg9[%c0_142, %c80] : memref<2x512xf32, #tpu.memory_space<vmem>>, vector<2x256xf32>
    %c26 = arith.constant 26 : index
    %c0_143 = arith.constant 0 : index
    %279 = vector.load %arg10[%c26, %c0_143] : memref<162x256xf32, #tpu.memory_space<vmem>>, vector<2x256xf32>
    tpu.vector_store %arg10[%c26, %c0_143], %278 {strides = array<i32>} : memref<162x256xf32, #tpu.memory_space<vmem>>, vector<2x256xf32>,
    %c0_144 = arith.constant 0 : index
    %c96_145 = arith.constant 96 : index
    %280 = vector.load %arg9[%c0_144, %c96_145] : memref<2x512xf32, #tpu.memory_space<vmem>>, vector<2x256xf32>
    %c44 = arith.constant 44 : index
    %c0_146 = arith.constant 0 : index
    %281 = vector.load %arg10[%c44, %c0_146] : memref<162x256xf32, #tpu.memory_space<vmem>>, vector<2x256xf32>
    tpu.vector_store %arg10[%c44, %c0_146], %280 {strides = array<i32>} : memref<162x256xf32, #tpu.memory_space<vmem>>, vector<2x256xf32>,
    %c0_147 = arith.constant 0 : index
    %c112_148 = arith.constant 112 : index
    %282 = vector.load %arg9[%c0_147, %c112_148] : memref<2x512xf32, #tpu.memory_space<vmem>>, vector<2x256xf32>
    %c62_149 = arith.constant 62 : index
    %c0_150 = arith.constant 0 : index
    %283 = vector.load %arg10[%c62_149, %c0_150] : memref<162x256xf32, #tpu.memory_space<vmem>>, vector<2x256xf32>
    tpu.vector_store %arg10[%c62_149, %c0_150], %282 {strides = array<i32>} : memref<162x256xf32, #tpu.memory_space<vmem>>, vector<2x256xf32>,
    %c0_151 = arith.constant 0 : index
    %c128_152 = arith.constant 128 : index
    %284 = vector.load %arg9[%c0_151, %c128_152] : memref<2x512xf32, #tpu.memory_space<vmem>>, vector<2x256xf32>
    %c80_153 = arith.constant 80 : index
    %c0_154 = arith.constant 0 : index
    %285 = vector.load %arg10[%c80_153, %c0_154] : memref<162x256xf32, #tpu.memory_space<vmem>>, vector<2x256xf32>
    tpu.vector_store %arg10[%c80_153, %c0_154], %284 {strides = array<i32>} : memref<162x256xf32, #tpu.memory_space<vmem>>, vector<2x256xf32>,
    %c0_155 = arith.constant 0 : index
    %c144_156 = arith.constant 144 : index
    %286 = vector.load %arg9[%c0_155, %c144_156] : memref<2x512xf32, #tpu.memory_space<vmem>>, vector<2x256xf32>
    %c98 = arith.constant 98 : index
    %c0_157 = arith.constant 0 : index
    %287 = vector.load %arg10[%c98, %c0_157] : memref<162x256xf32, #tpu.memory_space<vmem>>, vector<2x256xf32>
    tpu.vector_store %arg10[%c98, %c0_157], %286 {strides = array<i32>} : memref<162x256xf32, #tpu.memory_space<vmem>>, vector<2x256xf32>,
    %c0_158 = arith.constant 0 : index
    %c160 = arith.constant 160 : index
    %288 = vector.load %arg9[%c0_158, %c160] : memref<2x512xf32, #tpu.memory_space<vmem>>, vector<2x256xf32>
    %c116 = arith.constant 116 : index
    %c0_159 = arith.constant 0 : index
    %289 = vector.load %arg10[%c116, %c0_159] : memref<162x256xf32, #tpu.memory_space<vmem>>, vector<2x256xf32>
    tpu.vector_store %arg10[%c116, %c0_159], %288 {strides = array<i32>} : memref<162x256xf32, #tpu.memory_space<vmem>>, vector<2x256xf32>,
    %c0_160 = arith.constant 0 : index
    %c176 = arith.constant 176 : index
    %290 = vector.load %arg9[%c0_160, %c176] : memref<2x512xf32, #tpu.memory_space<vmem>>, vector<2x256xf32>
    %c134 = arith.constant 134 : index
    %c0_161 = arith.constant 0 : index
    %291 = vector.load %arg10[%c134, %c0_161] : memref<162x256xf32, #tpu.memory_space<vmem>>, vector<2x256xf32>
    tpu.vector_store %arg10[%c134, %c0_161], %290 {strides = array<i32>} : memref<162x256xf32, #tpu.memory_space<vmem>>, vector<2x256xf32>,
    %c0_162 = arith.constant 0 : index
    %c192 = arith.constant 192 : index
    %292 = vector.load %arg9[%c0_162, %c192] : memref<2x512xf32, #tpu.memory_space<vmem>>, vector<2x256xf32>
    %c152 = arith.constant 152 : index
    %c0_163 = arith.constant 0 : index
    %293 = vector.load %arg10[%c152, %c0_163] : memref<162x256xf32, #tpu.memory_space<vmem>>, vector<2x256xf32>
    tpu.vector_store %arg10[%c152, %c0_163], %292 {strides = array<i32>} : memref<162x256xf32, #tpu.memory_space<vmem>>, vector<2x256xf32>,
    %c1_i32_164 = arith.constant 1 : i32
    %294 = vector.broadcast %c1_i32_164 : i32 to vector<1x256xi32>
    %295 = arith.addi %16, %294 : vector<1x256xi32>
    %c0_i32_165 = arith.constant 0 : i32
    %296 = vector.broadcast %c0_i32_165 : i32 to vector<1x256xi32>
    %297 = arith.cmpi sge, %295, %296 : vector<1x256xi32>
    %c1_i32_166 = arith.constant 1 : i32
    %298 = vector.broadcast %c1_i32_166 : i32 to vector<1x256xi32>
    %299 = arith.addi %16, %298 : vector<1x256xi32>
    %c16_i32_167 = arith.constant 16 : i32
    %300 = vector.broadcast %c16_i32_167 : i32 to vector<1x256xi32>
    %301 = arith.cmpi slt, %299, %300 : vector<1x256xi32>
    %302 = arith.andi %297, %301 : vector<1x256xi1>
    %c0_168 = arith.constant 0 : index
    %c65 = arith.constant 65 : index
    %303 = vector.load %arg9[%c0_168, %c65] : memref<2x512xf32, #tpu.memory_space<vmem>>, vector<2x256xf32>
    %cst_169 = arith.constant 0.000000e+00 : f32
    %304 = vector.shape_cast %302 : vector<1x256xi1> to vector<1x256xi1>
    %305 = vector.broadcast %304 : vector<1x256xi1> to vector<2x256xi1>
    %306 = vector.broadcast %cst_169 : f32 to vector<2x256xf32>
    %307 = arith.select %305, %303, %306 : vector<2x256xi1>, vector<2x256xf32>
    %c10 = arith.constant 10 : index
    %c0_170 = arith.constant 0 : index
    %308 = vector.load %arg10[%c10, %c0_170] : memref<162x256xf32, #tpu.memory_space<vmem>>, vector<2x256xf32>
    tpu.vector_store %arg10[%c10, %c0_170], %307 {strides = array<i32>} : memref<162x256xf32, #tpu.memory_space<vmem>>, vector<2x256xf32>,
    %c0_171 = arith.constant 0 : index
    %c81 = arith.constant 81 : index
    %309 = vector.load %arg9[%c0_171, %c81] : memref<2x512xf32, #tpu.memory_space<vmem>>, vector<2x256xf32>
    %cst_172 = arith.constant 0.000000e+00 : f32
    %310 = vector.shape_cast %302 : vector<1x256xi1> to vector<1x256xi1>
    %311 = vector.broadcast %310 : vector<1x256xi1> to vector<2x256xi1>
    %312 = vector.broadcast %cst_172 : f32 to vector<2x256xf32>
    %313 = arith.select %311, %309, %312 : vector<2x256xi1>, vector<2x256xf32>
    %c28 = arith.constant 28 : index
    %c0_173 = arith.constant 0 : index
    %314 = vector.load %arg10[%c28, %c0_173] : memref<162x256xf32, #tpu.memory_space<vmem>>, vector<2x256xf32>
    tpu.vector_store %arg10[%c28, %c0_173], %313 {strides = array<i32>} : memref<162x256xf32, #tpu.memory_space<vmem>>, vector<2x256xf32>,
    %c0_174 = arith.constant 0 : index
    %c97 = arith.constant 97 : index
    %315 = vector.load %arg9[%c0_174, %c97] : memref<2x512xf32, #tpu.memory_space<vmem>>, vector<2x256xf32>
    %cst_175 = arith.constant 0.000000e+00 : f32
    %316 = vector.shape_cast %302 : vector<1x256xi1> to vector<1x256xi1>
    %317 = vector.broadcast %316 : vector<1x256xi1> to vector<2x256xi1>
    %318 = vector.broadcast %cst_175 : f32 to vector<2x256xf32>
    %319 = arith.select %317, %315, %318 : vector<2x256xi1>, vector<2x256xf32>
    %c46 = arith.constant 46 : index
    %c0_176 = arith.constant 0 : index
    %320 = vector.load %arg10[%c46, %c0_176] : memref<162x256xf32, #tpu.memory_space<vmem>>, vector<2x256xf32>
    tpu.vector_store %arg10[%c46, %c0_176], %319 {strides = array<i32>} : memref<162x256xf32, #tpu.memory_space<vmem>>, vector<2x256xf32>,
    %c0_177 = arith.constant 0 : index
    %c113 = arith.constant 113 : index
    %321 = vector.load %arg9[%c0_177, %c113] : memref<2x512xf32, #tpu.memory_space<vmem>>, vector<2x256xf32>
    %cst_178 = arith.constant 0.000000e+00 : f32
    %322 = vector.shape_cast %302 : vector<1x256xi1> to vector<1x256xi1>
    %323 = vector.broadcast %322 : vector<1x256xi1> to vector<2x256xi1>
    %324 = vector.broadcast %cst_178 : f32 to vector<2x256xf32>
    %325 = arith.select %323, %321, %324 : vector<2x256xi1>, vector<2x256xf32>
    %c64_179 = arith.constant 64 : index
    %c0_180 = arith.constant 0 : index
    %326 = vector.load %arg10[%c64_179, %c0_180] : memref<162x256xf32, #tpu.memory_space<vmem>>, vector<2x256xf32>
    tpu.vector_store %arg10[%c64_179, %c0_180], %325 {strides = array<i32>} : memref<162x256xf32, #tpu.memory_space<vmem>>, vector<2x256xf32>,
    %c0_181 = arith.constant 0 : index
    %c129 = arith.constant 129 : index
    %327 = vector.load %arg9[%c0_181, %c129] : memref<2x512xf32, #tpu.memory_space<vmem>>, vector<2x256xf32>
    %cst_182 = arith.constant 0.000000e+00 : f32
    %328 = vector.shape_cast %302 : vector<1x256xi1> to vector<1x256xi1>
    %329 = vector.broadcast %328 : vector<1x256xi1> to vector<2x256xi1>
    %330 = vector.broadcast %cst_182 : f32 to vector<2x256xf32>
    %331 = arith.select %329, %327, %330 : vector<2x256xi1>, vector<2x256xf32>
    %c82 = arith.constant 82 : index
    %c0_183 = arith.constant 0 : index
    %332 = vector.load %arg10[%c82, %c0_183] : memref<162x256xf32, #tpu.memory_space<vmem>>, vector<2x256xf32>
    tpu.vector_store %arg10[%c82, %c0_183], %331 {strides = array<i32>} : memref<162x256xf32, #tpu.memory_space<vmem>>, vector<2x256xf32>,
    %c0_184 = arith.constant 0 : index
    %c145 = arith.constant 145 : index
    %333 = vector.load %arg9[%c0_184, %c145] : memref<2x512xf32, #tpu.memory_space<vmem>>, vector<2x256xf32>
    %cst_185 = arith.constant 0.000000e+00 : f32
    %334 = vector.shape_cast %302 : vector<1x256xi1> to vector<1x256xi1>
    %335 = vector.broadcast %334 : vector<1x256xi1> to vector<2x256xi1>
    %336 = vector.broadcast %cst_185 : f32 to vector<2x256xf32>
    %337 = arith.select %335, %333, %336 : vector<2x256xi1>, vector<2x256xf32>
    %c100 = arith.constant 100 : index
    %c0_186 = arith.constant 0 : index
    %338 = vector.load %arg10[%c100, %c0_186] : memref<162x256xf32, #tpu.memory_space<vmem>>, vector<2x256xf32>
    tpu.vector_store %arg10[%c100, %c0_186], %337 {strides = array<i32>} : memref<162x256xf32, #tpu.memory_space<vmem>>, vector<2x256xf32>,
    %c0_187 = arith.constant 0 : index
    %c161 = arith.constant 161 : index
    %339 = vector.load %arg9[%c0_187, %c161] : memref<2x512xf32, #tpu.memory_space<vmem>>, vector<2x256xf32>
    %cst_188 = arith.constant 0.000000e+00 : f32
    %340 = vector.shape_cast %302 : vector<1x256xi1> to vector<1x256xi1>
    %341 = vector.broadcast %340 : vector<1x256xi1> to vector<2x256xi1>
    %342 = vector.broadcast %cst_188 : f32 to vector<2x256xf32>
    %343 = arith.select %341, %339, %342 : vector<2x256xi1>, vector<2x256xf32>
    %c118 = arith.constant 118 : index
    %c0_189 = arith.constant 0 : index
    %344 = vector.load %arg10[%c118, %c0_189] : memref<162x256xf32, #tpu.memory_space<vmem>>, vector<2x256xf32>
    tpu.vector_store %arg10[%c118, %c0_189], %343 {strides = array<i32>} : memref<162x256xf32, #tpu.memory_space<vmem>>, vector<2x256xf32>,
    %c0_190 = arith.constant 0 : index
    %c177 = arith.constant 177 : index
    %345 = vector.load %arg9[%c0_190, %c177] : memref<2x512xf32, #tpu.memory_space<vmem>>, vector<2x256xf32>
    %cst_191 = arith.constant 0.000000e+00 : f32
    %346 = vector.shape_cast %302 : vector<1x256xi1> to vector<1x256xi1>
    %347 = vector.broadcast %346 : vector<1x256xi1> to vector<2x256xi1>
    %348 = vector.broadcast %cst_191 : f32 to vector<2x256xf32>
    %349 = arith.select %347, %345, %348 : vector<2x256xi1>, vector<2x256xf32>
    %c136 = arith.constant 136 : index
    %c0_192 = arith.constant 0 : index
    %350 = vector.load %arg10[%c136, %c0_192] : memref<162x256xf32, #tpu.memory_space<vmem>>, vector<2x256xf32>
    tpu.vector_store %arg10[%c136, %c0_192], %349 {strides = array<i32>} : memref<162x256xf32, #tpu.memory_space<vmem>>, vector<2x256xf32>,
    %c0_193 = arith.constant 0 : index
    %c193 = arith.constant 193 : index
    %351 = vector.load %arg9[%c0_193, %c193] : memref<2x512xf32, #tpu.memory_space<vmem>>, vector<2x256xf32>
    %cst_194 = arith.constant 0.000000e+00 : f32
    %352 = vector.shape_cast %302 : vector<1x256xi1> to vector<1x256xi1>
    %353 = vector.broadcast %352 : vector<1x256xi1> to vector<2x256xi1>
    %354 = vector.broadcast %cst_194 : f32 to vector<2x256xf32>
    %355 = arith.select %353, %351, %354 : vector<2x256xi1>, vector<2x256xf32>
    %c154 = arith.constant 154 : index
    %c0_195 = arith.constant 0 : index
    %356 = vector.load %arg10[%c154, %c0_195] : memref<162x256xf32, #tpu.memory_space<vmem>>, vector<2x256xf32>
    tpu.vector_store %arg10[%c154, %c0_195], %355 {strides = array<i32>} : memref<162x256xf32, #tpu.memory_space<vmem>>, vector<2x256xf32>,
    %c2_i32 = arith.constant 2 : i32
    %357 = vector.broadcast %c2_i32 : i32 to vector<1x256xi32>
    %358 = arith.addi %16, %357 : vector<1x256xi32>
    %c0_i32_196 = arith.constant 0 : i32
    %359 = vector.broadcast %c0_i32_196 : i32 to vector<1x256xi32>
    %360 = arith.cmpi sge, %358, %359 : vector<1x256xi32>
    %c2_i32_197 = arith.constant 2 : i32
    %361 = vector.broadcast %c2_i32_197 : i32 to vector<1x256xi32>
    %362 = arith.addi %16, %361 : vector<1x256xi32>
    %c16_i32_198 = arith.constant 16 : i32
    %363 = vector.broadcast %c16_i32_198 : i32 to vector<1x256xi32>
    %364 = arith.cmpi slt, %362, %363 : vector<1x256xi32>
    %365 = arith.andi %360, %364 : vector<1x256xi1>
    %c0_199 = arith.constant 0 : index
    %c66 = arith.constant 66 : index
    %366 = vector.load %arg9[%c0_199, %c66] : memref<2x512xf32, #tpu.memory_space<vmem>>, vector<2x256xf32>
    %cst_200 = arith.constant 0.000000e+00 : f32
    %367 = vector.shape_cast %365 : vector<1x256xi1> to vector<1x256xi1>
    %368 = vector.broadcast %367 : vector<1x256xi1> to vector<2x256xi1>
    %369 = vector.broadcast %cst_200 : f32 to vector<2x256xf32>
    %370 = arith.select %368, %366, %369 : vector<2x256xi1>, vector<2x256xf32>
    %c12 = arith.constant 12 : index
    %c0_201 = arith.constant 0 : index
    %371 = vector.load %arg10[%c12, %c0_201] : memref<162x256xf32, #tpu.memory_space<vmem>>, vector<2x256xf32>
    tpu.vector_store %arg10[%c12, %c0_201], %370 {strides = array<i32>} : memref<162x256xf32, #tpu.memory_space<vmem>>, vector<2x256xf32>,
    %c0_202 = arith.constant 0 : index
    %c82_203 = arith.constant 82 : index
    %372 = vector.load %arg9[%c0_202, %c82_203] : memref<2x512xf32, #tpu.memory_space<vmem>>, vector<2x256xf32>
    %cst_204 = arith.constant 0.000000e+00 : f32
    %373 = vector.shape_cast %365 : vector<1x256xi1> to vector<1x256xi1>
    %374 = vector.broadcast %373 : vector<1x256xi1> to vector<2x256xi1>
    %375 = vector.broadcast %cst_204 : f32 to vector<2x256xf32>
    %376 = arith.select %374, %372, %375 : vector<2x256xi1>, vector<2x256xf32>
    %c30 = arith.constant 30 : index
    %c0_205 = arith.constant 0 : index
    %377 = vector.load %arg10[%c30, %c0_205] : memref<162x256xf32, #tpu.memory_space<vmem>>, vector<2x256xf32>
    tpu.vector_store %arg10[%c30, %c0_205], %376 {strides = array<i32>} : memref<162x256xf32, #tpu.memory_space<vmem>>, vector<2x256xf32>,
    %c0_206 = arith.constant 0 : index
    %c98_207 = arith.constant 98 : index
    %378 = vector.load %arg9[%c0_206, %c98_207] : memref<2x512xf32, #tpu.memory_space<vmem>>, vector<2x256xf32>
    %cst_208 = arith.constant 0.000000e+00 : f32
    %379 = vector.shape_cast %365 : vector<1x256xi1> to vector<1x256xi1>
    %380 = vector.broadcast %379 : vector<1x256xi1> to vector<2x256xi1>
    %381 = vector.broadcast %cst_208 : f32 to vector<2x256xf32>
    %382 = arith.select %380, %378, %381 : vector<2x256xi1>, vector<2x256xf32>
    %c48 = arith.constant 48 : index
    %c0_209 = arith.constant 0 : index
    %383 = vector.load %arg10[%c48, %c0_209] : memref<162x256xf32, #tpu.memory_space<vmem>>, vector<2x256xf32>
    tpu.vector_store %arg10[%c48, %c0_209], %382 {strides = array<i32>} : memref<162x256xf32, #tpu.memory_space<vmem>>, vector<2x256xf32>,
    %c0_210 = arith.constant 0 : index
    %c114_211 = arith.constant 114 : index
    %384 = vector.load %arg9[%c0_210, %c114_211] : memref<2x512xf32, #tpu.memory_space<vmem>>, vector<2x256xf32>
    %cst_212 = arith.constant 0.000000e+00 : f32
    %385 = vector.shape_cast %365 : vector<1x256xi1> to vector<1x256xi1>
    %386 = vector.broadcast %385 : vector<1x256xi1> to vector<2x256xi1>
    %387 = vector.broadcast %cst_212 : f32 to vector<2x256xf32>
    %388 = arith.select %386, %384, %387 : vector<2x256xi1>, vector<2x256xf32>
    %c66_213 = arith.constant 66 : index
    %c0_214 = arith.constant 0 : index
    %389 = vector.load %arg10[%c66_213, %c0_214] : memref<162x256xf32, #tpu.memory_space<vmem>>, vector<2x256xf32>
    tpu.vector_store %arg10[%c66_213, %c0_214], %388 {strides = array<i32>} : memref<162x256xf32, #tpu.memory_space<vmem>>, vector<2x256xf32>,
    %c0_215 = arith.constant 0 : index
    %c130_216 = arith.constant 130 : index
    %390 = vector.load %arg9[%c0_215, %c130_216] : memref<2x512xf32, #tpu.memory_space<vmem>>, vector<2x256xf32>
    %cst_217 = arith.constant 0.000000e+00 : f32
    %391 = vector.shape_cast %365 : vector<1x256xi1> to vector<1x256xi1>
    %392 = vector.broadcast %391 : vector<1x256xi1> to vector<2x256xi1>
    %393 = vector.broadcast %cst_217 : f32 to vector<2x256xf32>
    %394 = arith.select %392, %390, %393 : vector<2x256xi1>, vector<2x256xf32>
    %c84 = arith.constant 84 : index
    %c0_218 = arith.constant 0 : index
    %395 = vector.load %arg10[%c84, %c0_218] : memref<162x256xf32, #tpu.memory_space<vmem>>, vector<2x256xf32>
    tpu.vector_store %arg10[%c84, %c0_218], %394 {strides = array<i32>} : memref<162x256xf32, #tpu.memory_space<vmem>>, vector<2x256xf32>,
    %c0_219 = arith.constant 0 : index
    %c146_220 = arith.constant 146 : index
    %396 = vector.load %arg9[%c0_219, %c146_220] : memref<2x512xf32, #tpu.memory_space<vmem>>, vector<2x256xf32>
    %cst_221 = arith.constant 0.000000e+00 : f32
    %397 = vector.shape_cast %365 : vector<1x256xi1> to vector<1x256xi1>
    %398 = vector.broadcast %397 : vector<1x256xi1> to vector<2x256xi1>
    %399 = vector.broadcast %cst_221 : f32 to vector<2x256xf32>
    %400 = arith.select %398, %396, %399 : vector<2x256xi1>, vector<2x256xf32>
    %c102 = arith.constant 102 : index
    %c0_222 = arith.constant 0 : index
    %401 = vector.load %arg10[%c102, %c0_222] : memref<162x256xf32, #tpu.memory_space<vmem>>, vector<2x256xf32>
    tpu.vector_store %arg10[%c102, %c0_222], %400 {strides = array<i32>} : memref<162x256xf32, #tpu.memory_space<vmem>>, vector<2x256xf32>,
    %c0_223 = arith.constant 0 : index
    %c162 = arith.constant 162 : index
    %402 = vector.load %arg9[%c0_223, %c162] : memref<2x512xf32, #tpu.memory_space<vmem>>, vector<2x256xf32>
    %cst_224 = arith.constant 0.000000e+00 : f32
    %403 = vector.shape_cast %365 : vector<1x256xi1> to vector<1x256xi1>
    %404 = vector.broadcast %403 : vector<1x256xi1> to vector<2x256xi1>
    %405 = vector.broadcast %cst_224 : f32 to vector<2x256xf32>
    %406 = arith.select %404, %402, %405 : vector<2x256xi1>, vector<2x256xf32>
    %c120 = arith.constant 120 : index
    %c0_225 = arith.constant 0 : index
    %407 = vector.load %arg10[%c120, %c0_225] : memref<162x256xf32, #tpu.memory_space<vmem>>, vector<2x256xf32>
    tpu.vector_store %arg10[%c120, %c0_225], %406 {strides = array<i32>} : memref<162x256xf32, #tpu.memory_space<vmem>>, vector<2x256xf32>,
    %c0_226 = arith.constant 0 : index
    %c178 = arith.constant 178 : index
    %408 = vector.load %arg9[%c0_226, %c178] : memref<2x512xf32, #tpu.memory_space<vmem>>, vector<2x256xf32>
    %cst_227 = arith.constant 0.000000e+00 : f32
    %409 = vector.shape_cast %365 : vector<1x256xi1> to vector<1x256xi1>
    %410 = vector.broadcast %409 : vector<1x256xi1> to vector<2x256xi1>
    %411 = vector.broadcast %cst_227 : f32 to vector<2x256xf32>
    %412 = arith.select %410, %408, %411 : vector<2x256xi1>, vector<2x256xf32>
    %c138 = arith.constant 138 : index
    %c0_228 = arith.constant 0 : index
    %413 = vector.load %arg10[%c138, %c0_228] : memref<162x256xf32, #tpu.memory_space<vmem>>, vector<2x256xf32>
    tpu.vector_store %arg10[%c138, %c0_228], %412 {strides = array<i32>} : memref<162x256xf32, #tpu.memory_space<vmem>>, vector<2x256xf32>,
    %c0_229 = arith.constant 0 : index
    %c194 = arith.constant 194 : index
    %414 = vector.load %arg9[%c0_229, %c194] : memref<2x512xf32, #tpu.memory_space<vmem>>, vector<2x256xf32>
    %cst_230 = arith.constant 0.000000e+00 : f32
    %415 = vector.shape_cast %365 : vector<1x256xi1> to vector<1x256xi1>
    %416 = vector.broadcast %415 : vector<1x256xi1> to vector<2x256xi1>
    %417 = vector.broadcast %cst_230 : f32 to vector<2x256xf32>
    %418 = arith.select %416, %414, %417 : vector<2x256xi1>, vector<2x256xf32>
    %c156_231 = arith.constant 156 : index
    %c0_232 = arith.constant 0 : index
    %419 = vector.load %arg10[%c156_231, %c0_232] : memref<162x256xf32, #tpu.memory_space<vmem>>, vector<2x256xf32>
    tpu.vector_store %arg10[%c156_231, %c0_232], %418 {strides = array<i32>} : memref<162x256xf32, #tpu.memory_space<vmem>>, vector<2x256xf32>,
    %c3_i32 = arith.constant 3 : i32
    %420 = vector.broadcast %c3_i32 : i32 to vector<1x256xi32>
    %421 = arith.addi %16, %420 : vector<1x256xi32>
    %c0_i32_233 = arith.constant 0 : i32
    %422 = vector.broadcast %c0_i32_233 : i32 to vector<1x256xi32>
    %423 = arith.cmpi sge, %421, %422 : vector<1x256xi32>
    %c3_i32_234 = arith.constant 3 : i32
    %424 = vector.broadcast %c3_i32_234 : i32 to vector<1x256xi32>
    %425 = arith.addi %16, %424 : vector<1x256xi32>
    %c16_i32_235 = arith.constant 16 : i32
    %426 = vector.broadcast %c16_i32_235 : i32 to vector<1x256xi32>
    %427 = arith.cmpi slt, %425, %426 : vector<1x256xi32>
    %428 = arith.andi %423, %427 : vector<1x256xi1>
    %c0_236 = arith.constant 0 : index
    %c67 = arith.constant 67 : index
    %429 = vector.load %arg9[%c0_236, %c67] : memref<2x512xf32, #tpu.memory_space<vmem>>, vector<2x256xf32>
    %cst_237 = arith.constant 0.000000e+00 : f32
    %430 = vector.shape_cast %428 : vector<1x256xi1> to vector<1x256xi1>
    %431 = vector.broadcast %430 : vector<1x256xi1> to vector<2x256xi1>
    %432 = vector.broadcast %cst_237 : f32 to vector<2x256xf32>
    %433 = arith.select %431, %429, %432 : vector<2x256xi1>, vector<2x256xf32>
    %c14 = arith.constant 14 : index
    %c0_238 = arith.constant 0 : index
    %434 = vector.load %arg10[%c14, %c0_238] : memref<162x256xf32, #tpu.memory_space<vmem>>, vector<2x256xf32>
    tpu.vector_store %arg10[%c14, %c0_238], %433 {strides = array<i32>} : memref<162x256xf32, #tpu.memory_space<vmem>>, vector<2x256xf32>,
    %c0_239 = arith.constant 0 : index
    %c83 = arith.constant 83 : index
    %435 = vector.load %arg9[%c0_239, %c83] : memref<2x512xf32, #tpu.memory_space<vmem>>, vector<2x256xf32>
    %cst_240 = arith.constant 0.000000e+00 : f32
    %436 = vector.shape_cast %428 : vector<1x256xi1> to vector<1x256xi1>
    %437 = vector.broadcast %436 : vector<1x256xi1> to vector<2x256xi1>
    %438 = vector.broadcast %cst_240 : f32 to vector<2x256xf32>
    %439 = arith.select %437, %435, %438 : vector<2x256xi1>, vector<2x256xf32>
    %c32 = arith.constant 32 : index
    %c0_241 = arith.constant 0 : index
    %440 = vector.load %arg10[%c32, %c0_241] : memref<162x256xf32, #tpu.memory_space<vmem>>, vector<2x256xf32>
    tpu.vector_store %arg10[%c32, %c0_241], %439 {strides = array<i32>} : memref<162x256xf32, #tpu.memory_space<vmem>>, vector<2x256xf32>,
    %c0_242 = arith.constant 0 : index
    %c99 = arith.constant 99 : index
    %441 = vector.load %arg9[%c0_242, %c99] : memref<2x512xf32, #tpu.memory_space<vmem>>, vector<2x256xf32>
    %cst_243 = arith.constant 0.000000e+00 : f32
    %442 = vector.shape_cast %428 : vector<1x256xi1> to vector<1x256xi1>
    %443 = vector.broadcast %442 : vector<1x256xi1> to vector<2x256xi1>
    %444 = vector.broadcast %cst_243 : f32 to vector<2x256xf32>
    %445 = arith.select %443, %441, %444 : vector<2x256xi1>, vector<2x256xf32>
    %c50 = arith.constant 50 : index
    %c0_244 = arith.constant 0 : index
    %446 = vector.load %arg10[%c50, %c0_244] : memref<162x256xf32, #tpu.memory_space<vmem>>, vector<2x256xf32>
    tpu.vector_store %arg10[%c50, %c0_244], %445 {strides = array<i32>} : memref<162x256xf32, #tpu.memory_space<vmem>>, vector<2x256xf32>,
    %c0_245 = arith.constant 0 : index
    %c115 = arith.constant 115 : index
    %447 = vector.load %arg9[%c0_245, %c115] : memref<2x512xf32, #tpu.memory_space<vmem>>, vector<2x256xf32>
    %cst_246 = arith.constant 0.000000e+00 : f32
    %448 = vector.shape_cast %428 : vector<1x256xi1> to vector<1x256xi1>
    %449 = vector.broadcast %448 : vector<1x256xi1> to vector<2x256xi1>
    %450 = vector.broadcast %cst_246 : f32 to vector<2x256xf32>
    %451 = arith.select %449, %447, %450 : vector<2x256xi1>, vector<2x256xf32>
    %c68 = arith.constant 68 : index
    %c0_247 = arith.constant 0 : index
    %452 = vector.load %arg10[%c68, %c0_247] : memref<162x256xf32, #tpu.memory_space<vmem>>, vector<2x256xf32>
    tpu.vector_store %arg10[%c68, %c0_247], %451 {strides = array<i32>} : memref<162x256xf32, #tpu.memory_space<vmem>>, vector<2x256xf32>,
    %c0_248 = arith.constant 0 : index
    %c131 = arith.constant 131 : index
    %453 = vector.load %arg9[%c0_248, %c131] : memref<2x512xf32, #tpu.memory_space<vmem>>, vector<2x256xf32>
    %cst_249 = arith.constant 0.000000e+00 : f32
    %454 = vector.shape_cast %428 : vector<1x256xi1> to vector<1x256xi1>
    %455 = vector.broadcast %454 : vector<1x256xi1> to vector<2x256xi1>
    %456 = vector.broadcast %cst_249 : f32 to vector<2x256xf32>
    %457 = arith.select %455, %453, %456 : vector<2x256xi1>, vector<2x256xf32>
    %c86 = arith.constant 86 : index
    %c0_250 = arith.constant 0 : index
    %458 = vector.load %arg10[%c86, %c0_250] : memref<162x256xf32, #tpu.memory_space<vmem>>, vector<2x256xf32>
    tpu.vector_store %arg10[%c86, %c0_250], %457 {strides = array<i32>} : memref<162x256xf32, #tpu.memory_space<vmem>>, vector<2x256xf32>,
    %c0_251 = arith.constant 0 : index
    %c147 = arith.constant 147 : index
    %459 = vector.load %arg9[%c0_251, %c147] : memref<2x512xf32, #tpu.memory_space<vmem>>, vector<2x256xf32>
    %cst_252 = arith.constant 0.000000e+00 : f32
    %460 = vector.shape_cast %428 : vector<1x256xi1> to vector<1x256xi1>
    %461 = vector.broadcast %460 : vector<1x256xi1> to vector<2x256xi1>
    %462 = vector.broadcast %cst_252 : f32 to vector<2x256xf32>
    %463 = arith.select %461, %459, %462 : vector<2x256xi1>, vector<2x256xf32>
    %c104 = arith.constant 104 : index
    %c0_253 = arith.constant 0 : index
    %464 = vector.load %arg10[%c104, %c0_253] : memref<162x256xf32, #tpu.memory_space<vmem>>, vector<2x256xf32>
    tpu.vector_store %arg10[%c104, %c0_253], %463 {strides = array<i32>} : memref<162x256xf32, #tpu.memory_space<vmem>>, vector<2x256xf32>,
    %c0_254 = arith.constant 0 : index
    %c163 = arith.constant 163 : index
    %465 = vector.load %arg9[%c0_254, %c163] : memref<2x512xf32, #tpu.memory_space<vmem>>, vector<2x256xf32>
    %cst_255 = arith.constant 0.000000e+00 : f32
    %466 = vector.shape_cast %428 : vector<1x256xi1> to vector<1x256xi1>
    %467 = vector.broadcast %466 : vector<1x256xi1> to vector<2x256xi1>
    %468 = vector.broadcast %cst_255 : f32 to vector<2x256xf32>
    %469 = arith.select %467, %465, %468 : vector<2x256xi1>, vector<2x256xf32>
    %c122 = arith.constant 122 : index
    %c0_256 = arith.constant 0 : index
    %470 = vector.load %arg10[%c122, %c0_256] : memref<162x256xf32, #tpu.memory_space<vmem>>, vector<2x256xf32>
    tpu.vector_store %arg10[%c122, %c0_256], %469 {strides = array<i32>} : memref<162x256xf32, #tpu.memory_space<vmem>>, vector<2x256xf32>,
    %c0_257 = arith.constant 0 : index
    %c179 = arith.constant 179 : index
    %471 = vector.load %arg9[%c0_257, %c179] : memref<2x512xf32, #tpu.memory_space<vmem>>, vector<2x256xf32>
    %cst_258 = arith.constant 0.000000e+00 : f32
    %472 = vector.shape_cast %428 : vector<1x256xi1> to vector<1x256xi1>
    %473 = vector.broadcast %472 : vector<1x256xi1> to vector<2x256xi1>
    %474 = vector.broadcast %cst_258 : f32 to vector<2x256xf32>
    %475 = arith.select %473, %471, %474 : vector<2x256xi1>, vector<2x256xf32>
    %c140_259 = arith.constant 140 : index
    %c0_260 = arith.constant 0 : index
    %476 = vector.load %arg10[%c140_259, %c0_260] : memref<162x256xf32, #tpu.memory_space<vmem>>, vector<2x256xf32>
    tpu.vector_store %arg10[%c140_259, %c0_260], %475 {strides = array<i32>} : memref<162x256xf32, #tpu.memory_space<vmem>>, vector<2x256xf32>,
    %c0_261 = arith.constant 0 : index
    %c195 = arith.constant 195 : index
    %477 = vector.load %arg9[%c0_261, %c195] : memref<2x512xf32, #tpu.memory_space<vmem>>, vector<2x256xf32>
    %cst_262 = arith.constant 0.000000e+00 : f32
    %478 = vector.shape_cast %428 : vector<1x256xi1> to vector<1x256xi1>
    %479 = vector.broadcast %478 : vector<1x256xi1> to vector<2x256xi1>
    %480 = vector.broadcast %cst_262 : f32 to vector<2x256xf32>
    %481 = arith.select %479, %477, %480 : vector<2x256xi1>, vector<2x256xf32>
    %c158_263 = arith.constant 158 : index
    %c0_264 = arith.constant 0 : index
    %482 = vector.load %arg10[%c158_263, %c0_264] : memref<162x256xf32, #tpu.memory_space<vmem>>, vector<2x256xf32>
    tpu.vector_store %arg10[%c158_263, %c0_264], %481 {strides = array<i32>} : memref<162x256xf32, #tpu.memory_space<vmem>>, vector<2x256xf32>,
    %c4_i32 = arith.constant 4 : i32
    %483 = vector.broadcast %c4_i32 : i32 to vector<1x256xi32>
    %484 = arith.addi %16, %483 : vector<1x256xi32>
    %c0_i32_265 = arith.constant 0 : i32
    %485 = vector.broadcast %c0_i32_265 : i32 to vector<1x256xi32>
    %486 = arith.cmpi sge, %484, %485 : vector<1x256xi32>
    %c4_i32_266 = arith.constant 4 : i32
    %487 = vector.broadcast %c4_i32_266 : i32 to vector<1x256xi32>
    %488 = arith.addi %16, %487 : vector<1x256xi32>
    %c16_i32_267 = arith.constant 16 : i32
    %489 = vector.broadcast %c16_i32_267 : i32 to vector<1x256xi32>
    %490 = arith.cmpi slt, %488, %489 : vector<1x256xi32>
    %491 = arith.andi %486, %490 : vector<1x256xi1>
    %c0_268 = arith.constant 0 : index
    %c68_269 = arith.constant 68 : index
    %492 = vector.load %arg9[%c0_268, %c68_269] : memref<2x512xf32, #tpu.memory_space<vmem>>, vector<2x256xf32>
    %cst_270 = arith.constant 0.000000e+00 : f32
    %493 = vector.shape_cast %491 : vector<1x256xi1> to vector<1x256xi1>
    %494 = vector.broadcast %493 : vector<1x256xi1> to vector<2x256xi1>
    %495 = vector.broadcast %cst_270 : f32 to vector<2x256xf32>
    %496 = arith.select %494, %492, %495 : vector<2x256xi1>, vector<2x256xf32>
    %c16 = arith.constant 16 : index
    %c0_271 = arith.constant 0 : index
    %497 = vector.load %arg10[%c16, %c0_271] : memref<162x256xf32, #tpu.memory_space<vmem>>, vector<2x256xf32>
    tpu.vector_store %arg10[%c16, %c0_271], %496 {strides = array<i32>} : memref<162x256xf32, #tpu.memory_space<vmem>>, vector<2x256xf32>,
    %c0_272 = arith.constant 0 : index
    %c84_273 = arith.constant 84 : index
    %498 = vector.load %arg9[%c0_272, %c84_273] : memref<2x512xf32, #tpu.memory_space<vmem>>, vector<2x256xf32>
    %cst_274 = arith.constant 0.000000e+00 : f32
    %499 = vector.shape_cast %491 : vector<1x256xi1> to vector<1x256xi1>
    %500 = vector.broadcast %499 : vector<1x256xi1> to vector<2x256xi1>
    %501 = vector.broadcast %cst_274 : f32 to vector<2x256xf32>
    %502 = arith.select %500, %498, %501 : vector<2x256xi1>, vector<2x256xf32>
    %c34 = arith.constant 34 : index
    %c0_275 = arith.constant 0 : index
    %503 = vector.load %arg10[%c34, %c0_275] : memref<162x256xf32, #tpu.memory_space<vmem>>, vector<2x256xf32>
    tpu.vector_store %arg10[%c34, %c0_275], %502 {strides = array<i32>} : memref<162x256xf32, #tpu.memory_space<vmem>>, vector<2x256xf32>,
    %c0_276 = arith.constant 0 : index
    %c100_277 = arith.constant 100 : index
    %504 = vector.load %arg9[%c0_276, %c100_277] : memref<2x512xf32, #tpu.memory_space<vmem>>, vector<2x256xf32>
    %cst_278 = arith.constant 0.000000e+00 : f32
    %505 = vector.shape_cast %491 : vector<1x256xi1> to vector<1x256xi1>
    %506 = vector.broadcast %505 : vector<1x256xi1> to vector<2x256xi1>
    %507 = vector.broadcast %cst_278 : f32 to vector<2x256xf32>
    %508 = arith.select %506, %504, %507 : vector<2x256xi1>, vector<2x256xf32>
    %c52 = arith.constant 52 : index
    %c0_279 = arith.constant 0 : index
    %509 = vector.load %arg10[%c52, %c0_279] : memref<162x256xf32, #tpu.memory_space<vmem>>, vector<2x256xf32>
    tpu.vector_store %arg10[%c52, %c0_279], %508 {strides = array<i32>} : memref<162x256xf32, #tpu.memory_space<vmem>>, vector<2x256xf32>,
    %c0_280 = arith.constant 0 : index
    %c116_281 = arith.constant 116 : index
    %510 = vector.load %arg9[%c0_280, %c116_281] : memref<2x512xf32, #tpu.memory_space<vmem>>, vector<2x256xf32>
    %cst_282 = arith.constant 0.000000e+00 : f32
    %511 = vector.shape_cast %491 : vector<1x256xi1> to vector<1x256xi1>
    %512 = vector.broadcast %511 : vector<1x256xi1> to vector<2x256xi1>
    %513 = vector.broadcast %cst_282 : f32 to vector<2x256xf32>
    %514 = arith.select %512, %510, %513 : vector<2x256xi1>, vector<2x256xf32>
    %c70 = arith.constant 70 : index
    %c0_283 = arith.constant 0 : index
    %515 = vector.load %arg10[%c70, %c0_283] : memref<162x256xf32, #tpu.memory_space<vmem>>, vector<2x256xf32>
    tpu.vector_store %arg10[%c70, %c0_283], %514 {strides = array<i32>} : memref<162x256xf32, #tpu.memory_space<vmem>>, vector<2x256xf32>,
    %c0_284 = arith.constant 0 : index
    %c132_285 = arith.constant 132 : index
    %516 = vector.load %arg9[%c0_284, %c132_285] : memref<2x512xf32, #tpu.memory_space<vmem>>, vector<2x256xf32>
    %cst_286 = arith.constant 0.000000e+00 : f32
    %517 = vector.shape_cast %491 : vector<1x256xi1> to vector<1x256xi1>
    %518 = vector.broadcast %517 : vector<1x256xi1> to vector<2x256xi1>
    %519 = vector.broadcast %cst_286 : f32 to vector<2x256xf32>
    %520 = arith.select %518, %516, %519 : vector<2x256xi1>, vector<2x256xf32>
    %c88 = arith.constant 88 : index
    %c0_287 = arith.constant 0 : index
    %521 = vector.load %arg10[%c88, %c0_287] : memref<162x256xf32, #tpu.memory_space<vmem>>, vector<2x256xf32>
    tpu.vector_store %arg10[%c88, %c0_287], %520 {strides = array<i32>} : memref<162x256xf32, #tpu.memory_space<vmem>>, vector<2x256xf32>,
    %c0_288 = arith.constant 0 : index
    %c148_289 = arith.constant 148 : index
    %522 = vector.load %arg9[%c0_288, %c148_289] : memref<2x512xf32, #tpu.memory_space<vmem>>, vector<2x256xf32>
    %cst_290 = arith.constant 0.000000e+00 : f32
    %523 = vector.shape_cast %491 : vector<1x256xi1> to vector<1x256xi1>
    %524 = vector.broadcast %523 : vector<1x256xi1> to vector<2x256xi1>
    %525 = vector.broadcast %cst_290 : f32 to vector<2x256xf32>
    %526 = arith.select %524, %522, %525 : vector<2x256xi1>, vector<2x256xf32>
    %c106 = arith.constant 106 : index
    %c0_291 = arith.constant 0 : index
    %527 = vector.load %arg10[%c106, %c0_291] : memref<162x256xf32, #tpu.memory_space<vmem>>, vector<2x256xf32>
    tpu.vector_store %arg10[%c106, %c0_291], %526 {strides = array<i32>} : memref<162x256xf32, #tpu.memory_space<vmem>>, vector<2x256xf32>,
    %c0_292 = arith.constant 0 : index
    %c164 = arith.constant 164 : index
    %528 = vector.load %arg9[%c0_292, %c164] : memref<2x512xf32, #tpu.memory_space<vmem>>, vector<2x256xf32>
    %cst_293 = arith.constant 0.000000e+00 : f32
    %529 = vector.shape_cast %491 : vector<1x256xi1> to vector<1x256xi1>
    %530 = vector.broadcast %529 : vector<1x256xi1> to vector<2x256xi1>
    %531 = vector.broadcast %cst_293 : f32 to vector<2x256xf32>
    %532 = arith.select %530, %528, %531 : vector<2x256xi1>, vector<2x256xf32>
    %c124_294 = arith.constant 124 : index
    %c0_295 = arith.constant 0 : index
    %533 = vector.load %arg10[%c124_294, %c0_295] : memref<162x256xf32, #tpu.memory_space<vmem>>, vector<2x256xf32>
    tpu.vector_store %arg10[%c124_294, %c0_295], %532 {strides = array<i32>} : memref<162x256xf32, #tpu.memory_space<vmem>>, vector<2x256xf32>,
    %c0_296 = arith.constant 0 : index
    %c180 = arith.constant 180 : index
    %534 = vector.load %arg9[%c0_296, %c180] : memref<2x512xf32, #tpu.memory_space<vmem>>, vector<2x256xf32>
    %cst_297 = arith.constant 0.000000e+00 : f32
    %535 = vector.shape_cast %491 : vector<1x256xi1> to vector<1x256xi1>
    %536 = vector.broadcast %535 : vector<1x256xi1> to vector<2x256xi1>
    %537 = vector.broadcast %cst_297 : f32 to vector<2x256xf32>
    %538 = arith.select %536, %534, %537 : vector<2x256xi1>, vector<2x256xf32>
    %c142_298 = arith.constant 142 : index
    %c0_299 = arith.constant 0 : index
    %539 = vector.load %arg10[%c142_298, %c0_299] : memref<162x256xf32, #tpu.memory_space<vmem>>, vector<2x256xf32>
    tpu.vector_store %arg10[%c142_298, %c0_299], %538 {strides = array<i32>} : memref<162x256xf32, #tpu.memory_space<vmem>>, vector<2x256xf32>,
    %c0_300 = arith.constant 0 : index
    %c196 = arith.constant 196 : index
    %540 = vector.load %arg9[%c0_300, %c196] : memref<2x512xf32, #tpu.memory_space<vmem>>, vector<2x256xf32>
    %cst_301 = arith.constant 0.000000e+00 : f32
    %541 = vector.shape_cast %491 : vector<1x256xi1> to vector<1x256xi1>
    %542 = vector.broadcast %541 : vector<1x256xi1> to vector<2x256xi1>
    %543 = vector.broadcast %cst_301 : f32 to vector<2x256xf32>
    %544 = arith.select %542, %540, %543 : vector<2x256xi1>, vector<2x256xf32>
    %c160_302 = arith.constant 160 : index
    %c0_303 = arith.constant 0 : index
    %545 = vector.load %arg10[%c160_302, %c0_303] : memref<162x256xf32, #tpu.memory_space<vmem>>, vector<2x256xf32>
    tpu.vector_store %arg10[%c160_302, %c0_303], %544 {strides = array<i32>} : memref<162x256xf32, #tpu.memory_space<vmem>>, vector<2x256xf32>,
    %c0_304 = arith.constant 0 : index
    %c0_305 = arith.constant 0 : index
    %546 = vector.load %arg2[%c0_304, %c0_305] : memref<128x162xf32, #tpu.memory_space<vmem>>, vector<128x162xf32>
    %c0_306 = arith.constant 0 : index
    %c0_307 = arith.constant 0 : index
    %547 = vector.load %arg10[%c0_306, %c0_307] : memref<162x256xf32, #tpu.memory_space<vmem>>, vector<162x256xf32>
    %cst_308 = arith.constant dense<0.000000e+00> : vector<128x256xf32>
    %548 = tpu.matmul %546, %547, %cst_308 {dimension_numbers = #tpu.dot_dimension_numbers<[1], [0], [0], [1], [0, 0, 1, 1], [], []>} : vector<128x162xf32>, vector<162x256xf32>, vector<128x256xf32> -> vector<128x256xf32>
    %c0_309 = arith.constant 0 : index
    %c0_310 = arith.constant 0 : index
    %549 = vector.load %arg3[%c0_309, %c0_310] : memref<128x1xf32, #tpu.memory_space<vmem>>, vector<128x1xf32>
    %550 = vector.broadcast %549 : vector<128x1xf32> to vector<128x256xf32>
    %551 = arith.addf %548, %550 : vector<128x256xf32>
    %cst_311 = arith.constant 0.000000e+00 : f32
    %552 = vector.broadcast %cst_311 : f32 to vector<128x256xf32>
    %553 = arith.maximumf %551, %552 : vector<128x256xf32>
    %c0_312 = arith.constant 0 : index
    %c0_313 = arith.constant 0 : index
    %554 = vector.load %arg4[%c0_312, %c0_313] : memref<64x128xf32, #tpu.memory_space<vmem>>, vector<64x128xf32>
    %cst_314 = arith.constant dense<0.000000e+00> : vector<64x256xf32>
    %555 = tpu.matmul %554, %553, %cst_314 {dimension_numbers = #tpu.dot_dimension_numbers<[1], [0], [0], [1], [0, 0, 1, 1], [], []>} : vector<64x128xf32>, vector<128x256xf32>, vector<64x256xf32> -> vector<64x256xf32>
    %c0_315 = arith.constant 0 : index
    %c0_316 = arith.constant 0 : index
    %556 = vector.load %arg5[%c0_315, %c0_316] : memref<64x1xf32, #tpu.memory_space<vmem>>, vector<64x1xf32>
    %557 = vector.broadcast %556 : vector<64x1xf32> to vector<64x256xf32>
    %558 = arith.addf %555, %557 : vector<64x256xf32>
    %cst_317 = arith.constant 0.000000e+00 : f32
    %559 = vector.broadcast %cst_317 : f32 to vector<64x256xf32>
    %560 = arith.maximumf %558, %559 : vector<64x256xf32>
    %cst_318 = arith.constant 0.000000e+00 : f32
    %561 = vector.broadcast %cst_318 : f32 to vector<64x128xf32>
    %c0_319 = arith.constant 0 : index
    %c0_320 = arith.constant 0 : index
    %562 = vector.load %arg11[%c0_319, %c0_320] : memref<64x512xf32, #tpu.memory_space<vmem>>, vector<64x128xf32>
    tpu.vector_store %arg11[%c0_319, %c0_320], %561 {strides = array<i32>} : memref<64x512xf32, #tpu.memory_space<vmem>>, vector<64x128xf32>,
    %cst_321 = arith.constant 0.000000e+00 : f32
    %563 = vector.broadcast %cst_321 : f32 to vector<64x128xf32>
    %c0_322 = arith.constant 0 : index
    %c384_323 = arith.constant 384 : index
    %564 = vector.load %arg11[%c0_322, %c384_323] : memref<64x512xf32, #tpu.memory_space<vmem>>, vector<64x128xf32>
    tpu.vector_store %arg11[%c0_322, %c384_323], %563 {strides = array<i32>} : memref<64x512xf32, #tpu.memory_space<vmem>>, vector<64x128xf32>,
    %c0_324 = arith.constant 0 : index
    %c128_325 = arith.constant 128 : index
    %565 = vector.load %arg11[%c0_324, %c128_325] : memref<64x512xf32, #tpu.memory_space<vmem>>, vector<64x256xf32>
    tpu.vector_store %arg11[%c0_324, %c128_325], %560 {strides = array<i32>} : memref<64x512xf32, #tpu.memory_space<vmem>>, vector<64x256xf32>,
    %cst_326 = arith.constant 0.000000e+00 : f32
    %566 = vector.broadcast %cst_326 : f32 to vector<8x256xf32>
    %c-2_i32_327 = arith.constant -2 : i32
    %567 = vector.broadcast %c-2_i32_327 : i32 to vector<1x256xi32>
    %568 = arith.addi %16, %567 : vector<1x256xi32>
    %c0_i32_328 = arith.constant 0 : i32
    %569 = vector.broadcast %c0_i32_328 : i32 to vector<1x256xi32>
    %570 = arith.cmpi sge, %568, %569 : vector<1x256xi32>
    %c-2_i32_329 = arith.constant -2 : i32
    %571 = vector.broadcast %c-2_i32_329 : i32 to vector<1x256xi32>
    %572 = arith.addi %16, %571 : vector<1x256xi32>
    %c16_i32_330 = arith.constant 16 : i32
    %573 = vector.broadcast %c16_i32_330 : i32 to vector<1x256xi32>
    %574 = arith.cmpi slt, %572, %573 : vector<1x256xi32>
    %575 = arith.andi %570, %574 : vector<1x256xi1>
    %c0_331 = arith.constant 0 : index
    %c0_332 = arith.constant 0 : index
    %576 = vector.load %arg6[%c0_331, %c0_332] : memref<8x1600xf32, #tpu.memory_space<vmem>>, vector<8x64xf32>
    %c0_333 = arith.constant 0 : index
    %c94_334 = arith.constant 94 : index
    %577 = vector.load %arg11[%c0_333, %c94_334] : memref<64x512xf32, #tpu.memory_space<vmem>>, vector<64x256xf32>
    %cst_335 = arith.constant dense<0.000000e+00> : vector<8x256xf32>
    %578 = tpu.matmul %576, %577, %cst_335 {dimension_numbers = #tpu.dot_dimension_numbers<[1], [0], [0], [1], [0, 0, 1, 1], [], []>} : vector<8x64xf32>, vector<64x256xf32>, vector<8x256xf32> -> vector<8x256xf32>
    %cst_336 = arith.constant 0.000000e+00 : f32
    %579 = vector.shape_cast %575 : vector<1x256xi1> to vector<1x256xi1>
    %580 = vector.broadcast %579 : vector<1x256xi1> to vector<8x256xi1>
    %581 = vector.broadcast %cst_336 : f32 to vector<8x256xf32>
    %582 = arith.select %580, %578, %581 : vector<8x256xi1>, vector<8x256xf32>
    %583 = arith.addf %566, %582 : vector<8x256xf32>
    %c0_337 = arith.constant 0 : index
    %c320 = arith.constant 320 : index
    %584 = vector.load %arg6[%c0_337, %c320] : memref<8x1600xf32, #tpu.memory_space<vmem>>, vector<8x64xf32>
    %c0_338 = arith.constant 0 : index
    %c110_339 = arith.constant 110 : index
    %585 = vector.load %arg11[%c0_338, %c110_339] : memref<64x512xf32, #tpu.memory_space<vmem>>, vector<64x256xf32>
    %cst_340 = arith.constant dense<0.000000e+00> : vector<8x256xf32>
    %586 = tpu.matmul %584, %585, %cst_340 {dimension_numbers = #tpu.dot_dimension_numbers<[1], [0], [0], [1], [0, 0, 1, 1], [], []>} : vector<8x64xf32>, vector<64x256xf32>, vector<8x256xf32> -> vector<8x256xf32>
    %cst_341 = arith.constant 0.000000e+00 : f32
    %587 = vector.shape_cast %575 : vector<1x256xi1> to vector<1x256xi1>
    %588 = vector.broadcast %587 : vector<1x256xi1> to vector<8x256xi1>
    %589 = vector.broadcast %cst_341 : f32 to vector<8x256xf32>
    %590 = arith.select %588, %586, %589 : vector<8x256xi1>, vector<8x256xf32>
    %591 = arith.addf %583, %590 : vector<8x256xf32>
    %c0_342 = arith.constant 0 : index
    %c640 = arith.constant 640 : index
    %592 = vector.load %arg6[%c0_342, %c640] : memref<8x1600xf32, #tpu.memory_space<vmem>>, vector<8x64xf32>
    %c0_343 = arith.constant 0 : index
    %c126_344 = arith.constant 126 : index
    %593 = vector.load %arg11[%c0_343, %c126_344] : memref<64x512xf32, #tpu.memory_space<vmem>>, vector<64x256xf32>
    %cst_345 = arith.constant dense<0.000000e+00> : vector<8x256xf32>
    %594 = tpu.matmul %592, %593, %cst_345 {dimension_numbers = #tpu.dot_dimension_numbers<[1], [0], [0], [1], [0, 0, 1, 1], [], []>} : vector<8x64xf32>, vector<64x256xf32>, vector<8x256xf32> -> vector<8x256xf32>
    %cst_346 = arith.constant 0.000000e+00 : f32
    %595 = vector.shape_cast %575 : vector<1x256xi1> to vector<1x256xi1>
    %596 = vector.broadcast %595 : vector<1x256xi1> to vector<8x256xi1>
    %597 = vector.broadcast %cst_346 : f32 to vector<8x256xf32>
    %598 = arith.select %596, %594, %597 : vector<8x256xi1>, vector<8x256xf32>
    %599 = arith.addf %591, %598 : vector<8x256xf32>
    %c0_347 = arith.constant 0 : index
    %c960 = arith.constant 960 : index
    %600 = vector.load %arg6[%c0_347, %c960] : memref<8x1600xf32, #tpu.memory_space<vmem>>, vector<8x64xf32>
    %c0_348 = arith.constant 0 : index
    %c142_349 = arith.constant 142 : index
    %601 = vector.load %arg11[%c0_348, %c142_349] : memref<64x512xf32, #tpu.memory_space<vmem>>, vector<64x256xf32>
    %cst_350 = arith.constant dense<0.000000e+00> : vector<8x256xf32>
    %602 = tpu.matmul %600, %601, %cst_350 {dimension_numbers = #tpu.dot_dimension_numbers<[1], [0], [0], [1], [0, 0, 1, 1], [], []>} : vector<8x64xf32>, vector<64x256xf32>, vector<8x256xf32> -> vector<8x256xf32>
    %cst_351 = arith.constant 0.000000e+00 : f32
    %603 = vector.shape_cast %575 : vector<1x256xi1> to vector<1x256xi1>
    %604 = vector.broadcast %603 : vector<1x256xi1> to vector<8x256xi1>
    %605 = vector.broadcast %cst_351 : f32 to vector<8x256xf32>
    %606 = arith.select %604, %602, %605 : vector<8x256xi1>, vector<8x256xf32>
    %607 = arith.addf %599, %606 : vector<8x256xf32>
    %c0_352 = arith.constant 0 : index
    %c1280 = arith.constant 1280 : index
    %608 = vector.load %arg6[%c0_352, %c1280] : memref<8x1600xf32, #tpu.memory_space<vmem>>, vector<8x64xf32>
    %c0_353 = arith.constant 0 : index
    %c158_354 = arith.constant 158 : index
    %609 = vector.load %arg11[%c0_353, %c158_354] : memref<64x512xf32, #tpu.memory_space<vmem>>, vector<64x256xf32>
    %cst_355 = arith.constant dense<0.000000e+00> : vector<8x256xf32>
    %610 = tpu.matmul %608, %609, %cst_355 {dimension_numbers = #tpu.dot_dimension_numbers<[1], [0], [0], [1], [0, 0, 1, 1], [], []>} : vector<8x64xf32>, vector<64x256xf32>, vector<8x256xf32> -> vector<8x256xf32>
    %cst_356 = arith.constant 0.000000e+00 : f32
    %611 = vector.shape_cast %575 : vector<1x256xi1> to vector<1x256xi1>
    %612 = vector.broadcast %611 : vector<1x256xi1> to vector<8x256xi1>
    %613 = vector.broadcast %cst_356 : f32 to vector<8x256xf32>
    %614 = arith.select %612, %610, %613 : vector<8x256xi1>, vector<8x256xf32>
    %615 = arith.addf %607, %614 : vector<8x256xf32>
    %c-1_i32_357 = arith.constant -1 : i32
    %616 = vector.broadcast %c-1_i32_357 : i32 to vector<1x256xi32>
    %617 = arith.addi %16, %616 : vector<1x256xi32>
    %c0_i32_358 = arith.constant 0 : i32
    %618 = vector.broadcast %c0_i32_358 : i32 to vector<1x256xi32>
    %619 = arith.cmpi sge, %617, %618 : vector<1x256xi32>
    %c-1_i32_359 = arith.constant -1 : i32
    %620 = vector.broadcast %c-1_i32_359 : i32 to vector<1x256xi32>
    %621 = arith.addi %16, %620 : vector<1x256xi32>
    %c16_i32_360 = arith.constant 16 : i32
    %622 = vector.broadcast %c16_i32_360 : i32 to vector<1x256xi32>
    %623 = arith.cmpi slt, %621, %622 : vector<1x256xi32>
    %624 = arith.andi %619, %623 : vector<1x256xi1>
    %c0_361 = arith.constant 0 : index
    %c64_362 = arith.constant 64 : index
    %625 = vector.load %arg6[%c0_361, %c64_362] : memref<8x1600xf32, #tpu.memory_space<vmem>>, vector<8x64xf32>
    %c0_363 = arith.constant 0 : index
    %c95_364 = arith.constant 95 : index
    %626 = vector.load %arg11[%c0_363, %c95_364] : memref<64x512xf32, #tpu.memory_space<vmem>>, vector<64x256xf32>
    %cst_365 = arith.constant dense<0.000000e+00> : vector<8x256xf32>
    %627 = tpu.matmul %625, %626, %cst_365 {dimension_numbers = #tpu.dot_dimension_numbers<[1], [0], [0], [1], [0, 0, 1, 1], [], []>} : vector<8x64xf32>, vector<64x256xf32>, vector<8x256xf32> -> vector<8x256xf32>
    %cst_366 = arith.constant 0.000000e+00 : f32
    %628 = vector.shape_cast %624 : vector<1x256xi1> to vector<1x256xi1>
    %629 = vector.broadcast %628 : vector<1x256xi1> to vector<8x256xi1>
    %630 = vector.broadcast %cst_366 : f32 to vector<8x256xf32>
    %631 = arith.select %629, %627, %630 : vector<8x256xi1>, vector<8x256xf32>
    %632 = arith.addf %615, %631 : vector<8x256xf32>
    %c0_367 = arith.constant 0 : index
    %c384_368 = arith.constant 384 : index
    %633 = vector.load %arg6[%c0_367, %c384_368] : memref<8x1600xf32, #tpu.memory_space<vmem>>, vector<8x64xf32>
    %c0_369 = arith.constant 0 : index
    %c111_370 = arith.constant 111 : index
    %634 = vector.load %arg11[%c0_369, %c111_370] : memref<64x512xf32, #tpu.memory_space<vmem>>, vector<64x256xf32>
    %cst_371 = arith.constant dense<0.000000e+00> : vector<8x256xf32>
    %635 = tpu.matmul %633, %634, %cst_371 {dimension_numbers = #tpu.dot_dimension_numbers<[1], [0], [0], [1], [0, 0, 1, 1], [], []>} : vector<8x64xf32>, vector<64x256xf32>, vector<8x256xf32> -> vector<8x256xf32>
    %cst_372 = arith.constant 0.000000e+00 : f32
    %636 = vector.shape_cast %624 : vector<1x256xi1> to vector<1x256xi1>
    %637 = vector.broadcast %636 : vector<1x256xi1> to vector<8x256xi1>
    %638 = vector.broadcast %cst_372 : f32 to vector<8x256xf32>
    %639 = arith.select %637, %635, %638 : vector<8x256xi1>, vector<8x256xf32>
    %640 = arith.addf %632, %639 : vector<8x256xf32>
    %c0_373 = arith.constant 0 : index
    %c704 = arith.constant 704 : index
    %641 = vector.load %arg6[%c0_373, %c704] : memref<8x1600xf32, #tpu.memory_space<vmem>>, vector<8x64xf32>
    %c0_374 = arith.constant 0 : index
    %c127_375 = arith.constant 127 : index
    %642 = vector.load %arg11[%c0_374, %c127_375] : memref<64x512xf32, #tpu.memory_space<vmem>>, vector<64x256xf32>
    %cst_376 = arith.constant dense<0.000000e+00> : vector<8x256xf32>
    %643 = tpu.matmul %641, %642, %cst_376 {dimension_numbers = #tpu.dot_dimension_numbers<[1], [0], [0], [1], [0, 0, 1, 1], [], []>} : vector<8x64xf32>, vector<64x256xf32>, vector<8x256xf32> -> vector<8x256xf32>
    %cst_377 = arith.constant 0.000000e+00 : f32
    %644 = vector.shape_cast %624 : vector<1x256xi1> to vector<1x256xi1>
    %645 = vector.broadcast %644 : vector<1x256xi1> to vector<8x256xi1>
    %646 = vector.broadcast %cst_377 : f32 to vector<8x256xf32>
    %647 = arith.select %645, %643, %646 : vector<8x256xi1>, vector<8x256xf32>
    %648 = arith.addf %640, %647 : vector<8x256xf32>
    %c0_378 = arith.constant 0 : index
    %c1024 = arith.constant 1024 : index
    %649 = vector.load %arg6[%c0_378, %c1024] : memref<8x1600xf32, #tpu.memory_space<vmem>>, vector<8x64xf32>
    %c0_379 = arith.constant 0 : index
    %c143_380 = arith.constant 143 : index
    %650 = vector.load %arg11[%c0_379, %c143_380] : memref<64x512xf32, #tpu.memory_space<vmem>>, vector<64x256xf32>
    %cst_381 = arith.constant dense<0.000000e+00> : vector<8x256xf32>
    %651 = tpu.matmul %649, %650, %cst_381 {dimension_numbers = #tpu.dot_dimension_numbers<[1], [0], [0], [1], [0, 0, 1, 1], [], []>} : vector<8x64xf32>, vector<64x256xf32>, vector<8x256xf32> -> vector<8x256xf32>
    %cst_382 = arith.constant 0.000000e+00 : f32
    %652 = vector.shape_cast %624 : vector<1x256xi1> to vector<1x256xi1>
    %653 = vector.broadcast %652 : vector<1x256xi1> to vector<8x256xi1>
    %654 = vector.broadcast %cst_382 : f32 to vector<8x256xf32>
    %655 = arith.select %653, %651, %654 : vector<8x256xi1>, vector<8x256xf32>
    %656 = arith.addf %648, %655 : vector<8x256xf32>
    %c0_383 = arith.constant 0 : index
    %c1344 = arith.constant 1344 : index
    %657 = vector.load %arg6[%c0_383, %c1344] : memref<8x1600xf32, #tpu.memory_space<vmem>>, vector<8x64xf32>
    %c0_384 = arith.constant 0 : index
    %c159_385 = arith.constant 159 : index
    %658 = vector.load %arg11[%c0_384, %c159_385] : memref<64x512xf32, #tpu.memory_space<vmem>>, vector<64x256xf32>
    %cst_386 = arith.constant dense<0.000000e+00> : vector<8x256xf32>
    %659 = tpu.matmul %657, %658, %cst_386 {dimension_numbers = #tpu.dot_dimension_numbers<[1], [0], [0], [1], [0, 0, 1, 1], [], []>} : vector<8x64xf32>, vector<64x256xf32>, vector<8x256xf32> -> vector<8x256xf32>
    %cst_387 = arith.constant 0.000000e+00 : f32
    %660 = vector.shape_cast %624 : vector<1x256xi1> to vector<1x256xi1>
    %661 = vector.broadcast %660 : vector<1x256xi1> to vector<8x256xi1>
    %662 = vector.broadcast %cst_387 : f32 to vector<8x256xf32>
    %663 = arith.select %661, %659, %662 : vector<8x256xi1>, vector<8x256xf32>
    %664 = arith.addf %656, %663 : vector<8x256xf32>
    %c0_388 = arith.constant 0 : index
    %c128_389 = arith.constant 128 : index
    %665 = vector.load %arg6[%c0_388, %c128_389] : memref<8x1600xf32, #tpu.memory_space<vmem>>, vector<8x64xf32>
    %c0_390 = arith.constant 0 : index
    %c96_391 = arith.constant 96 : index
    %666 = vector.load %arg11[%c0_390, %c96_391] : memref<64x512xf32, #tpu.memory_space<vmem>>, vector<64x256xf32>
    %cst_392 = arith.constant dense<0.000000e+00> : vector<8x256xf32>
    %667 = tpu.matmul %665, %666, %cst_392 {dimension_numbers = #tpu.dot_dimension_numbers<[1], [0], [0], [1], [0, 0, 1, 1], [], []>} : vector<8x64xf32>, vector<64x256xf32>, vector<8x256xf32> -> vector<8x256xf32>
    %668 = arith.addf %664, %667 : vector<8x256xf32>
    %c0_393 = arith.constant 0 : index
    %c448 = arith.constant 448 : index
    %669 = vector.load %arg6[%c0_393, %c448] : memref<8x1600xf32, #tpu.memory_space<vmem>>, vector<8x64xf32>
    %c0_394 = arith.constant 0 : index
    %c112_395 = arith.constant 112 : index
    %670 = vector.load %arg11[%c0_394, %c112_395] : memref<64x512xf32, #tpu.memory_space<vmem>>, vector<64x256xf32>
    %cst_396 = arith.constant dense<0.000000e+00> : vector<8x256xf32>
    %671 = tpu.matmul %669, %670, %cst_396 {dimension_numbers = #tpu.dot_dimension_numbers<[1], [0], [0], [1], [0, 0, 1, 1], [], []>} : vector<8x64xf32>, vector<64x256xf32>, vector<8x256xf32> -> vector<8x256xf32>
    %672 = arith.addf %668, %671 : vector<8x256xf32>
    %c0_397 = arith.constant 0 : index
    %c768 = arith.constant 768 : index
    %673 = vector.load %arg6[%c0_397, %c768] : memref<8x1600xf32, #tpu.memory_space<vmem>>, vector<8x64xf32>
    %c0_398 = arith.constant 0 : index
    %c128_399 = arith.constant 128 : index
    %674 = vector.load %arg11[%c0_398, %c128_399] : memref<64x512xf32, #tpu.memory_space<vmem>>, vector<64x256xf32>
    %cst_400 = arith.constant dense<0.000000e+00> : vector<8x256xf32>
    %675 = tpu.matmul %673, %674, %cst_400 {dimension_numbers = #tpu.dot_dimension_numbers<[1], [0], [0], [1], [0, 0, 1, 1], [], []>} : vector<8x64xf32>, vector<64x256xf32>, vector<8x256xf32> -> vector<8x256xf32>
    %676 = arith.addf %672, %675 : vector<8x256xf32>
    %c0_401 = arith.constant 0 : index
    %c1088 = arith.constant 1088 : index
    %677 = vector.load %arg6[%c0_401, %c1088] : memref<8x1600xf32, #tpu.memory_space<vmem>>, vector<8x64xf32>
    %c0_402 = arith.constant 0 : index
    %c144_403 = arith.constant 144 : index
    %678 = vector.load %arg11[%c0_402, %c144_403] : memref<64x512xf32, #tpu.memory_space<vmem>>, vector<64x256xf32>
    %cst_404 = arith.constant dense<0.000000e+00> : vector<8x256xf32>
    %679 = tpu.matmul %677, %678, %cst_404 {dimension_numbers = #tpu.dot_dimension_numbers<[1], [0], [0], [1], [0, 0, 1, 1], [], []>} : vector<8x64xf32>, vector<64x256xf32>, vector<8x256xf32> -> vector<8x256xf32>
    %680 = arith.addf %676, %679 : vector<8x256xf32>
    %c0_405 = arith.constant 0 : index
    %c1408 = arith.constant 1408 : index
    %681 = vector.load %arg6[%c0_405, %c1408] : memref<8x1600xf32, #tpu.memory_space<vmem>>, vector<8x64xf32>
    %c0_406 = arith.constant 0 : index
    %c160_407 = arith.constant 160 : index
    %682 = vector.load %arg11[%c0_406, %c160_407] : memref<64x512xf32, #tpu.memory_space<vmem>>, vector<64x256xf32>
    %cst_408 = arith.constant dense<0.000000e+00> : vector<8x256xf32>
    %683 = tpu.matmul %681, %682, %cst_408 {dimension_numbers = #tpu.dot_dimension_numbers<[1], [0], [0], [1], [0, 0, 1, 1], [], []>} : vector<8x64xf32>, vector<64x256xf32>, vector<8x256xf32> -> vector<8x256xf32>
    %684 = arith.addf %680, %683 : vector<8x256xf32>
    %c1_i32_409 = arith.constant 1 : i32
    %685 = vector.broadcast %c1_i32_409 : i32 to vector<1x256xi32>
    %686 = arith.addi %16, %685 : vector<1x256xi32>
    %c0_i32_410 = arith.constant 0 : i32
    %687 = vector.broadcast %c0_i32_410 : i32 to vector<1x256xi32>
    %688 = arith.cmpi sge, %686, %687 : vector<1x256xi32>
    %c1_i32_411 = arith.constant 1 : i32
    %689 = vector.broadcast %c1_i32_411 : i32 to vector<1x256xi32>
    %690 = arith.addi %16, %689 : vector<1x256xi32>
    %c16_i32_412 = arith.constant 16 : i32
    %691 = vector.broadcast %c16_i32_412 : i32 to vector<1x256xi32>
    %692 = arith.cmpi slt, %690, %691 : vector<1x256xi32>
    %693 = arith.andi %688, %692 : vector<1x256xi1>
    %c0_413 = arith.constant 0 : index
    %c192_414 = arith.constant 192 : index
    %694 = vector.load %arg6[%c0_413, %c192_414] : memref<8x1600xf32, #tpu.memory_space<vmem>>, vector<8x64xf32>
    %c0_415 = arith.constant 0 : index
    %c97_416 = arith.constant 97 : index
    %695 = vector.load %arg11[%c0_415, %c97_416] : memref<64x512xf32, #tpu.memory_space<vmem>>, vector<64x256xf32>
    %cst_417 = arith.constant dense<0.000000e+00> : vector<8x256xf32>
    %696 = tpu.matmul %694, %695, %cst_417 {dimension_numbers = #tpu.dot_dimension_numbers<[1], [0], [0], [1], [0, 0, 1, 1], [], []>} : vector<8x64xf32>, vector<64x256xf32>, vector<8x256xf32> -> vector<8x256xf32>
    %cst_418 = arith.constant 0.000000e+00 : f32
    %697 = vector.shape_cast %693 : vector<1x256xi1> to vector<1x256xi1>
    %698 = vector.broadcast %697 : vector<1x256xi1> to vector<8x256xi1>
    %699 = vector.broadcast %cst_418 : f32 to vector<8x256xf32>
    %700 = arith.select %698, %696, %699 : vector<8x256xi1>, vector<8x256xf32>
    %701 = arith.addf %684, %700 : vector<8x256xf32>
    %c0_419 = arith.constant 0 : index
    %c512 = arith.constant 512 : index
    %702 = vector.load %arg6[%c0_419, %c512] : memref<8x1600xf32, #tpu.memory_space<vmem>>, vector<8x64xf32>
    %c0_420 = arith.constant 0 : index
    %c113_421 = arith.constant 113 : index
    %703 = vector.load %arg11[%c0_420, %c113_421] : memref<64x512xf32, #tpu.memory_space<vmem>>, vector<64x256xf32>
    %cst_422 = arith.constant dense<0.000000e+00> : vector<8x256xf32>
    %704 = tpu.matmul %702, %703, %cst_422 {dimension_numbers = #tpu.dot_dimension_numbers<[1], [0], [0], [1], [0, 0, 1, 1], [], []>} : vector<8x64xf32>, vector<64x256xf32>, vector<8x256xf32> -> vector<8x256xf32>
    %cst_423 = arith.constant 0.000000e+00 : f32
    %705 = vector.shape_cast %693 : vector<1x256xi1> to vector<1x256xi1>
    %706 = vector.broadcast %705 : vector<1x256xi1> to vector<8x256xi1>
    %707 = vector.broadcast %cst_423 : f32 to vector<8x256xf32>
    %708 = arith.select %706, %704, %707 : vector<8x256xi1>, vector<8x256xf32>
    %709 = arith.addf %701, %708 : vector<8x256xf32>
    %c0_424 = arith.constant 0 : index
    %c832 = arith.constant 832 : index
    %710 = vector.load %arg6[%c0_424, %c832] : memref<8x1600xf32, #tpu.memory_space<vmem>>, vector<8x64xf32>
    %c0_425 = arith.constant 0 : index
    %c129_426 = arith.constant 129 : index
    %711 = vector.load %arg11[%c0_425, %c129_426] : memref<64x512xf32, #tpu.memory_space<vmem>>, vector<64x256xf32>
    %cst_427 = arith.constant dense<0.000000e+00> : vector<8x256xf32>
    %712 = tpu.matmul %710, %711, %cst_427 {dimension_numbers = #tpu.dot_dimension_numbers<[1], [0], [0], [1], [0, 0, 1, 1], [], []>} : vector<8x64xf32>, vector<64x256xf32>, vector<8x256xf32> -> vector<8x256xf32>
    %cst_428 = arith.constant 0.000000e+00 : f32
    %713 = vector.shape_cast %693 : vector<1x256xi1> to vector<1x256xi1>
    %714 = vector.broadcast %713 : vector<1x256xi1> to vector<8x256xi1>
    %715 = vector.broadcast %cst_428 : f32 to vector<8x256xf32>
    %716 = arith.select %714, %712, %715 : vector<8x256xi1>, vector<8x256xf32>
    %717 = arith.addf %709, %716 : vector<8x256xf32>
    %c0_429 = arith.constant 0 : index
    %c1152 = arith.constant 1152 : index
    %718 = vector.load %arg6[%c0_429, %c1152] : memref<8x1600xf32, #tpu.memory_space<vmem>>, vector<8x64xf32>
    %c0_430 = arith.constant 0 : index
    %c145_431 = arith.constant 145 : index
    %719 = vector.load %arg11[%c0_430, %c145_431] : memref<64x512xf32, #tpu.memory_space<vmem>>, vector<64x256xf32>
    %cst_432 = arith.constant dense<0.000000e+00> : vector<8x256xf32>
    %720 = tpu.matmul %718, %719, %cst_432 {dimension_numbers = #tpu.dot_dimension_numbers<[1], [0], [0], [1], [0, 0, 1, 1], [], []>} : vector<8x64xf32>, vector<64x256xf32>, vector<8x256xf32> -> vector<8x256xf32>
    %cst_433 = arith.constant 0.000000e+00 : f32
    %721 = vector.shape_cast %693 : vector<1x256xi1> to vector<1x256xi1>
    %722 = vector.broadcast %721 : vector<1x256xi1> to vector<8x256xi1>
    %723 = vector.broadcast %cst_433 : f32 to vector<8x256xf32>
    %724 = arith.select %722, %720, %723 : vector<8x256xi1>, vector<8x256xf32>
    %725 = arith.addf %717, %724 : vector<8x256xf32>
    %c0_434 = arith.constant 0 : index
    %c1472 = arith.constant 1472 : index
    %726 = vector.load %arg6[%c0_434, %c1472] : memref<8x1600xf32, #tpu.memory_space<vmem>>, vector<8x64xf32>
    %c0_435 = arith.constant 0 : index
    %c161_436 = arith.constant 161 : index
    %727 = vector.load %arg11[%c0_435, %c161_436] : memref<64x512xf32, #tpu.memory_space<vmem>>, vector<64x256xf32>
    %cst_437 = arith.constant dense<0.000000e+00> : vector<8x256xf32>
    %728 = tpu.matmul %726, %727, %cst_437 {dimension_numbers = #tpu.dot_dimension_numbers<[1], [0], [0], [1], [0, 0, 1, 1], [], []>} : vector<8x64xf32>, vector<64x256xf32>, vector<8x256xf32> -> vector<8x256xf32>
    %cst_438 = arith.constant 0.000000e+00 : f32
    %729 = vector.shape_cast %693 : vector<1x256xi1> to vector<1x256xi1>
    %730 = vector.broadcast %729 : vector<1x256xi1> to vector<8x256xi1>
    %731 = vector.broadcast %cst_438 : f32 to vector<8x256xf32>
    %732 = arith.select %730, %728, %731 : vector<8x256xi1>, vector<8x256xf32>
    %733 = arith.addf %725, %732 : vector<8x256xf32>
    %c2_i32_439 = arith.constant 2 : i32
    %734 = vector.broadcast %c2_i32_439 : i32 to vector<1x256xi32>
    %735 = arith.addi %16, %734 : vector<1x256xi32>
    %c0_i32_440 = arith.constant 0 : i32
    %736 = vector.broadcast %c0_i32_440 : i32 to vector<1x256xi32>
    %737 = arith.cmpi sge, %735, %736 : vector<1x256xi32>
    %c2_i32_441 = arith.constant 2 : i32
    %738 = vector.broadcast %c2_i32_441 : i32 to vector<1x256xi32>
    %739 = arith.addi %16, %738 : vector<1x256xi32>
    %c16_i32_442 = arith.constant 16 : i32
    %740 = vector.broadcast %c16_i32_442 : i32 to vector<1x256xi32>
    %741 = arith.cmpi slt, %739, %740 : vector<1x256xi32>
    %742 = arith.andi %737, %741 : vector<1x256xi1>
    %c0_443 = arith.constant 0 : index
    %c256 = arith.constant 256 : index
    %743 = vector.load %arg6[%c0_443, %c256] : memref<8x1600xf32, #tpu.memory_space<vmem>>, vector<8x64xf32>
    %c0_444 = arith.constant 0 : index
    %c98_445 = arith.constant 98 : index
    %744 = vector.load %arg11[%c0_444, %c98_445] : memref<64x512xf32, #tpu.memory_space<vmem>>, vector<64x256xf32>
    %cst_446 = arith.constant dense<0.000000e+00> : vector<8x256xf32>
    %745 = tpu.matmul %743, %744, %cst_446 {dimension_numbers = #tpu.dot_dimension_numbers<[1], [0], [0], [1], [0, 0, 1, 1], [], []>} : vector<8x64xf32>, vector<64x256xf32>, vector<8x256xf32> -> vector<8x256xf32>
    %cst_447 = arith.constant 0.000000e+00 : f32
    %746 = vector.shape_cast %742 : vector<1x256xi1> to vector<1x256xi1>
    %747 = vector.broadcast %746 : vector<1x256xi1> to vector<8x256xi1>
    %748 = vector.broadcast %cst_447 : f32 to vector<8x256xf32>
    %749 = arith.select %747, %745, %748 : vector<8x256xi1>, vector<8x256xf32>
    %750 = arith.addf %733, %749 : vector<8x256xf32>
    %c0_448 = arith.constant 0 : index
    %c576 = arith.constant 576 : index
    %751 = vector.load %arg6[%c0_448, %c576] : memref<8x1600xf32, #tpu.memory_space<vmem>>, vector<8x64xf32>
    %c0_449 = arith.constant 0 : index
    %c114_450 = arith.constant 114 : index
    %752 = vector.load %arg11[%c0_449, %c114_450] : memref<64x512xf32, #tpu.memory_space<vmem>>, vector<64x256xf32>
    %cst_451 = arith.constant dense<0.000000e+00> : vector<8x256xf32>
    %753 = tpu.matmul %751, %752, %cst_451 {dimension_numbers = #tpu.dot_dimension_numbers<[1], [0], [0], [1], [0, 0, 1, 1], [], []>} : vector<8x64xf32>, vector<64x256xf32>, vector<8x256xf32> -> vector<8x256xf32>
    %cst_452 = arith.constant 0.000000e+00 : f32
    %754 = vector.shape_cast %742 : vector<1x256xi1> to vector<1x256xi1>
    %755 = vector.broadcast %754 : vector<1x256xi1> to vector<8x256xi1>
    %756 = vector.broadcast %cst_452 : f32 to vector<8x256xf32>
    %757 = arith.select %755, %753, %756 : vector<8x256xi1>, vector<8x256xf32>
    %758 = arith.addf %750, %757 : vector<8x256xf32>
    %c0_453 = arith.constant 0 : index
    %c896 = arith.constant 896 : index
    %759 = vector.load %arg6[%c0_453, %c896] : memref<8x1600xf32, #tpu.memory_space<vmem>>, vector<8x64xf32>
    %c0_454 = arith.constant 0 : index
    %c130_455 = arith.constant 130 : index
    %760 = vector.load %arg11[%c0_454, %c130_455] : memref<64x512xf32, #tpu.memory_space<vmem>>, vector<64x256xf32>
    %cst_456 = arith.constant dense<0.000000e+00> : vector<8x256xf32>
    %761 = tpu.matmul %759, %760, %cst_456 {dimension_numbers = #tpu.dot_dimension_numbers<[1], [0], [0], [1], [0, 0, 1, 1], [], []>} : vector<8x64xf32>, vector<64x256xf32>, vector<8x256xf32> -> vector<8x256xf32>
    %cst_457 = arith.constant 0.000000e+00 : f32
    %762 = vector.shape_cast %742 : vector<1x256xi1> to vector<1x256xi1>
    %763 = vector.broadcast %762 : vector<1x256xi1> to vector<8x256xi1>
    %764 = vector.broadcast %cst_457 : f32 to vector<8x256xf32>
    %765 = arith.select %763, %761, %764 : vector<8x256xi1>, vector<8x256xf32>
    %766 = arith.addf %758, %765 : vector<8x256xf32>
    %c0_458 = arith.constant 0 : index
    %c1216 = arith.constant 1216 : index
    %767 = vector.load %arg6[%c0_458, %c1216] : memref<8x1600xf32, #tpu.memory_space<vmem>>, vector<8x64xf32>
    %c0_459 = arith.constant 0 : index
    %c146_460 = arith.constant 146 : index
    %768 = vector.load %arg11[%c0_459, %c146_460] : memref<64x512xf32, #tpu.memory_space<vmem>>, vector<64x256xf32>
    %cst_461 = arith.constant dense<0.000000e+00> : vector<8x256xf32>
    %769 = tpu.matmul %767, %768, %cst_461 {dimension_numbers = #tpu.dot_dimension_numbers<[1], [0], [0], [1], [0, 0, 1, 1], [], []>} : vector<8x64xf32>, vector<64x256xf32>, vector<8x256xf32> -> vector<8x256xf32>
    %cst_462 = arith.constant 0.000000e+00 : f32
    %770 = vector.shape_cast %742 : vector<1x256xi1> to vector<1x256xi1>
    %771 = vector.broadcast %770 : vector<1x256xi1> to vector<8x256xi1>
    %772 = vector.broadcast %cst_462 : f32 to vector<8x256xf32>
    %773 = arith.select %771, %769, %772 : vector<8x256xi1>, vector<8x256xf32>
    %774 = arith.addf %766, %773 : vector<8x256xf32>
    %c0_463 = arith.constant 0 : index
    %c1536 = arith.constant 1536 : index
    %775 = vector.load %arg6[%c0_463, %c1536] : memref<8x1600xf32, #tpu.memory_space<vmem>>, vector<8x64xf32>
    %c0_464 = arith.constant 0 : index
    %c162_465 = arith.constant 162 : index
    %776 = vector.load %arg11[%c0_464, %c162_465] : memref<64x512xf32, #tpu.memory_space<vmem>>, vector<64x256xf32>
    %cst_466 = arith.constant dense<0.000000e+00> : vector<8x256xf32>
    %777 = tpu.matmul %775, %776, %cst_466 {dimension_numbers = #tpu.dot_dimension_numbers<[1], [0], [0], [1], [0, 0, 1, 1], [], []>} : vector<8x64xf32>, vector<64x256xf32>, vector<8x256xf32> -> vector<8x256xf32>
    %cst_467 = arith.constant 0.000000e+00 : f32
    %778 = vector.shape_cast %742 : vector<1x256xi1> to vector<1x256xi1>
    %779 = vector.broadcast %778 : vector<1x256xi1> to vector<8x256xi1>
    %780 = vector.broadcast %cst_467 : f32 to vector<8x256xf32>
    %781 = arith.select %779, %777, %780 : vector<8x256xi1>, vector<8x256xf32>
    %782 = arith.addf %774, %781 : vector<8x256xf32>
    %c0_468 = arith.constant 0 : index
    %c0_469 = arith.constant 0 : index
    %783 = vector.load %arg7[%c0_468, %c0_469] : memref<8x1xf32, #tpu.memory_space<vmem>>, vector<8x1xf32>
    %784 = vector.broadcast %783 : vector<8x1xf32> to vector<8x256xf32>
    %785 = arith.addf %782, %784 : vector<8x256xf32>
    %786 = vector.extract_strided_slice %785 {offsets = [0, 0], sizes = [2, 256], strides = [1, 1]} : vector<8x256xf32> to vector<2x256xf32>
    %c0_470 = arith.constant 0 : index
    %c0_471 = arith.constant 0 : index
    %c0_472 = arith.constant 0 : index
    %787 = vector.load %arg8[%c0_470, %c0_471, %c0_472] : memref<1x2x256xf32, #tpu.memory_space<vmem>>, vector<1x2x256xf32>
    %788 = vector.shape_cast %787 : vector<1x2x256xf32> to vector<2x256xf32>
    %789 = vector.shape_cast %786 : vector<2x256xf32> to vector<1x2x256xf32>
    tpu.vector_store %arg8[%c0_470, %c0_471, %c0_472], %789 {strides = array<i32>} : memref<1x2x256xf32, #tpu.memory_space<vmem>>, vector<1x2x256xf32>,
    return
  }
  func.func @transform_0(%arg0: i32) -> (i32, i32, i32) {
    %c0_i32 = arith.constant 0 : i32
    %c0_i32_0 = arith.constant 0 : i32
    %c0_i32_1 = arith.constant 0 : i32
    return %arg0, %c0_i32, %c0_i32_0 : i32, i32, i32
  }
  func.func @transform_1(%arg0: i32) -> (i32, i32) {
    %c0_i32 = arith.constant 0 : i32
    %c0_i32_0 = arith.constant 0 : i32
    %c0_i32_1 = arith.constant 0 : i32
    return %c0_i32, %c0_i32_0 : i32, i32
  }
  func.func @transform_2(%arg0: i32) -> (i32, i32) {
    %c0_i32 = arith.constant 0 : i32
    %c0_i32_0 = arith.constant 0 : i32
    %c0_i32_1 = arith.constant 0 : i32
    return %c0_i32, %c0_i32_0 : i32, i32
  }
  func.func @transform_3(%arg0: i32) -> (i32, i32) {
    %c0_i32 = arith.constant 0 : i32
    %c0_i32_0 = arith.constant 0 : i32
    %c0_i32_1 = arith.constant 0 : i32
    return %c0_i32, %c0_i32_0 : i32, i32
  }
  func.func @transform_4(%arg0: i32) -> (i32, i32) {
    %c0_i32 = arith.constant 0 : i32
    %c0_i32_0 = arith.constant 0 : i32
    %c0_i32_1 = arith.constant 0 : i32
    return %c0_i32, %c0_i32_0 : i32, i32
  }
  func.func @transform_5(%arg0: i32) -> (i32, i32) {
    %c0_i32 = arith.constant 0 : i32
    %c0_i32_0 = arith.constant 0 : i32
    %c0_i32_1 = arith.constant 0 : i32
    return %c0_i32, %c0_i32_0 : i32, i32
  }
  func.func @transform_6(%arg0: i32) -> (i32, i32) {
    %c0_i32 = arith.constant 0 : i32
    %c0_i32_0 = arith.constant 0 : i32
    %c0_i32_1 = arith.constant 0 : i32
    return %c0_i32, %c0_i32_0 : i32, i32
  }
  func.func @transform_7(%arg0: i32) -> (i32, i32, i32) {
    %c0_i32 = arith.constant 0 : i32
    %c0_i32_0 = arith.constant 0 : i32
    %c0_i32_1 = arith.constant 0 : i32
    return %arg0, %c0_i32, %c0_i32_0 : i32, i32, i32
  }
}

</mosaic_0001>

<bundles_post_ra>
// kernel: _srcnn_forward_impl.1
= control target key start
LH: loop header
LB: loop body
LE: loop exit
PB: predicated region body
PF: predicated region fallthrough
CT: control target
= control target key end

     0   :  { %s10326_s24 = smov 0   ;;  %s13328_s0 = inlined_call_operand.vmem [shape: f32[2,2,256], index: 0, kind: input, shape index: {}]   ;;  %s13329_s1 = inlined_call_operand.vmem [shape: f32[128,162], index: 1, kind: input, shape index: {}]   ;;  %s13330_s2 = inlined_call_operand.vmem [shape: f32[128,1], index: 2, kind: input, shape index: {}]   ;;  %s13331_s3 = inlined_call_operand.vmem [shape: f32[64,128], index: 3, kind: input, shape index: {}]   ;;  %s13332_s4 = inlined_call_operand.vmem [shape: f32[64,1], index: 4, kind: input, shape index: {}]   ;;  %s13333_s5 = inlined_call_operand.vmem [shape: f32[8,1600], index: 5, kind: input, shape index: {}]   ;;  %s13334_s6 = inlined_call_operand.vmem [shape: f32[8,1], index: 6, kind: input, shape index: {}]   ;;  %s13335_s7 = inlined_call_operand.vmem [shape: f32[2,2,256], index: 7, kind: output, shape index: {}]  }
   0x1 LB: > { %s8054_s25 = sadd.s32 4294967295, %s10210_s24   ;;  %p8058_p0 = scmp.ge.s32.totalorder %s10210_s24, 1  ;;  %s10210_s24 = sphi %s10326_s24, %s17_s24  }
   0x2   : > { %p237_p1 = scmp.lt.s32.totalorder %s10210_s24, 3 }
   0x4   : > { %p238_p2 = pnand %p8058_p0, %p237_p1 }
   0x6   : > { %241 = sbr.rel (%p238_p2) target bundleno = 2078 (0x81e), region = 48 }
   0xd   : > { %p269_p3 = scmp.lt.s32.totalorder %s8054_s25, 1  ;;  %v13407_v0 = vmov 0.0   ;;  %v279_v1 = vlaneseq  ;;  %v10213_v2 = vmov 1983009808   ;;  %s10214_s30 = smov 52   ;;  %vm346_vm0 = vcmask 556032  }
   0xe   : > { %306 = vst [vmem:[#allocation2] sm:$0x3] %v13407_v0  ;;  %307 = vst [vmem:[#allocation2 + $0x6] sm:$0x3] %v13407_v0  ;;  %3901 = vmatprep.mubr.f32.mxu1 %v13407_v0  ;;  %v326_v3 = vunpack.c.l.s4 %v10213_v2  ;;  %s10215_s8 = smov 68   ;;  %s10216_s9 = smov 20  }
   0xf   : > { %s14010_s25 = smov (!%p269_p3, %s8054_s25), 1  ;;  %v329_v6 = vshrl.u32 %v279_v1, 7  ;;  %s10217_s10 = smov 36   ;;  %vm379_vm3 = vcmask 424960   ;;  %vm418_vm4 = vcmask 293888   ;;  %vm457_vm5 = vcmask 162816  }
  0x10   : > { %s13336_s26 = sshll.u32 %s14010_s25, 2  ;;  %v327_v5 = vunpack.c.0.s8 %v326_v3  ;;  %s10218_s11 = smov 4   ;;  %vm496_vm6 = vcmask 31744   ;;  %vm529_vm7 = vcmask 949248   ;;  %vm568_vm8 = vcmask 818176  }
  0x11   : > { %s273_s29 = scalar_lea.vmem %s13328_s0, %s13336_s26  ;;  %s10219_s12 = smov 116   ;;  %vm607_vm9 = vcmask 687104   ;;  %vm690_vm10 = vcmask 547840   ;;  %vm729_vm13 = vcmask 416768   ;;  %vm768_vm14 = vcmask 285696  }
  0x12   : > { %v308_v4 = vld [vmem:[%s273_s29] sm:$0xf]  ;;  %v10346_v7 = vsub.s32 %v327_v5, %v329_v6  ;;  %s10220_s13 = smov 100   ;;  %s10221_s14 = smov 84   ;;  %vm807_vm15 = vcmask 154624  }
  0x13   : > { %309 = vst [vmem:[#allocation2 + $0x2] sm:$0xf] %v308_v4  ;;  %s10222_s15 = smov 67   ;;  %s10223_s16 = smov 51  }
  0x14   : > { %s10224_s17 = smov 35   ;;  %s10225_s18 = smov 19  }
  0x15   : > { %s10226_s19 = smov 3   ;;  %s10227_s20 = smov 115  }
  0x16   : > { %s10228_s21 = smov 99   ;;  %s10229_s22 = smov 83  }
  0x17   : > { %s10230_s23 = smov 66   ;;  %s10231_s27 = smov 50  }
  0x18   : > { %s10232_s28 = smov 34   ;;  %s10233_s29 = smov 18  }
  0x19   : > { %s13339_s26 = smov 95  }
  0x1a   : > { %v355_v8 = vld [vmem:[#allocation2] sm:$0x3f] }
  0x1b   : > { %v318_v9 = vld [vmem:[#allocation2] sm:$0x3f]  ;;  %v364_v11 = vrot.slane %v355_v8, %v10346_v7  ;;  %v357_v17 = vcombine.high %v355_v8, %v355_v8 }
  0x1c   : > { %v433_v10 = vld [vmem:[#allocation2] sm:$0x3f]  ;;  %v331_v12 = vrot.slane %v318_v9, %v10346_v7  ;;  %v324_v14 = vcombine.high %v318_v9, %v318_v9 }
  0x1d   : > { %v394_v13 = vld [vmem:[#allocation2] sm:$0x3f]  ;;  %373 = vrot.lane.b32.xlu1 %v364_v11, %s10214_s30  ;;  %v442_v15 = vrot.slane %v433_v10, %v10346_v7  ;;  %v372_v20 = vcombine.high %v364_v11, %v364_v11  ;;  %v371_v21 = vrot.slane %v357_v17, %v10346_v7  ;;  %v435_v25 = vcombine.high %v433_v10, %v433_v10 }
  0x1e   : > { %340 = vrot.lane.b32.xlu0 %v331_v12, %s10215_s8  ;;  %v403_v16 = vrot.slane %v394_v13, %v10346_v7  ;;  %v339_v18 = vcombine.high %v331_v12, %v331_v12  ;;  %v338_v19 = vrot.slane %v324_v14, %v10346_v7  ;;  %v396_v22 = vcombine.high %v394_v13, %v394_v13  ;;  %v472_v26 = vld [vmem:[#allocation2] sm:$0x3f] }
  0x1f   : > { %v450_v27 = vcombine.high %v442_v15, %v442_v15  ;;  %v449_v28 = vrot.slane %v435_v25, %v10346_v7  ;;  %v481_v29 = vrot.slane %v472_v26, %v10346_v7  ;;  %v474_v31 = vcombine.high %v472_v26, %v472_v26  ;;  %v505_v32 = vld [vmem:[#allocation2 + $0x2] sm:$0x3f] }
  0x20   : > { %v410_v23 = vrot.slane %v396_v22, %v10346_v7  ;;  %v411_v24 = vcombine.high %v403_v16, %v403_v16  ;;  %v514_v34 = vrot.slane %v505_v32, %v10346_v7  ;;  %v507_v35 = vcombine.high %v505_v32, %v505_v32  ;;  %v544_v36 = vld [vmem:[#allocation2 + $0x2] sm:$0x3f] }
  0x21   : > { %451 = vrot.lane.b32.xlu1 %v442_v15, %s10216_s9  ;;  %v489_v30 = vcombine.high %v481_v29, %v481_v29  ;;  %v488_v33 = vrot.slane %v474_v31, %v10346_v7  ;;  %v553_v39 = vrot.slane %v544_v36, %v10346_v7  ;;  %v546_v41 = vcombine.high %v544_v36, %v544_v36  ;;  %v583_v42 = vld [vmem:[#allocation2 + $0x2] sm:$0x3f] }
  0x22   : > { %412 = vrot.lane.b32.xlu0 %v403_v16, %s10217_s10  ;;  %v522_v37 = vcombine.high %v514_v34, %v514_v34  ;;  %v521_v38 = vrot.slane %v507_v35, %v10346_v7  ;;  %v592_v44 = vrot.slane %v583_v42, %v10346_v7  ;;  %v585_v45 = vcombine.high %v583_v42, %v583_v42  ;;  %v622_v46 = vld [vmem:[#allocation2 + $0x2] sm:$0x3f] }
  0x23   : > { %v561_v40 = vcombine.high %v553_v39, %v553_v39  ;;  %v560_v43 = vrot.slane %v546_v41, %v10346_v7  ;;  %v631_v49 = vrot.slane %v622_v46, %v10346_v7  ;;  %v624_v51 = vcombine.high %v622_v46, %v622_v46  ;;  %v662_v52 = vld [vmem:[#allocation2] sm:$0x3f] }
  0x24   : > { %v600_v47 = vcombine.high %v592_v44, %v592_v44  ;;  %v599_v48 = vrot.slane %v585_v45, %v10346_v7  ;;  %v675_v54 = vrot.slane %v662_v52, %v10346_v7  ;;  %v668_v55 = vcombine.high %v662_v52, %v662_v52  ;;  %v705_v56 = vld [vmem:[#allocation2] sm:$0x3f] }
  0x25   : > { %344 = vrot.lane.b32.xlu1 %v338_v19, %s10215_s8  ;;  %v639_v50 = vcombine.high %v631_v49, %v631_v49  ;;  %v638_v53 = vrot.slane %v624_v51, %v10346_v7  ;;  %v714_v59 = vrot.slane %v705_v56, %v10346_v7  ;;  %v707_v61 = vcombine.high %v705_v56, %v705_v56  ;;  %v744_v62 = vld [vmem:[#allocation2] sm:$0x3f] }
  0x26   : > { %342 = vrot.lane.b32.xlu0 %v339_v18, %s10215_s8  ;;  %v683_v57 = vcombine.high %v675_v54, %v675_v54  ;;  %v682_v58 = vrot.slane %v668_v55, %v10346_v7  ;;  %v753_v2 = vrot.slane %v744_v62, %v10346_v7  ;;  %v746_v3 = vcombine.high %v744_v62, %v744_v62  ;;  %v783_v4 = vld [vmem:[#allocation2] sm:$0x3f] }
  0x27   : > { %v722_v60 = vcombine.high %v714_v59, %v714_v59  ;;  %v721_v63 = vrot.slane %v707_v61, %v10346_v7  ;;  %v792_v8 = vrot.slane %v783_v4, %v10346_v7  ;;  %v785_v10 = vcombine.high %v783_v4, %v783_v4  ;;  %v816_v11 = vld [vmem:[#allocation2] sm:$0x3f] }
  0x28   : > { %v761_v5 = vcombine.high %v753_v2, %v753_v2  ;;  %v760_v6 = vrot.slane %v746_v3, %v10346_v7  ;;  %v825_v13 = vrot.slane %v816_v11, %v10346_v7  ;;  %v818_v14 = vcombine.high %v816_v11, %v816_v11  ;;  %v855_v15 = vld [vmem:[#allocation2 + $0x2] sm:$0x3f] }
  0x29   : > { %377 = vrot.lane.b32.xlu1 %v371_v21, %s10214_s30  ;;  %v800_v9 = vcombine.high %v792_v8, %v792_v8  ;;  %v799_v12 = vrot.slane %v785_v10, %v10346_v7  ;;  %v864_v18 = vrot.slane %v855_v15, %v10346_v7  ;;  %v894_v21 = vld [vmem:[#allocation2 + $0x2] sm:$0x3f]  ;;  %v280_v42 = vand.u32 127, %v279_v1 }
  0x2a   : > { %375 = vrot.lane.b32.xlu0 %v372_v20, %s10214_s30  ;;  %v833_v16 = vcombine.high %v825_v13, %v825_v13  ;;  %v832_v17 = vrot.slane %v818_v14, %v10346_v7  ;;  %v857_v20 = vcombine.high %v855_v15, %v855_v15  ;;  %v933_v25 = vld [vmem:[#allocation2 + $0x2] sm:$0x3f]  ;;  %s10234_s30 = smov 2  }
  0x2b   : > { %v872_v19 = vcombine.high %v864_v18, %v864_v18  ;;  %v966_v31 = vld [vmem:[#allocation2 + $0x2] sm:$0x3f] }
  0x2c   : > { %v871_v22 = vrot.slane %v857_v20, %v10346_v7  ;;  %v1012_v35 = vld [vmem:[#allocation2] sm:$0x3f] }
  0x2d   : > { %414 = vrot.lane.b32.xlu1 %v411_v24, %s10217_s10  ;;  %v896_v24 = vcombine.high %v894_v21, %v894_v21  ;;  %v1055_v41 = vld [vmem:[#allocation2] sm:$0x3f] }
  0x2e   : > { %416 = vrot.lane.b32.xlu0 %v410_v23, %s10217_s10  ;;  %v903_v23 = vrot.slane %v894_v21, %v10346_v7  ;;  %v1057_v45 = vcombine.high %v1055_v41, %v1055_v41  ;;  %v1094_v46 = vld [vmem:[#allocation2] sm:$0x3f]  ;;  %s10237_s10 = smov 82  }
  0x2f   : > { %v1103_v1 = vrot.slane %v1094_v46, %v10346_v7  ;;  %v1096_v55 = vcombine.high %v1094_v46, %v1094_v46  ;;  %v1205_v21 = vld [vmem:[#allocation2 + $0x2] sm:$0x3f] }
  0x30   : > { %v911_v26 = vcombine.high %v903_v23, %v903_v23 }
  0x31   : > { %455 = vrot.lane.b32.xlu1 %v449_v28, %s10216_s9  ;;  %v942_v28 = vrot.slane %v933_v25, %v10346_v7  ;;  %v1110_v61 = vrot.slane %v1096_v55, %v10346_v7 }
  0x32   : > { %453 = vrot.lane.b32.xlu0 %v450_v27, %s10216_s9  ;;  %v910_v27 = vrot.slane %v896_v24, %v10346_v7  ;;  %s10236_s9 = smov 98  }
  0x35   : > { %492 = vrot.lane.b32.xlu1 %v489_v30, %s10218_s11  ;;  %v935_v30 = vcombine.high %v933_v25, %v933_v25 }
  0x36   : > { %490 = vrot.lane.b32.xlu0 %v481_v29, %s10218_s11  ;;  %v950_v29 = vcombine.high %v942_v28, %v942_v28 }
  0x37   : > { %v949_v32 = vrot.slane %v935_v30, %v10346_v7 }
  0x39   : > { %523 = vrot.lane.b32.xlu1 %v514_v34, %s10219_s12  ;;  %v968_v34 = vcombine.high %v966_v31, %v966_v31 }
  0x3a   : > { %494 = vrot.lane.b32.xlu0 %v488_v33, %s10218_s11  ;;  %v975_v33 = vrot.slane %v966_v31, %v10346_v7  ;;  %s10238_s11 = smov 65  }
  0x3c   : > { %v983_v36 = vcombine.high %v975_v33, %v975_v33 }
  0x3d   : > { %527 = vrot.lane.b32.xlu1 %v521_v38, %s10219_s12  ;;  %v1025_v38 = vrot.slane %v1012_v35, %v10346_v7 }
  0x3e   : > { %525 = vrot.lane.b32.xlu0 %v522_v37, %s10219_s12  ;;  %v982_v37 = vrot.slane %v968_v34, %v10346_v7  ;;  %s10239_s12 = smov 49  }
  0x41   : > { %564 = vrot.lane.b32.xlu1 %v561_v40, %s10220_s13  ;;  %v1018_v40 = vcombine.high %v1012_v35, %v1012_v35 }
  0x42   : > { %562 = vrot.lane.b32.xlu0 %v553_v39, %s10220_s13  ;;  %v1033_v39 = vcombine.high %v1025_v38, %v1025_v38 }
  0x45   : > { %601 = vrot.lane.b32.xlu1 %v592_v44, %s10221_s14  ;;  %v1064_v44 = vrot.slane %v1055_v41, %v10346_v7 }
  0x46   : > { %566 = vrot.lane.b32.xlu0 %v560_v43, %s10220_s13  ;;  %v1032_v43 = vrot.slane %v1018_v40, %v10346_v7  ;;  %s10240_s13 = smov 33  }
  0x49   : > { %605 = vrot.lane.b32.xlu1 %v599_v48, %s10221_s14  ;;  %v1072_v48 = vcombine.high %v1064_v44, %v1064_v44 }
  0x4a   : > { %603 = vrot.lane.b32.xlu0 %v600_v47, %s10221_s14  ;;  %v281_v47 = vadd.s32 128, %v280_v42  ;;  %s10241_s14 = smov 17  }
  0x4c   : > { %v10407_v51 = vand.u32 15, %v281_v47 }
  0x4d   : > { %642 = vrot.lane.b32.xlu1 %v639_v50, %s10215_s8  ;;  %v10405_v50 = vand.u32 15, %v280_v42 }
  0x4e   : > { %640 = vrot.lane.b32.xlu0 %v631_v49, %s10215_s8  ;;  %v1071_v49 = vrot.slane %v1057_v45, %v10346_v7 }
  0x4f   : > { %v10410_v56 = vadd.s32 4294967292, %v10405_v50 }
  0x51   : > { %684 = vrot.lane.b32.xlu1 %v675_v54, %s10222_s15  ;;  %v1111_v54 = vcombine.high %v1103_v1, %v1103_v1  ;;  %vm312_vm1 = vcmp.ge.s32.totalorder %v10410_v56, 0 }
  0x52   : > { %644 = vrot.lane.b32.xlu0 %v638_v53, %s10215_s8  ;;  %s10235_s8 = smov 114  }
  0x55   : > { %688 = vrot.lane.b32.xlu1 %v682_v58, %s10222_s15  ;;  %v1127_v58 = vld [vmem:[#allocation2] sm:$0x3f] }
  0x56   : > { %686 = vrot.lane.b32.xlu0 %v683_v57, %s10222_s15  ;;  %v10413_v57 = vadd.s32 4294967292, %v10407_v51  ;;  %v1136_v62 = vrot.slane %v1127_v58, %v10346_v7 }
  0x58   : > { %vm313_vm2 = vcmp.ge.s32.totalorder %v10413_v57, 0  ;;  %v1144_v11 = vcombine.high %v1136_v62, %v1136_v62 }
  0x59   : > { %725 = vrot.lane.b32.xlu1 %v722_v60, %s10223_s16 }
  0x5a   : > { %723 = vrot.lane.b32.xlu0 %v714_v59, %s10223_s16 }
  0x5d   : > { %762 = vrot.lane.b32.xlu1 %v753_v2, %s10224_s17  ;;  %v1166_v2 = vld [vmem:[#allocation2] sm:$0x3f] }
  0x5e   : > { %727 = vrot.lane.b32.xlu0 %v721_v63, %s10223_s16  ;;  %v1129_v63 = vcombine.high %v1127_v58, %v1127_v58  ;;  %v1168_v20 = vcombine.high %v1166_v2, %v1166_v2  ;;  %s10243_s16 = smov 113  }
  0x60   : > { %v1182_v31 = vrot.slane %v1168_v20, %v10346_v7 }
  0x61   : > { %766 = vrot.lane.b32.xlu1 %v760_v6, %s10224_s17 }
  0x62   : > { %764 = vrot.lane.b32.xlu0 %v761_v5, %s10224_s17  ;;  %s10244_s17 = smov 97  }
  0x65   : > { %803 = vrot.lane.b32.xlu1 %v800_v9, %s10225_s18 }
  0x66   : > { %801 = vrot.lane.b32.xlu0 %v792_v8, %s10225_s18  ;;  %v1175_v8 = vrot.slane %v1166_v2, %v10346_v7  ;;  %v1316_v2 = vld [vmem:[#allocation2 + $0x2] sm:$0x3f] }
  0x67   : > { %v1318_v20 = vcombine.high %v1316_v2, %v1316_v2 }
  0x69   : > { %834 = vrot.lane.b32.xlu1 %v825_v13, %s10226_s19 }
  0x6a   : > { %805 = vrot.lane.b32.xlu0 %v799_v12, %s10225_s18  ;;  %v1143_v12 = vrot.slane %v1129_v63, %v10346_v7  ;;  %s10245_s18 = smov 81  }
  0x6d   : > { %838 = vrot.lane.b32.xlu1 %v832_v17, %s10226_s19 }
  0x6e   : > { %836 = vrot.lane.b32.xlu0 %v833_v16, %s10226_s19  ;;  %s10246_s19 = smov 64  }
  0x71   : > { %875 = vrot.lane.b32.xlu1 %v872_v19, %s10227_s20  ;;  %v1183_v19 = vcombine.high %v1175_v8, %v1175_v8 }
  0x72   : > { %873 = vrot.lane.b32.xlu0 %v864_v18, %s10227_s20 }
  0x75   : > { %912 = vrot.lane.b32.xlu1 %v903_v23, %s10228_s21 }
  0x76   : > { %877 = vrot.lane.b32.xlu0 %v871_v22, %s10227_s20  ;;  %s10247_s20 = smov 48  }
  0x79   : > { %916 = vrot.lane.b32.xlu1 %v910_v27, %s10228_s21 }
  0x7a   : > { %914 = vrot.lane.b32.xlu0 %v911_v26, %s10228_s21  ;;  %s10248_s21 = smov 32  }
  0x7d   : > { %953 = vrot.lane.b32.xlu1 %v950_v29, %s10229_s22 }
  0x7e   : > { %951 = vrot.lane.b32.xlu0 %v942_v28, %s10229_s22  ;;  %v1214_v28 = vrot.slane %v1205_v21, %v10346_v7 }
  0x81   : > { %984 = vrot.lane.b32.xlu1 %v975_v33, %s10222_s15  ;;  %v1244_v33 = vld [vmem:[#allocation2 + $0x2] sm:$0x3f] }
  0x82   : > { %955 = vrot.lane.b32.xlu0 %v949_v32, %s10229_s22  ;;  %v1207_v32 = vcombine.high %v1205_v21, %v1205_v21  ;;  %v1253_v40 = vrot.slane %v1244_v33, %v10346_v7  ;;  %s10249_s22 = smov 16  }
  0x85   : > { %988 = vrot.lane.b32.xlu1 %v982_v37, %s10222_s15 }
  0x86   : > { %986 = vrot.lane.b32.xlu0 %v983_v36, %s10222_s15  ;;  %s10242_s15 = smov 1  }
  0x89   : > { %1036 = vrot.lane.b32.xlu1 %v1033_v39, %s10230_s23 }
  0x8a   : > { %1034 = vrot.lane.b32.xlu0 %v1025_v38, %s10230_s23 }
  0x8d   : > { %1073 = vrot.lane.b32.xlu1 %v1064_v44, %s10231_s27  ;;  %v1221_v44 = vrot.slane %v1207_v32, %v10346_v7 }
  0x8e   : > { %1038 = vrot.lane.b32.xlu0 %v1032_v43, %s10230_s23  ;;  %v1222_v43 = vcombine.high %v1214_v28, %v1214_v28 }
  0x8f   : > { %v374_v52 = vpop.permute.xlu1 %373 }
  0x90   : > { %v341_v53 = vpop.permute.xlu0 %340 }
  0x91   : > { %1077 = vrot.lane.b32.xlu1 %v1071_v49, %s10231_s27 }
  0x92   : > { %1075 = vrot.lane.b32.xlu0 %v1072_v48, %s10231_s27  ;;  %s13380_s27 = smov 96  }
  0x93   : > { %v10415_v59 = vpop.permute.xlu1 %451 }
  0x94   : > { %v413_v60 = vpop.permute.xlu0 %412 }
  0x95   : > { %1114 = vrot.lane.b32.xlu1 %v1111_v54, %s10232_s28  ;;  %v1277_v54 = vld [vmem:[#allocation2 + $0x2] sm:$0x3f] }
  0x96   : > { %1112 = vrot.lane.b32.xlu0 %v1103_v1, %s10232_s28  ;;  %v1279_v63 = vcombine.high %v1277_v54, %v1277_v54 }
  0x97   : > { %v345_v4 = vpop.permute.xlu1 %344 }
  0x98   : > { %v343_v3 = vpop.permute.xlu0 %342 }
  0x99   : > { %v347_v5 = vsel %vm346_vm0, %v341_v53, %v343_v3  ;;  %v348_v6 = vsel %vm346_vm0, %v343_v3, %v345_v4  ;;  %1145 = vrot.lane.b32.xlu1 %v1136_v62, %s10233_s29  ;;  %v1246_v53 = vcombine.high %v1244_v33, %v1244_v33  ;;  %v1286_v62 = vrot.slane %v1277_v54, %v10346_v7 }
  0x9a   : > { %v351_v9 = vsel %vm312_vm1, %v347_v5, 0.0  ;;  %v352_v10 = vsel %vm313_vm2, %v348_v6, 0.0  ;;  %1116 = vrot.lane.b32.xlu0 %v1110_v61, %s10232_s28 }
  0x9b   : > { %353 = vst [vmem:[#allocation3] sm:$0x3] %v351_v9  ;;  %354 = vst [vmem:[#allocation3 + $0x8] sm:$0x3] %v352_v10  ;;  %v378_v14 = vpop.permute.xlu1 %377  ;;  %v1260_v61 = vrot.slane %v1246_v53, %v10346_v7 }
  0x9c   : > { %v376_v13 = vpop.permute.xlu0 %375 }
  0x9d   : > { %v380_v15 = vsel %vm379_vm3, %v374_v52, %v376_v13  ;;  %v381_v16 = vsel %vm379_vm3, %v376_v13, %v378_v14  ;;  %1149 = vrot.lane.b32.xlu1 %v1143_v12, %s10233_s29  ;;  %v1261_v52 = vcombine.high %v1253_v40, %v1253_v40  ;;  %v1325_v12 = vrot.slane %v1316_v2, %v10346_v7 }
  0x9e   : > { %v384_v17 = vsel %vm312_vm1, %v380_v15, 0.0  ;;  %v385_v18 = vsel %vm313_vm2, %v381_v16, 0.0  ;;  %1147 = vrot.lane.b32.xlu0 %v1144_v11, %s10233_s29  ;;  %v1293_v11 = vrot.slane %v1279_v63, %v10346_v7  ;;  %vm957_vm3 = vcmask 678912  }
  0x9f   : > { %v388_v22 = vrot.slane %v384_v17, 6  ;;  %v389_v23 = vrot.slane %v385_v18, 6  ;;  %v415_v25 = vpop.permute.xlu1 %414 }
  0xa0   : > { %v417_v24 = vpop.permute.xlu0 %416  ;;  %v419_v26 = vsel %vm418_vm4, %v413_v60, %v415_v25 }
  0xa1   : > { %392 = vst [vmem:[#allocation3 + $0x20] sm:$0xc] %v388_v22  ;;  %393 = vst [vmem:[#allocation3 + $0x28] sm:$0xc] %v389_v23  ;;  %v420_v27 = vsel %vm418_vm4, %v415_v25, %v417_v24  ;;  %v423_v29 = vsel %vm312_vm1, %v419_v26, 0.0  ;;  %1186 = vrot.lane.b32.xlu1 %v1183_v19, %s10234_s30  ;;  %v1333_v19 = vcombine.high %v1325_v12, %v1325_v12  ;;  %vm1040_vm4 = vcmask 539648  }
  0xa2   : > { %v424_v30 = vsel %vm313_vm2, %v420_v27, 0.0  ;;  %1184 = vrot.lane.b32.xlu0 %v1175_v8, %s10234_s30  ;;  %v427_v34 = vrot.slane %v423_v29, 4  ;;  %v1294_v8 = vcombine.high %v1286_v62, %v1286_v62  ;;  %v1362_v22 = vld [vmem:[#allocation2] sm:$0x3f]  ;;  %v1332_v27 = vrot.slane %v1318_v20, %v10346_v7 }
  0xa3   : > { %v428_v35 = vrot.slane %v424_v30, 4  ;;  %v456_v37 = vpop.permute.xlu1 %455  ;;  %v1368_v29 = vcombine.high %v1362_v22, %v1362_v22 }
  0xa4   : > { %v454_v36 = vpop.permute.xlu0 %453  ;;  %431 = vst [vmem:[#allocation3 + $0x40] sm:$0x30] %v427_v34 }
  0xa5   : > { %432 = vst [vmem:[#allocation3 + $0x48] sm:$0x30] %v428_v35  ;;  %v458_v38 = vsel %vm457_vm5, %v10415_v59, %v454_v36  ;;  %v459_v39 = vsel %vm457_vm5, %v454_v36, %v456_v37  ;;  %1223 = vrot.lane.b32.xlu1 %v1214_v28, %s10235_s8  ;;  %v1375_v28 = vrot.slane %v1362_v22, %v10346_v7 }
  0xa6   : > { %v462_v41 = vsel %vm312_vm1, %v458_v38, 0.0  ;;  %v463_v42 = vsel %vm313_vm2, %v459_v39, 0.0  ;;  %1188 = vrot.lane.b32.xlu0 %v1182_v31, %s10234_s30  ;;  %v1405_v31 = vld [vmem:[#allocation2] sm:$0x3f]  ;;  %v1382_v39 = vrot.slane %v1368_v29, %v10346_v7 }
  0xa7   : > { %v466_v45 = vrot.slane %v462_v41, 2  ;;  %v467_v46 = vrot.slane %v463_v42, 2  ;;  %v493_v48 = vpop.permute.xlu1 %492  ;;  %v1383_v36 = vcombine.high %v1375_v28, %v1375_v28 }
  0xa8   : > { %v491_v47 = vpop.permute.xlu0 %490 }
  0xa9   : > { %470 = vst [vmem:[#allocation3 + $0x60] sm:$0xc0] %v466_v45  ;;  %471 = vst [vmem:[#allocation3 + $0x68] sm:$0xc0] %v467_v46  ;;  %v497_v49 = vsel %vm496_vm6, %v491_v47, %v493_v48  ;;  %1227 = vrot.lane.b32.xlu1 %v1221_v44, %s10235_s8 }
  0xaa   : > { %v501_v1 = vsel %vm312_vm1, %v497_v49, 0.0  ;;  %1225 = vrot.lane.b32.xlu0 %v1222_v43, %s10235_s8  ;;  %v10501_v49 = vadd.s32 4294967293, %v10405_v50 }
  0xab   : > { %503 = vst [vmem:[#allocation3 + $0x90] sm:$0x3] %v501_v1  ;;  %v524_v58 = vpop.permute.xlu1 %523  ;;  %v10504_v1 = vadd.s32 4294967293, %v10407_v51 }
  0xac   : > { %v495_v55 = vpop.permute.xlu0 %494  ;;  %vm656_vm11 = vcmp.ge.s32.totalorder %v10501_v49, 0 }
  0xad   : > { %v498_v59 = vsel %vm496_vm6, %v493_v48, %v495_v55  ;;  %1264 = vrot.lane.b32.xlu1 %v1261_v52, %s10236_s9  ;;  %v1407_v48 = vcombine.high %v1405_v31, %v1405_v31  ;;  %v1438_v52 = vld [vmem:[#allocation2] sm:$0x3f]  ;;  %vm657_vm12 = vcmp.ge.s32.totalorder %v10504_v1, 0 }
  0xae   : > { %v502_v60 = vsel %vm313_vm2, %v498_v59, 0.0  ;;  %1262 = vrot.lane.b32.xlu0 %v1253_v40, %s10236_s9  ;;  %v1414_v40 = vrot.slane %v1405_v31, %v10346_v7  ;;  %v1447_v59 = vrot.slane %v1438_v52, %v10346_v7 }
  0xaf   : > { %504 = vst [vmem:[#allocation3 + $0x98] sm:$0x3] %v502_v60  ;;  %v528_v4 = vpop.permute.xlu1 %527  ;;  %v1440_v60 = vcombine.high %v1438_v52, %v1438_v52 }
  0xb0   : > { %v526_v3 = vpop.permute.xlu0 %525  ;;  %v1422_v47 = vcombine.high %v1414_v40, %v1414_v40 }
  0xb1   : > { %v530_v5 = vsel %vm529_vm7, %v524_v58, %v526_v3  ;;  %v531_v6 = vsel %vm529_vm7, %v526_v3, %v528_v4  ;;  %1295 = vrot.lane.b32.xlu1 %v1286_v62, %s10237_s10  ;;  %v1421_v58 = vrot.slane %v1407_v48, %v10346_v7  ;;  %v1455_v3 = vcombine.high %v1447_v59, %v1447_v59 }
  0xb2   : > { %v534_v9 = vsel %vm312_vm1, %v530_v5, 0.0  ;;  %v535_v10 = vsel %vm313_vm2, %v531_v6, 0.0  ;;  %1266 = vrot.lane.b32.xlu0 %v1260_v61, %s10236_s9  ;;  %v1477_v61 = vld [vmem:[#allocation2] sm:$0x3f]  ;;  %v1454_v6 = vrot.slane %v1440_v60, %v10346_v7  ;;  %vm1079_vm7 = vcmask 408576  }
  0xb3   : > { %v538_v13 = vrot.slane %v534_v9, 6  ;;  %v539_v14 = vrot.slane %v535_v10, 6  ;;  %v565_v16 = vpop.permute.xlu1 %564 }
  0xb4   : > { %v563_v15 = vpop.permute.xlu0 %562 }
  0xb5   : > { %542 = vst [vmem:[#allocation3 + $0xb0] sm:$0xc] %v538_v13  ;;  %543 = vst [vmem:[#allocation3 + $0xb8] sm:$0xc] %v539_v14  ;;  %v569_v17 = vsel %vm568_vm8, %v563_v15, %v565_v16  ;;  %1299 = vrot.lane.b32.xlu1 %v1293_v11, %s10237_s10 }
  0xb6   : > { %v573_v18 = vsel %vm312_vm1, %v569_v17, 0.0  ;;  %1297 = vrot.lane.b32.xlu0 %v1294_v8, %s10237_s10  ;;  %v1486_v8 = vrot.slane %v1477_v61, %v10346_v7  ;;  %s10252_s10 = smov 80  }
  0xb7   : > { %v577_v21 = vrot.slane %v573_v18, 4  ;;  %v602_v24 = vpop.permute.xlu1 %601  ;;  %v1516_v18 = vld [vmem:[#allocation2] sm:$0x3f] }
  0xb8   : > { %v567_v23 = vpop.permute.xlu0 %566  ;;  %v1494_v15 = vcombine.high %v1486_v8, %v1486_v8 }
  0xb9   : > { %581 = vst [vmem:[#allocation3 + $0xd0] sm:$0x30] %v577_v21  ;;  %v570_v25 = vsel %vm568_vm8, %v565_v16, %v567_v23  ;;  %1336 = vrot.lane.b32.xlu1 %v1333_v19, %s10230_s23  ;;  %v1479_v16 = vcombine.high %v1477_v61, %v1477_v61  ;;  %vm1118_vm8 = vcmask 277504  }
  0xba   : > { %v574_v26 = vsel %vm313_vm2, %v570_v25, 0.0  ;;  %1334 = vrot.lane.b32.xlu0 %v1325_v12, %s10230_s23  ;;  %v1518_v25 = vcombine.high %v1516_v18, %v1516_v18 }
  0xbb   : > { %v578_v30 = vrot.slane %v574_v26, 4  ;;  %v606_v33 = vpop.permute.xlu1 %605  ;;  %v1493_v23 = vrot.slane %v1479_v16, %v10346_v7 }
  0xbc   : > { %v604_v32 = vpop.permute.xlu0 %603 }
  0xbd   : > { %582 = vst [vmem:[#allocation3 + $0xd8] sm:$0x30] %v578_v30  ;;  %v608_v34 = vsel %vm607_vm9, %v602_v24, %v604_v32  ;;  %v609_v35 = vsel %vm607_vm9, %v604_v32, %v606_v33  ;;  %1384 = vrot.lane.b32.xlu1 %v1375_v28, %s10238_s11  ;;  %v1525_v24 = vrot.slane %v1516_v18, %v10346_v7  ;;  %vm1151_vm9 = vcmask 146432  }
  0xbe   : > { %v612_v37 = vsel %vm312_vm1, %v608_v34, 0.0  ;;  %v613_v38 = vsel %vm313_vm2, %v609_v35, 0.0  ;;  %1338 = vrot.lane.b32.xlu0 %v1332_v27, %s10230_s23  ;;  %v1555_v27 = vld [vmem:[#allocation2 + $0x2] sm:$0x3f]  ;;  %v1532_v35 = vrot.slane %v1518_v25, %v10346_v7  ;;  %s13382_s23 = smov 112  }
  0xbf   : > { %v616_v41 = vrot.slane %v612_v37, 2  ;;  %v617_v42 = vrot.slane %v613_v38, 2  ;;  %v643_v44 = vpop.permute.xlu1 %642  ;;  %v1533_v32 = vcombine.high %v1525_v24, %v1525_v24 }
  0xc0   : > { %v641_v43 = vpop.permute.xlu0 %640 }
  0xc1   : > { %620 = vst [vmem:[#allocation3 + $0xf0] sm:$0xc0] %v616_v41  ;;  %621 = vst [vmem:[#allocation3 + $0xf8] sm:$0xc0] %v617_v42  ;;  %v646_v45 = vsel %vm346_vm0, %v641_v43, %v643_v44  ;;  %1388 = vrot.lane.b32.xlu1 %v1382_v39, %s10238_s11  ;;  %v1557_v43 = vcombine.high %v1555_v27, %v1555_v27 }
  0xc2   : > { %v650_v46 = vsel %vm312_vm1, %v646_v45, 0.0  ;;  %1386 = vrot.lane.b32.xlu0 %v1383_v36, %s10238_s11  ;;  %v1564_v36 = vrot.slane %v1555_v27, %v10346_v7  ;;  %v1588_v45 = vld [vmem:[#allocation2 + $0x2] sm:$0x3f]  ;;  %vm879_vm1 = vcmask 941056  }
  0xc3   : > { %652 = vst [vmem:[#allocation3 + $0x120] sm:$0x3] %v650_v46  ;;  %v685_v54 = vpop.permute.xlu1 %684 }
  0xc4   : > { %v645_v53 = vpop.permute.xlu0 %644 }
  0xc5   : > { %v647_v55 = vsel %vm346_vm0, %v643_v44, %v645_v53  ;;  %1425 = vrot.lane.b32.xlu1 %v1422_v47, %s10239_s12  ;;  %v1572_v44 = vcombine.high %v1564_v36, %v1564_v36  ;;  %vm840_vm0 = vcmask 23552   ;;  %v1571_v53 = vrot.slane %v1557_v43, %v10346_v7 }
  0xc6   : > { %v651_v56 = vsel %vm313_vm2, %v647_v55, 0.0  ;;  %1423 = vrot.lane.b32.xlu0 %v1414_v40, %s10239_s12  ;;  %v1590_v55 = vcombine.high %v1588_v45, %v1588_v45  ;;  %vm918_vm2 = vcmask 809984  }
  0xc7   : > { %653 = vst [vmem:[#allocation3 + $0x128] sm:$0x3] %v651_v56  ;;  %v689_v63 = vpop.permute.xlu1 %688  ;;  %v1627_v56 = vld [vmem:[#allocation2 + $0x2] sm:$0x3f] }
  0xc8   : > { %v687_v62 = vpop.permute.xlu0 %686 }
  0xc9   : > { %v691_v2 = vsel %vm690_vm10, %v685_v54, %v687_v62  ;;  %v692_v57 = vsel %vm690_vm10, %v687_v62, %v689_v63  ;;  %1456 = vrot.lane.b32.xlu1 %v1447_v59, %s10240_s13  ;;  %v1597_v54 = vrot.slane %v1588_v45, %v10346_v7 }
  0xca   : > { %v695_v4 = vsel %vm656_vm11, %v691_v2, 0.0  ;;  %v696_v5 = vsel %vm657_vm12, %v692_v57, 0.0  ;;  %1427 = vrot.lane.b32.xlu0 %v1421_v58, %s10239_s12  ;;  %v1604_v57 = vrot.slane %v1590_v55, %v10346_v7  ;;  %s10254_s12 = smov 47  }
  0xcb   : > { %v699_v9 = vrot.slane %v695_v4, 6  ;;  %v700_v10 = vrot.slane %v696_v5, 6  ;;  %v726_v12 = vpop.permute.xlu1 %725  ;;  %v1605_v62 = vcombine.high %v1597_v54, %v1597_v54 }
  0xcc   : > { %v724_v11 = vpop.permute.xlu0 %723 }
  0xcd   : > { %703 = vst [vmem:[#allocation3] sm:$0xc] %v699_v9  ;;  %704 = vst [vmem:[#allocation3 + $0x8] sm:$0xc] %v700_v10  ;;  %v730_v13 = vsel %vm729_vm13, %v724_v11, %v726_v12  ;;  %1460 = vrot.lane.b32.xlu1 %v1454_v6, %s10240_s13 }
  0xce   : > { %v734_v14 = vsel %vm656_vm11, %v730_v13, 0.0  ;;  %1458 = vrot.lane.b32.xlu0 %v1455_v3, %s10240_s13  ;;  %v1636_v3 = vrot.slane %v1627_v56, %v10346_v7 }
  0xcf   : > { %v738_v17 = vrot.slane %v734_v14, 4  ;;  %v763_v20 = vpop.permute.xlu1 %762  ;;  %v1666_v14 = vld [vmem:[#allocation2 + $0x2] sm:$0x3f] }
  0xd0   : > { %v728_v19 = vpop.permute.xlu0 %727  ;;  %v1644_v11 = vcombine.high %v1636_v3, %v1636_v3 }
  0xd1   : > { %742 = vst [vmem:[#allocation3 + $0x20] sm:$0x30] %v738_v17  ;;  %v731_v21 = vsel %vm729_vm13, %v726_v12, %v728_v19  ;;  %1497 = vrot.lane.b32.xlu1 %v1494_v15, %s10241_s14  ;;  %v1629_v12 = vcombine.high %v1627_v56, %v1627_v56  ;;  %vm1301_vm13 = vcmask 670720  }
  0xd2   : > { %v735_v22 = vsel %vm657_vm12, %v731_v21, 0.0  ;;  %1495 = vrot.lane.b32.xlu0 %v1486_v8, %s10241_s14  ;;  %v1668_v21 = vcombine.high %v1666_v14, %v1666_v14 }
  0xd3   : > { %v739_v26 = vrot.slane %v735_v22, 4  ;;  %v767_v29 = vpop.permute.xlu1 %766  ;;  %v1643_v19 = vrot.slane %v1629_v12, %v10346_v7 }
  0xd4   : > { %v765_v28 = vpop.permute.xlu0 %764 }
  0xd5   : > { %743 = vst [vmem:[#allocation3 + $0x28] sm:$0x30] %v739_v26  ;;  %v769_v30 = vsel %vm768_vm14, %v763_v20, %v765_v28  ;;  %v770_v31 = vsel %vm768_vm14, %v765_v28, %v767_v29  ;;  %1534 = vrot.lane.b32.xlu1 %v1525_v24, %s10242_s15  ;;  %v1675_v20 = vrot.slane %v1666_v14, %v10346_v7  ;;  %v10613_v14 = vld [vmem:[#allocation2 + $0x2] sm:$0x3f]  ;;  %vm1390_vm14 = vcmask 531456  }
  0xd6   : > { %v773_v33 = vsel %vm656_vm11, %v769_v30, 0.0  ;;  %v774_v34 = vsel %vm657_vm12, %v770_v31, 0.0  ;;  %1499 = vrot.lane.b32.xlu0 %v1493_v23, %s10241_s14  ;;  %v1704_v23 = vld [vmem:[#allocation2] sm:$0x3f]  ;;  %v1682_v31 = vrot.slane %v1668_v21, %v10346_v7 }
  0xd7   : > { %v777_v37 = vrot.slane %v773_v33, 2  ;;  %v778_v38 = vrot.slane %v774_v34, 2  ;;  %v804_v40 = vpop.permute.xlu1 %803  ;;  %v1683_v28 = vcombine.high %v1675_v20, %v1675_v20 }
  0xd8   : > { %v802_v39 = vpop.permute.xlu0 %801 }
  0xd9   : > { %781 = vst [vmem:[#allocation3 + $0x40] sm:$0xc0] %v777_v37  ;;  %782 = vst [vmem:[#allocation3 + $0x48] sm:$0xc0] %v778_v38  ;;  %v808_v41 = vsel %vm807_vm15, %v802_v39, %v804_v40  ;;  %1538 = vrot.lane.b32.xlu1 %v1532_v35, %s10242_s15  ;;  %v1735_v35 = vld [vmem:[#allocation2] sm:$0x3f] }
  0xda   : > { %v812_v42 = vsel %vm656_vm11, %v808_v41, 0.0  ;;  %1536 = vrot.lane.b32.xlu0 %v1533_v32, %s10242_s15  ;;  %v1713_v32 = vrot.slane %v1704_v23, %v10346_v7  ;;  %v1706_v41 = vcombine.high %v1704_v23, %v1704_v23 }
  0xdb   : > { %814 = vst [vmem:[#allocation3 + $0x70] sm:$0x3] %v812_v42  ;;  %v835_v47 = vpop.permute.xlu1 %834  ;;  %v1737_v42 = vcombine.low %v1735_v35, %v1735_v35 }
  0xdc   : > { %v806_v46 = vpop.permute.xlu0 %805 }
  0xdd   : > { %v809_v48 = vsel %vm807_vm15, %v804_v40, %v806_v46  ;;  %1575 = vrot.lane.b32.xlu1 %v1572_v44, %s10243_s16  ;;  %v1721_v40 = vcombine.high %v1713_v32, %v1713_v32 }
  0xde   : > { %v813_v52 = vsel %vm657_vm12, %v809_v48, 0.0  ;;  %1573 = vrot.lane.b32.xlu0 %v1564_v36, %s10243_s16  ;;  %v1744_v48 = vrot.slane %v1737_v42, %v10346_v7  ;;  %v1907_v42 = vld [vmem:[#allocation2 + $0x2] sm:$0x3f] }
  0xdf   : > { %815 = vst [vmem:[#allocation3 + $0x78] sm:$0x3] %v813_v52  ;;  %v839_v59 = vpop.permute.xlu1 %838  ;;  %v10592_v52 = vadd.s32 4294967294, %v10405_v50 }
  0xe0   : > { %v837_v58 = vpop.permute.xlu0 %836 }
  0xe1   : > { %v841_v60 = vsel %vm840_vm0, %v835_v47, %v837_v58  ;;  %v842_v61 = vsel %vm840_vm0, %v837_v58, %v839_v59  ;;  %1606 = vrot.lane.b32.xlu1 %v1597_v54, %s10244_s17  ;;  %v1720_v47 = vrot.slane %v1706_v41, %v10346_v7  ;;  %13509 = vst [vmem:[#allocation5_spill] sm:$0xff] %v10592_v52  ;;  %v1798_v54 = vld [vmem:[#allocation2] sm:$0x3f]  ;;  %vm13352_vm5 = vcmp.ge.s32.totalorder %v10592_v52, 0 }
  0xe2   : > { %v845_v63 = vsel %vm656_vm11, %v841_v60, 0.0  ;;  %v846_v2 = vsel %vm657_vm12, %v842_v61, 0.0  ;;  %1577 = vrot.lane.b32.xlu0 %v1571_v53, %s10243_s16  ;;  %v1766_v53 = vld [vmem:[#allocation2] sm:$0x3f]  ;;  %v1752_v58 = vcombine.high %v1744_v48, %v1744_v48  ;;  %v1751_v61 = vrot.slane %v1735_v35, %v10346_v7 }
  0xe3   : > { %v849_v4 = vrot.slane %v845_v63, 6  ;;  %v850_v5 = vrot.slane %v846_v2, 6  ;;  %v876_v8 = vpop.permute.xlu1 %875  ;;  %v1814_v21 = vrot.slane %v1798_v54, %v10346_v7 }
  0xe4   : > { %v874_v6 = vpop.permute.xlu0 %873 }
  0xe5   : > { %853 = vst [vmem:[#allocation3 + $0x90] sm:$0xc] %v849_v4  ;;  %854 = vst [vmem:[#allocation3 + $0x98] sm:$0xc] %v850_v5  ;;  %v880_v9 = vsel %vm879_vm1, %v874_v6, %v876_v8  ;;  %1610 = vrot.lane.b32.xlu1 %v1604_v57, %s10244_s17  ;;  %v1775_v57 = vrot.slane %v1766_v53, %v10346_v7  ;;  %v10605_v6 = vadd.s32 4294967294, %v10407_v51 }
  0xe6   : > { %v884_v10 = vsel %vm656_vm11, %v880_v9, 0.0  ;;  %1608 = vrot.lane.b32.xlu0 %v1605_v62, %s10244_s17  ;;  %v1768_v62 = vcombine.high %v1766_v53, %v1766_v53 }
  0xe7   : > { %v888_v13 = vrot.slane %v884_v10, 4  ;;  %v913_v16 = vpop.permute.xlu1 %912  ;;  %13510 = vst [vmem:[#allocation6_spill] sm:$0xff] %v10605_v6  ;;  %vm13351_vm6 = vcmp.ge.s32.totalorder %v10605_v6, 0 }
  0xe8   : > { %v878_v15 = vpop.permute.xlu0 %877  ;;  %v1782_v9 = vrot.slane %v1768_v62, %v10346_v7 }
  0xe9   : > { %892 = vst [vmem:[#allocation3 + $0xb0] sm:$0x30] %v888_v13  ;;  %v881_v17 = vsel %vm879_vm1, %v876_v8, %v878_v15  ;;  %1647 = vrot.lane.b32.xlu1 %v1644_v11, %s10245_s18  ;;  %v1783_v11 = vcombine.low %v1775_v57, %v1775_v57  ;;  %vm1429_vm1 = vcmask 400384  }
  0xea   : > { %v885_v18 = vsel %vm657_vm12, %v881_v17, 0.0  ;;  %1645 = vrot.lane.b32.xlu0 %v1636_v3, %s10245_s18  ;;  %v1800_v3 = vcombine.low %v1798_v54, %v1798_v54  ;;  %v1909_v54 = vcombine.low %v1907_v42, %v1907_v42 }
  0xeb   : > { %v889_v22 = vrot.slane %v885_v18, 4  ;;  %v917_v25 = vpop.permute.xlu1 %916  ;;  %v1784_v18 = vcombine.low %v1782_v9, %v1782_v9 }
  0xec   : > { %v915_v24 = vpop.permute.xlu0 %914  ;;  %v1807_v12 = vrot.slane %v1800_v3, %v10346_v7 }
  0xed   : > { %893 = vst [vmem:[#allocation3 + $0xb8] sm:$0x30] %v889_v22  ;;  %v919_v26 = vsel %vm918_vm2, %v913_v16, %v915_v24  ;;  %v920_v27 = vsel %vm918_vm2, %v915_v24, %v917_v25  ;;  %1684 = vrot.lane.b32.xlu1 %v1675_v20, %s10238_s11  ;;  %v1846_v22 = vcombine.low %v10613_v14, %v10613_v14  ;;  %vm1462_vm2 = vcmask 269312  }
  0xee   : > { %v923_v29 = vsel %vm656_vm11, %v919_v26, 0.0  ;;  %v924_v30 = vsel %vm657_vm12, %v920_v27, 0.0  ;;  %1649 = vrot.lane.b32.xlu0 %v1643_v19, %s10245_s18  ;;  %v1815_v20 = vcombine.low %v1807_v12, %v1807_v12  ;;  %s13378_s18 = smov 31  }
  0xef   : > { %v927_v33 = vrot.slane %v923_v29, 2  ;;  %v928_v34 = vrot.slane %v924_v30, 2  ;;  %v954_v37 = vpop.permute.xlu1 %953  ;;  %v1816_v30 = vcombine.low %v1814_v21, %v1814_v21 }
  0xf0   : > { %v952_v36 = vpop.permute.xlu0 %951 }
  0xf1   : > { %931 = vst [vmem:[#allocation3 + $0xd0] sm:$0xc0] %v927_v33  ;;  %932 = vst [vmem:[#allocation3 + $0xd8] sm:$0xc0] %v928_v34  ;;  %v958_v38 = vsel %vm957_vm3, %v952_v36, %v954_v37  ;;  %1688 = vrot.lane.b32.xlu1 %v1682_v31, %s10238_s11  ;;  %v1853_v31 = vrot.slane %v1846_v22, %v10346_v7  ;;  %v1875_v34 = vld [vmem:[#allocation2 + $0x2] sm:$0x3f] }
  0xf2   : > { %v962_v39 = vsel %vm656_vm11, %v958_v38, 0.0  ;;  %1686 = vrot.lane.b32.xlu0 %v1683_v28, %s10238_s11  ;;  %v1877_v41 = vcombine.high %v1875_v34, %v1875_v34  ;;  %s10253_s11 = smov 63  }
  0xf3   : > { %964 = vst [vmem:[#allocation3 + $0x100] sm:$0x3] %v962_v39  ;;  %v985_v44 = vpop.permute.xlu1 %984  ;;  %v1861_v39 = vcombine.high %v1853_v31, %v1853_v31 }
  0xf4   : > { %v956_v43 = vpop.permute.xlu0 %955  ;;  %v1891_v53 = vrot.slane %v1877_v41, %v10346_v7 }
  0xf5   : > { %v959_v45 = vsel %vm957_vm3, %v954_v37, %v956_v43  ;;  %1724 = vrot.lane.b32.xlu1 %v1721_v40, %s10246_s19  ;;  %v1884_v40 = vrot.slane %v1875_v34, %v10346_v7  ;;  %vm1501_vm3 = vcmask 138240  }
  0xf6   : > { %v963_v46 = vsel %vm657_vm12, %v959_v45, 0.0  ;;  %1722 = vrot.lane.b32.xlu0 %v1713_v32, %s10246_s19  ;;  %v1893_v62 = vcombine.low %v1891_v53, %v1891_v53 }
  0xf7   : > { %965 = vst [vmem:[#allocation3 + $0x108] sm:$0x3] %v963_v46  ;;  %v989_v56 = vpop.permute.xlu1 %988  ;;  %v1860_v46 = vrot.slane %v10613_v14, %v10346_v7 }
  0xf8   : > { %v987_v55 = vpop.permute.xlu0 %986 }
  0xf9   : > { %v990_v59 = vsel %vm690_vm10, %v985_v44, %v987_v55  ;;  %v991_v60 = vsel %vm690_vm10, %v987_v55, %v989_v56  ;;  %1753 = vrot.lane.b32.xlu1 %v1744_v48, %s10247_s20  ;;  %v1892_v48 = vcombine.low %v1884_v40, %v1884_v40  ;;  %vm1190_vm10 = vcmask 15360  }
  0xfa   : > { %v994_v63 = vsel %vm656_vm11, %v990_v59, 0.0  ;;  %v995_v2 = vsel %vm657_vm12, %v991_v60, 0.0  ;;  %1726 = vrot.lane.b32.xlu0 %v1720_v47, %s10246_s19  ;;  %vm1229_vm11 = vcmask 932864   ;;  %vm1268_vm12 = vcmask 801792  }
  0xfb   : > { %v998_v4 = vrot.slane %v994_v63, 6  ;;  %v999_v5 = vrot.slane %v995_v2, 6  ;;  %v1037_v49 = vpop.permute.xlu1 %1036  ;;  %v1916_v63 = vrot.slane %v1909_v54, %v10346_v7 }
  0xfc   : > { %v1035_v8 = vpop.permute.xlu0 %1034 }
  0xfd   : > { %1002 = vst [vmem:[#allocation3 + $0x120] sm:$0xc] %v998_v4  ;;  %1003 = vst [vmem:[#allocation3 + $0x128] sm:$0xc] %v999_v5  ;;  %v1041_v1 = vsel %vm1040_vm4, %v1035_v8, %v1037_v49  ;;  %1757 = vrot.lane.b32.xlu1 %v1751_v61, %s10247_s20 }
  0xfe   : > { %v1045_v10 = vsel %vm13352_vm5, %v1041_v1, 0.0  ;;  %1755 = vrot.lane.b32.xlu0 %v1752_v58, %s10247_s20  ;;  %v1923_v1 = vrot.slane %v1907_v42, %v10346_v7  ;;  %s13376_s20 = smov 15  }
  0xff   : > { %v1049_v13 = vrot.slane %v1045_v10, 4  ;;  %v1074_v16 = vpop.permute.xlu1 %1073  ;;  %v1939_v10 = vld [vmem:[#allocation2 + $0x2] sm:$0x3f] }
 0x100   : > { %v1039_v15 = vpop.permute.xlu0 %1038 }
 0x101   : > { %1053 = vst [vmem:[#allocation3] sm:$0x30] %v1049_v13  ;;  %v1042_v17 = vsel %vm1040_vm4, %v1037_v49, %v1039_v15  ;;  %1787 = vrot.lane.b32.xlu1 %v1775_v57, %s10248_s21  ;;  %v1924_v49 = vcombine.low %v1916_v63, %v1916_v63  ;;  %v1925_v15 = vcombine.low %v1923_v1, %v1923_v1  ;;  %v2098_v1 = vld [vmem:[#allocation2] sm:$0x3f] }
 0x102   : > { %v1046_v19 = vsel %vm13351_vm6, %v1042_v17, 0.0  ;;  %1785 = vrot.lane.b32.xlu0 %v1783_v11, %s10248_s21  ;;  %v1941_v17 = vcombine.high %v1939_v10, %v1939_v10 }
 0x103   : > { %v1050_v23 = vrot.slane %v1046_v19, 4  ;;  %v1078_v25 = vpop.permute.xlu1 %1077  ;;  %v1977_v19 = vld [vmem:[#allocation2] sm:$0x3f] }
 0x104   : > { %v1076_v24 = vpop.permute.xlu0 %1075 }
 0x105   : > { %1054 = vst [vmem:[#allocation3 + $0x8] sm:$0x30] %v1050_v23  ;;  %v1080_v26 = vsel %vm1079_vm7, %v1074_v16, %v1076_v24  ;;  %v1081_v27 = vsel %vm1079_vm7, %v1076_v24, %v1078_v25  ;;  %1817 = vrot.lane.b32.xlu1 %v1815_v20, %s10249_s22  ;;  %v1948_v16 = vrot.slane %v1939_v10, %v10346_v7  ;;  %vm13373_vm7 = vcmask 924672  }
 0x106   : > { %v1084_v28 = vsel %vm13352_vm5, %v1080_v26, 0.0  ;;  %v1085_v29 = vsel %vm13351_vm6, %v1081_v27, 0.0  ;;  %1789 = vrot.lane.b32.xlu0 %v1784_v18, %s10248_s21  ;;  %v1955_v27 = vrot.slane %v1941_v17, %v10346_v7  ;;  %v2131_v17 = vld [vmem:[#allocation2 + $0x2] sm:$0x3f] }
 0x107   : > { %v1088_v32 = vrot.slane %v1084_v28, 2  ;;  %v1089_v33 = vrot.slane %v1085_v29, 2  ;;  %v1115_v36 = vpop.permute.xlu1 %1114  ;;  %v1956_v24 = vcombine.high %v1948_v16, %v1948_v16  ;;  %v1990_v28 = vrot.slane %v1977_v19, %v10346_v7 }
 0x108   : > { %v1113_v35 = vpop.permute.xlu0 %1112 }
 0x109   : > { %1092 = vst [vmem:[#allocation3 + $0x20] sm:$0xc0] %v1088_v32  ;;  %1093 = vst [vmem:[#allocation3 + $0x28] sm:$0xc0] %v1089_v33  ;;  %v1119_v37 = vsel %vm1118_vm8, %v1113_v35, %v1115_v36  ;;  %1821 = vrot.lane.b32.xlu1 %v1816_v30, %s10249_s22  ;;  %v1998_v35 = vcombine.high %v1990_v28, %v1990_v28 }
 0x10a   : > { %v1123_v38 = vsel %vm13352_vm5, %v1119_v37, 0.0  ;;  %1819 = vrot.lane.b32.xlu0 %v1807_v12, %s10249_s22  ;;  %v2020_v37 = vld [vmem:[#allocation2] sm:$0x3f] }
 0x10b   : > { %1125 = vst [vmem:[#allocation3 + $0x50] sm:$0x3] %v1123_v38  ;;  %v1146_v44 = vpop.permute.xlu1 %1145 }
 0x10c   : > { %v1117_v43 = vpop.permute.xlu0 %1116 }
 0x10d   : > { %v1120_v45 = vsel %vm1118_vm8, %v1115_v36, %v1117_v43  ;;  %1864 = vrot.lane.b32.xlu1 %v1861_v39, %s13382_s23  ;;  %v1983_v36 = vcombine.high %v1977_v19, %v1977_v19  ;;  %v2029_v43 = vrot.slane %v2020_v37, %v10346_v7 }
 0x10e   : > { %v1124_v47 = vsel %vm13351_vm6, %v1120_v45, 0.0  ;;  %1862 = vrot.lane.b32.xlu0 %v1853_v31, %s13382_s23  ;;  %v2059_v45 = vld [vmem:[#allocation2] sm:$0x3f] }
 0x10f   : > { %1126 = vst [vmem:[#allocation3 + $0x58] sm:$0x3] %v1124_v47  ;;  %v1150_v56 = vpop.permute.xlu1 %1149  ;;  %v1997_v42 = vrot.slane %v1983_v36, %v10346_v7  ;;  %v2037_v54 = vcombine.high %v2029_v43, %v2029_v43 }
 0x110   : > { %v1148_v55 = vpop.permute.xlu0 %1147 }
 0x111   : > { %v1152_v58 = vsel %vm1151_vm9, %v1146_v44, %v1148_v55  ;;  %v1153_v59 = vsel %vm1151_vm9, %v1148_v55, %v1150_v56  ;;  %1894 = vrot.lane.b32.xlu1 %v1892_v48, %s13380_s27  ;;  %v2022_v44 = vcombine.high %v2020_v37, %v2020_v37 }
 0x112   : > { %v1156_v60 = vsel %vm13352_vm5, %v1152_v58, 0.0  ;;  %v1157_v61 = vsel %vm13351_vm6, %v1153_v59, 0.0  ;;  %1866 = vrot.lane.b32.xlu0 %v1860_v46, %s13382_s23  ;;  %v2068_v59 = vrot.slane %v2059_v45, %v10346_v7  ;;  %s13865_s23 = smov 110  }
 0x113   : > { %v1160_v2 = vrot.slane %v1156_v60, 6  ;;  %v1161_v57 = vrot.slane %v1157_v61, 6  ;;  %v1187_v4 = vpop.permute.xlu1 %1186  ;;  %v2036_v58 = vrot.slane %v2022_v44, %v10346_v7 }
 0x114   : > { %v1185_v3 = vpop.permute.xlu0 %1184 }
 0x115   : > { %1164 = vst [vmem:[#allocation3 + $0x70] sm:$0xc] %v1160_v2  ;;  %1165 = vst [vmem:[#allocation3 + $0x78] sm:$0xc] %v1161_v57  ;;  %v1191_v5 = vsel %vm1190_vm10, %v1185_v3, %v1187_v4  ;;  %1898 = vrot.lane.b32.xlu1 %v1893_v62, %s13380_s27  ;;  %v2076_v3 = vcombine.high %v2068_v59, %v2068_v59 }
 0x116   : > { %v1195_v8 = vsel %vm13352_vm5, %v1191_v5, 0.0  ;;  %1896 = vrot.lane.b32.xlu0 %v1884_v40, %s13380_s27  ;;  %s13868_s27 = smov 94  }
 0x117   : > { %v1199_v9 = vrot.slane %v1195_v8, 4  ;;  %v1224_v12 = vpop.permute.xlu1 %1223  ;;  %v10695_v8 = vadd.s32 4294967295, %v10405_v50 }
 0x118   : > { %v1189_v11 = vpop.permute.xlu0 %1188 }
 0x119   : > { %1203 = vst [vmem:[#allocation3 + $0x90] sm:$0x30] %v1199_v9  ;;  %v1192_v13 = vsel %vm1190_vm10, %v1187_v4, %v1189_v11  ;;  %1928 = vrot.lane.b32.xlu1 %v1916_v63, %s10252_s10  ;;  %v2061_v4 = vcombine.high %v2059_v45, %v2059_v45  ;;  %13511 = vst [vmem:[#allocation7_spill] sm:$0xff] %v10695_v8  ;;  %vm13348_vm15 = vcmp.ge.s32.totalorder %v10695_v8, 0 }
 0x11a   : > { %v1196_v14 = vsel %vm13351_vm6, %v1192_v13, 0.0  ;;  %1926 = vrot.lane.b32.xlu0 %v1924_v49, %s10252_s10  ;;  %v10698_v49 = vadd.s32 4294967295, %v10407_v51 }
 0x11b   : > { %v1200_v18 = vrot.slane %v1196_v14, 4  ;;  %v1228_v21 = vpop.permute.xlu1 %1227  ;;  %v2075_v13 = vrot.slane %v2061_v4, %v10346_v7  ;;  %v2107_v14 = vrot.slane %v2098_v1, %v10346_v7  ;;  %v2248_v4 = vld [vmem:[#allocation2 + $0x2] sm:$0x3f] }
 0x11c   : > { %v1226_v20 = vpop.permute.xlu0 %1225  ;;  %13512 = vst [vmem:[#allocation8_spill] sm:$0xff] %v10698_v49  ;;  %vm13343_vm0 = vcmp.ge.s32.totalorder %v10698_v49, 0 }
 0x11d   : > { %1204 = vst [vmem:[#allocation3 + $0x98] sm:$0x30] %v1200_v18  ;;  %v1230_v22 = vsel %vm1229_vm11, %v1224_v12, %v1226_v20  ;;  %v1231_v23 = vsel %vm1229_vm11, %v1226_v20, %v1228_v21  ;;  %1957 = vrot.lane.b32.xlu1 %v1948_v16, %s10246_s19 }
 0x11e   : > { %v1234_v25 = vsel %vm13352_vm5, %v1230_v22, 0.0  ;;  %v1235_v26 = vsel %vm13351_vm6, %v1231_v23, 0.0  ;;  %1930 = vrot.lane.b32.xlu0 %v1925_v15, %s10252_s10  ;;  %v2100_v15 = vcombine.high %v2098_v1, %v2098_v1  ;;  %v2115_v22 = vcombine.high %v2107_v14, %v2107_v14  ;;  %s13374_s10 = smov 127  }
 0x11f   : > { %v1238_v29 = vrot.slane %v1234_v25, 2  ;;  %v1239_v30 = vrot.slane %v1235_v26, 2  ;;  %v1265_v32 = vpop.permute.xlu1 %1264  ;;  %v2140_v26 = vrot.slane %v2131_v17, %v10346_v7 }
 0x120   : > { %v1263_v31 = vpop.permute.xlu0 %1262  ;;  %v2114_v25 = vrot.slane %v2100_v15, %v10346_v7  ;;  %v2281_v15 = vld [vmem:[#allocation2 + $0x2] sm:$0x3f] }
 0x121   : > { %1242 = vst [vmem:[#allocation3 + $0xb0] sm:$0xc0] %v1238_v29  ;;  %1243 = vst [vmem:[#allocation3 + $0xb8] sm:$0xc0] %v1239_v30  ;;  %v1269_v33 = vsel %vm1268_vm12, %v1263_v31, %v1265_v32  ;;  %1961 = vrot.lane.b32.xlu1 %v1955_v27, %s10246_s19 }
 0x122   : > { %v1273_v34 = vsel %vm13352_vm5, %v1269_v33, 0.0  ;;  %1959 = vrot.lane.b32.xlu0 %v1956_v24, %s10246_s19  ;;  %v2148_v33 = vcombine.high %v2140_v26, %v2140_v26 }
 0x123   : > { %1275 = vst [vmem:[#allocation3 + $0xe0] sm:$0x3] %v1273_v34  ;;  %v1296_v39 = vpop.permute.xlu1 %1295  ;;  %v2133_v34 = vcombine.high %v2131_v17, %v2131_v17 }
 0x124   : > { %v1267_v38 = vpop.permute.xlu0 %1266 }
 0x125   : > { %v1270_v40 = vsel %vm1268_vm12, %v1265_v32, %v1267_v38  ;;  %2001 = vrot.lane.b32.xlu1 %v1998_v35, %s10253_s11  ;;  %v2170_v35 = vld [vmem:[#allocation2 + $0x2] sm:$0x3f] }
 0x126   : > { %v1274_v41 = vsel %vm13351_vm6, %v1270_v40, 0.0  ;;  %1999 = vrot.lane.b32.xlu0 %v1990_v28, %s10253_s11  ;;  %v2147_v40 = vrot.slane %v2133_v34, %v10346_v7 }
 0x127   : > { %1276 = vst [vmem:[#allocation3 + $0xe8] sm:$0x3] %v1274_v41  ;;  %v1300_v47 = vpop.permute.xlu1 %1299  ;;  %v2179_v41 = vrot.slane %v2170_v35, %v10346_v7 }
 0x128   : > { %v1298_v46 = vpop.permute.xlu0 %1297 }
 0x129   : > { %v1302_v48 = vsel %vm1301_vm13, %v1296_v39, %v1298_v46  ;;  %v1303_v53 = vsel %vm1301_vm13, %v1298_v46, %v1300_v47  ;;  %2038 = vrot.lane.b32.xlu1 %v2029_v43, %s10254_s12  ;;  %v2209_v43 = vld [vmem:[#allocation2 + $0x2] sm:$0x3f]  ;;  %vm1612_vm13 = vcmask 793600  }
 0x12a   : > { %v1306_v55 = vsel %vm13352_vm5, %v1302_v48, 0.0  ;;  %v1307_v56 = vsel %vm13351_vm6, %v1303_v53, 0.0  ;;  %2003 = vrot.lane.b32.xlu0 %v1997_v42, %s10253_s11  ;;  %v2172_v42 = vcombine.high %v2170_v35, %v2170_v35  ;;  %v2187_v48 = vcombine.high %v2179_v41, %v2179_v41 }
 0x12b   : > { %v1310_v60 = vrot.slane %v1306_v55, 6  ;;  %v1311_v61 = vrot.slane %v1307_v56, 6  ;;  %v1337_v63 = vpop.permute.xlu1 %1336  ;;  %v2218_v56 = vrot.slane %v2209_v43, %v10346_v7 }
 0x12c   : > { %v1335_v62 = vpop.permute.xlu0 %1334  ;;  %v2186_v55 = vrot.slane %v2172_v42, %v10346_v7 }
 0x12d   : > { %1314 = vst [vmem:[#allocation3 + $0x100] sm:$0xc] %v1310_v60  ;;  %1315 = vst [vmem:[#allocation3 + $0x108] sm:$0xc] %v1311_v61  ;;  %v1340_v2 = vsel %vm1040_vm4, %v1335_v62, %v1337_v63  ;;  %2042 = vrot.lane.b32.xlu1 %v2036_v58, %s10254_s12 }
 0x12e   : > { %v1344_v57 = vsel %vm13352_vm5, %v1340_v2, 0.0  ;;  %2040 = vrot.lane.b32.xlu0 %v2037_v54, %s10254_s12  ;;  %s13337_s12 = smov 111   ;;  %v2226_v2 = vcombine.high %v2218_v56, %v2218_v56  ;;  %vm1932_vm5 = vcmask 654336  }
 0x12f   : > { %v1348_v5 = vrot.slane %v1344_v57, 4  ;;  %v1385_v10 = vpop.permute.xlu1 %1384  ;;  %v2211_v57 = vcombine.high %v2209_v43, %v2209_v43 }
 0x130   : > { %v1339_v9 = vpop.permute.xlu0 %1338 }
 0x131   : > { %1352 = vst [vmem:[#allocation3 + $0x120] sm:$0x30] %v1348_v5  ;;  %v1341_v11 = vsel %vm1040_vm4, %v1337_v63, %v1339_v9  ;;  %2079 = vrot.lane.b32.xlu1 %v2076_v3, %s13378_s18  ;;  %vm1540_vm4 = vcmask 7168  }
 0x132   : > { %v1345_v12 = vsel %vm13351_vm6, %v1341_v11, 0.0  ;;  %2077 = vrot.lane.b32.xlu0 %v2068_v59, %s13378_s18  ;;  %v2225_v11 = vrot.slane %v2211_v57, %v10346_v7  ;;  %v2409_v57 = vld [vmem:[#allocation2] sm:$0x3f]  ;;  %vm13353_vm6 = vcmask 785408  }
 0x133   : > { %v1349_v16 = vrot.slane %v1345_v12, 4  ;;  %v1389_v19 = vpop.permute.xlu1 %1388  ;;  %v2257_v12 = vrot.slane %v2248_v4, %v10346_v7 }
 0x134   : > { %v1387_v18 = vpop.permute.xlu0 %1386 }
 0x135   : > { %1353 = vst [vmem:[#allocation3 + $0x128] sm:$0x30] %v1349_v16  ;;  %v1391_v20 = vsel %vm1390_vm14, %v1385_v10, %v1387_v18  ;;  %v1392_v21 = vsel %vm1390_vm14, %v1387_v18, %v1389_v19  ;;  %2116 = vrot.lane.b32.xlu1 %v2107_v14, %s13376_s20 }
 0x136   : > { %v1395_v23 = vsel %vm13348_vm15, %v1391_v20, 0.0  ;;  %v1396_v24 = vsel %vm13343_vm0, %v1392_v21, 0.0  ;;  %2081 = vrot.lane.b32.xlu0 %v2075_v13, %s13378_s18  ;;  %v2250_v13 = vcombine.high %v2248_v4, %v2248_v4  ;;  %v2265_v20 = vcombine.high %v2257_v12, %v2257_v12 }
 0x137   : > { %v1399_v27 = vrot.slane %v1395_v23, 2  ;;  %v1400_v28 = vrot.slane %v1396_v24, 2  ;;  %v1426_v30 = vpop.permute.xlu1 %1425  ;;  %v2290_v24 = vrot.slane %v2281_v15, %v10346_v7 }
 0x138   : > { %v1424_v29 = vpop.permute.xlu0 %1423  ;;  %v2264_v23 = vrot.slane %v2250_v13, %v10346_v7  ;;  %v2442_v13 = vld [vmem:[#allocation2] sm:$0x3f] }
 0x139   : > { %1403 = vst [vmem:[#allocation3] sm:$0xc0] %v1399_v27  ;;  %1404 = vst [vmem:[#allocation3 + $0x8] sm:$0xc0] %v1400_v28  ;;  %v1430_v31 = vsel %vm1429_vm1, %v1424_v29, %v1426_v30  ;;  %2120 = vrot.lane.b32.xlu1 %v2114_v25, %s13376_s20 }
 0x13a   : > { %v1434_v32 = vsel %vm13348_vm15, %v1430_v31, 0.0  ;;  %2118 = vrot.lane.b32.xlu0 %v2115_v22, %s13376_s20  ;;  %v2298_v31 = vcombine.high %v2290_v24, %v2290_v24 }
 0x13b   : > { %1436 = vst [vmem:[#allocation3 + $0x30] sm:$0x3] %v1434_v32  ;;  %v1457_v37 = vpop.permute.xlu1 %1456  ;;  %v2283_v32 = vcombine.high %v2281_v15, %v2281_v15 }
 0x13c   : > { %v1428_v36 = vpop.permute.xlu0 %1427 }
 0x13d   : > { %v1431_v38 = vsel %vm1429_vm1, %v1426_v30, %v1428_v36  ;;  %2151 = vrot.lane.b32.xlu1 %v2148_v33, %s13374_s10  ;;  %v2327_v33 = vld [vmem:[#allocation2] sm:$0x3f]  ;;  %vm1651_vm1 = vcmask 662528  }
 0x13e   : > { %v1435_v39 = vsel %vm13343_vm0, %v1431_v38, 0.0  ;;  %2149 = vrot.lane.b32.xlu0 %v2140_v26, %s13374_s10  ;;  %v2297_v38 = vrot.slane %v2283_v32, %v10346_v7 }
 0x13f   : > { %1437 = vst [vmem:[#allocation3 + $0x38] sm:$0x3] %v1435_v39  ;;  %v1461_v45 = vpop.permute.xlu1 %1460  ;;  %v2340_v39 = vrot.slane %v2327_v33, %v10346_v7 }
 0x140   : > { %v1459_v44 = vpop.permute.xlu0 %1458 }
 0x141   : > { %v1463_v46 = vsel %vm1462_vm2, %v1457_v37, %v1459_v44  ;;  %v1464_v47 = vsel %vm1462_vm2, %v1459_v44, %v1461_v45  ;;  %2188 = vrot.lane.b32.xlu1 %v2179_v41, %s13337_s12  ;;  %v2370_v41 = vld [vmem:[#allocation2] sm:$0x3f] }
 0x142   : > { %v1467_v53 = vsel %vm13348_vm15, %v1463_v46, 0.0  ;;  %v1468_v54 = vsel %vm13343_vm0, %v1464_v47, 0.0  ;;  %2153 = vrot.lane.b32.xlu0 %v2147_v40, %s13374_s10  ;;  %v2333_v40 = vcombine.high %v2327_v33, %v2327_v33  ;;  %v2348_v46 = vcombine.high %v2340_v39, %v2340_v39  ;;  %s13684_s10 = smov 31  }
 0x143   : > { %v1471_v58 = vrot.slane %v1467_v53, 6  ;;  %v1472_v59 = vrot.slane %v1468_v54, 6  ;;  %v1498_v61 = vpop.permute.xlu1 %1497  ;;  %v2379_v54 = vrot.slane %v2370_v41, %v10346_v7 }
 0x144   : > { %v1496_v60 = vpop.permute.xlu0 %1495  ;;  %v2347_v53 = vrot.slane %v2333_v40, %v10346_v7 }
 0x145   : > { %1475 = vst [vmem:[#allocation3 + $0x50] sm:$0xc] %v1471_v58  ;;  %1476 = vst [vmem:[#allocation3 + $0x58] sm:$0xc] %v1472_v59  ;;  %v1502_v62 = vsel %vm1501_vm3, %v1496_v60, %v1498_v61  ;;  %2192 = vrot.lane.b32.xlu1 %v2186_v55, %s13337_s12 }
 0x146   : > { %v1506_v63 = vsel %vm13348_vm15, %v1502_v62, 0.0  ;;  %2190 = vrot.lane.b32.xlu0 %v2187_v48, %s13337_s12  ;;  %s10260_s12 = smov 79   ;;  %v2387_v62 = vcombine.high %v2379_v54, %v2379_v54 }
 0x147   : > { %v1510_v3 = vrot.slane %v1506_v63, 4  ;;  %v1535_v1 = vpop.permute.xlu1 %1534  ;;  %v2372_v63 = vcombine.high %v2370_v41, %v2370_v41 }
 0x148   : > { %v1500_v5 = vpop.permute.xlu0 %1499 }
 0x149   : > { %1514 = vst [vmem:[#allocation3 + $0x70] sm:$0x30] %v1510_v3  ;;  %v1503_v9 = vsel %vm1501_vm3, %v1498_v61, %v1500_v5  ;;  %2229 = vrot.lane.b32.xlu1 %v2226_v2, %s13339_s26 }
 0x14a   : > { %v1507_v10 = vsel %vm13343_vm0, %v1503_v9, 0.0  ;;  %2227 = vrot.lane.b32.xlu0 %v2218_v56, %s13339_s26  ;;  %v2386_v9 = vrot.slane %v2372_v63, %v10346_v7 }
 0x14b   : > { %v1511_v14 = vrot.slane %v1507_v10, 4  ;;  %v1539_v17 = vpop.permute.xlu1 %1538  ;;  %v2418_v10 = vrot.slane %v2409_v57, %v10346_v7 }
 0x14c   : > { %v1537_v16 = vpop.permute.xlu0 %1536 }
 0x14d   : > { %1515 = vst [vmem:[#allocation3 + $0x78] sm:$0x30] %v1511_v14  ;;  %v1541_v18 = vsel %vm1540_vm4, %v1535_v1, %v1537_v16  ;;  %v1542_v19 = vsel %vm1540_vm4, %v1537_v16, %v1539_v17  ;;  %2266 = vrot.lane.b32.xlu1 %v2257_v12, %s10260_s12 }
 0x14e   : > { %v1545_v21 = vsel %vm13348_vm15, %v1541_v18, 0.0  ;;  %v1546_v22 = vsel %vm13343_vm0, %v1542_v19, 0.0  ;;  %2231 = vrot.lane.b32.xlu0 %v2225_v11, %s13339_s26  ;;  %v2411_v11 = vcombine.high %v2409_v57, %v2409_v57  ;;  %v2426_v18 = vcombine.high %v2418_v10, %v2418_v10  ;;  %s13341_s26 = smov 30  }
 0x14f   : > { %v1549_v25 = vrot.slane %v1545_v21, 2  ;;  %v1550_v26 = vrot.slane %v1546_v22, 2  ;;  %v1576_v28 = vpop.permute.xlu1 %1575  ;;  %v2451_v22 = vrot.slane %v2442_v13, %v10346_v7 }
 0x150   : > { %v1574_v27 = vpop.permute.xlu0 %1573  ;;  %v2425_v21 = vrot.slane %v2411_v11, %v10346_v7 }
 0x151   : > { %1553 = vst [vmem:[#allocation3 + $0x90] sm:$0xc0] %v1549_v25  ;;  %1554 = vst [vmem:[#allocation3 + $0x98] sm:$0xc0] %v1550_v26  ;;  %v1580_v29 = vsel %vm13373_vm7, %v1574_v27, %v1576_v28  ;;  %2270 = vrot.lane.b32.xlu1 %v2264_v23, %s10260_s12 }
 0x152   : > { %v1584_v30 = vsel %vm13348_vm15, %v1580_v29, 0.0  ;;  %2268 = vrot.lane.b32.xlu0 %v2265_v20, %s10260_s12  ;;  %s10261_s12 = smov 62   ;;  %v2444_v29 = vcombine.high %v2442_v13, %v2442_v13 }
 0x153   : > { %1586 = vst [vmem:[#allocation3 + $0xc0] sm:$0x3] %v1584_v30  ;;  %v1607_v35 = vpop.permute.xlu1 %1606  ;;  %v2481_v30 = vld [vmem:[#allocation2 + $0x2] sm:$0x3f] }
 0x154   : > { %v1578_v34 = vpop.permute.xlu0 %1577 }
 0x155   : > { %v1581_v36 = vsel %vm13373_vm7, %v1576_v28, %v1578_v34  ;;  %2301 = vrot.lane.b32.xlu1 %v2298_v31, %s10253_s11  ;;  %v2459_v28 = vcombine.high %v2451_v22, %v2451_v22  ;;  %v2458_v34 = vrot.slane %v2444_v29, %v10346_v7  ;;  %vm2927_vm7 = vcmask 760832  }
 0x156   : > { %v1585_v37 = vsel %vm13343_vm0, %v1581_v36, 0.0  ;;  %2299 = vrot.lane.b32.xlu0 %v2290_v24, %s10253_s11  ;;  %v2483_v36 = vcombine.high %v2481_v30, %v2481_v30 }
 0x157   : > { %1587 = vst [vmem:[#allocation3 + $0xc8] sm:$0x3] %v1585_v37  ;;  %v1611_v43 = vpop.permute.xlu1 %1610  ;;  %v2520_v37 = vld [vmem:[#allocation2 + $0x2] sm:$0x3f] }
 0x158   : > { %v1609_v42 = vpop.permute.xlu0 %1608 }
 0x159   : > { %v1613_v44 = vsel %vm1612_vm13, %v1607_v35, %v1609_v42  ;;  %v1614_v45 = vsel %vm1612_vm13, %v1609_v42, %v1611_v43  ;;  %2349 = vrot.lane.b32.xlu1 %v2340_v39, %s10261_s12  ;;  %v2490_v35 = vrot.slane %v2481_v30, %v10346_v7  ;;  %v2497_v43 = vrot.slane %v2483_v36, %v10346_v7 }
 0x15a   : > { %v1617_v47 = vsel %vm13348_vm15, %v1613_v44, 0.0  ;;  %v1618_v48 = vsel %vm13343_vm0, %v1614_v45, 0.0  ;;  %2303 = vrot.lane.b32.xlu0 %v2297_v38, %s10253_s11  ;;  %s10262_s11 = smov 46   ;;  %v2529_v44 = vrot.slane %v2520_v37, %v10346_v7 }
 0x15b   : > { %v1621_v55 = vrot.slane %v1617_v47, 6  ;;  %v1622_v56 = vrot.slane %v1618_v48, 6  ;;  %v1648_v59 = vpop.permute.xlu1 %1647  ;;  %v2498_v42 = vcombine.high %v2490_v35, %v2490_v35 }
 0x15c   : > { %v1646_v58 = vpop.permute.xlu0 %1645  ;;  %v2537_v48 = vcombine.high %v2529_v44, %v2529_v44 }
 0x15d   : > { %1625 = vst [vmem:[#allocation3 + $0xe0] sm:$0xc] %v1621_v55  ;;  %1626 = vst [vmem:[#allocation3 + $0xe8] sm:$0xc] %v1622_v56  ;;  %v1652_v60 = vsel %vm1651_vm1, %v1646_v58, %v1648_v59  ;;  %2353 = vrot.lane.b32.xlu1 %v2347_v53, %s10261_s12  ;;  %v2522_v53 = vcombine.high %v2520_v37, %v2520_v37 }
 0x15e   : > { %v1656_v61 = vsel %vm13348_vm15, %v1652_v60, 0.0  ;;  %2351 = vrot.lane.b32.xlu0 %v2348_v46, %s10261_s12 }
 0x15f   : > { %v1660_v2 = vrot.slane %v1656_v61, 4  ;;  %v1685_v4 = vpop.permute.xlu1 %1684 }
 0x160   : > { %v1650_v3 = vpop.permute.xlu0 %1649 }
 0x161   : > { %1664 = vst [vmem:[#allocation3 + $0x100] sm:$0x30] %v1660_v2  ;;  %v1653_v5 = vsel %vm1651_vm1, %v1648_v59, %v1650_v3  ;;  %2390 = vrot.lane.b32.xlu1 %v2387_v62, %s10262_s11  ;;  %vm1728_vm1 = vcmask 523264   ;;  %v2536_v59 = vrot.slane %v2522_v53, %v10346_v7  ;;  %v2592_v62 = vld [vmem:[#allocation2 + $0x2] sm:$0x3f] }
 0x162   : > { %v1657_v1 = vsel %vm13343_vm0, %v1653_v5, 0.0  ;;  %2388 = vrot.lane.b32.xlu0 %v2379_v54, %s10262_s11  ;;  %v2559_v54 = vld [vmem:[#allocation2 + $0x2] sm:$0x3f]  ;;  %v2594_v13 = vcombine.high %v2592_v62, %v2592_v62 }
 0x163   : > { %v1661_v12 = vrot.slane %v1657_v1, 4  ;;  %v1689_v15 = vpop.permute.xlu1 %1688  ;;  %v2568_v60 = vrot.slane %v2559_v54, %v10346_v7  ;;  %v2561_v61 = vcombine.high %v2559_v54, %v2559_v54  ;;  %v2601_v1 = vrot.slane %v2592_v62, %v10346_v7 }
 0x164   : > { %v1687_v14 = vpop.permute.xlu0 %1686  ;;  %v10854_v54 = vadd.s32 1, %v10407_v51 }
 0x165   : > { %1665 = vst [vmem:[#allocation3 + $0x108] sm:$0x30] %v1661_v12  ;;  %v1690_v16 = vsel %vm1390_vm14, %v1685_v4, %v1687_v14  ;;  %v1691_v17 = vsel %vm1390_vm14, %v1687_v14, %v1689_v15  ;;  %2427 = vrot.lane.b32.xlu1 %v2418_v10, %s13341_s26  ;;  %vm1759_vm14 = vcmask 392192   ;;  %v2576_v4 = vcombine.high %v2568_v60, %v2568_v60  ;;  %v2631_v14 = vld [vmem:[#allocation2 + $0x2] sm:$0x3f] }
 0x166   : > { %v1694_v19 = vsel %vm13348_vm15, %v1690_v16, 0.0  ;;  %v1695_v20 = vsel %vm13343_vm0, %v1691_v17, 0.0  ;;  %2392 = vrot.lane.b32.xlu0 %v2386_v9, %s10262_s11  ;;  %s13344_s11 = smov 14   ;;  %vm13358_vm0 = vcmask 261120   ;;  %vm13354_vm15 = vcmask 916480   ;;  %13514 = vst [vmem:[#allocation10_spill] sm:$0xff] %v10854_v54 }
 0x167   : > { %v1698_v23 = vrot.slane %v1694_v19, 2  ;;  %v1699_v24 = vrot.slane %v1695_v20, 2  ;;  %v1725_v26 = vpop.permute.xlu1 %1724  ;;  %v2575_v5 = vrot.slane %v2561_v61, %v10346_v7  ;;  %v2609_v12 = vcombine.high %v2601_v1, %v2601_v1 }
 0x168   : > { %v1723_v25 = vpop.permute.xlu0 %1722  ;;  %v2640_v19 = vrot.slane %v2631_v14, %v10346_v7  ;;  %v2633_v20 = vcombine.high %v2631_v14, %v2631_v14  ;;  %v8063_v14 = vld.sshfl [vmem:[#allocation2 + $0x2] sm:$0x33 pattern:$0x76325410] }
 0x169   : > { %1702 = vst [vmem:[#allocation3 + $0x120] sm:$0xc0] %v1698_v23  ;;  %1703 = vst [vmem:[#allocation3 + $0x128] sm:$0xc0] %v1699_v24  ;;  %v1729_v27 = vsel %vm1728_vm1, %v1723_v25, %v1725_v26  ;;  %2431 = vrot.lane.b32.xlu1 %v2425_v21, %s13341_s26  ;;  %v2677_v21 = vld [vmem:[#allocation2] sm:$0x3f] }
 0x16a   : > { %1733 = vst [vmem:[#allocation3 + $0x10] sm:$0x3] %v1729_v27  ;;  %2429 = vrot.lane.b32.xlu0 %v2426_v18, %s13341_s26  ;;  %s13346_s26 = smov 126   ;;  %v2608_v18 = vrot.slane %v2594_v13, %v10346_v7  ;;  %v2647_v27 = vrot.slane %v2633_v20, %v10346_v7  ;;  %1842 = vst [vmem:[#allocation3 + $0xa0] sm:$0x3] %v8063_v14 }
 0x16b   : > { %v1754_v32 = vpop.permute.xlu1 %1753 }
 0x16c   : > { %v1727_v31 = vpop.permute.xlu0 %1726 }
 0x16d   : > { %v1730_v33 = vsel %vm1728_vm1, %v1725_v26, %v1727_v31  ;;  %2462 = vrot.lane.b32.xlu1 %v2459_v28, %s13344_s11  ;;  %v2648_v26 = vcombine.high %v2640_v19, %v2640_v19  ;;  %v2690_v28 = vrot.slane %v2677_v21, %v10346_v7 }
 0x16e   : > { %1734 = vst [vmem:[#allocation3 + $0x18] sm:$0x3] %v1730_v33  ;;  %2460 = vrot.lane.b32.xlu0 %v2451_v22, %s13344_s11  ;;  %v2683_v33 = vcombine.high %v2677_v21, %v2677_v21 }
 0x16f   : > { %v1758_v39 = vpop.permute.xlu1 %1757 }
 0x170   : > { %v1756_v38 = vpop.permute.xlu0 %1755 }
 0x171   : > { %v1760_v40 = vsel %vm1759_vm14, %v1754_v32, %v1756_v38  ;;  %v1761_v41 = vsel %vm1759_vm14, %v1756_v38, %v1758_v39  ;;  %2499 = vrot.lane.b32.xlu1 %v2490_v35, %s13346_s26  ;;  %vm13355_vm14 = vcmask 130048   ;;  %v2698_v32 = vcombine.high %v2690_v28, %v2690_v28 }
 0x172   : > { %1764 = vst [vmem:[#allocation3 + $0x30] sm:$0xc] %v1760_v40  ;;  %1765 = vst [vmem:[#allocation3 + $0x38] sm:$0xc] %v1761_v41  ;;  %2464 = vrot.lane.b32.xlu0 %v2458_v34, %s13344_s11  ;;  %s13349_s11 = smov 110   ;;  %v2697_v38 = vrot.slane %v2683_v33, %v10346_v7  ;;  %v10845_v41 = vadd.s32 1, %v10405_v50 }
 0x173   : > { %v1788_v46 = vpop.permute.xlu1 %1787  ;;  %v2720_v34 = vld [vmem:[#allocation2] sm:$0x3f] }
 0x174   : > { %v1786_v45 = vpop.permute.xlu0 %1785  ;;  %v2729_v39 = vrot.slane %v2720_v34, %v10346_v7  ;;  %v2722_v40 = vcombine.high %v2720_v34, %v2720_v34  ;;  %13513 = vst [vmem:[#allocation9_spill] sm:$0xff] %v10845_v41 }
 0x175   : > { %v1792_v47 = vsel %vm13358_vm0, %v1786_v45, %v1788_v46  ;;  %2503 = vrot.lane.b32.xlu1 %v2497_v43, %s13346_s26 }
 0x176   : > { %1796 = vst [vmem:[#allocation3 + $0x50] sm:$0x30] %v1792_v47  ;;  %2501 = vrot.lane.b32.xlu0 %v2498_v42, %s13346_s26  ;;  %s13356_s26 = smov 94   ;;  %v2753_v42 = vld [vmem:[#allocation2] sm:$0x3f]  ;;  %v2737_v47 = vcombine.high %v2729_v39, %v2729_v39 }
 0x177   : > { %v1818_v56 = vpop.permute.xlu1 %1817  ;;  %v2762_v53 = vrot.slane %v2753_v42, %v10346_v7  ;;  %v2755_v61 = vcombine.high %v2753_v42, %v2753_v42  ;;  %v2903_v42 = vld [vmem:[#allocation2 + $0x2] sm:$0x3f] }
 0x178   : > { %v1790_v55 = vpop.permute.xlu0 %1789 }
 0x179   : > { %v1793_v58 = vsel %vm13358_vm0, %v1788_v46, %v1790_v55  ;;  %2540 = vrot.lane.b32.xlu1 %v2537_v48, %s13349_s11  ;;  %v2736_v48 = vrot.slane %v2722_v40, %v10346_v7  ;;  %vm13359_vm0 = vcmask 252928  }
 0x17a   : > { %1797 = vst [vmem:[#allocation3 + $0x58] sm:$0x30] %v1793_v58  ;;  %2538 = vrot.lane.b32.xlu0 %v2529_v44, %s13349_s11 }
 0x17b   : > { %v1822_v2 = vpop.permute.xlu1 %1821 }
 0x17c   : > { %v1820_v63 = vpop.permute.xlu0 %1819 }
 0x17d   : > { %v1824_v57 = vsel %vm13355_vm14, %v1818_v56, %v1820_v63  ;;  %v1825_v3 = vsel %vm13355_vm14, %v1820_v63, %v1822_v2  ;;  %2577 = vrot.lane.b32.xlu1 %v2568_v60, %s13356_s26  ;;  %v2770_v60 = vcombine.high %v2762_v53, %v2762_v53  ;;  %v2792_v63 = vld [vmem:[#allocation2] sm:$0x3f]  ;;  %vm2044_vm14 = vcmask 384000  }
 0x17e   : > { %1828 = vst [vmem:[#allocation3 + $0x70] sm:$0xc0] %v1824_v57  ;;  %1829 = vst [vmem:[#allocation3 + $0x78] sm:$0xc0] %v1825_v3  ;;  %2542 = vrot.lane.b32.xlu0 %v2536_v59, %s13349_s11  ;;  %s10268_s11 = smov 78  }
 0x17f   : > { %v1865_v10 = vpop.permute.xlu1 %1864 }
 0x180   : > { %v1863_v9 = vpop.permute.xlu0 %1862 }
 0x181   : > { %v1869_v11 = vsel %vm13354_vm15, %v1863_v9, %v1865_v10  ;;  %2581 = vrot.lane.b32.xlu1 %v2575_v5, %s13356_s26  ;;  %v2769_v5 = vrot.slane %v2755_v61, %v10346_v7  ;;  %v2794_v9 = vcombine.high %v2792_v63, %v2792_v63 }
 0x182   : > { %1873 = vst [vmem:[#allocation3 + $0xc0] sm:$0xc] %v1869_v11  ;;  %2579 = vrot.lane.b32.xlu0 %v2576_v4, %s13356_s26  ;;  %s10271_s26 = smov 29   ;;  %v2831_v11 = vld [vmem:[#allocation2 + $0x2] sm:$0x3f] }
 0x183   : > { %v1895_v16 = vpop.permute.xlu1 %1894  ;;  %v2808_v20 = vrot.slane %v2794_v9, %v10346_v7  ;;  %v2840_v21 = vrot.slane %v2831_v11, %v10346_v7 }
 0x184   : > { %v1867_v15 = vpop.permute.xlu0 %1866 }
 0x185   : > { %v1870_v17 = vsel %vm13354_vm15, %v1865_v10, %v1867_v15  ;;  %2612 = vrot.lane.b32.xlu1 %v2609_v12, %s10268_s11  ;;  %vm13365_vm15 = vcmp.lt.s32.totalorder %v10854_v54, 16 }
 0x186   : > { %1874 = vst [vmem:[#allocation3 + $0xc8] sm:$0xc] %v1870_v17  ;;  %2610 = vrot.lane.b32.xlu0 %v2601_v1, %s10268_s11  ;;  %v2801_v1 = vrot.slane %v2792_v63, %v10346_v7  ;;  %v2905_v63 = vcombine.high %v2903_v42, %v2903_v42 }
 0x187   : > { %v1899_v23 = vpop.permute.xlu1 %1898 }
 0x188   : > { %v1897_v22 = vpop.permute.xlu0 %1896  ;;  %v2809_v17 = vcombine.high %v2801_v1, %v2801_v1  ;;  %v2919_v9 = vrot.slane %v2905_v63, %v10346_v7 }
 0x189   : > { %v1901_v24 = vsel %vm13353_vm6, %v1895_v16, %v1897_v22  ;;  %v1902_v25 = vsel %vm13353_vm6, %v1897_v22, %v1899_v23  ;;  %2649 = vrot.lane.b32.xlu1 %v2640_v19, %s10261_s12  ;;  %vm13363_vm6 = vcmp.lt.s32.totalorder %v10845_v41, 16 }
 0x18a   : > { %1905 = vst [vmem:[#allocation3 + $0xe0] sm:$0x30] %v1901_v24  ;;  %1906 = vst [vmem:[#allocation3 + $0xe8] sm:$0x30] %v1902_v25  ;;  %2614 = vrot.lane.b32.xlu0 %v2608_v18, %s10268_s11  ;;  %s10269_s11 = smov 61   ;;  %v1839_v24 = vcombine.high %v8063_v14, %v8063_v14 }
 0x18b   : > { %v1929_v30 = vpop.permute.xlu1 %1928 }
 0x18c   : > { %v1927_v29 = vpop.permute.xlu0 %1926  ;;  %1843 = vst [vmem:[#allocation3 + $0xa8] sm:$0x3] %v1839_v24 }
 0x18d   : > { %v1933_v31 = vsel %vm1932_vm5, %v1927_v29, %v1929_v30  ;;  %2653 = vrot.lane.b32.xlu1 %v2647_v27, %s10261_s12  ;;  %v2848_v29 = vcombine.high %v2840_v21, %v2840_v21 }
 0x18e   : > { %1937 = vst [vmem:[#allocation3 + $0x100] sm:$0xc0] %v1933_v31  ;;  %2651 = vrot.lane.b32.xlu0 %v2648_v26, %s10261_s12  ;;  %s10270_s12 = smov 45  }
 0x18f   : > { %v1958_v36 = vpop.permute.xlu1 %1957 }
 0x190   : > { %v1931_v35 = vpop.permute.xlu0 %1930 }
 0x191   : > { %v1934_v37 = vsel %vm1932_vm5, %v1929_v30, %v1931_v35  ;;  %2701 = vrot.lane.b32.xlu1 %v2698_v32, %s10269_s11  ;;  %vm2005_vm5 = vcmask 515072   ;;  %v2833_v30 = vcombine.high %v2831_v11, %v2831_v11  ;;  %v2870_v32 = vld [vmem:[#allocation2 + $0x2] sm:$0x3f] }
 0x192   : > { %1938 = vst [vmem:[#allocation3 + $0x108] sm:$0xc0] %v1934_v37  ;;  %2699 = vrot.lane.b32.xlu0 %v2690_v28, %s10269_s11 }
 0x193   : > { %v1962_v44 = vpop.permute.xlu1 %1961  ;;  %v2847_v37 = vrot.slane %v2833_v30, %v10346_v7 }
 0x194   : > { %v1960_v43 = vpop.permute.xlu0 %1959 }
 0x195   : > { %v1963_v45 = vsel %vm1728_vm1, %v1958_v36, %v1960_v43  ;;  %v1964_v46 = vsel %vm1728_vm1, %v1960_v43, %v1962_v44  ;;  %2738 = vrot.lane.b32.xlu1 %v2729_v39, %s10270_s12  ;;  %v2872_v39 = vcombine.high %v2870_v32, %v2870_v32 }
 0x196   : > { %1967 = vst [vmem:[#allocation3 + $0x130] sm:$0x3] %v1963_v45  ;;  %1968 = vst [vmem:[#allocation3 + $0x138] sm:$0x3] %v1964_v46  ;;  %2703 = vrot.lane.b32.xlu0 %v2697_v38, %s10269_s11  ;;  %v2879_v38 = vrot.slane %v2870_v32, %v10346_v7  ;;  %v3027_v32 = vld [vmem:[#allocation2] sm:$0x3f] }
 0x197   : > { %v2002_v56 = vpop.permute.xlu1 %2001 }
 0x198   : > { %v2000_v55 = vpop.permute.xlu0 %1999 }
 0x199   : > { %v2006_v58 = vsel %vm2005_vm5, %v2000_v55, %v2002_v56  ;;  %2742 = vrot.lane.b32.xlu1 %v2736_v48, %s10270_s12  ;;  %v2886_v55 = vrot.slane %v2872_v39, %v10346_v7  ;;  %v3033_v39 = vcombine.high %v3027_v32, %v3027_v32 }
 0x19a   : > { %v2010_v59 = vsel %vm13363_vm6, %v2006_v58, 0.0  ;;  %2740 = vrot.lane.b32.xlu0 %v2737_v47, %s10270_s12  ;;  %s10272_s12 = smov 13   ;;  %v2887_v47 = vcombine.high %v2879_v38, %v2879_v38 }
 0x19b   : > { %v2014_v62 = vrot.slane %v2010_v59, 6  ;;  %v2039_v57 = vpop.permute.xlu1 %2038 }
 0x19c   : > { %v2004_v2 = vpop.permute.xlu0 %2003 }
 0x19d   : > { %2018 = vst [vmem:[#allocation3 + $0x10] sm:$0xc] %v2014_v62  ;;  %v2007_v3 = vsel %vm2005_vm5, %v2002_v56, %v2004_v2  ;;  %2773 = vrot.lane.b32.xlu1 %v2770_v60, %s10271_s26  ;;  %v2912_v56 = vrot.slane %v2903_v42, %v10346_v7  ;;  %v3064_v42 = vld [vmem:[#allocation2] sm:$0x3f] }
 0x19e   : > { %v2011_v4 = vsel %vm13365_vm15, %v2007_v3, 0.0  ;;  %2771 = vrot.lane.b32.xlu0 %v2762_v53, %s10271_s26  ;;  %v3066_v63 = vcombine.high %v3064_v42, %v3064_v42 }
 0x19f   : > { %v2015_v10 = vrot.slane %v2011_v4, 6  ;;  %v2043_v13 = vpop.permute.xlu1 %2042  ;;  %v2920_v62 = vcombine.high %v2912_v56, %v2912_v56 }
 0x1a0   : > { %v2041_v12 = vpop.permute.xlu0 %2040 }
 0x1a1   : > { %2019 = vst [vmem:[#allocation3 + $0x18] sm:$0xc] %v2015_v10  ;;  %v2045_v15 = vsel %vm2044_vm14, %v2039_v57, %v2041_v12  ;;  %v2046_v16 = vsel %vm2044_vm14, %v2041_v12, %v2043_v13  ;;  %2810 = vrot.lane.b32.xlu1 %v2801_v1, %s10272_s12  ;;  %vm13360_vm14 = vcmask 121856   ;;  %v2942_v57 = vld [vmem:[#allocation2 + $0x2] sm:$0x3f] }
 0x1a2   : > { %v2049_v18 = vsel %vm13363_vm6, %v2045_v15, 0.0  ;;  %v2050_v19 = vsel %vm13365_vm15, %v2046_v16, 0.0  ;;  %2775 = vrot.lane.b32.xlu0 %v2769_v5, %s10271_s26  ;;  %s10273_s26 = smov 125   ;;  %v2951_v10 = vrot.slane %v2942_v57, %v10346_v7  ;;  %v2944_v11 = vcombine.high %v2942_v57, %v2942_v57  ;;  %v2981_v13 = vld [vmem:[#allocation2 + $0x2] sm:$0x3f] }
 0x1a3   : > { %v2053_v22 = vrot.slane %v2049_v18, 4  ;;  %v2054_v23 = vrot.slane %v2050_v19, 4  ;;  %v2080_v26 = vpop.permute.xlu1 %2079  ;;  %v2983_v30 = vcombine.high %v2981_v13, %v2981_v13  ;;  %v10927_v57 = vadd.s32 2, %v10405_v50 }
 0x1a4   : > { %v2078_v25 = vpop.permute.xlu0 %2077  ;;  %v2959_v18 = vcombine.high %v2951_v10, %v2951_v10 }
 0x1a5   : > { %2057 = vst [vmem:[#allocation3 + $0x30] sm:$0x30] %v2053_v22  ;;  %2058 = vst [vmem:[#allocation3 + $0x38] sm:$0x30] %v2054_v23  ;;  %v2084_v27 = vsel %vm13359_vm0, %v2078_v25, %v2080_v26  ;;  %2814 = vrot.lane.b32.xlu1 %v2808_v20, %s10272_s12  ;;  %v2990_v22 = vrot.slane %v2981_v13, %v10346_v7 }
 0x1a6   : > { %v2088_v28 = vsel %vm13363_vm6, %v2084_v27, 0.0  ;;  %2812 = vrot.lane.b32.xlu0 %v2809_v17, %s10272_s12  ;;  %s10274_s12 = smov 109   ;;  %13515 = vst [vmem:[#allocation11_spill] sm:$0xff] %v10927_v57 }
 0x1a7   : > { %v2092_v31 = vrot.slane %v2088_v28, 2  ;;  %v2117_v34 = vpop.permute.xlu1 %2116 }
 0x1a8   : > { %v2082_v33 = vpop.permute.xlu0 %2081 }
 0x1a9   : > { %2096 = vst [vmem:[#allocation3 + $0x50] sm:$0xc0] %v2092_v31  ;;  %v2085_v35 = vsel %vm13359_vm0, %v2080_v26, %v2082_v33  ;;  %2851 = vrot.lane.b32.xlu1 %v2848_v29, %s10273_s26  ;;  %vm13361_vm0 = vcmask 1039360   ;;  %v2998_v29 = vcombine.high %v2990_v22, %v2990_v22 }
 0x1aa   : > { %v2089_v36 = vsel %vm13365_vm15, %v2085_v35, 0.0  ;;  %2849 = vrot.lane.b32.xlu0 %v2840_v21, %s10273_s26  ;;  %v2958_v21 = vrot.slane %v2944_v11, %v10346_v7  ;;  %v3080_v11 = vrot.slane %v3066_v63, %v10346_v7 }
 0x1ab   : > { %v2093_v40 = vrot.slane %v2089_v36, 2  ;;  %v2121_v44 = vpop.permute.xlu1 %2120 }
 0x1ac   : > { %v2119_v43 = vpop.permute.xlu0 %2118 }
 0x1ad   : > { %2097 = vst [vmem:[#allocation3 + $0x58] sm:$0xc0] %v2093_v40  ;;  %v2123_v45 = vsel %vm13360_vm14, %v2117_v34, %v2119_v43  ;;  %v2124_v46 = vsel %vm13360_vm14, %v2119_v43, %v2121_v44  ;;  %2888 = vrot.lane.b32.xlu1 %v2879_v38, %s10274_s12  ;;  %vm13362_vm14 = vcmask 908288   ;;  %v3040_v38 = vrot.slane %v3027_v32, %v10346_v7 }
 0x1ae   : > { %v2127_v48 = vsel %vm13363_vm6, %v2123_v45, 0.0  ;;  %v2128_v53 = vsel %vm13365_vm15, %v2124_v46, 0.0  ;;  %2853 = vrot.lane.b32.xlu0 %v2847_v37, %s10273_s26  ;;  %s10275_s26 = smov 93   ;;  %v2997_v37 = vrot.slane %v2983_v30, %v10346_v7 }
 0x1af   : > { %2129 = vst [vmem:[#allocation3 + $0x80] sm:$0x3] %v2127_v48  ;;  %2130 = vst [vmem:[#allocation3 + $0x88] sm:$0x3] %v2128_v53  ;;  %v2152_v59 = vpop.permute.xlu1 %2151 }
 0x1b0   : > { %v2150_v58 = vpop.permute.xlu0 %2149 }
 0x1b1   : > { %v2156_v60 = vsel %vm13361_vm0, %v2150_v58, %v2152_v59  ;;  %2892 = vrot.lane.b32.xlu1 %v2886_v55, %s10274_s12  ;;  %v3047_v55 = vrot.slane %v3033_v39, %v10346_v7 }
 0x1b2   : > { %v2160_v61 = vsel %vm13363_vm6, %v2156_v60, 0.0  ;;  %2890 = vrot.lane.b32.xlu0 %v2887_v47, %s10274_s12  ;;  %s10276_s12 = smov 77   ;;  %v3048_v47 = vcombine.high %v3040_v38, %v3040_v38 }
 0x1b3   : > { %v2164_v2 = vrot.slane %v2160_v61, 6  ;;  %v2189_v4 = vpop.permute.xlu1 %2188 }
 0x1b4   : > { %v2154_v3 = vpop.permute.xlu0 %2153 }
 0x1b5   : > { %2168 = vst [vmem:[#allocation3 + $0xa0] sm:$0xc] %v2164_v2  ;;  %v2157_v5 = vsel %vm13361_vm0, %v2152_v59, %v2154_v3  ;;  %2923 = vrot.lane.b32.xlu1 %v2920_v62, %s10275_s26  ;;  %vm13364_vm0 = vcmask 777216   ;;  %v10930_v3 = vadd.s32 2, %v10407_v51 }
 0x1b6   : > { %v2161_v1 = vsel %vm13365_vm15, %v2157_v5, 0.0  ;;  %2921 = vrot.lane.b32.xlu0 %v2912_v56, %s10275_s26  ;;  %v3073_v56 = vrot.slane %v3064_v42, %v10346_v7 }
 0x1b7   : > { %v2165_v12 = vrot.slane %v2161_v1, 6  ;;  %v2193_v15 = vpop.permute.xlu1 %2192  ;;  %13516 = vst [vmem:[#allocation12_spill] sm:$0xff] %v10930_v3 }
 0x1b8   : > { %v2191_v14 = vpop.permute.xlu0 %2190  ;;  %v3081_v62 = vcombine.high %v3073_v56, %v3073_v56 }
 0x1b9   : > { %2169 = vst [vmem:[#allocation3 + $0xa8] sm:$0xc] %v2165_v12  ;;  %v2195_v16 = vsel %vm13362_vm14, %v2189_v4, %v2191_v14  ;;  %v2196_v17 = vsel %vm13362_vm14, %v2191_v14, %v2193_v15  ;;  %2960 = vrot.lane.b32.xlu1 %v2951_v10, %s10276_s12  ;;  %vm2272_vm14 = vcmask 646144   ;;  %v3103_v4 = vld [vmem:[#allocation2] sm:$0x3f] }
 0x1ba   : > { %v2199_v19 = vsel %vm13363_vm6, %v2195_v16, 0.0  ;;  %v2200_v20 = vsel %vm13365_vm15, %v2196_v17, 0.0  ;;  %2925 = vrot.lane.b32.xlu0 %v2919_v9, %s10275_s26  ;;  %s10277_s26 = smov 60   ;;  %v3112_v12 = vrot.slane %v3103_v4, %v10346_v7  ;;  %v3105_v13 = vcombine.high %v3103_v4, %v3103_v4  ;;  %v3142_v15 = vld [vmem:[#allocation2] sm:$0x3f] }
 0x1bb   : > { %v2203_v23 = vrot.slane %v2199_v19, 4  ;;  %v2204_v24 = vrot.slane %v2200_v20, 4  ;;  %v2230_v26 = vpop.permute.xlu1 %2229  ;;  %v3144_v32 = vcombine.high %v3142_v15, %v3142_v15 }
 0x1bc   : > { %v2228_v25 = vpop.permute.xlu0 %2227  ;;  %v3120_v20 = vcombine.high %v3112_v12, %v3112_v12 }
 0x1bd   : > { %2207 = vst [vmem:[#allocation3 + $0xc0] sm:$0x30] %v2203_v23  ;;  %2208 = vst [vmem:[#allocation3 + $0xc8] sm:$0x30] %v2204_v24  ;;  %v2234_v27 = vsel %vm13364_vm0, %v2228_v25, %v2230_v26  ;;  %2964 = vrot.lane.b32.xlu1 %v2958_v21, %s10276_s12  ;;  %v3119_v23 = vrot.slane %v3105_v13, %v10346_v7  ;;  %v3151_v24 = vrot.slane %v3142_v15, %v10346_v7 }
 0x1be   : > { %v2238_v28 = vsel %vm13363_vm6, %v2234_v27, 0.0  ;;  %2962 = vrot.lane.b32.xlu0 %v2959_v18, %s10276_s12  ;;  %s10279_s12 = smov 28   ;;  %v3158_v39 = vrot.slane %v3144_v32, %v10346_v7 }
 0x1bf   : > { %v2242_v31 = vrot.slane %v2238_v28, 2  ;;  %v2267_v34 = vpop.permute.xlu1 %2266 }
 0x1c0   : > { %v2232_v33 = vpop.permute.xlu0 %2231 }
 0x1c1   : > { %2246 = vst [vmem:[#allocation3 + $0xe0] sm:$0xc0] %v2242_v31  ;;  %v2235_v35 = vsel %vm13364_vm0, %v2230_v26, %v2232_v33  ;;  %3001 = vrot.lane.b32.xlu1 %v2998_v29, %s10269_s11  ;;  %vm13371_vm0 = vcmp.lt.s32.totalorder %v10930_v3, 16  ;;  %v3159_v31 = vcombine.high %v3151_v24, %v3151_v24 }
 0x1c2   : > { %v2239_v36 = vsel %vm13365_vm15, %v2235_v35, 0.0  ;;  %2999 = vrot.lane.b32.xlu0 %v2990_v22, %s10269_s11 }
 0x1c3   : > { %v2243_v40 = vrot.slane %v2239_v36, 2  ;;  %v2271_v44 = vpop.permute.xlu1 %2270 }
 0x1c4   : > { %v2269_v43 = vpop.permute.xlu0 %2268 }
 0x1c5   : > { %2247 = vst [vmem:[#allocation3 + $0xe8] sm:$0xc0] %v2243_v40  ;;  %v2273_v45 = vsel %vm2272_vm14, %v2267_v34, %v2269_v43  ;;  %v2274_v46 = vsel %vm2272_vm14, %v2269_v43, %v2271_v44  ;;  %3049 = vrot.lane.b32.xlu1 %v3040_v38, %s10277_s26  ;;  %vm2355_vm14 = vcmask 506880   ;;  %v3181_v34 = vld [vmem:[#allocation2 + $0x2] sm:$0x3f] }
 0x1c6   : > { %v2277_v48 = vsel %vm13363_vm6, %v2273_v45, 0.0  ;;  %v2278_v53 = vsel %vm13365_vm15, %v2274_v46, 0.0  ;;  %3003 = vrot.lane.b32.xlu0 %v2997_v37, %s10269_s11  ;;  %s10278_s11 = smov 44   ;;  %v3190_v40 = vrot.slane %v3181_v34, %v10346_v7  ;;  %v3183_v42 = vcombine.high %v3181_v34, %v3181_v34  ;;  %v3214_v44 = vld [vmem:[#allocation2 + $0x2] sm:$0x3f] }
 0x1c7   : > { %2279 = vst [vmem:[#allocation3 + $0x110] sm:$0x3] %v2277_v48  ;;  %2280 = vst [vmem:[#allocation3 + $0x118] sm:$0x3] %v2278_v53  ;;  %v2302_v59 = vpop.permute.xlu1 %2301  ;;  %v3216_v4 = vcombine.high %v3214_v44, %v3214_v44 }
 0x1c8   : > { %v2300_v58 = vpop.permute.xlu0 %2299  ;;  %v3198_v53 = vcombine.high %v3190_v40, %v3190_v40 }
 0x1c9   : > { %v2305_v60 = vsel %vm2005_vm5, %v2300_v58, %v2302_v59  ;;  %3053 = vrot.lane.b32.xlu1 %v3047_v55, %s10277_s26  ;;  %v3197_v58 = vrot.slane %v3183_v42, %v10346_v7  ;;  %v3230_v13 = vrot.slane %v3216_v4, %v10346_v7 }
 0x1ca   : > { %v2309_v61 = vsel %vm13363_vm6, %v2305_v60, 0.0  ;;  %3051 = vrot.lane.b32.xlu0 %v3048_v47, %s10277_s26  ;;  %vm13372_vm6 = vcmp.lt.s32.totalorder %v10927_v57, 16 }
 0x1cb   : > { %v2313_v2 = vrot.slane %v2309_v61, 6  ;;  %v2350_v1 = vpop.permute.xlu1 %2349 }
 0x1cc   : > { %v2304_v5 = vpop.permute.xlu0 %2303 }
 0x1cd   : > { %2317 = vst [vmem:[#allocation3 + $0x130] sm:$0xc] %v2313_v2  ;;  %v2306_v9 = vsel %vm2005_vm5, %v2302_v59, %v2304_v5  ;;  %3084 = vrot.lane.b32.xlu1 %v3081_v62, %s10278_s11  ;;  %vm2394_vm5 = vcmask 375808   ;;  %v3223_v59 = vrot.slane %v3214_v44, %v10346_v7 }
 0x1ce   : > { %v2310_v10 = vsel %vm13365_vm15, %v2306_v9, 0.0  ;;  %3082 = vrot.lane.b32.xlu0 %v3073_v56, %s10278_s11  ;;  %vm13366_vm15 = vcmask 244736  }
 0x1cf   : > { %v2314_v14 = vrot.slane %v2310_v10, 6  ;;  %v2354_v17 = vpop.permute.xlu1 %2353  ;;  %v3231_v2 = vcombine.high %v3223_v59, %v3223_v59 }
 0x1d0   : > { %v2352_v16 = vpop.permute.xlu0 %2351 }
 0x1d1   : > { %2318 = vst [vmem:[#allocation3 + $0x138] sm:$0xc] %v2314_v14  ;;  %v2356_v18 = vsel %vm2355_vm14, %v2350_v1, %v2352_v16  ;;  %v2357_v19 = vsel %vm2355_vm14, %v2352_v16, %v2354_v17  ;;  %3121 = vrot.lane.b32.xlu1 %v3112_v12, %s10279_s12  ;;  %v3253_v1 = vld [vmem:[#allocation2 + $0x2] sm:$0x3f] }
 0x1d2   : > { %v2360_v21 = vsel %vm13372_vm6, %v2356_v18, 0.0  ;;  %v2361_v22 = vsel %vm13371_vm0, %v2357_v19, 0.0  ;;  %3086 = vrot.lane.b32.xlu0 %v3080_v11, %s10278_s11  ;;  %s10280_s11 = smov 12   ;;  %v3262_v14 = vrot.slane %v3253_v1, %v10346_v7  ;;  %v3255_v15 = vcombine.high %v3253_v1, %v3253_v1  ;;  %v3292_v17 = vld [vmem:[#allocation2 + $0x2] sm:$0x3f] }
 0x1d3   : > { %v2364_v25 = vrot.slane %v2360_v21, 4  ;;  %v2365_v26 = vrot.slane %v2361_v22, 4  ;;  %v2391_v28 = vpop.permute.xlu1 %2390  ;;  %v3294_v34 = vcombine.high %v3292_v17, %v3292_v17 }
 0x1d4   : > { %v2389_v27 = vpop.permute.xlu0 %2388  ;;  %v3270_v22 = vcombine.high %v3262_v14, %v3262_v14 }
 0x1d5   : > { %2368 = vst [vmem:[#allocation3 + $0x10] sm:$0x30] %v2364_v25  ;;  %2369 = vst [vmem:[#allocation3 + $0x18] sm:$0x30] %v2365_v26  ;;  %v2395_v29 = vsel %vm2394_vm5, %v2389_v27, %v2391_v28  ;;  %3125 = vrot.lane.b32.xlu1 %v3119_v23, %s10279_s12  ;;  %v3269_v25 = vrot.slane %v3255_v15, %v10346_v7  ;;  %v3301_v26 = vrot.slane %v3292_v17, %v10346_v7 }
 0x1d6   : > { %v2399_v30 = vsel %vm13372_vm6, %v2395_v29, 0.0  ;;  %3123 = vrot.lane.b32.xlu0 %v3120_v20, %s10279_s12  ;;  %s10281_s12 = smov 124   ;;  %v3308_v42 = vrot.slane %v3294_v34, %v10346_v7 }
 0x1d7   : > { %v2403_v33 = vrot.slane %v2399_v30, 2  ;;  %v2428_v36 = vpop.permute.xlu1 %2427 }
 0x1d8   : > { %v2393_v35 = vpop.permute.xlu0 %2392 }
 0x1d9   : > { %2407 = vst [vmem:[#allocation3 + $0x30] sm:$0xc0] %v2403_v33  ;;  %v2396_v37 = vsel %vm2394_vm5, %v2391_v28, %v2393_v35  ;;  %3162 = vrot.lane.b32.xlu1 %v3159_v31, %s10280_s11  ;;  %vm13367_vm5 = vcmask 113664   ;;  %v3309_v33 = vcombine.high %v3301_v26, %v3301_v26 }
 0x1da   : > { %v2400_v38 = vsel %vm13371_vm0, %v2396_v37, 0.0  ;;  %3160 = vrot.lane.b32.xlu0 %v3151_v24, %s10280_s11 }
 0x1db   : > { %v2404_v43 = vrot.slane %v2400_v38, 2  ;;  %v2432_v46 = vpop.permute.xlu1 %2431 }
 0x1dc   : > { %v2430_v45 = vpop.permute.xlu0 %2429 }
 0x1dd   : > { %2408 = vst [vmem:[#allocation3 + $0x38] sm:$0xc0] %v2404_v43  ;;  %v2434_v47 = vsel %vm13366_vm15, %v2428_v36, %v2430_v45  ;;  %v2435_v48 = vsel %vm13366_vm15, %v2430_v45, %v2432_v46  ;;  %3199 = vrot.lane.b32.xlu1 %v3190_v40, %s10281_s12  ;;  %vm13368_vm15 = vcmask 1031168   ;;  %v3331_v36 = vld [vmem:[#allocation2 + $0x2] sm:$0x3f] }
 0x1de   : > { %v2438_v55 = vsel %vm13372_vm6, %v2434_v47, 0.0  ;;  %v2439_v56 = vsel %vm13371_vm0, %v2435_v48, 0.0  ;;  %3164 = vrot.lane.b32.xlu0 %v3158_v39, %s10280_s11  ;;  %s10282_s11 = smov 108   ;;  %v3340_v43 = vrot.slane %v3331_v36, %v10346_v7  ;;  %v3333_v44 = vcombine.high %v3331_v36, %v3331_v36 }
 0x1df   : > { %2440 = vst [vmem:[#allocation3 + $0x60] sm:$0x3] %v2438_v55  ;;  %2441 = vst [vmem:[#allocation3 + $0x68] sm:$0x3] %v2439_v56  ;;  %v2463_v61 = vpop.permute.xlu1 %2462 }
 0x1e0   : > { %v2461_v60 = vpop.permute.xlu0 %2460 }
 0x1e1   : > { %v2467_v62 = vsel %vm13367_vm5, %v2461_v60, %v2463_v61  ;;  %3203 = vrot.lane.b32.xlu1 %v3197_v58, %s10281_s12  ;;  %v3348_v58 = vcombine.high %v3340_v43, %v3340_v43 }
 0x1e2   : > { %v2471_v63 = vsel %vm13372_vm6, %v2467_v62, 0.0  ;;  %3201 = vrot.lane.b32.xlu0 %v3198_v53, %s10281_s12  ;;  %s10283_s12 = smov 92  }
 0x1e3   : > { %v2475_v5 = vrot.slane %v2471_v63, 6  ;;  %v2500_v10 = vpop.permute.xlu1 %2499 }
 0x1e4   : > { %v2465_v9 = vpop.permute.xlu0 %2464 }
 0x1e5   : > { %2479 = vst [vmem:[#allocation3 + $0x80] sm:$0xc] %v2475_v5  ;;  %v2468_v11 = vsel %vm13367_vm5, %v2463_v61, %v2465_v9  ;;  %3234 = vrot.lane.b32.xlu1 %v3231_v2, %s10282_s11  ;;  %vm13369_vm5 = vcmask 900096  }
 0x1e6   : > { %v2472_v12 = vsel %vm13371_vm0, %v2468_v11, 0.0  ;;  %3232 = vrot.lane.b32.xlu0 %v3223_v59, %s10282_s11  ;;  %v3347_v59 = vrot.slane %v3333_v44, %v10346_v7  ;;  %v3364_v11 = vld [vmem:[%s13329_s1 + $0x8] sm:$0xff] }
 0x1e7   : > { %v2476_v16 = vrot.slane %v2472_v12, 6  ;;  %v2504_v19 = vpop.permute.xlu1 %2503  ;;  %8066 = vmatprep.mubr.msk.f32.mxu0 %vm1118_vm8, %v3364_v11 }
 0x1e8   : > { %v2502_v18 = vpop.permute.xlu0 %2501 }
 0x1e9   : > { %2480 = vst [vmem:[#allocation3 + $0x88] sm:$0xc] %v2476_v16  ;;  %v2506_v20 = vsel %vm13368_vm15, %v2500_v10, %v2502_v18  ;;  %v2507_v21 = vsel %vm13368_vm15, %v2502_v18, %v2504_v19  ;;  %3271 = vrot.lane.b32.xlu1 %v3262_v14, %s10283_s12  ;;  %vm13370_vm15 = vcmask 769024   ;;  %v11004_v10 = vadd.s32 3, %v10405_v50 }
 0x1ea   : > { %v2510_v23 = vsel %vm13372_vm6, %v2506_v20, 0.0  ;;  %v2511_v24 = vsel %vm13371_vm0, %v2507_v21, 0.0  ;;  %3236 = vrot.lane.b32.xlu0 %v3230_v13, %s10282_s11  ;;  %s10284_s11 = smov 76   ;;  %v11018_v20 = vadd.s32 3, %v10407_v51 }
 0x1eb   : > { %v2514_v27 = vrot.slane %v2510_v23, 4  ;;  %v2515_v28 = vrot.slane %v2511_v24, 4  ;;  %v2541_v30 = vpop.permute.xlu1 %2540 }
 0x1ec   : > { %v2539_v29 = vpop.permute.xlu0 %2538 }
 0x1ed   : > { %2518 = vst [vmem:[#allocation3 + $0xa0] sm:$0x30] %v2514_v27  ;;  %2519 = vst [vmem:[#allocation3 + $0xa8] sm:$0x30] %v2515_v28  ;;  %v2545_v31 = vsel %vm13369_vm5, %v2539_v29, %v2541_v30  ;;  %3275 = vrot.lane.b32.xlu1 %v3269_v25, %s10283_s12 }
 0x1ee   : > { %v2549_v32 = vsel %vm13372_vm6, %v2545_v31, 0.0  ;;  %3273 = vrot.lane.b32.xlu0 %v3270_v22, %s10283_s12  ;;  %s13713_s12 = smov 15  }
 0x1ef   : > { %v2553_v35 = vrot.slane %v2549_v32, 2  ;;  %v2578_v38 = vpop.permute.xlu1 %2577 }
 0x1f0   : > { %v2543_v37 = vpop.permute.xlu0 %2542 }
 0x1f1   : > { %2557 = vst [vmem:[#allocation3 + $0xc0] sm:$0xc0] %v2553_v35  ;;  %v2546_v39 = vsel %vm13369_vm5, %v2541_v30, %v2543_v37  ;;  %3312 = vrot.lane.b32.xlu1 %v3309_v33, %s10284_s11  ;;  %vm2616_vm5 = vcmask 637952  }
 0x1f2   : > { %v2550_v40 = vsel %vm13371_vm0, %v2546_v39, 0.0  ;;  %3310 = vrot.lane.b32.xlu0 %v3301_v26, %s10284_s11 }
 0x1f3   : > { %v2554_v45 = vrot.slane %v2550_v40, 2  ;;  %v2582_v47 = vpop.permute.xlu1 %2581 }
 0x1f4   : > { %v2580_v46 = vpop.permute.xlu0 %2579 }
 0x1f5   : > { %2558 = vst [vmem:[#allocation3 + $0xc8] sm:$0xc0] %v2554_v45  ;;  %v2584_v48 = vsel %vm13370_vm15, %v2578_v38, %v2580_v46  ;;  %v2585_v53 = vsel %vm13370_vm15, %v2580_v46, %v2582_v47  ;;  %3349 = vrot.lane.b32.xlu1 %v3340_v43, %s10277_s26  ;;  %vm2673_vm15 = vcmp.lt.s32.totalorder %v11004_v10, 16  ;;  %v3396_v46 = vld [vmem:[#allocation3 + $0x8] sm:$0xff] }
 0x1f6   : > { %v2588_v55 = vsel %vm13372_vm6, %v2584_v48, 0.0  ;;  %v2589_v56 = vsel %vm13371_vm0, %v2585_v53, 0.0  ;;  %3314 = vrot.lane.b32.xlu0 %v3308_v42, %s10284_s11 }
 0x1f7   : > { %2590 = vst [vmem:[#allocation3 + $0xf0] sm:$0x3] %v2588_v55  ;;  %2591 = vst [vmem:[#allocation3 + $0xf8] sm:$0x3] %v2589_v56  ;;  %v2613_v61 = vpop.permute.xlu1 %2612  ;;  %v3395_v55 = vld [vmem:[#allocation3] sm:$0xff] }
 0x1f8   : > { %v2611_v60 = vpop.permute.xlu0 %2610 }
 0x1f9   : > { %v2617_v62 = vsel %vm2616_vm5, %v2611_v60, %v2613_v61  ;;  %3353 = vrot.lane.b32.xlu1 %v3347_v59, %s10277_s26 }
 0x1fa   : > { %v2621_v63 = vsel %vm13372_vm6, %v2617_v62, 0.0  ;;  %3351 = vrot.lane.b32.xlu0 %v3348_v58, %s10277_s26 }
 0x1fb   : > { %v2625_v2 = vrot.slane %v2621_v63, 6  ;;  %v2650_v5 = vpop.permute.xlu1 %2649 }
 0x1fc   : > { %v2615_v4 = vpop.permute.xlu0 %2614 }
 0x1fd   : > { %2629 = vst [vmem:[#allocation3 + $0x110] sm:$0xc] %v2625_v2  ;;  %v2618_v1 = vsel %vm2616_vm5, %v2613_v61, %v2615_v4  ;;  %vm2705_vm5 = vcmask 498688  }
 0x1fe   : > { %v2622_v7 = vsel %vm13371_vm0, %v2618_v1, 0.0 }
 0x1ff   : > { %v2626_v9 = vrot.slane %v2622_v7, 6  ;;  %v2654_v13 = vpop.permute.xlu1 %2653 }
 0x200   : > { %v2652_v12 = vpop.permute.xlu0 %2651 }
 0x201   : > { %2630 = vst [vmem:[#allocation3 + $0x118] sm:$0xc] %v2626_v9  ;;  %v2655_v14 = vsel %vm2355_vm14, %v2650_v5, %v2652_v12  ;;  %v2656_v15 = vsel %vm2355_vm14, %v2652_v12, %v2654_v13  ;;  %vm2674_vm14 = vcmp.lt.s32.totalorder %v11018_v20, 16  ;;  %v3438_v20 = vld [vmem:[%s13330_s2 + $0x8] sm:$0xff] }
 0x202   : > { %v2659_v16 = vsel %vm13372_vm6, %v2655_v14, 0.0  ;;  %v2660_v17 = vsel %vm13371_vm0, %v2656_v15, 0.0  ;;  %vm2744_vm0 = vcmask 367616   ;;  %vm2777_vm6 = vcmask 236544  }
 0x203   : > { %v2663_v18 = vrot.slane %v2659_v16, 4  ;;  %v2664_v19 = vrot.slane %v2660_v17, 4  ;;  %v2702_v22 = vpop.permute.xlu1 %2701 }
 0x204   : > { %v2700_v21 = vpop.permute.xlu0 %2699 }
 0x205   : > { %2667 = vst [vmem:[#allocation3 + $0x130] sm:$0x30] %v2663_v18  ;;  %2668 = vst [vmem:[#allocation3 + $0x138] sm:$0x30] %v2664_v19  ;;  %v2706_v23 = vsel %vm2705_vm5, %v2700_v21, %v2702_v22 }
 0x206   : > { %v2710_v24 = vsel %vm2673_vm15, %v2706_v23, 0.0 }
 0x207   : > { %v2714_v25 = vrot.slane %v2710_v24, 2  ;;  %v2739_v27 = vpop.permute.xlu1 %2738 }
 0x208   : > { %v2704_v26 = vpop.permute.xlu0 %2703 }
 0x209   : > { %2718 = vst [vmem:[#allocation3 + $0x10] sm:$0xc0] %v2714_v25  ;;  %v2707_v28 = vsel %vm2705_vm5, %v2702_v22, %v2704_v26 }
 0x20a   : > { %v2711_v29 = vsel %vm2674_vm14, %v2707_v28, 0.0 }
 0x20b   : > { %v2715_v30 = vrot.slane %v2711_v29, 2  ;;  %v2743_v32 = vpop.permute.xlu1 %2742 }
 0x20c   : > { %v2741_v31 = vpop.permute.xlu0 %2740 }
 0x20d   : > { %2719 = vst [vmem:[#allocation3 + $0x18] sm:$0xc0] %v2715_v30  ;;  %v2745_v33 = vsel %vm2744_vm0, %v2739_v27, %v2741_v31  ;;  %v2746_v34 = vsel %vm2744_vm0, %v2741_v31, %v2743_v32  ;;  %vm2816_vm0 = vcmask 105472  }
 0x20e   : > { %v2749_v35 = vsel %vm2673_vm15, %v2745_v33, 0.0  ;;  %v2750_v36 = vsel %vm2674_vm14, %v2746_v34, 0.0 }
 0x20f   : > { %2751 = vst [vmem:[#allocation3 + $0x40] sm:$0x3] %v2749_v35  ;;  %2752 = vst [vmem:[#allocation3 + $0x48] sm:$0x3] %v2750_v36  ;;  %v2774_v38 = vpop.permute.xlu1 %2773 }
 0x210   : > { %v2772_v37 = vpop.permute.xlu0 %2771  ;;  %v3397_v43 = vld [vmem:[#allocation3 + $0x10] sm:$0xff] }
 0x211   : > { %v2778_v39 = vsel %vm2777_vm6, %v2772_v37, %v2774_v38  ;;  %v8114_v58 = vpack.c.bf16 %v3397_v43, %v3395_v55  ;;  %v11059_v55 = vadd.s32 4, %v10405_v50 }
 0x212   : > { %v2782_v40 = vsel %vm2673_vm15, %v2778_v39, 0.0 }
 0x213   : > { %v2786_v42 = vrot.slane %v2782_v40, 6  ;;  %v2811_v45 = vpop.permute.xlu1 %2810 }
 0x214   : > { %v2776_v44 = vpop.permute.xlu0 %2775  ;;  %v3398_v47 = vld [vmem:[#allocation3 + $0x18] sm:$0xff] }
 0x215   : > { %2790 = vst [vmem:[#allocation3 + $0x60] sm:$0xc] %v2786_v42  ;;  %v2779_v48 = vsel %vm2777_vm6, %v2774_v38, %v2776_v44  ;;  %v8112_v53 = vpack.c.bf16 %v3398_v47, %v3396_v46  ;;  %vm2855_vm6 = vcmask 1022976  }
 0x216   : > { %v2783_v56 = vsel %vm2674_vm14, %v2779_v48, 0.0 }
 0x217   : > { %v2787_v59 = vrot.slane %v2783_v56, 6  ;;  %8113 = vmatprep.subr.bf16.mxu0 %v8112_v53  ;;  %v2815_v61 = vpop.permute.xlu1 %2814  ;;  %v11062_v56 = vadd.s32 4, %v10407_v51 }
 0x218   : > { %v2813_v60 = vpop.permute.xlu0 %2812  ;;  %8115 = vmatpush1.bf16.msra.mxu0 %v8114_v58 }
 0x219   : > { %2791 = vst [vmem:[#allocation3 + $0x68] sm:$0xc] %v2787_v59  ;;  %v2817_v62 = vsel %vm2816_vm0, %v2811_v45, %v2813_v60  ;;  %v2818_v63 = vsel %vm2816_vm0, %v2813_v60, %v2815_v61  ;;  %vm2894_vm0 = vcmask 891904  }
 0x21a   : > { %v2821_v2 = vsel %vm2673_vm15, %v2817_v62, 0.0  ;;  %v2822_v4 = vsel %vm2674_vm14, %v2818_v63, 0.0 }
 0x21b   : > { %v2825_v5 = vrot.slane %v2821_v2, 4  ;;  %v2826_v1 = vrot.slane %v2822_v4, 4  ;;  %v2852_v9 = vpop.permute.xlu1 %2851  ;;  %v3437_v2 = vld [vmem:[%s13330_s2] sm:$0xff] }
 0x21c   : > { %v2850_v7 = vpop.permute.xlu0 %2849 }
 0x21d   : > { %2829 = vst [vmem:[#allocation3 + $0x80] sm:$0x30] %v2825_v5  ;;  %2830 = vst [vmem:[#allocation3 + $0x88] sm:$0x30] %v2826_v1  ;;  %v2856_v11 = vsel %vm2855_vm6, %v2850_v7, %v2852_v9  ;;  %v10285_v1 = vmov 0  }
 0x21e   : > { %v2860_v12 = vsel %vm2673_vm15, %v2856_v11, 0.0  ;;  %8677 = vset.pattern.permute.xlu1 %v10285_v1  ;;  %8676 = vset.pattern.permute.xlu0 %v10285_v1  ;;  %v3440_v11 = vld [vmem:[%s13330_s2 + $0x18] sm:$0xff] }
 0x21f   : > { %v2864_v13 = vrot.slane %v2860_v12, 2  ;;  %v2889_v15 = vpop.permute.xlu1 %2888  ;;  %3455 = vperm.xlu0 %8676, %v3437_v2   ;;  %3460 = vperm.xlu1 %8677, %v3438_v20   ;;  %v3439_v12 = vld [vmem:[%s13330_s2 + $0x10] sm:$0xff] }
 0x220   : > { %v2854_v14 = vpop.permute.xlu0 %2853 }
 0x221   : > { %2868 = vst [vmem:[#allocation3 + $0xa0] sm:$0xc0] %v2864_v13  ;;  %v2857_v16 = vsel %vm2855_vm6, %v2852_v9, %v2854_v14  ;;  %vm2966_vm6 = vcmask 629760  }
 0x222   : > { %v2861_v17 = vsel %vm2674_vm14, %v2857_v16, 0.0 }
 0x223   : > { %v2865_v18 = vrot.slane %v2861_v17, 2  ;;  %v2893_v21 = vpop.permute.xlu1 %2892  ;;  %3470 = vperm.xlu0 %8676, %v3440_v11   ;;  %3465 = vperm.xlu1 %8677, %v3439_v12   ;;  %v3450_v12 = vld [vmem:[%s13330_s2 + $0x68] sm:$0xff] }
 0x224   : > { %v2891_v19 = vpop.permute.xlu0 %2890 }
 0x225   : > { %2869 = vst [vmem:[#allocation3 + $0xa8] sm:$0xc0] %v2865_v18  ;;  %v2895_v22 = vsel %vm2894_vm0, %v2889_v15, %v2891_v19  ;;  %v2896_v23 = vsel %vm2894_vm0, %v2891_v19, %v2893_v21  ;;  %vm3023_vm0 = vcmp.lt.s32.totalorder %v11059_v55, 16  ;;  %v3442_v18 = vld [vmem:[%s13330_s2 + $0x28] sm:$0xff]  ;;  %v3441_v19 = vld [vmem:[%s13330_s2 + $0x20] sm:$0xff] }
 0x226   : > { %v2899_v24 = vsel %vm2673_vm15, %v2895_v22, 0.0  ;;  %v2900_v25 = vsel %vm2674_vm14, %v2896_v23, 0.0  ;;  %v3401_v22 = vld [vmem:[#allocation3 + $0x30] sm:$0xff]  ;;  %v3431_v55 = vld [vmem:[#allocation3 + $0x120] sm:$0xff] }
 0x227   : > { %2901 = vst [vmem:[#allocation3 + $0xd0] sm:$0x3] %v2899_v24  ;;  %2902 = vst [vmem:[#allocation3 + $0xd8] sm:$0x3] %v2900_v25  ;;  %v2924_v27 = vpop.permute.xlu1 %2923  ;;  %v3402_v25 = vld [vmem:[#allocation3 + $0x38] sm:$0xff]  ;;  %3480 = vperm.xlu0 %8676, %v3442_v18   ;;  %3475 = vperm.xlu1 %8677, %v3441_v19  }
 0x228   : > { %v2922_v26 = vpop.permute.xlu0 %2921 }
 0x229   : > { %v2928_v28 = vsel %vm2927_vm7, %v2922_v26, %v2924_v27 }
 0x22a   : > { %v2932_v29 = vsel %vm2673_vm15, %v2928_v28, 0.0 }
 0x22b   : > { %v2936_v30 = vrot.slane %v2932_v29, 6  ;;  %v2961_v32 = vpop.permute.xlu1 %2960 }
 0x22c   : > { %v2926_v31 = vpop.permute.xlu0 %2925 }
 0x22d   : > { %2940 = vst [vmem:[#allocation3 + $0xf0] sm:$0xc] %v2936_v30  ;;  %v2929_v33 = vsel %vm2927_vm7, %v2924_v27, %v2926_v31  ;;  %vm3055_vm7 = vcmask 490496  }
 0x22e   : > { %v2933_v34 = vsel %vm2674_vm14, %v2929_v33, 0.0  ;;  %v3443_v33 = vld [vmem:[%s13330_s2 + $0x30] sm:$0xff] }
 0x22f   : > { %v2937_v35 = vrot.slane %v2933_v34, 6  ;;  %v2965_v37 = vpop.permute.xlu1 %2964  ;;  %3485 = vperm.xlu1 %8677, %v3443_v33   ;;  %v3790_v33 = vld [vmem:[%s13332_s4 + $0x8] sm:$0xff] }
 0x230   : > { %v2963_v36 = vpop.permute.xlu0 %2962 }
 0x231   : > { %2941 = vst [vmem:[#allocation3 + $0xf8] sm:$0xc] %v2937_v35  ;;  %v2967_v38 = vsel %vm2966_vm6, %v2961_v32, %v2963_v36  ;;  %v2968_v39 = vsel %vm2966_vm6, %v2963_v36, %v2965_v37  ;;  %v3444_v32 = vld [vmem:[%s13330_s2 + $0x38] sm:$0xff]  ;;  %vm3166_vm6 = vcmask 97280  }
 0x232   : > { %v2971_v40 = vsel %vm2673_vm15, %v2967_v38, 0.0  ;;  %v2972_v42 = vsel %vm2674_vm14, %v2968_v39, 0.0  ;;  %3490 = vperm.xlu0 %8676, %v3444_v32   ;;  %v3414_v32 = vld [vmem:[#allocation3 + $0x98] sm:$0xff] }
 0x233   : > { %v2975_v43 = vrot.slane %v2971_v40, 4  ;;  %v2976_v44 = vrot.slane %v2972_v42, 4  ;;  %v3002_v46 = vpop.permute.xlu1 %3001 }
 0x234   : > { %v3000_v45 = vpop.permute.xlu0 %2999 }
 0x235   : > { %2979 = vst [vmem:[#allocation3 + $0x110] sm:$0x30] %v2975_v43  ;;  %2980 = vst [vmem:[#allocation3 + $0x118] sm:$0x30] %v2976_v44  ;;  %v3005_v47 = vsel %vm2705_vm5, %v3000_v45, %v3002_v46  ;;  %v3446_v43 = vld [vmem:[%s13330_s2 + $0x48] sm:$0xff]  ;;  %v3445_v44 = vld [vmem:[%s13330_s2 + $0x40] sm:$0xff] }
 0x236   : > { %v3009_v48 = vsel %vm2673_vm15, %v3005_v47, 0.0  ;;  %vm3024_vm15 = vcmp.lt.s32.totalorder %v11062_v56, 16  ;;  %3500 = vperm.xlu0 %8676, %v3446_v43   ;;  %3495 = vperm.xlu1 %8677, %v3445_v44  }
 0x237   : > { %v3013_v53 = vrot.slane %v3009_v48, 2  ;;  %v3050_v59 = vpop.permute.xlu1 %3049 }
 0x238   : > { %v3004_v58 = vpop.permute.xlu0 %3003 }
 0x239   : > { %3017 = vst [vmem:[#allocation3 + $0x130] sm:$0xc0] %v3013_v53  ;;  %v3006_v60 = vsel %vm2705_vm5, %v3002_v46, %v3004_v58  ;;  %vm3088_vm5 = vcmask 359424  }
 0x23a   : > { %v3010_v61 = vsel %vm2674_vm14, %v3006_v60, 0.0  ;;  %vm3127_vm14 = vcmask 228352   ;;  %v3406_v60 = vld [vmem:[#allocation3 + $0x58] sm:$0xff] }
 0x23b   : > { %v3014_v62 = vrot.slane %v3010_v61, 2  ;;  %v3054_v50 = vpop.permute.xlu1 %3053  ;;  %v3448_v61 = vld [vmem:[%s13330_s2 + $0x58] sm:$0xff] }
 0x23c   : > { %v3052_v10 = vpop.permute.xlu0 %3051  ;;  %3510 = vperm.xlu0 %8676, %v3448_v61  }
 0x23d   : > { %3018 = vst [vmem:[#allocation3 + $0x138] sm:$0xc0] %v3014_v62  ;;  %v3056_v51 = vsel %vm3055_vm7, %v3050_v59, %v3052_v10  ;;  %v3057_v63 = vsel %vm3055_vm7, %v3052_v10, %v3054_v50  ;;  %v3405_v50 = vld [vmem:[#allocation3 + $0x50] sm:$0xff] }
 0x23e   : > { %v3060_v4 = vsel %vm3023_vm0, %v3056_v51, 0.0  ;;  %v3061_v5 = vsel %vm3024_vm15, %v3057_v63, 0.0  ;;  %v3447_v51 = vld [vmem:[%s13330_s2 + $0x50] sm:$0xff] }
 0x23f   : > { %3062 = vst [vmem:[#allocation3 + $0x20] sm:$0x3] %v3060_v4  ;;  %3063 = vst [vmem:[#allocation3 + $0x28] sm:$0x3] %v3061_v5  ;;  %v3085_v9 = vpop.permute.xlu1 %3084  ;;  %v3410_v4 = vld [vmem:[#allocation3 + $0x78] sm:$0xff]  ;;  %v3409_v5 = vld [vmem:[#allocation3 + $0x70] sm:$0xff]  ;;  %3505 = vperm.xlu1 %8677, %v3447_v51  }
 0x240   : > { %v3083_v7 = vpop.permute.xlu0 %3082  ;;  %3520 = vperm.xlu0 %8676, %v3450_v12   ;;  %v3420_v12 = vld [vmem:[#allocation3 + $0xc8] sm:$0xff] }
 0x241   : > { %v3089_v13 = vsel %vm3088_vm5, %v3083_v7, %v3085_v9 }
 0x242   : > { %v3093_v14 = vsel %vm3023_vm0, %v3089_v13, 0.0 }
 0x243   : > { %v3097_v15 = vrot.slane %v3093_v14, 6  ;;  %v3122_v17 = vpop.permute.xlu1 %3121 }
 0x244   : > { %v3087_v16 = vpop.permute.xlu0 %3086 }
 0x245   : > { %3101 = vst [vmem:[#allocation3 + $0x40] sm:$0xc] %v3097_v15  ;;  %v3090_v21 = vsel %vm3088_vm5, %v3085_v9, %v3087_v16  ;;  %vm3205_vm5 = vcmask 1014784  }
 0x246   : > { %v3094_v23 = vsel %vm3024_vm15, %v3090_v21, 0.0  ;;  %v3400_v24 = vld [vmem:[#allocation3 + $0x28] sm:$0xff]  ;;  %v3399_v26 = vld [vmem:[#allocation3 + $0x20] sm:$0xff] }
 0x247   : > { %v3098_v27 = vrot.slane %v3094_v23, 6  ;;  %v8116_v28 = vpack.c.bf16 %v3402_v25, %v3400_v24  ;;  %v8118_v29 = vpack.c.bf16 %v3401_v22, %v3399_v26  ;;  %v3126_v31 = vpop.permute.xlu1 %3125  ;;  %v3452_v23 = vld [vmem:[%s13330_s2 + $0x78] sm:$0xff]  ;;  %v3451_v25 = vld [vmem:[%s13330_s2 + $0x70] sm:$0xff] }
 0x248   : > { %v3124_v30 = vpop.permute.xlu0 %3123  ;;  %3530 = vperm.xlu0 %8676, %v3452_v23  }
 0x249   : > { %3102 = vst [vmem:[#allocation3 + $0x48] sm:$0xc] %v3098_v27  ;;  %v3128_v34 = vsel %vm3127_vm14, %v3122_v17, %v3124_v30  ;;  %v3129_v35 = vsel %vm3127_vm14, %v3124_v30, %v3126_v31  ;;  %8117 = vmatprep.subr.bf16.mxu0 %v8116_v28  ;;  %v3449_v17 = vld [vmem:[%s13330_s2 + $0x60] sm:$0xff]  ;;  %vm3238_vm14 = vcmask 883712  }
 0x24a   : > { %v3132_v36 = vsel %vm3023_vm0, %v3128_v34, 0.0  ;;  %v3133_v37 = vsel %vm3024_vm15, %v3129_v35, 0.0  ;;  %8119 = vmatpush1.bf16.msra.mxu0 %v8118_v29  ;;  %3515 = vperm.xlu1 %8677, %v3449_v17  }
 0x24b   : > { %v3136_v38 = vrot.slane %v3132_v36, 4  ;;  %v3137_v39 = vrot.slane %v3133_v37, 4  ;;  %v3163_v42 = vpop.permute.xlu1 %3162  ;;  %v3413_v36 = vld [vmem:[#allocation3 + $0x90] sm:$0xff]  ;;  %v3789_v37 = vld [vmem:[%s13332_s4] sm:$0xff] }
 0x24c   : > { %v3161_v40 = vpop.permute.xlu0 %3160  ;;  %v3403_v48 = vld [vmem:[#allocation3 + $0x40] sm:$0xff]  ;;  %3804 = vperm.xlu0 %8676, %v3790_v33  }
 0x24d   : > { %3140 = vst [vmem:[#allocation3 + $0x60] sm:$0x30] %v3136_v38  ;;  %3141 = vst [vmem:[#allocation3 + $0x68] sm:$0x30] %v3137_v39  ;;  %v3167_v45 = vsel %vm3166_vm6, %v3161_v40, %v3163_v42  ;;  %v8122_v2 = vpack.c.bf16 %v3405_v50, %v3403_v48  ;;  %v3416_v40 = vld [vmem:[#allocation3 + $0xa8] sm:$0xff]  ;;  %v3792_v48 = vld [vmem:[%s13332_s4 + $0x18] sm:$0xff] }
 0x24e   : > { %v3171_v46 = vsel %vm3023_vm0, %v3167_v45, 0.0  ;;  %3525 = vperm.xlu1 %8677, %v3451_v25   ;;  %v3424_v25 = vld [vmem:[#allocation3 + $0xe8] sm:$0xff] }
 0x24f   : > { %v3175_v47 = vrot.slane %v3171_v46, 2  ;;  %v3200_v58 = vpop.permute.xlu1 %3199 }
 0x250   : > { %v3165_v53 = vpop.permute.xlu0 %3164  ;;  %v3404_v59 = vld [vmem:[#allocation3 + $0x48] sm:$0xff]  ;;  %3814 = vperm.xlu0 %8676, %v3792_v48   ;;  %v3363_v48 = vld [vmem:[%s13329_s1] sm:$0xff] }
 0x251   : > { %3179 = vst [vmem:[#allocation3 + $0x80] sm:$0xc0] %v3175_v47  ;;  %v3168_v62 = vsel %vm3166_vm6, %v3163_v42, %v3165_v53  ;;  %v8120_v10 = vpack.c.bf16 %v3406_v60, %v3404_v59  ;;  %vm3277_vm6 = vcmask 752640   ;;  %v3415_v59 = vld [vmem:[#allocation3 + $0xa0] sm:$0xff]  ;;  %v3791_v60 = vld [vmem:[%s13332_s4 + $0x10] sm:$0xff] }
 0x252   : > { %v3172_v63 = vsel %vm3024_vm15, %v3168_v62, 0.0  ;;  %3799 = vperm.xlu1 %8677, %v3789_v37   ;;  %v3428_v37 = vld [vmem:[#allocation3 + $0x108] sm:$0xff] }
 0x253   : > { %v3176_v20 = vrot.slane %v3172_v63, 2  ;;  %8121 = vmatprep.subr.bf16.mxu0 %v8120_v10  ;;  %v3204_v7 = vpop.permute.xlu1 %3203 }
 0x254   : > { %v3202_v1 = vpop.permute.xlu0 %3201  ;;  %8123 = vmatpush1.bf16.msra.mxu0 %v8122_v2  ;;  %v3408_v9 = vld [vmem:[#allocation3 + $0x68] sm:$0xff]  ;;  %v3407_v11 = vld [vmem:[#allocation3 + $0x60] sm:$0xff] }
 0x255   : > { %3180 = vst [vmem:[#allocation3 + $0x88] sm:$0xc0] %v3176_v20  ;;  %v3206_v13 = vsel %vm3205_vm5, %v3200_v58, %v3202_v1  ;;  %v3207_v14 = vsel %vm3205_vm5, %v3202_v1, %v3204_v7  ;;  %v8124_v15 = vpack.c.bf16 %v3410_v4, %v3408_v9  ;;  %v8126_v16 = vpack.c.bf16 %v3409_v5, %v3407_v11  ;;  %v3794_v20 = vld [vmem:[%s13332_s4 + $0x28] sm:$0xff]  ;;  %v3793_v5 = vld [vmem:[%s13332_s4 + $0x20] sm:$0xff] }
 0x256   : > { %v3210_v18 = vsel %vm3023_vm0, %v3206_v13, 0.0  ;;  %v3211_v19 = vsel %vm3024_vm15, %v3207_v14, 0.0  ;;  %vm3316_vm5 = vcmask 621568   ;;  %3809 = vperm.xlu1 %8677, %v3791_v60   ;;  %3824 = vperm.xlu0 %8676, %v3794_v20   ;;  %v3368_v60 = vld [vmem:[%s13329_s1 + $0x28] sm:$0xff] }
 0x257   : > { %3212 = vst [vmem:[#allocation3 + $0xb0] sm:$0x3] %v3210_v18  ;;  %3213 = vst [vmem:[#allocation3 + $0xb8] sm:$0x3] %v3211_v19  ;;  %8125 = vmatprep.subr.bf16.mxu0 %v8124_v15  ;;  %v3235_v22 = vpop.permute.xlu1 %3234  ;;  %v3796_v15 = vld [vmem:[%s13332_s4 + $0x38] sm:$0xff]  ;;  %v3419_v18 = vld [vmem:[#allocation3 + $0xc0] sm:$0xff] }
 0x258   : > { %v3233_v21 = vpop.permute.xlu0 %3232  ;;  %8127 = vmatpush1.bf16.msra.mxu0 %v8126_v16  ;;  %v3411_v28 = vld [vmem:[#allocation3 + $0x80] sm:$0xff]  ;;  %v3795_v19 = vld [vmem:[%s13332_s4 + $0x30] sm:$0xff] }
 0x259   : > { %v3239_v24 = vsel %vm3238_vm14, %v3233_v21, %v3235_v22  ;;  %v8130_v39 = vpack.c.bf16 %v3413_v36, %v3411_v28  ;;  %v3376_v20 = vld [vmem:[%s13329_s1 + $0x68] sm:$0xff] }
 0x25a   : > { %v3243_v26 = vsel %vm3023_vm0, %v3239_v24, 0.0  ;;  %3819 = vperm.xlu1 %8677, %v3793_v5   ;;  %v3423_v24 = vld [vmem:[#allocation3 + $0xe0] sm:$0xff]  ;;  %3834 = vperm.xlu0 %8676, %v3796_v15   ;;  %v3378_v5 = vld [vmem:[%s13329_s1 + $0x78] sm:$0xff] }
 0x25b   : > { %v3247_v27 = vrot.slane %v3243_v26, 6  ;;  %v3272_v30 = vpop.permute.xlu1 %3271  ;;  %v3386_v15 = vld [vmem:[%s13329_s1 + $0xb8] sm:$0xff] }
 0x25c   : > { %v3237_v29 = vpop.permute.xlu0 %3236  ;;  %v3412_v31 = vld [vmem:[#allocation3 + $0x88] sm:$0xff] }
 0x25d   : > { %3251 = vst [vmem:[#allocation3 + $0xd0] sm:$0xc] %v3247_v27  ;;  %v3240_v34 = vsel %vm3238_vm14, %v3235_v22, %v3237_v29  ;;  %v8128_v35 = vpack.c.bf16 %v3414_v32, %v3412_v31 }
 0x25e   : > { %v3244_v38 = vsel %vm3024_vm15, %v3240_v34, 0.0  ;;  %v3418_v42 = vld [vmem:[#allocation3 + $0xb8] sm:$0xff]  ;;  %v3417_v45 = vld [vmem:[#allocation3 + $0xb0] sm:$0xff]  ;;  %3829 = vperm.xlu1 %8677, %v3795_v19  }
 0x25f   : > { %v3248_v43 = vrot.slane %v3244_v38, 6  ;;  %8129 = vmatprep.subr.bf16.mxu0 %v8128_v35  ;;  %v8132_v44 = vpack.c.bf16 %v3418_v42, %v3416_v40  ;;  %v3276_v47 = vpop.permute.xlu1 %3275  ;;  %v8134_v10 = vpack.c.bf16 %v3417_v45, %v3415_v59  ;;  %v3427_v42 = vld [vmem:[#allocation3 + $0x100] sm:$0xff]  ;;  %v3365_v59 = vld [vmem:[%s13329_s1 + $0x10] sm:$0xff]  ;;  %v3390_v19 = vld [vmem:[%s13329_s1 + $0xd8] sm:$0xff] }
 0x260   : > { %v3274_v46 = vpop.permute.xlu0 %3273  ;;  %8131 = vmatpush1.bf16.msra.mxu0 %v8130_v39  ;;  %v3434_v39 = vld [vmem:[#allocation3 + $0x138] sm:$0xff] }
 0x261   : > { %3252 = vst [vmem:[#allocation3 + $0xd8] sm:$0xc] %v3248_v43  ;;  %v3278_v53 = vsel %vm3277_vm6, %v3272_v30, %v3274_v46  ;;  %v3279_v58 = vsel %vm3277_vm6, %v3274_v46, %v3276_v47  ;;  %8133 = vmatprep.subr.bf16.mxu0 %v8132_v44  ;;  %v3432_v44 = vld [vmem:[#allocation3 + $0x128] sm:$0xff]  ;;  %v3433_v46 = vld [vmem:[#allocation3 + $0x130] sm:$0xff] }
 0x262   : > { %v3282_v61 = vsel %vm3023_vm0, %v3278_v53, 0.0  ;;  %v3283_v62 = vsel %vm3024_vm15, %v3279_v58, 0.0  ;;  %v8148_v45 = vpack.c.bf16 %v3434_v39, %v3432_v44  ;;  %v8150_v56 = vpack.c.bf16 %v3433_v46, %v3431_v55  ;;  %v3366_v58 = vld [vmem:[%s13329_s1 + $0x18] sm:$0xff] }
 0x263   : > { %v3286_v50 = vrot.slane %v3282_v61, 4  ;;  %v3287_v51 = vrot.slane %v3283_v62, 4  ;;  %v3313_v2 = vpop.permute.xlu1 %3312  ;;  %v3367_v61 = vld [vmem:[%s13329_s1 + $0x20] sm:$0xff]  ;;  %v3370_v62 = vld [vmem:[%s13329_s1 + $0x38] sm:$0xff] }
 0x264   : > { %v3311_v63 = vpop.permute.xlu0 %3310  ;;  %8135 = vmatpush1.bf16.msra.mxu0 %v8134_v10  ;;  %v3421_v9 = vld [vmem:[#allocation3 + $0xd0] sm:$0xff]  ;;  %v3369_v10 = vld [vmem:[%s13329_s1 + $0x30] sm:$0xff] }
 0x265   : > { %3290 = vst [vmem:[#allocation3 + $0xf0] sm:$0x30] %v3286_v50  ;;  %3291 = vst [vmem:[#allocation3 + $0xf8] sm:$0x30] %v3287_v51  ;;  %v3317_v4 = vsel %vm3316_vm5, %v3311_v63, %v3313_v2  ;;  %v8138_v22 = vpack.c.bf16 %v3421_v9, %v3419_v18  ;;  %v3372_v50 = vld [vmem:[%s13329_s1 + $0x48] sm:$0xff]  ;;  %v3371_v51 = vld [vmem:[%s13329_s1 + $0x40] sm:$0xff] }
 0x266   : > { %v3321_v1 = vsel %vm3023_vm0, %v3317_v4, 0.0  ;;  %v3374_v63 = vld [vmem:[%s13329_s1 + $0x58] sm:$0xff]  ;;  %v3375_v4 = vld [vmem:[%s13329_s1 + $0x60] sm:$0xff] }
 0x267   : > { %v3325_v7 = vrot.slane %v3321_v1, 2  ;;  %v3350_v14 = vpop.permute.xlu1 %3349  ;;  %v3377_v1 = vld [vmem:[%s13329_s1 + $0x70] sm:$0xff]  ;;  %v3379_v9 = vld [vmem:[%s13329_s1 + $0x80] sm:$0xff] }
 0x268   : > { %v3315_v11 = vpop.permute.xlu0 %3314  ;;  %v3422_v13 = vld [vmem:[#allocation3 + $0xd8] sm:$0xff] }
 0x269   : > { %3329 = vst [vmem:[#allocation3 + $0x110] sm:$0xc0] %v3325_v7  ;;  %v3318_v16 = vsel %vm3316_vm5, %v3313_v2, %v3315_v11  ;;  %v8136_v17 = vpack.c.bf16 %v3422_v13, %v3420_v12  ;;  %v3373_v2 = vld [vmem:[%s13329_s1 + $0x50] sm:$0xff]  ;;  %v3380_v7 = vld [vmem:[%s13329_s1 + $0x88] sm:$0xff]  ;;  %v3382_v11 = vld [vmem:[%s13329_s1 + $0x98] sm:$0xff] }
 0x26a   : > { %v3322_v21 = vsel %vm3024_vm15, %v3318_v16, 0.0  ;;  %v3381_v12 = vld [vmem:[%s13329_s1 + $0x90] sm:$0xff]  ;;  %v3384_v13 = vld [vmem:[%s13329_s1 + $0xa8] sm:$0xff]  ;;  %v3387_v18 = vld [vmem:[%s13329_s1 + $0xc0] sm:$0xff] }
 0x26b   : > { %v3326_v23 = vrot.slane %v3322_v21, 2  ;;  %8137 = vmatprep.subr.bf16.mxu0 %v8136_v17  ;;  %v3354_v29 = vpop.permute.xlu1 %3353  ;;  %v3385_v16 = vld [vmem:[%s13329_s1 + $0xb0] sm:$0xff]  ;;  %v3388_v17 = vld [vmem:[%s13329_s1 + $0xc8] sm:$0xff] }
 0x26c   : > { %8139 = vmatpush1.bf16.msra.mxu0 %v8138_v22  ;;  %v3426_v26 = vld [vmem:[#allocation3 + $0xf8] sm:$0xff]  ;;  %v3352_v27 = vpop.permute.xlu0 %3351  ;;  %v3425_v28 = vld [vmem:[#allocation3 + $0xf0] sm:$0xff]  ;;  %v3389_v21 = vld [vmem:[%s13329_s1 + $0xd0] sm:$0xff] }
 0x26d   : > { %3330 = vst [vmem:[#allocation3 + $0x118] sm:$0xc0] %v3326_v23  ;;  %v8140_v30 = vpack.c.bf16 %v3426_v26, %v3424_v25  ;;  %v8142_v31 = vpack.c.bf16 %v3425_v28, %v3423_v24  ;;  %v3355_v32 = vsel %vm3055_vm7, %v3350_v14, %v3352_v27  ;;  %v3356_v33 = vsel %vm3055_vm7, %v3352_v27, %v3354_v29  ;;  %v3383_v14 = vld [vmem:[%s13329_s1 + $0xa0] sm:$0xff]  ;;  %v3392_v22 = vld [vmem:[%s13329_s1 + $0xe8] sm:$0xff]  ;;  %v3394_v24 = vld [vmem:[%s13329_s1 + $0xf8] sm:$0xff] }
 0x26e   : > { %v3359_v34 = vsel %vm3023_vm0, %v3355_v32, 0.0  ;;  %v3360_v35 = vsel %vm3024_vm15, %v3356_v33, 0.0  ;;  %vm3581_vm7 = vcmask 1041408   ;;  %v3391_v23 = vld [vmem:[%s13329_s1 + $0xe0] sm:$0xff]  ;;  %v3393_v25 = vld [vmem:[%s13329_s1 + $0xf0] sm:$0xff]  ;;  %v4525_v26 = vld [vmem:[%s13333_s5 + $0x38] sm:$0xff] }
 0x26f   : > { %8141 = vmatprep.subr.bf16.mxu0 %v8140_v30  ;;  %3361 = vst [vmem:[#allocation3 + $0x140] sm:$0x3] %v3359_v34  ;;  %3362 = vst [vmem:[#allocation3 + $0x148] sm:$0x3] %v3360_v35  ;;  %v4205_v27 = vld [vmem:[%s13333_s5 + $0x10] sm:$0xff]  ;;  %4551 = vrot.lane.b32.xlu0 %v4525_v26, %s10246_s19 }
 0x270   : > { %8143 = vmatpush1.bf16.msra.mxu0 %v8142_v31  ;;  %v3429_v36 = vld [vmem:[#allocation3 + $0x110] sm:$0xff]  ;;  %4207 = vrot.lane.b32.xlu1 %v4205_v27, %s10246_s19 }
 0x271   : > { %v8146_v43 = vpack.c.bf16 %v3429_v36, %v3427_v42 }
 0x274   : > { %v3430_v38 = vld [vmem:[#allocation3 + $0x118] sm:$0xff] }
 0x275   : > { %v8144_v40 = vpack.c.bf16 %v3430_v38, %v3428_v37 }
 0x276   : > { %v3436_v47 = vld [vmem:[#allocation3 + $0x148] sm:$0x3]  ;;  %v3435_v53 = vld [vmem:[#allocation3 + $0x140] sm:$0x3] }
 0x277   : > { %8145 = vmatprep.subr.bf16.mxu0 %v8144_v40 }
 0x278   : > { %8147 = vmatpush1.bf16.msra.mxu0 %v8146_v43 }
 0x279   : > { %8149 = vmatprep.subr.bf16.mxu0 %v8148_v45 }
 0x27c   : > { %8151 = vmatpush1.bf16.msra.mxu0 %v8150_v56 }
 0x27d   : > { %8064 = vmatprep.subr.msk.mxu0 %vm3581_vm7, %v3436_v47 }
 0x280   : > { %8065 = vmatpush1.msk.msra.mxu0 %vm3581_vm7, %v3435_v53 }
 0x281   : > { %3653 = vmatmul.mubr.f32.vlgmr.msra.gmra.mrb[0].mxu0 %v3363_v48 }
 0x282   : > { %8067 = vmatprep.mubr.msk.f32.mxu0 %vm1118_vm8, %v3366_v58 }
 0x285   : > { %3659 = vmatmul.mubr.f32.gmra.mrb[2].mxu0 %v3365_v59 }
 0x286   : > { %8068 = vmatprep.mubr.msk.f32.mxu0 %vm1118_vm8, %v3368_v60 }
 0x289   : > { %3665 = vmatmul.mubr.f32.gmra.mrb[4].mxu0 %v3367_v61 }
 0x28a   : > { %8069 = vmatprep.mubr.msk.f32.mxu0 %vm1118_vm8, %v3370_v62 }
 0x28d   : > { %3671 = vmatmul.mubr.f32.gmra.mrb[6].mxu0 %v3369_v10 }
 0x28e   : > { %8070 = vmatprep.mubr.msk.f32.mxu0 %vm1118_vm8, %v3372_v50 }
 0x291   : > { %3677 = vmatmul.mubr.f32.gmra.mrb[8].mxu0 %v3371_v51 }
 0x292   : > { %8071 = vmatprep.mubr.msk.f32.mxu0 %vm1118_vm8, %v3374_v63 }
 0x295   : > { %3683 = vmatmul.mubr.f32.gmra.mrb[10].mxu0 %v3373_v2 }
 0x296   : > { %8072 = vmatprep.mubr.msk.f32.mxu0 %vm1118_vm8, %v3376_v20 }
 0x299   : > { %3689 = vmatmul.mubr.f32.gmra.mrb[12].mxu0 %v3375_v4 }
 0x29a   : > { %8073 = vmatprep.mubr.msk.f32.mxu0 %vm1118_vm8, %v3378_v5 }
 0x29d   : > { %3695 = vmatmul.mubr.f32.gmra.mrb[14].mxu0 %v3377_v1 }
 0x29e   : > { %8074 = vmatprep.mubr.msk.f32.mxu0 %vm1118_vm8, %v3380_v7  ;;  %v3456_v30 = vpop.permute.xlu0 %3455  ;;  %v3461_v32 = vpop.permute.xlu1 %3460 }
 0x2a1   : > { %3701 = vmatmul.mubr.f32.gmra.mrb[16].mxu0 %v3379_v9 }
 0x2a2   : > { %8075 = vmatprep.mubr.msk.f32.mxu0 %vm1118_vm8, %v3382_v11  ;;  %v3466_v46 = vpop.permute.xlu1 %3465  ;;  %v3471_v47 = vpop.permute.xlu0 %3470 }
 0x2a5   : > { %3707 = vmatmul.mubr.f32.gmra.mrb[18].mxu0 %v3381_v12 }
 0x2a6   : > { %8076 = vmatprep.mubr.msk.f32.mxu0 %vm1118_vm8, %v3384_v13  ;;  %v3476_v20 = vpop.permute.xlu1 %3475  ;;  %v3481_v1 = vpop.permute.xlu0 %3480 }
 0x2a9   : > { %3713 = vmatmul.mubr.f32.gmra.mrb[20].mxu0 %v3383_v14 }
 0x2aa   : > { %8077 = vmatprep.mubr.msk.f32.mxu0 %vm1118_vm8, %v3386_v15 }
 0x2ad   : > { %3719 = vmatmul.mubr.f32.gmra.mrb[22].mxu0 %v3385_v16 }
 0x2ae   : > { %8078 = vmatprep.mubr.msk.f32.mxu0 %vm1118_vm8, %v3388_v17 }
 0x2b1   : > { %3725 = vmatmul.mubr.f32.gmra.mrb[24].mxu0 %v3387_v18 }
 0x2b2   : > { %8079 = vmatprep.mubr.msk.f32.mxu0 %vm1118_vm8, %v3390_v19 }
 0x2b5   : > { %3731 = vmatmul.mubr.f32.gmra.mrb[26].mxu0 %v3389_v21 }
 0x2b6   : > { %8080 = vmatprep.mubr.msk.f32.mxu0 %vm1118_vm8, %v3392_v22  ;;  %v3486_v22 = vpop.permute.xlu1 %3485 }
 0x2b9   : > { %3737 = vmatmul.mubr.f32.gmra.mrb[28].mxu0 %v3391_v23 }
 0x2ba   : > { %8081 = vmatprep.mubr.msk.f32.mxu0 %vm1118_vm8, %v3394_v24 }
 0x2bd   : > { %3743 = vmatmul.mubr.f32.gmra.mrb[30].mxu0 %v3393_v25  ;;  %v3491_v25 = vpop.permute.xlu0 %3490 }
 0x2be   : > { %4723 = vmatprep.mubr.f32.mxu0 %v13407_v0 }
 0x354   : > { %v3654_v28 = vpop.f32.mrb[0].mxu0 }
 0x355   : > { %v3656_v29 = vpop.f32.mrb[1].mxu0  ;;  %v3655_v31 = vadd.f32 %v3654_v28, %v3456_v30 }
 0x356   : > { %v3657_v33 = vadd.f32 %v3656_v29, %v3456_v30 }
 0x357   : > { %v3749_v38 = vmax.f32 %v3655_v31, 0.0 }
 0x358   : > { %v3660_v34 = vpop.f32.mrb[2].mxu0  ;;  %v3750_v40 = vmax.f32 %v3657_v33, 0.0 }
 0x359   : > { %v3661_v35 = vadd.f32 %v3660_v34, %v3461_v32  ;;  %v3662_v36 = vpop.f32.mrb[3].mxu0 }
 0x35a   : > { %v3663_v37 = vadd.f32 %v3662_v36, %v3461_v32 }
 0x35b   : > { %v3751_v39 = vmax.f32 %v3661_v35, 0.0 }
 0x35c   : > { %v3752_v42 = vmax.f32 %v3663_v37, 0.0  ;;  %v3666_v43 = vpop.f32.mrb[4].mxu0 }
 0x35d   : > { %v3668_v44 = vpop.f32.mrb[5].mxu0  ;;  %v8154_v45 = vpack.c.bf16 %v3751_v39, %v3749_v38  ;;  %v3667_v56 = vadd.f32 %v3666_v43, %v3466_v46  ;;  %v3496_v38 = vpop.permute.xlu1 %3495 }
 0x35e   : > { %v8152_v55 = vpack.c.bf16 %v3752_v42, %v3750_v40  ;;  %v3669_v48 = vadd.f32 %v3668_v44, %v3466_v46  ;;  %v3501_v42 = vpop.permute.xlu0 %3500 }
 0x35f   : > { %v3753_v61 = vmax.f32 %v3667_v56, 0.0 }
 0x360   : > { %v3672_v53 = vpop.f32.mrb[6].mxu0  ;;  %8153 = vmatprep.subr.bf16.mxu1 %v8152_v55  ;;  %v3754_v10 = vmax.f32 %v3669_v48, 0.0 }
 0x361   : > { %v3673_v58 = vadd.f32 %v3672_v53, %v3471_v47  ;;  %v3674_v59 = vpop.f32.mrb[7].mxu0  ;;  %8155 = vmatpush1.bf16.msra.mxu1 %v8154_v45 }
 0x362   : > { %v3675_v60 = vadd.f32 %v3674_v59, %v3471_v47 }
 0x363   : > { %v3755_v62 = vmax.f32 %v3673_v58, 0.0 }
 0x364   : > { %v3756_v50 = vmax.f32 %v3675_v60, 0.0  ;;  %v3678_v51 = vpop.f32.mrb[8].mxu0 }
 0x365   : > { %v8158_v63 = vpack.c.bf16 %v3755_v62, %v3753_v61  ;;  %v3680_v2 = vpop.f32.mrb[9].mxu0  ;;  %v3679_v5 = vadd.f32 %v3678_v51, %v3476_v20  ;;  %v3506_v61 = vpop.permute.xlu1 %3505 }
 0x366   : > { %v8156_v4 = vpack.c.bf16 %v3756_v50, %v3754_v10  ;;  %v3681_v7 = vadd.f32 %v3680_v2, %v3476_v20  ;;  %v3511_v50 = vpop.permute.xlu0 %3510 }
 0x367   : > { %v3757_v14 = vmax.f32 %v3679_v5, 0.0 }
 0x368   : > { %v3684_v9 = vpop.f32.mrb[10].mxu0  ;;  %8157 = vmatprep.subr.bf16.mxu1 %v8156_v4  ;;  %v3758_v16 = vmax.f32 %v3681_v7, 0.0 }
 0x369   : > { %v3685_v11 = vadd.f32 %v3684_v9, %v3481_v1  ;;  %v3686_v12 = vpop.f32.mrb[11].mxu0  ;;  %8159 = vmatpush1.bf16.msra.mxu1 %v8158_v63 }
 0x36a   : > { %v3687_v13 = vadd.f32 %v3686_v12, %v3481_v1 }
 0x36b   : > { %v3759_v15 = vmax.f32 %v3685_v11, 0.0 }
 0x36c   : > { %v3760_v17 = vmax.f32 %v3687_v13, 0.0  ;;  %v3690_v18 = vpop.f32.mrb[12].mxu0 }
 0x36d   : > { %v8162_v19 = vpack.c.bf16 %v3759_v15, %v3757_v14  ;;  %v3692_v21 = vpop.f32.mrb[13].mxu0  ;;  %v3691_v24 = vadd.f32 %v3690_v18, %v3486_v22  ;;  %v3516_v14 = vpop.permute.xlu1 %3515 }
 0x36e   : > { %v8160_v23 = vpack.c.bf16 %v3760_v17, %v3758_v16  ;;  %v3693_v26 = vadd.f32 %v3692_v21, %v3486_v22  ;;  %v3521_v17 = vpop.permute.xlu0 %3520 }
 0x36f   : > { %v3761_v31 = vmax.f32 %v3691_v24, 0.0 }
 0x370   : > { %v3696_v27 = vpop.f32.mrb[14].mxu0  ;;  %8161 = vmatprep.subr.bf16.mxu1 %v8160_v23  ;;  %v3762_v33 = vmax.f32 %v3693_v26, 0.0 }
 0x371   : > { %v3697_v28 = vadd.f32 %v3696_v27, %v3491_v25  ;;  %v3698_v29 = vpop.f32.mrb[15].mxu0  ;;  %8163 = vmatpush1.bf16.msra.mxu1 %v8162_v19 }
 0x372   : > { %v3699_v30 = vadd.f32 %v3698_v29, %v3491_v25 }
 0x373   : > { %v3763_v32 = vmax.f32 %v3697_v28, 0.0 }
 0x374   : > { %v3764_v34 = vmax.f32 %v3699_v30, 0.0  ;;  %v3702_v35 = vpop.f32.mrb[16].mxu0 }
 0x375   : > { %v8166_v36 = vpack.c.bf16 %v3763_v32, %v3761_v31  ;;  %v3704_v37 = vpop.f32.mrb[17].mxu0  ;;  %v3703_v40 = vadd.f32 %v3702_v35, %v3496_v38  ;;  %v3526_v31 = vpop.permute.xlu1 %3525 }
 0x376   : > { %v8164_v39 = vpack.c.bf16 %v3764_v34, %v3762_v33  ;;  %v3705_v43 = vadd.f32 %v3704_v37, %v3496_v38  ;;  %v3531_v34 = vpop.permute.xlu0 %3530 }
 0x377   : > { %v3765_v56 = vmax.f32 %v3703_v40, 0.0 }
 0x378   : > { %v3708_v44 = vpop.f32.mrb[18].mxu0  ;;  %8165 = vmatprep.subr.bf16.mxu1 %v8164_v39  ;;  %v3766_v48 = vmax.f32 %v3705_v43, 0.0 }
 0x379   : > { %v3709_v45 = vadd.f32 %v3708_v44, %v3501_v42  ;;  %v3710_v46 = vpop.f32.mrb[19].mxu0  ;;  %8167 = vmatpush1.bf16.msra.mxu1 %v8166_v36 }
 0x37a   : > { %v3711_v55 = vadd.f32 %v3710_v46, %v3501_v42 }
 0x37b   : > { %v3767_v47 = vmax.f32 %v3709_v45, 0.0 }
 0x37c   : > { %v3768_v53 = vmax.f32 %v3711_v55, 0.0  ;;  %v3714_v58 = vpop.f32.mrb[20].mxu0  ;;  %v3781_v55 = vld [vmem:[%s13331_s3] sm:$0xff] }
 0x37d   : > { %v8170_v59 = vpack.c.bf16 %v3767_v47, %v3765_v56  ;;  %v3716_v60 = vpop.f32.mrb[21].mxu0  ;;  %v3715_v10 = vadd.f32 %v3714_v58, %v3506_v61  ;;  %v3782_v56 = vld [vmem:[%s13331_s3 + $0x8] sm:$0xff]  ;;  %v3783_v47 = vld [vmem:[%s13331_s3 + $0x10] sm:$0xff] }
 0x37e   : > { %v8168_v62 = vpack.c.bf16 %v3768_v53, %v3766_v48  ;;  %v3717_v51 = vadd.f32 %v3716_v60, %v3506_v61  ;;  %v3784_v48 = vld [vmem:[%s13331_s3 + $0x18] sm:$0xff]  ;;  %v3785_v53 = vld [vmem:[%s13331_s3 + $0x20] sm:$0xff]  ;;  %v3786_v58 = vld [vmem:[%s13331_s3 + $0x28] sm:$0xff] }
 0x37f   : > { %v3769_v5 = vmax.f32 %v3715_v10, 0.0  ;;  %v3788_v60 = vld [vmem:[%s13331_s3 + $0x38] sm:$0xff]  ;;  %v4366_v61 = vld [vmem:[%s13333_s5 + $0x28] sm:$0xff]  ;;  %v3800_v10 = vpop.permute.xlu1 %3799 }
 0x380   : > { %v3720_v63 = vpop.f32.mrb[22].mxu0  ;;  %8169 = vmatprep.subr.bf16.mxu1 %v8168_v62  ;;  %v3770_v7 = vmax.f32 %v3717_v51, 0.0  ;;  %v3998_v62 = vld [vmem:[%s13333_s5] sm:$0xff]  ;;  %5211 = vrot.lane.b32.xlu0 %v4366_v61, %s10246_s19 }
 0x381   : > { %v3721_v2 = vadd.f32 %v3720_v63, %v3511_v50  ;;  %v3722_v20 = vpop.f32.mrb[23].mxu0  ;;  %8171 = vmatpush1.bf16.msra.mxu1 %v8170_v59  ;;  %v3787_v59 = vld [vmem:[%s13331_s3 + $0x30] sm:$0xff]  ;;  %4893 = vrot.lane.b32.xlu1 %v3998_v62, %s10246_s19 }
 0x382   : > { %v3723_v4 = vadd.f32 %v3722_v20, %v3511_v50 }
 0x383   : > { %v3771_v1 = vmax.f32 %v3721_v2, 0.0 }
 0x384   : > { %v3772_v9 = vmax.f32 %v3723_v4, 0.0  ;;  %v3726_v11 = vpop.f32.mrb[24].mxu0 }
 0x385   : > { %v8174_v12 = vpack.c.bf16 %v3771_v1, %v3769_v5  ;;  %v3728_v13 = vpop.f32.mrb[25].mxu0  ;;  %v3727_v16 = vadd.f32 %v3726_v11, %v3516_v14 }
 0x386   : > { %v8172_v15 = vpack.c.bf16 %v3772_v9, %v3770_v7  ;;  %v3729_v18 = vadd.f32 %v3728_v13, %v3516_v14  ;;  %v3805_v7 = vpop.permute.xlu0 %3804  ;;  %v11366_v13 = vpop.permute.xlu1 %3809 }
 0x387   : > { %v3773_v24 = vmax.f32 %v3727_v16, 0.0 }
 0x388   : > { %v3732_v19 = vpop.f32.mrb[26].mxu0  ;;  %8173 = vmatprep.subr.bf16.mxu1 %v8172_v15  ;;  %v3774_v26 = vmax.f32 %v3729_v18, 0.0 }
 0x389   : > { %v3733_v21 = vadd.f32 %v3732_v19, %v3521_v17  ;;  %v3734_v22 = vpop.f32.mrb[27].mxu0  ;;  %8175 = vmatpush1.bf16.msra.mxu1 %v8174_v12 }
 0x38a   : > { %v3735_v23 = vadd.f32 %v3734_v22, %v3521_v17  ;;  %v11380_v17 = vpop.permute.xlu0 %3814  ;;  %v3820_v18 = vpop.permute.xlu1 %3819 }
 0x38b   : > { %v3775_v25 = vmax.f32 %v3733_v21, 0.0 }
 0x38c   : > { %v3776_v27 = vmax.f32 %v3735_v23, 0.0  ;;  %v3738_v28 = vpop.f32.mrb[28].mxu0 }
 0x38d   : > { %v8178_v29 = vpack.c.bf16 %v3775_v25, %v3773_v24  ;;  %v3740_v30 = vpop.f32.mrb[29].mxu0  ;;  %v3739_v33 = vadd.f32 %v3738_v28, %v3526_v31 }
 0x38e   : > { %v8176_v32 = vpack.c.bf16 %v3776_v27, %v3774_v26  ;;  %v3741_v35 = vadd.f32 %v3740_v30, %v3526_v31  ;;  %v3825_v24 = vpop.permute.xlu0 %3824 }
 0x38f   : > { %v3777_v40 = vmax.f32 %v3739_v33, 0.0 }
 0x390   : > { %v3744_v36 = vpop.f32.mrb[30].mxu0  ;;  %8177 = vmatprep.subr.bf16.mxu1 %v8176_v32  ;;  %v3778_v43 = vmax.f32 %v3741_v35, 0.0 }
 0x391   : > { %v3745_v37 = vadd.f32 %v3744_v36, %v3531_v34  ;;  %v3746_v38 = vpop.f32.mrb[31].mxu0  ;;  %8179 = vmatpush1.bf16.msra.mxu1 %v8178_v29 }
 0x392   : > { %v3747_v39 = vadd.f32 %v3746_v38, %v3531_v34  ;;  %v3830_v34 = vpop.permute.xlu1 %3829 }
 0x393   : > { %v3779_v42 = vmax.f32 %v3745_v37, 0.0 }
 0x394   : > { %v3780_v44 = vmax.f32 %v3747_v39, 0.0 }
 0x395   : > { %v8182_v45 = vpack.c.bf16 %v3779_v42, %v3777_v40 }
 0x396   : > { %v8180_v46 = vpack.c.bf16 %v3780_v44, %v3778_v43 }
 0x398   : > { %8181 = vmatprep.subr.bf16.mxu1 %v8180_v46 }
 0x399   : > { %8183 = vmatpush1.bf16.msra.mxu1 %v8182_v45  ;;  %v3835_v45 = vpop.permute.xlu0 %3834 }
 0x39c   : > { %3902 = vmatmul.mubr.f32.vlgmr.msra.gmra.mrb[0].mxu1 %v3781_v55 }
 0x39d   : > { %3907 = vmatprep.mubr.f32.mxu1 %v13407_v0 }
 0x3a0   : > { %3908 = vmatmul.mubr.f32.gmra.mrb[2].mxu1 %v3782_v56 }
 0x3a1   : > { %3913 = vmatprep.mubr.f32.mxu1 %v13407_v0 }
 0x3a4   : > { %3914 = vmatmul.mubr.f32.gmra.mrb[4].mxu1 %v3783_v47 }
 0x3a5   : > { %3919 = vmatprep.mubr.f32.mxu1 %v13407_v0 }
 0x3a8   : > { %3920 = vmatmul.mubr.f32.gmra.mrb[6].mxu1 %v3784_v48 }
 0x3a9   : > { %3925 = vmatprep.mubr.f32.mxu1 %v13407_v0 }
 0x3ac   : > { %3926 = vmatmul.mubr.f32.gmra.mrb[8].mxu1 %v3785_v53 }
 0x3ad   : > { %3931 = vmatprep.mubr.f32.mxu1 %v13407_v0 }
 0x3b0   : > { %3932 = vmatmul.mubr.f32.gmra.mrb[10].mxu1 %v3786_v58 }
 0x3b1   : > { %3937 = vmatprep.mubr.f32.mxu1 %v13407_v0 }
 0x3b4   : > { %3938 = vmatmul.mubr.f32.gmra.mrb[12].mxu1 %v3787_v59 }
 0x3b5   : > { %3943 = vmatprep.mubr.f32.mxu1 %v13407_v0 }
 0x3b8   : > { %3944 = vmatmul.mubr.f32.gmra.mrb[14].mxu1 %v3788_v60 }
 0x3b9   : > { %4194 = vmatprep.mubr.f32.mxu1 %v13407_v0 }
 0x46f   : > { %v3903_v50 = vpop.f32.mrb[0].mxu1 }
 0x470   : > { %v3904_v51 = vadd.f32 %v3903_v50, %v3800_v10  ;;  %v3905_v63 = vpop.f32.mrb[1].mxu1 }
 0x471   : > { %v3906_v4 = vadd.f32 %v3905_v63, %v3800_v10 }
 0x472   : > { %v11350_v2 = vmax.f32 %v3904_v51, 0.0 }
 0x473   : > { %v3909_v20 = vpop.f32.mrb[2].mxu1  ;;  %v11362_v11 = vmax.f32 %v3906_v4, 0.0 }
 0x474   : > { %13517 = vst [vmem:[#allocation13_spill] sm:$0xff] %v11350_v2  ;;  %v3911_v5 = vpop.f32.mrb[3].mxu1  ;;  %v11354_v1 = vpack.i.bf16 %v11350_v2, %v13407_v0  ;;  %v3910_v28 = vadd.f32 %v3909_v20, %v3805_v7 }
 0x475   : > { %13519 = vst [vmem:[#allocation15_spill] sm:$0xff] %v11362_v11  ;;  %v11378_v16 = vpack.i.bf16 %v13407_v0, %v11362_v11  ;;  %v11396_v31 = vpack.i.bf16 %v11362_v11, %v11350_v2  ;;  %v3912_v56 = vadd.f32 %v3911_v5, %v3805_v7 }
 0x476   : > { %13518 = vst [vmem:[#allocation14_spill] sm:$0xff] %v11354_v1  ;;  %8684 = vrot.lane.b32.xlu0 %v11354_v1, %s10233_s29  ;;  %8679 = vrot.lane.b32.xlu1 %v11354_v1, %s10232_s28  ;;  %v11410_v38 = vmax.f32 %v3910_v28, 0.0 }
 0x477   : > { %v11360_v9 = vpop.f32.mrb[4].mxu1  ;;  %13520 = vst [vmem:[#allocation16_spill] sm:$0xff] %v11378_v16  ;;  %v11440_v62 = vmax.f32 %v3912_v56, 0.0 }
 0x478   : > { %v11364_v12 = vpop.f32.mrb[5].mxu1  ;;  %13526 = vst [vmem:[#allocation22_spill] sm:$0xff] %v11410_v38  ;;  %v11426_v53 = vpack.i.bf16 %v11410_v38, %v13407_v0  ;;  %v3916_v63 = vadd.f32 %v11360_v9, %v11366_v13 }
 0x479   : > { %13534 = vst [vmem:[#allocation30_spill] sm:$0xff] %v11440_v62  ;;  %v11452_v50 = vpack.i.bf16 %v11440_v62, %v11410_v38  ;;  %v11460_v51 = vpack.i.bf16 %v13407_v0, %v11440_v62  ;;  %v3918_v4 = vadd.f32 %v11364_v12, %v11366_v13 }
 0x47a   : > { %8689 = vrot.lane.b32.xlu0 %v11354_v1, %s10234_s30  ;;  %8704 = vrot.lane.b32.xlu1 %v11354_v1, %s10242_s15  ;;  %13530 = vst [vmem:[#allocation26_spill] sm:$0xff] %v11426_v53  ;;  %v11472_v20 = vmax.f32 %v3916_v63, 0.0 }
 0x47b   : > { %v11372_v14 = vpop.f32.mrb[6].mxu1  ;;  %13535 = vst [vmem:[#allocation31_spill] sm:$0xff] %v11452_v50  ;;  %v11488_v7 = vmax.f32 %v3918_v4, 0.0 }
 0x47c   : > { %v11374_v15 = vpop.f32.mrb[7].mxu1  ;;  %13536 = vst [vmem:[#allocation32_spill] sm:$0xff] %v11472_v20  ;;  %v11482_v5 = vpack.i.bf16 %v11472_v20, %v13407_v0 }
 0x47d   : > { %13538 = vst [vmem:[#allocation34_spill] sm:$0xff] %v11488_v7  ;;  %v11496_v9 = vpack.i.bf16 %v13407_v0, %v11488_v7 }
 0x47e   : > { %8694 = vrot.lane.b32.xlu0 %v11354_v1, %s10240_s13  ;;  %8714 = vrot.lane.b32.xlu1 %v11378_v16, %s10233_s29  ;;  %13537 = vst [vmem:[#allocation33_spill] sm:$0xff] %v11482_v5 }
 0x47f   : > { %v3927_v19 = vpop.f32.mrb[8].mxu1  ;;  %13539 = vst [vmem:[#allocation35_spill] sm:$0xff] %v11496_v9 }
 0x480   : > { %v3928_v21 = vadd.f32 %v3927_v19, %v3820_v18  ;;  %v3929_v22 = vpop.f32.mrb[9].mxu1  ;;  %v3922_v19 = vadd.f32 %v11372_v14, %v11380_v17 }
 0x481   : > { %v3930_v23 = vadd.f32 %v3929_v22, %v3820_v18  ;;  %v11518_v22 = vpack.i.bf16 %v11488_v7, %v11472_v20 }
 0x482   : > { %8699 = vrot.lane.b32.xlu0 %v11354_v1, %s10241_s14  ;;  %8719 = vrot.lane.b32.xlu1 %v11378_v16, %s10234_s30  ;;  %v11390_v25 = vmax.f32 %v3928_v21, 0.0  ;;  %v11532_v14 = vmax.f32 %v3922_v19, 0.0 }
 0x483   : > { %v11392_v26 = vmax.f32 %v3930_v23, 0.0  ;;  %v3933_v27 = vpop.f32.mrb[10].mxu1  ;;  %13540 = vst [vmem:[#allocation36_spill] sm:$0xff] %v11518_v22 }
 0x484   : > { %13521 = vst [vmem:[#allocation17_spill] sm:$0xff] %v11390_v25  ;;  %v3934_v29 = vadd.f32 %v3933_v27, %v3825_v24  ;;  %v3935_v30 = vpop.f32.mrb[11].mxu1  ;;  %13543 = vst [vmem:[#allocation39_spill] sm:$0xff] %v11532_v14  ;;  %v3924_v27 = vadd.f32 %v11374_v15, %v11380_v17  ;;  %v11542_v28 = vpack.i.bf16 %v11532_v14, %v13407_v0 }
 0x485   : > { %13522 = vst [vmem:[#allocation18_spill] sm:$0xff] %v11392_v26  ;;  %v3936_v32 = vadd.f32 %v3935_v30, %v3825_v24  ;;  %v11408_v37 = vpack.i.bf16 %v11392_v26, %v11390_v25  ;;  %v11580_v30 = vpack.i.bf16 %v11390_v25, %v13407_v0 }
 0x486   : > { %v11398_v33 = vmax.f32 %v3934_v29, 0.0  ;;  %8709 = vrot.lane.b32.xlu0 %v11378_v16, %s10232_s28  ;;  %8724 = vrot.lane.b32.xlu1 %v11396_v31, %s10235_s8  ;;  %13544 = vst [vmem:[#allocation40_spill] sm:$0xff] %v11542_v28  ;;  %v11548_v29 = vmax.f32 %v3924_v27, 0.0 }
 0x487   : > { %v11404_v35 = vmax.f32 %v3936_v32, 0.0  ;;  %v3939_v36 = vpop.f32.mrb[12].mxu1  ;;  %13525 = vst [vmem:[#allocation21_spill] sm:$0xff] %v11408_v37  ;;  %13548 = vst [vmem:[#allocation44_spill] sm:$0xff] %v11580_v30  ;;  %v11592_v32 = vpack.i.bf16 %v13407_v0, %v11392_v26 }
 0x488   : > { %13523 = vst [vmem:[#allocation19_spill] sm:$0xff] %v11398_v33  ;;  %v3940_v39 = vadd.f32 %v3939_v36, %v3830_v34  ;;  %v3941_v40 = vpop.f32.mrb[13].mxu1  ;;  %v11522_v23 = vpack.i.bf16 %v11398_v33, %v11390_v25  ;;  %13545 = vst [vmem:[#allocation41_spill] sm:$0xff] %v11548_v29  ;;  %v11556_v15 = vpack.i.bf16 %v11548_v29, %v11532_v14  ;;  %v11596_v36 = vpop.permute.xlu1 %4207 }
 0x489   : > { %13524 = vst [vmem:[#allocation20_spill] sm:$0xff] %v11404_v35  ;;  %v3942_v42 = vadd.f32 %v3941_v40, %v3830_v34  ;;  %v11414_v43 = vpack.i.bf16 %v11404_v35, %v11398_v33  ;;  %v11564_v17 = vpack.i.bf16 %v13407_v0, %v11548_v29  ;;  %13549 = vst [vmem:[#allocation45_spill] sm:$0xff] %v11592_v32  ;;  %v11594_v34 = vpop.permute.xlu0 %4551 }
 0x48a   : > { %v11416_v44 = vmax.f32 %v3940_v39, 0.0  ;;  %8744 = vrot.lane.b32.xlu0 %v11378_v16, %s10242_s15  ;;  %8729 = vrot.lane.b32.xlu1 %v11396_v31, %s10236_s9  ;;  %13541 = vst [vmem:[#allocation37_spill] sm:$0xff] %v11522_v23  ;;  %13546 = vst [vmem:[#allocation42_spill] sm:$0xff] %v11556_v15  ;;  %v11650_v21 = vpack.i.bf16 %v13407_v0, %v11404_v35 }
 0x48b   : > { %13527 = vst [vmem:[#allocation23_spill] sm:$0xff] %v11414_v43  ;;  %v11422_v46 = vmax.f32 %v3942_v42, 0.0  ;;  %v3945_v55 = vpop.f32.mrb[14].mxu1  ;;  %13547 = vst [vmem:[#allocation43_spill] sm:$0xff] %v11564_v17 }
 0x48c   : > { %13528 = vst [vmem:[#allocation24_spill] sm:$0xff] %v11416_v44  ;;  %v3946_v47 = vadd.f32 %v3945_v55, %v3835_v45  ;;  %v3947_v48 = vpop.f32.mrb[15].mxu1  ;;  %13550 = vst [vmem:[#allocation46_spill] sm:$0xff] %v11594_v34  ;;  %v11608_v40 = vpop.permute.xlu1 %4893  ;;  %v11618_v55 = vpack.i.bf16 %v11398_v33, %v13407_v0  ;;  %v11668_v57 = vpack.i.bf16 %v11416_v44, %v13407_v0 }
 0x48d   : > { %13529 = vst [vmem:[#allocation25_spill] sm:$0xff] %v11422_v46  ;;  %v3948_v58 = vadd.f32 %v3947_v48, %v3835_v45  ;;  %v11436_v60 = vpack.i.bf16 %v11422_v46, %v11416_v44  ;;  %13551 = vst [vmem:[#allocation47_spill] sm:$0xff] %v11596_v36  ;;  %v11606_v39 = vpop.permute.xlu0 %5211  ;;  %v11680_v49 = vpack.i.bf16 %v13407_v0, %v11422_v46 }
 0x48e   : > { %v11428_v59 = vmax.f32 %v3946_v47, 0.0  ;;  %8749 = vrot.lane.b32.xlu0 %v11426_v53, %s10235_s8  ;;  %8734 = vrot.lane.b32.xlu1 %v11378_v16, %s10240_s13  ;;  %13552 = vst [vmem:[#allocation48_spill] sm:$0xff] %v11606_v39  ;;  %13553 = vst [vmem:[#allocation49_spill] sm:$0xff] %v11608_v40 }
 0x48f   : > { %13532 = vst [vmem:[#allocation28_spill] sm:$0xff] %v11436_v60  ;;  %v11438_v61 = vmax.f32 %v3948_v58, 0.0  ;;  %13554 = vst [vmem:[#allocation50_spill] sm:$0xff] %v11618_v55 }
 0x490   : > { %13531 = vst [vmem:[#allocation27_spill] sm:$0xff] %v11428_v59  ;;  %v11526_v24 = vpack.i.bf16 %v11428_v59, %v11416_v44  ;;  %13555 = vst [vmem:[#allocation51_spill] sm:$0xff] %v11650_v21 }
 0x491   : > { %13533 = vst [vmem:[#allocation29_spill] sm:$0xff] %v11438_v61  ;;  %v11444_v10 = vpack.i.bf16 %v11438_v61, %v11428_v59  ;;  %13556 = vst [vmem:[#allocation52_spill] sm:$0xff] %v11668_v57 }
 0x492   : > { %8754 = vrot.lane.b32.xlu0 %v11426_v53, %s10236_s9  ;;  %8739 = vrot.lane.b32.xlu1 %v11378_v16, %s10241_s14  ;;  %13542 = vst [vmem:[#allocation38_spill] sm:$0xff] %v11526_v24 }
 0x496   : > { %8764 = vrot.lane.b32.xlu0 %v11452_v50, %s10233_s29  ;;  %8759 = vrot.lane.b32.xlu1 %v11452_v50, %s10232_s28 }
 0x49a   : > { %8769 = vrot.lane.b32.xlu0 %v11452_v50, %s10234_s30  ;;  %8774 = vrot.lane.b32.xlu1 %v11460_v51, %s10235_s8 }
 0x49e   : > { %8784 = vrot.lane.b32.xlu0 %v11452_v50, %s10240_s13  ;;  %8779 = vrot.lane.b32.xlu1 %v11460_v51, %s10236_s9 }
 0x4a2   : > { %8789 = vrot.lane.b32.xlu0 %v11452_v50, %s10241_s14  ;;  %8794 = vrot.lane.b32.xlu1 %v11452_v50, %s10242_s15 }
 0x4a6   : > { %8804 = vrot.lane.b32.xlu1 %v11482_v5, %s10233_s29  ;;  %8799 = vrot.lane.b32.xlu0 %v11482_v5, %s10232_s28 }
 0x4aa   : > { %8809 = vrot.lane.b32.xlu1 %v11482_v5, %s10234_s30  ;;  %8824 = vrot.lane.b32.xlu0 %v11482_v5, %s10242_s15 }
 0x4ae   : > { %8814 = vrot.lane.b32.xlu1 %v11482_v5, %s10240_s13  ;;  %8834 = vrot.lane.b32.xlu0 %v11496_v9, %s10233_s29 }
 0x4b2   : > { %8819 = vrot.lane.b32.xlu1 %v11482_v5, %s10241_s14  ;;  %8839 = vrot.lane.b32.xlu0 %v11496_v9, %s10234_s30 }
 0x4b6   : > { %8829 = vrot.lane.b32.xlu1 %v11496_v9, %s10232_s28  ;;  %8844 = vrot.lane.b32.xlu0 %v11518_v22, %s10235_s8 }
 0x4ba   : > { %8864 = vrot.lane.b32.xlu1 %v11496_v9, %s10242_s15  ;;  %8849 = vrot.lane.b32.xlu0 %v11518_v22, %s10236_s9 }
 0x4be   : > { %8869 = vrot.lane.b32.xlu1 %v11542_v28, %s10235_s8  ;;  %8854 = vrot.lane.b32.xlu0 %v11496_v9, %s10240_s13 }
 0x4c2   : > { %8874 = vrot.lane.b32.xlu1 %v11542_v28, %s10236_s9  ;;  %8859 = vrot.lane.b32.xlu0 %v11496_v9, %s10241_s14 }
 0x4c6   : > { %8884 = vrot.lane.b32.xlu1 %v11556_v15, %s10233_s29  ;;  %8879 = vrot.lane.b32.xlu0 %v11556_v15, %s10232_s28 }
 0x4ca   : > { %8889 = vrot.lane.b32.xlu1 %v11556_v15, %s10234_s30  ;;  %8894 = vrot.lane.b32.xlu0 %v11564_v17, %s10235_s8 }
 0x4ce   : > { %8904 = vrot.lane.b32.xlu1 %v11556_v15, %s10240_s13  ;;  %8899 = vrot.lane.b32.xlu0 %v11564_v17, %s10236_s9 }
 0x4d2   : > { %8909 = vrot.lane.b32.xlu1 %v11556_v15, %s10241_s14  ;;  %8914 = vrot.lane.b32.xlu0 %v11556_v15, %s10242_s15 }
 0x4d6   : > { %8924 = vrot.lane.b32.xlu0 %v11580_v30, %s10233_s29  ;;  %8919 = vrot.lane.b32.xlu1 %v11580_v30, %s10232_s28 }
 0x4da   : > { %8929 = vrot.lane.b32.xlu0 %v11580_v30, %s10234_s30  ;;  %8944 = vrot.lane.b32.xlu1 %v11580_v30, %s10242_s15 }
 0x4de   : > { %8934 = vrot.lane.b32.xlu0 %v11580_v30, %s10240_s13  ;;  %8954 = vrot.lane.b32.xlu1 %v11592_v32, %s10233_s29 }
 0x4e2   : > { %8939 = vrot.lane.b32.xlu0 %v11580_v30, %s10241_s14  ;;  %8959 = vrot.lane.b32.xlu1 %v11592_v32, %s10234_s30 }
 0x4e6   : > { %8949 = vrot.lane.b32.xlu0 %v11592_v32, %s10232_s28  ;;  %8964 = vrot.lane.b32.xlu1 %v11408_v37, %s10235_s8 }
 0x4e8   : > { %v11614_v42 = vpop.permute.xlu0 %8684  ;;  %v8680_v45 = vpop.permute.xlu1 %8679 }
 0x4e9   : > { %v8682_v8 = vunpack.i.h.bf16 %v8680_v45  ;;  %v8681_v6 = vunpack.i.l.bf16 %v8680_v45 }
 0x4ea   : > { %8984 = vrot.lane.b32.xlu0 %v11618_v55, %s10235_s8  ;;  %8969 = vrot.lane.b32.xlu1 %v11408_v37, %s10236_s9 }
 0x4eb   : > { %v4095_v26 = vsel %vm1118_vm8, %v8681_v6, %v8682_v8 }
 0x4ec   : > { %v11624_v56 = vpop.permute.xlu0 %8689  ;;  %v11626_v47 = vpop.permute.xlu1 %8704 }
 0x4ee   : > { %8989 = vrot.lane.b32.xlu0 %v11618_v55, %s10236_s9  ;;  %8974 = vrot.lane.b32.xlu1 %v11592_v32, %s10240_s13 }
 0x4f0   : > { %v11632_v48 = vpop.permute.xlu0 %8694  ;;  %v11634_v58 = vpop.permute.xlu1 %8714 }
 0x4f2   : > { %8999 = vrot.lane.b32.xlu0 %v11414_v43, %s10233_s29  ;;  %8979 = vrot.lane.b32.xlu1 %v11592_v32, %s10241_s14 }
 0x4f4   : > { %v11640_v63 = vpop.permute.xlu0 %8699  ;;  %v11642_v4 = vpop.permute.xlu1 %8719 }
 0x4f6   : > { %9004 = vrot.lane.b32.xlu0 %v11414_v43, %s10234_s30  ;;  %8994 = vrot.lane.b32.xlu1 %v11414_v43, %s10232_s28 }
 0x4f8   : > { %v8710_v19 = vpop.permute.xlu0 %8709  ;;  %v8725_v27 = vpop.permute.xlu1 %8724 }
 0x4f9   : > { %v8711_v52 = vunpack.i.l.bf16 %v8710_v19  ;;  %v8712_v44 = vunpack.i.h.bf16 %v8710_v19  ;;  %v8727_v35 = vunpack.i.h.bf16 %v8725_v27  ;;  %v8726_v0 = vunpack.i.l.bf16 %v8725_v27 }
 0x4fa   : > { %9019 = vrot.lane.b32.xlu0 %v11414_v43, %s10240_s13  ;;  %9009 = vrot.lane.b32.xlu1 %v11650_v21, %s10235_s8 }
 0x4fb   : > { %v4096_v14 = vsel %vm1118_vm8, %v8682_v8, %v8711_v52 }
 0x4fc   : > { %v11656_v18 = vpop.permute.xlu0 %8744  ;;  %v11658_v13 = vpop.permute.xlu1 %8729 }
 0x4fe   : > { %9024 = vrot.lane.b32.xlu0 %v11414_v43, %s10241_s14  ;;  %9014 = vrot.lane.b32.xlu1 %v11650_v21, %s10236_s9 }
 0x500   : > { %v8750_v12 = vpop.permute.xlu0 %8749  ;;  %v11664_v3 = vpop.permute.xlu1 %8734 }
 0x501   : > { %v8751_v45 = vunpack.i.l.bf16 %v8750_v12  ;;  %v8752_v7 = vunpack.i.h.bf16 %v8750_v12 }
 0x502   : > { %9034 = vrot.lane.b32.xlu1 %v11668_v57, %s10233_s29  ;;  %9029 = vrot.lane.b32.xlu0 %v11668_v57, %s10232_s28 }
 0x503   : > { %v4626_v8 = vsel %vm1229_vm11, %v8727_v35, %v8751_v45 }
 0x504   : > { %v11674_v54 = vpop.permute.xlu0 %8754  ;;  %v11676_v41 = vpop.permute.xlu1 %8739 }
 0x506   : > { %9039 = vrot.lane.b32.xlu1 %v11668_v57, %s10234_s30  ;;  %9059 = vrot.lane.b32.xlu0 %v11680_v49, %s10233_s29 }
 0x508   : > { %v11686_v24 = vpop.permute.xlu0 %8764  ;;  %v8760_v23 = vpop.permute.xlu1 %8759 }
 0x509   : > { %v8762_v25 = vunpack.i.h.bf16 %v8760_v23  ;;  %v8761_v33 = vunpack.i.l.bf16 %v8760_v23 }
 0x50a   : > { %9044 = vrot.lane.b32.xlu1 %v11668_v57, %s10240_s13  ;;  %9064 = vrot.lane.b32.xlu0 %v11680_v49, %s10234_s30 }
 0x50b   : > { %v4097_v46 = vsel %vm1118_vm8, %v8712_v44, %v8761_v33  ;;  %v4098_v20 = vsel %vm1118_vm8, %v8761_v33, %v8762_v25  ;;  %v4625_v44 = vsel %vm1229_vm11, %v8726_v0, %v8727_v35 }
 0x50c   : > { %v11696_v19 = vpop.permute.xlu0 %8769  ;;  %v8775_v23 = vpop.permute.xlu1 %8774  ;;  %v8184_v29 = vpack.c.bf16 %v4098_v20, %v4096_v14  ;;  %v8186_v6 = vpack.c.bf16 %v4097_v46, %v4095_v26 }
 0x50d   : > { %v8777_v27 = vunpack.i.h.bf16 %v8775_v23  ;;  %v8776_v38 = vunpack.i.l.bf16 %v8775_v23 }
 0x50e   : > { %9049 = vrot.lane.b32.xlu1 %v11668_v57, %s10241_s14  ;;  %9069 = vrot.lane.b32.xlu0 %v11436_v60, %s10235_s8 }
 0x50f   : > { %v4627_v52 = vsel %vm1229_vm11, %v8752_v7, %v8776_v38  ;;  %8185 = vmatprep.subr.bf16.mxu1 %v8184_v29  ;;  %v4628_v25 = vsel %vm1229_vm11, %v8776_v38, %v8777_v27  ;;  %v13557_v38 = vmov 0.0  }
 0x510   : > { %8187 = vmatpush1.bf16.msra.mxu1 %v8186_v6  ;;  %v11706_v26 = vpop.permute.xlu0 %8784  ;;  %v11708_v33 = vpop.permute.xlu1 %8779  ;;  %v8232_v46 = vpack.c.bf16 %v4628_v25, %v4626_v8  ;;  %v8234_v20 = vpack.c.bf16 %v4627_v52, %v4625_v44  ;;  %v11720_v7 = vpack.i.bf16 %v11428_v59, %v13557_v38  ;;  %v11746_v27 = vpack.i.bf16 %v13557_v38, %v11438_v61 }
 0x512   : > { %9054 = vrot.lane.b32.xlu1 %v11680_v49, %s10232_s28  ;;  %9074 = vrot.lane.b32.xlu0 %v11436_v60, %s10236_s9  ;;  %13558 = vst [vmem:[#allocation53_spill] sm:$0xff] %v11720_v7  ;;  %13562 = vst [vmem:[#allocation57_spill] sm:$0xff] %v11746_v27 }
 0x513   : > { %8233 = vmatprep.subr.bf16.mxu0 %v8232_v46 }
 0x514   : > { %8235 = vmatpush1.bf16.msra.mxu0 %v8234_v20  ;;  %v11714_v0 = vpop.permute.xlu0 %8789  ;;  %v11716_v35 = vpop.permute.xlu1 %8794 }
 0x516   : > { %9089 = vrot.lane.b32.xlu1 %v11720_v7, %s10235_s8  ;;  %9079 = vrot.lane.b32.xlu0 %v11680_v49, %s10240_s13 }
 0x518   : > { %v8800_v12 = vpop.permute.xlu0 %8799  ;;  %v11726_v14 = vpop.permute.xlu1 %8804 }
 0x519   : > { %v8802_v11 = vunpack.i.h.bf16 %v8800_v12  ;;  %v8801_v39 = vunpack.i.l.bf16 %v8800_v12 }
 0x51a   : > { %9094 = vrot.lane.b32.xlu1 %v11720_v7, %s10236_s9  ;;  %9084 = vrot.lane.b32.xlu0 %v11680_v49, %s10241_s14 }
 0x51c   : > { %v11732_v29 = vpop.permute.xlu0 %8824  ;;  %v11734_v45 = vpop.permute.xlu1 %8809 }
 0x51d   : > { %13559 = vst [vmem:[#allocation54_spill] sm:$0xff] %v11734_v45 }
 0x51e   : > { %9104 = vrot.lane.b32.xlu1 %v11444_v10, %s10233_s29  ;;  %9099 = vrot.lane.b32.xlu0 %v11444_v10, %s10232_s28 }
 0x520   : > { %v11740_v23 = vpop.permute.xlu0 %8834  ;;  %v11742_v6 = vpop.permute.xlu1 %8814 }
 0x521   : > { %13560 = vst [vmem:[#allocation55_spill] sm:$0xff] %v11740_v23  ;;  %13561 = vst [vmem:[#allocation56_spill] sm:$0xff] %v11742_v6 }
 0x522   : > { %9109 = vrot.lane.b32.xlu1 %v11444_v10, %s10234_s30  ;;  %9114 = vrot.lane.b32.xlu0 %v11746_v27, %s10235_s8  ;;  %s13732_s30 = smov 127   ;;  %s13752_s8 = smov 111  }
 0x524   : > { %v11752_v44 = vpop.permute.xlu0 %8839  ;;  %v11754_v52 = vpop.permute.xlu1 %8819 }
 0x525   : > { %13563 = vst [vmem:[#allocation58_spill] sm:$0xff] %v11752_v44  ;;  %13564 = vst [vmem:[#allocation59_spill] sm:$0xff] %v11754_v52 }
 0x526   : > { %9129 = vrot.lane.b32.xlu1 %v11444_v10, %s10240_s13  ;;  %9119 = vrot.lane.b32.xlu0 %v11746_v27, %s10236_s9  ;;  %s13786_s9 = smov 95   ;;  %s13794_s13 = smov 30  }
 0x528   : > { %v8845_v8 = vpop.permute.xlu0 %8844  ;;  %v8830_v25 = vpop.permute.xlu1 %8829 }
 0x529   : > { %v8832_v36 = vunpack.i.h.bf16 %v8830_v25 }
 0x52a   : > { %9134 = vrot.lane.b32.xlu1 %v11444_v10, %s10241_s14  ;;  %9124 = vrot.lane.b32.xlu0 %v11592_v32, %s10242_s15  ;;  %s13615_s14 = smov 112  }
 0x52c   : > { %v11764_v46 = vpop.permute.xlu0 %8849  ;;  %v11766_v20 = vpop.permute.xlu1 %8864 }
 0x52d   : > { %13565 = vst [vmem:[#allocation60_spill] sm:$0xff] %v11764_v46  ;;  %13566 = vst [vmem:[#allocation61_spill] sm:$0xff] %v11766_v20  ;;  %v8831_v46 = vunpack.i.l.bf16 %v8830_v25  ;;  %v4099_v20 = vsel %vm1118_vm8, %v8801_v39, %v8802_v11 }
 0x52e   : > { %9139 = vrot.lane.b32.xlu1 %v11414_v43, %s10242_s15  ;;  %9144 = vrot.lane.b32.xlu0 %v11668_v57, %s10242_s15 }
 0x52f   : > { %v4100_v44 = vsel %vm1118_vm8, %v8802_v11, %v8831_v46  ;;  %v4734_v46 = vld [vmem:[%s13333_s5 + $0x50] sm:$0xff] }
 0x530   : > { %v11772_v59 = vpop.permute.xlu0 %8854  ;;  %v8870_v61 = vpop.permute.xlu1 %8869 }
 0x531   : > { %13567 = vst [vmem:[#allocation62_spill] sm:$0xff] %v11772_v59  ;;  %v8846_v59 = vunpack.i.l.bf16 %v8845_v8  ;;  %v8871_v12 = vunpack.i.l.bf16 %v8870_v61  ;;  %v8872_v6 = vunpack.i.h.bf16 %v8870_v61 }
 0x532   : > { %9154 = vrot.lane.b32.xlu0 %v11444_v10, %s10242_s15  ;;  %9149 = vrot.lane.b32.xlu1 %v11680_v49, %s10242_s15 }
 0x534   : > { %v11778_v2 = vpop.permute.xlu0 %8859  ;;  %v11780_v62 = vpop.permute.xlu1 %8874 }
 0x535   : > { %13568 = vst [vmem:[#allocation63_spill] sm:$0xff] %v11778_v2  ;;  %13569 = vst [vmem:[#allocation64_spill] sm:$0xff] %v11780_v62  ;;  %v8847_v2 = vunpack.i.h.bf16 %v8845_v8 }
 0x536   : > { %9164 = vrot.lane.b32.xlu0 %v11426_v53, %s10243_s16  ;;  %9159 = vrot.lane.b32.xlu1 %v11396_v31, %s10243_s16 }
 0x538   : > { %v8880_v52 = vpop.permute.xlu0 %8879  ;;  %v11786_v40 = vpop.permute.xlu1 %8884 }
 0x539   : > { %13570 = vst [vmem:[#allocation65_spill] sm:$0xff] %v11786_v40  ;;  %v8882_v38 = vunpack.i.h.bf16 %v8880_v52  ;;  %v8881_v34 = vunpack.i.l.bf16 %v8880_v52 }
 0x53a   : > { %9174 = vrot.lane.b32.xlu0 %v11518_v22, %s10243_s16  ;;  %9169 = vrot.lane.b32.xlu1 %v11460_v51, %s10243_s16 }
 0x53b   : > { %v4101_v62 = vsel %vm1118_vm8, %v8832_v36, %v8881_v34  ;;  %v4102_v40 = vsel %vm1118_vm8, %v8881_v34, %v8882_v38  ;;  %v4629_v36 = vsel %vm1229_vm11, %v8846_v59, %v8847_v2  ;;  %v4630_v34 = vsel %vm1229_vm11, %v8847_v2, %v8871_v12 }
 0x53c   : > { %v8895_v25 = vpop.permute.xlu0 %8894  ;;  %v11796_v23 = vpop.permute.xlu1 %8889  ;;  %v8188_v52 = vpack.c.bf16 %v4102_v40, %v4100_v44  ;;  %v8190_v39 = vpack.c.bf16 %v4101_v62, %v4099_v20 }
 0x53d   : > { %v8897_v8 = vunpack.i.h.bf16 %v8895_v25  ;;  %v8896_v45 = vunpack.i.l.bf16 %v8895_v25 }
 0x53e   : > { %9184 = vrot.lane.b32.xlu0 %v11564_v17, %s10243_s16  ;;  %9179 = vrot.lane.b32.xlu1 %v11542_v28, %s10243_s16 }
 0x53f   : > { %v4631_v11 = vsel %vm1229_vm11, %v8872_v6, %v8896_v45  ;;  %8189 = vmatprep.subr.bf16.mxu1 %v8188_v52  ;;  %v4632_v38 = vsel %vm1229_vm11, %v8896_v45, %v8897_v8 }
 0x540   : > { %8191 = vmatpush1.bf16.msra.mxu1 %v8190_v39  ;;  %v11806_v62 = vpop.permute.xlu0 %8899  ;;  %v11808_v61 = vpop.permute.xlu1 %8904  ;;  %v8236_v40 = vpack.c.bf16 %v4632_v38, %v4630_v34  ;;  %v8238_v44 = vpack.c.bf16 %v4631_v11, %v4629_v36 }
 0x541   : > { %13571 = vst [vmem:[#allocation66_spill] sm:$0xff] %v11806_v62 }
 0x542   : > { %9194 = vrot.lane.b32.xlu0 %v11618_v55, %s10243_s16  ;;  %9189 = vrot.lane.b32.xlu1 %v11408_v37, %s10243_s16 }
 0x543   : > { %8237 = vmatprep.subr.bf16.mxu0 %v8236_v40 }
 0x544   : > { %8239 = vmatpush1.bf16.msra.mxu0 %v8238_v44  ;;  %v11814_v59 = vpop.permute.xlu0 %8914  ;;  %v11816_v2 = vpop.permute.xlu1 %8909 }
 0x545   : > { %13572 = vst [vmem:[#allocation67_spill] sm:$0xff] %v11814_v59  ;;  %13573 = vst [vmem:[#allocation68_spill] sm:$0xff] %v11816_v2 }
 0x546   : > { %9204 = vrot.lane.b32.xlu0 %v11436_v60, %s10243_s16  ;;  %9199 = vrot.lane.b32.xlu1 %v11650_v21, %s10243_s16 }
 0x548   : > { %v11822_v45 = vpop.permute.xlu0 %8924  ;;  %v8920_v6 = vpop.permute.xlu1 %8919 }
 0x549   : > { %v8921_v2 = vunpack.i.l.bf16 %v8920_v6 }
 0x54a   : > { %9214 = vrot.lane.b32.xlu0 %v11746_v27, %s10243_s16  ;;  %9209 = vrot.lane.b32.xlu1 %v11720_v7, %s10243_s16  ;;  %s13820_s16 = smov 14  }
 0x54c   : > { %v11831_v20 = vpop.permute.xlu0 %8929  ;;  %v11833_v12 = vpop.permute.xlu1 %8944 }
 0x54d   : > { %13574 = vst [vmem:[#allocation69_spill] sm:$0xff] %v11831_v20  ;;  %13575 = vst [vmem:[#allocation70_spill] sm:$0xff] %v11833_v12 }
 0x54e   : > { %9219 = vrot.lane.b32.xlu0 %v11396_v31, %s10244_s17  ;;  %5529 = vrot.lane.b32.xlu1 %v4734_v46, %s10246_s19 }
 0x550   : > { %v11838_v25 = vpop.permute.xlu0 %8934  ;;  %v11840_v52 = vpop.permute.xlu1 %8954 }
 0x551   : > { %13576 = vst [vmem:[#allocation71_spill] sm:$0xff] %v11838_v25 }
 0x552   : > { %9229 = vrot.lane.b32.xlu0 %v11460_v51, %s10244_s17  ;;  %9224 = vrot.lane.b32.xlu1 %v11426_v53, %s10244_s17 }
 0x554   : > { %v11846_v39 = vpop.permute.xlu0 %8939  ;;  %v11848_v8 = vpop.permute.xlu1 %8959 }
 0x555   : > { %13577 = vst [vmem:[#allocation72_spill] sm:$0xff] %v11846_v39  ;;  %13578 = vst [vmem:[#allocation73_spill] sm:$0xff] %v11848_v8 }
 0x556   : > { %9239 = vrot.lane.b32.xlu0 %v11542_v28, %s10244_s17  ;;  %9234 = vrot.lane.b32.xlu1 %v11518_v22, %s10244_s17  ;;  %v8772_v28 = vunpack.i.h.bf16 %v11696_v19 }
 0x558   : > { %v8950_v36 = vpop.permute.xlu0 %8949  ;;  %v8965_v11 = vpop.permute.xlu1 %8964 }
 0x559   : > { %v8967_v8 = vunpack.i.h.bf16 %v8965_v11  ;;  %v8966_v20 = vunpack.i.l.bf16 %v8965_v11 }
 0x55a   : > { %9249 = vrot.lane.b32.xlu0 %v11408_v37, %s10244_s17  ;;  %9244 = vrot.lane.b32.xlu1 %v11564_v17, %s10244_s17 }
 0x55c   : > { %v8985_v34 = vpop.permute.xlu0 %8984  ;;  %v11858_v38 = vpop.permute.xlu1 %8969 }
 0x55d   : > { %13579 = vst [vmem:[#allocation74_spill] sm:$0xff] %v11858_v38  ;;  %v8922_v38 = vunpack.i.h.bf16 %v8920_v6  ;;  %v8986_v6 = vunpack.i.l.bf16 %v8985_v34  ;;  %v8987_v37 = vunpack.i.h.bf16 %v8985_v34  ;;  %v8686_v34 = vunpack.i.l.bf16 %v11614_v42 }
 0x55e   : > { %9259 = vrot.lane.b32.xlu0 %v11650_v21, %s10244_s17  ;;  %9254 = vrot.lane.b32.xlu1 %v11618_v55, %s10244_s17 }
 0x560   : > { %v11864_v40 = vpop.permute.xlu0 %8989  ;;  %v11866_v44 = vpop.permute.xlu1 %8974 }
 0x561   : > { %13580 = vst [vmem:[#allocation75_spill] sm:$0xff] %v11864_v40  ;;  %v8951_v40 = vunpack.i.l.bf16 %v8950_v36 }
 0x562   : > { %9269 = vrot.lane.b32.xlu0 %v11720_v7, %s10244_s17  ;;  %9264 = vrot.lane.b32.xlu1 %v11436_v60, %s10244_s17  ;;  %v8952_v7 = vunpack.i.h.bf16 %v8950_v36  ;;  %v4103_v60 = vsel %vm1118_vm8, %v8921_v2, %v8922_v38 }
 0x564   : > { %v11872_v46 = vpop.permute.xlu0 %8999  ;;  %v11874_v39 = vpop.permute.xlu1 %8979 }
 0x565   : > { %13581 = vst [vmem:[#allocation76_spill] sm:$0xff] %v11874_v39 }
 0x566   : > { %9279 = vrot.lane.b32.xlu0 %v11354_v1, %s10248_s21  ;;  %9274 = vrot.lane.b32.xlu1 %v11746_v27, %s10244_s17  ;;  %v4104_v27 = vsel %vm1118_vm8, %v8922_v38, %v8951_v40  ;;  %v8692_v40 = vunpack.i.h.bf16 %v11624_v56  ;;  %s13652_s17 = smov 96  }
 0x568   : > { %v11880_v62 = vpop.permute.xlu0 %9004  ;;  %v8995_v12 = vpop.permute.xlu1 %8994 }
 0x569   : > { %13582 = vst [vmem:[#allocation77_spill] sm:$0xff] %v11880_v62  ;;  %v8997_v55 = vunpack.i.h.bf16 %v8995_v12  ;;  %v8996_v21 = vunpack.i.l.bf16 %v8995_v12 }
 0x56a   : > { %9289 = vrot.lane.b32.xlu0 %v11452_v50, %s10248_s21  ;;  %9284 = vrot.lane.b32.xlu1 %v11378_v16, %s10248_s21 }
 0x56b   : > { %v4105_v39 = vsel %vm1118_vm8, %v8952_v7, %v8996_v21  ;;  %v4106_v62 = vsel %vm1118_vm8, %v8996_v21, %v8997_v55  ;;  %v4633_v7 = vsel %vm1229_vm11, %v8966_v20, %v8967_v8  ;;  %v4634_v21 = vsel %vm1229_vm11, %v8967_v8, %v8986_v6 }
 0x56c   : > { %v11890_v36 = vpop.permute.xlu0 %9019  ;;  %v9010_v12 = vpop.permute.xlu1 %9009  ;;  %v8192_v17 = vpack.c.bf16 %v4106_v62, %v4104_v27  ;;  %v8194_v2 = vpack.c.bf16 %v4105_v39, %v4103_v60  ;;  %v8687_v8 = vunpack.i.h.bf16 %v11614_v42  ;;  %v8691_v6 = vunpack.i.l.bf16 %v11624_v56  ;;  %v5052_v42 = vld [vmem:[%s13333_s5 + $0x18] sm:$0xff] }
 0x56d   : > { %v9012_v11 = vunpack.i.h.bf16 %v9010_v12  ;;  %v9011_v59 = vunpack.i.l.bf16 %v9010_v12  ;;  %v8707_v12 = vunpack.i.h.bf16 %v11626_v47  ;;  %v8716_v56 = vunpack.i.l.bf16 %v11634_v58 }
 0x56e   : > { %9299 = vrot.lane.b32.xlu0 %v11496_v9, %s10248_s21  ;;  %9294 = vrot.lane.b32.xlu1 %v11482_v5, %s10248_s21 }
 0x56f   : > { %v4635_v38 = vsel %vm1229_vm11, %v8987_v37, %v9011_v59  ;;  %8193 = vmatprep.subr.bf16.mxu1 %v8192_v17  ;;  %v4636_v55 = vsel %vm1229_vm11, %v9011_v59, %v9012_v11  ;;  %v8697_v11 = vunpack.i.h.bf16 %v11632_v48 }
 0x570   : > { %8195 = vmatpush1.bf16.msra.mxu1 %v8194_v2  ;;  %v11900_v60 = vpop.permute.xlu0 %9024  ;;  %v11902_v27 = vpop.permute.xlu1 %9014  ;;  %v8240_v62 = vpack.c.bf16 %v4636_v55, %v4634_v21  ;;  %v8242_v39 = vpack.c.bf16 %v4635_v38, %v4633_v7  ;;  %v8706_v2 = vunpack.i.l.bf16 %v11626_v47  ;;  %v8696_v7 = vunpack.i.l.bf16 %v11632_v48 }
 0x571   : > { %13583 = vst [vmem:[#allocation78_spill] sm:$0xff] %v11900_v60  ;;  %13584 = vst [vmem:[#allocation79_spill] sm:$0xff] %v11902_v27  ;;  %v11941_v55 = vsel %vm1151_vm9, %v8686_v34, %v8687_v8  ;;  %v8702_v47 = vunpack.i.h.bf16 %v11640_v63  ;;  %v8701_v48 = vunpack.i.l.bf16 %v11640_v63  ;;  %v8732_v60 = vunpack.i.h.bf16 %v11658_v13 }
 0x572   : > { %9309 = vrot.lane.b32.xlu0 %v11580_v30, %s10248_s21  ;;  %9304 = vrot.lane.b32.xlu1 %v11556_v15, %s10248_s21  ;;  %v8731_v27 = vunpack.i.l.bf16 %v11658_v13  ;;  %v11955_v34 = vsel %vm1540_vm4, %v8706_v2, %v8707_v12  ;;  %v8746_v63 = vunpack.i.l.bf16 %v11656_v18  ;;  %v8771_v13 = vunpack.i.l.bf16 %v11696_v19 }
 0x573   : > { %8241 = vmatprep.subr.bf16.mxu0 %v8240_v62  ;;  %v11944_v62 = vsel %vm1190_vm10, %v8691_v6, %v8692_v40  ;;  %13589 = vst [vmem:[#allocation84_spill] sm:$0xff] %v11955_v34  ;;  %v11958_v6 = vsel %vm1462_vm2, %v8696_v7, %v8697_v11  ;;  %v11970_v2 = vsel %vm1151_vm9, %v8687_v8, %v8716_v56  ;;  %v8722_v7 = vunpack.i.h.bf16 %v11642_v4 }
 0x574   : > { %8243 = vmatpush1.bf16.msra.mxu0 %v8242_v39  ;;  %v11908_v37 = vpop.permute.xlu0 %9029  ;;  %v11910_v17 = vpop.permute.xlu1 %9034  ;;  %v8721_v39 = vunpack.i.l.bf16 %v11642_v4  ;;  %v11977_v25 = vsel %vm1501_vm3, %v8701_v48, %v8702_v47  ;;  %v11981_v53 = vsel %vm1268_vm12, %v8731_v27, %v8732_v60  ;;  %v8736_v19 = vunpack.i.l.bf16 %v11664_v3 }
 0x575   : > { %13585 = vst [vmem:[#allocation80_spill] sm:$0xff] %v11910_v17  ;;  %v8786_v17 = vunpack.i.l.bf16 %v11706_v26  ;;  %13591 = vst [vmem:[#allocation86_spill] sm:$0xff] %v11977_v25  ;;  %v8741_v8 = vunpack.i.l.bf16 %v11676_v41  ;;  %v8737_v27 = vunpack.i.h.bf16 %v11664_v3  ;;  %v12001_v48 = vsel %vm1190_vm10, %v8722_v7, %v8771_v13 }
 0x576   : > { %9319 = vrot.lane.b32.xlu0 %v11414_v43, %s10248_s21  ;;  %9314 = vrot.lane.b32.xlu1 %v11592_v32, %s10248_s21  ;;  %13592 = vst [vmem:[#allocation87_spill] sm:$0xff] %v11981_v53  ;;  %v11988_v4 = vsel %vm1190_vm10, %v8692_v40, %v8721_v39  ;;  %v12016_v3 = vsel %vm1190_vm10, %v8771_v13, %v8772_v28  ;;  %v8791_v7 = vunpack.i.l.bf16 %v11714_v0  ;;  %v9032_v13 = vunpack.i.h.bf16 %v11908_v37 }
 0x578   : > { %v11916_v59 = vpop.permute.xlu0 %9059  ;;  %v11918_v20 = vpop.permute.xlu1 %9039 }
 0x579   : > { %13586 = vst [vmem:[#allocation81_spill] sm:$0xff] %v11918_v20  ;;  %v8717_v20 = vunpack.i.h.bf16 %v11634_v58  ;;  %v8787_v58 = vunpack.i.h.bf16 %v11706_v26  ;;  %v8756_v26 = vunpack.i.l.bf16 %v11674_v54 }
 0x57a   : > { %9329 = vrot.lane.b32.xlu0 %v11680_v49, %s10248_s21  ;;  %9324 = vrot.lane.b32.xlu1 %v11668_v57, %s10248_s21 }
 0x57b   : > { %v12031_v28 = vsel %vm1268_vm12, %v8732_v60, %v8756_v26  ;;  %v13605_v60 = vunpack.i.h.bf16 %v11732_v29 }
 0x57c   : > { %v11936_v38 = vpop.permute.xlu0 %9064  ;;  %v11938_v21 = vpop.permute.xlu1 %9044  ;;  %13594 = vst [vmem:[#allocation89_spill] sm:$0xff] %v12031_v28 }
 0x57d   : > { %13587 = vst [vmem:[#allocation82_spill] sm:$0xff] %v11936_v38  ;;  %13588 = vst [vmem:[#allocation83_spill] sm:$0xff] %v11938_v21  ;;  %v8767_v38 = vunpack.i.h.bf16 %v11686_v24  ;;  %v8766_v21 = vunpack.i.l.bf16 %v11686_v24  ;;  %v8747_v24 = vunpack.i.h.bf16 %v11656_v18  ;;  %v11994_v18 = vsel %vm1540_vm4, %v8707_v12, %v8746_v63 }
 0x57e   : > { %5845 = vrot.lane.b32.xlu0 %v5052_v42, %s10246_s19  ;;  %9334 = vrot.lane.b32.xlu1 %v11444_v10, %s10248_s21  ;;  %v8781_v12 = vunpack.i.l.bf16 %v11708_v33  ;;  %v12013_v63 = vsel %vm1462_vm2, %v8786_v17, %v8787_v58 }
 0x57f   : > { %v11998_v56 = vsel %vm1151_vm9, %v8717_v20, %v8766_v21  ;;  %v12008_v39 = vsel %vm1151_vm9, %v8766_v21, %v8767_v38  ;;  %v8792_v20 = vunpack.i.h.bf16 %v11714_v0  ;;  %v12028_v38 = vsel %vm1462_vm2, %v8697_v11, %v8736_v19  ;;  %v13601_v19 = vld [vmem:[#allocation56_spill] sm:$0xff] }
 0x580   : > { %v11965_v42 = vpop.permute.xlu0 %9069  ;;  %v11967_v22 = vpop.permute.xlu1 %9049  ;;  %v12034_v0 = vsel %vm1501_vm3, %v8702_v47, %v8741_v8  ;;  %v12049_v11 = vsel %vm1462_vm2, %v8737_v27, %v8786_v17  ;;  %v8742_v8 = vunpack.i.h.bf16 %v11676_v41 }
 0x581   : > { %13590 = vst [vmem:[#allocation85_spill] sm:$0xff] %v11967_v22  ;;  %v8797_v22 = vunpack.i.h.bf16 %v11716_v35  ;;  %13595 = vst [vmem:[#allocation90_spill] sm:$0xff] %v12034_v0  ;;  %v12071_v27 = vsel %vm1501_vm3, %v8791_v7, %v8792_v20 }
 0x582   : > { %9344 = vrot.lane.b32.xlu0 %v11378_v16, %s10249_s22  ;;  %9339 = vrot.lane.b32.xlu1 %v11354_v1, %s10249_s22  ;;  %v8782_v16 = vunpack.i.h.bf16 %v11708_v33  ;;  %v8757_v33 = vunpack.i.h.bf16 %v11674_v54  ;;  %13599 = vst [vmem:[#allocation94_spill] sm:$0xff] %v12071_v27 }
 0x584   : > { %v12003_v1 = vpop.permute.xlu0 %9074  ;;  %v12005_v40 = vpop.permute.xlu1 %9054  ;;  %v12052_v47 = vsel %vm1268_vm12, %v8757_v33, %v8781_v12  ;;  %v12057_v26 = vsel %vm1268_vm12, %v8781_v12, %v8782_v16  ;;  %v8807_v16 = vunpack.i.h.bf16 %v11726_v14  ;;  %v8806_v12 = vunpack.i.l.bf16 %v11726_v14  ;;  %v13600_v33 = vld [vmem:[#allocation54_spill] sm:$0xff] }
 0x585   : > { %13593 = vst [vmem:[#allocation88_spill] sm:$0xff] %v12003_v1  ;;  %v8796_v1 = vunpack.i.l.bf16 %v11716_v35  ;;  %13596 = vst [vmem:[#allocation91_spill] sm:$0xff] %v12052_v47  ;;  %v8811_v54 = vunpack.i.l.bf16 %v13600_v33  ;;  %v9071_v47 = vunpack.i.l.bf16 %v11965_v42 }
 0x586   : > { %9354 = vrot.lane.b32.xlu0 %v11482_v5, %s10249_s22  ;;  %9349 = vrot.lane.b32.xlu1 %v11452_v50, %s10249_s22  ;;  %13597 = vst [vmem:[#allocation92_spill] sm:$0xff] %v12057_v26  ;;  %v12105_v41 = vsel %vm1151_vm9, %v8806_v12, %v8807_v16  ;;  %v13608_v50 = vld [vmem:[#allocation55_spill] sm:$0xff]  ;;  %v13609_v5 = vunpack.i.h.bf16 %v13601_v19  ;;  %v8906_v26 = vunpack.i.l.bf16 %v11808_v61 }
 0x587   : > { %v12061_v58 = vsel %vm1540_vm4, %v8747_v24, %v8796_v1  ;;  %v12068_v17 = vsel %vm1540_vm4, %v8796_v1, %v8797_v22  ;;  %v8826_v24 = vunpack.i.l.bf16 %v11732_v29  ;;  %v8816_v1 = vunpack.i.l.bf16 %v13601_v19 }
 0x588   : > { %v12036_v21 = vpop.permute.xlu0 %9079  ;;  %v12038_v35 = vpop.permute.xlu1 %9089  ;;  %13598 = vst [vmem:[#allocation93_spill] sm:$0xff] %v12061_v58  ;;  %v8836_v12 = vunpack.i.l.bf16 %v13608_v50 }
 0x589   : > { %v12110_v14 = vsel %vm1540_vm4, %v8826_v24, %v13605_v60 }
 0x58a   : > { %9364 = vrot.lane.b32.xlu0 %v11556_v15, %s10249_s22  ;;  %9359 = vrot.lane.b32.xlu1 %v11496_v9, %s10249_s22  ;;  %v12086_v9 = vsel %vm1501_vm3, %v8742_v8, %v8791_v7  ;;  %v9031_v15 = vunpack.i.l.bf16 %v11908_v37  ;;  %13606 = vst [vmem:[#allocation96_spill] sm:$0xff] %v12110_v14  ;;  %v9056_v37 = vunpack.i.l.bf16 %v12005_v40  ;;  %v8837_v8 = vunpack.i.h.bf16 %v13608_v50 }
 0x58b   : > { %13604 = vst [vmem:[#allocation95_spill] sm:$0xff] %v12086_v9  ;;  %v9072_v50 = vunpack.i.h.bf16 %v11965_v42 }
 0x58c   : > { %v12081_v22 = vpop.permute.xlu0 %9084  ;;  %v12083_v20 = vpop.permute.xlu1 %9094 }
 0x58d   : > { %13602 = vst [vmem:[#allocation54_spill] sm:$0xff] %v12081_v22  ;;  %13603 = vst [vmem:[#allocation56_spill] sm:$0xff] %v12083_v20  ;;  %v12125_v22 = vsel %vm1462_vm2, %v8816_v1, %v13609_v5  ;;  %v13610_v20 = vld [vmem:[#allocation65_spill] sm:$0xff]  ;;  %v9091_v5 = vunpack.i.l.bf16 %v12038_v35  ;;  %v4108_v1 = vsel %vm1118_vm8, %v9032_v13, %v9056_v37 }
 0x58e   : > { %9374 = vrot.lane.b32.xlu0 %v11592_v32, %s10249_s22  ;;  %9369 = vrot.lane.b32.xlu1 %v11580_v30, %s10249_s22  ;;  %v13607_v30 = vunpack.i.h.bf16 %v13600_v33  ;;  %v8887_v53 = vunpack.i.h.bf16 %v13610_v20  ;;  %v9057_v32 = vunpack.i.h.bf16 %v12005_v40 }
 0x590   : > { %v12118_v7 = vsel %vm1190_vm10, %v8811_v54, %v13607_v30  ;;  %v9100_v60 = vpop.permute.xlu0 %9099  ;;  %v12127_v24 = vpop.permute.xlu1 %9104  ;;  %v8886_v30 = vunpack.i.l.bf16 %v13610_v20  ;;  %v4107_v54 = vsel %vm1118_vm8, %v9031_v15, %v9032_v13 }
 0x591   : > { %v9102_v0 = vunpack.i.h.bf16 %v9100_v60  ;;  %v9101_v27 = vunpack.i.l.bf16 %v9100_v60  ;;  %v13611_v60 = vld [vmem:[#allocation58_spill] sm:$0xff] }
 0x592   : > { %9384 = vrot.lane.b32.xlu0 %v11668_v57, %s10249_s22  ;;  %9379 = vrot.lane.b32.xlu1 %v11414_v43, %s10249_s22  ;;  %v8842_v15 = vunpack.i.h.bf16 %v13611_v60  ;;  %v4262_v57 = vsel %vm1151_vm9, %v8807_v16, %v8836_v12  ;;  %v9092_v43 = vunpack.i.h.bf16 %v12038_v35  ;;  %v4637_v16 = vsel %vm1229_vm11, %v9071_v47, %v9072_v50 }
 0x593   : > { %v4109_v40 = vsel %vm1118_vm8, %v9057_v32, %v9101_v27  ;;  %v4110_v20 = vsel %vm1118_vm8, %v9101_v27, %v9102_v0  ;;  %v13612_v32 = vld [vmem:[#allocation62_spill] sm:$0xff]  ;;  %v8907_v0 = vunpack.i.h.bf16 %v11808_v61  ;;  %v4264_v27 = vsel %vm1151_vm9, %v8886_v30, %v8887_v53 }
 0x594   : > { %v9115_v9 = vpop.permute.xlu0 %9114  ;;  %v12144_v25 = vpop.permute.xlu1 %9109  ;;  %v8196_v42 = vpack.c.bf16 %v4110_v20, %v4108_v1  ;;  %v8198_v28 = vpack.c.bf16 %v4109_v40, %v4107_v54  ;;  %v8857_v14 = vunpack.i.h.bf16 %v13612_v32  ;;  %v8856_v13 = vunpack.i.l.bf16 %v13612_v32  ;;  %v13613_v20 = vld [vmem:[#allocation61_spill] sm:$0xff] }
 0x595   : > { %v9117_v34 = vunpack.i.h.bf16 %v9115_v9  ;;  %v9116_v58 = vunpack.i.l.bf16 %v9115_v9  ;;  %v12162_v9 = vld [vmem:[%s13333_s5 + $0x40] sm:$0xff]  ;;  %v4638_v61 = vsel %vm1229_vm11, %v9072_v50, %v9091_v5  ;;  %v9002_v12 = vunpack.i.h.bf16 %v11872_v46 }
 0x596   : > { %9394 = vrot.lane.b32.xlu0 %v11444_v10, %s10249_s22  ;;  %9389 = vrot.lane.b32.xlu1 %v11680_v49, %s10249_s22  ;;  %v9001_v54 = vunpack.i.l.bf16 %v11872_v46  ;;  %v8841_v1 = vunpack.i.l.bf16 %v13611_v60  ;;  %v4263_v32 = vsel %vm1151_vm9, %v8837_v8, %v8886_v30  ;;  %v12176_v50 = vsel %vm1462_vm2, %v8857_v14, %v8906_v26 }
 0x597   : > { %v4639_v35 = vsel %vm1229_vm11, %v9092_v43, %v9116_v58  ;;  %8197 = vmatprep.subr.bf16.mxu1 %v8196_v42  ;;  %v4640_v37 = vsel %vm1229_vm11, %v9116_v58, %v9117_v34  ;;  %v8866_v42 = vunpack.i.l.bf16 %v13613_v20  ;;  %v13614_v34 = vpack.c.bf16 %v12008_v39, %v11970_v2  ;;  %v10198_v2 = vld [vmem:[%s13333_s5] sm:$0xff] }
 0x598   : > { %8199 = vmatpush1.bf16.msra.mxu1 %v8198_v28  ;;  %v12168_v53 = vpop.permute.xlu0 %9119  ;;  %v12170_v47 = vpop.permute.xlu1 %9129  ;;  %v8244_v43 = vpack.c.bf16 %v4640_v37, %v4638_v61  ;;  %v8246_v40 = vpack.c.bf16 %v4639_v35, %v4637_v16  ;;  %v8927_v46 = vunpack.i.h.bf16 %v11822_v45  ;;  %v8926_v28 = vunpack.i.l.bf16 %v11822_v45 }
 0x599   : > { %8201 = vmatprep.subr.bf16.mxu1 %v13614_v34  ;;  %v8956_v58 = vunpack.i.l.bf16 %v11840_v52  ;;  %v4950_v8 = vsel %vm1462_vm2, %v8906_v26, %v8907_v0  ;;  %v9022_v14 = vunpack.i.h.bf16 %v11890_v36  ;;  %v9021_v30 = vunpack.i.l.bf16 %v11890_v36  ;;  %v13623_v34 = vld [vmem:[#allocation80_spill] sm:$0xff] }
 0x59a   : > { %9399 = vrot.lane.b32.xlu0 %v11396_v31, %s13615_s14  ;;  %6079 = vrot.lane.b32.xlu1 %v12162_v9, %s10246_s19  ;;  %v8204_v45 = vpack.c.bf16 %v4264_v27, %v4262_v57  ;;  %v13616_v39 = vunpack.i.h.bf16 %v13601_v19  ;;  %v9107_v16 = vunpack.i.h.bf16 %v12127_v24  ;;  %v9106_v26 = vunpack.i.l.bf16 %v12127_v24 }
 0x59b   : > { %8245 = vmatprep.subr.bf16.mxu0 %v8244_v43  ;;  %8082 = vmatmul.mubr.msk.f32.vlgmr.msra.gmra.mrb[16].mxu1 %vm1728_vm1, %v10198_v2  ;;  %v13617_v0 = vpack.c.bf16 %v11998_v56, %v11941_v55  ;;  %v8206_v61 = vpack.c.bf16 %v4263_v32, %v12105_v41  ;;  %v4268_v57 = vsel %vm1151_vm9, %v9001_v54, %v9002_v12  ;;  %v8892_v19 = vunpack.i.h.bf16 %v11796_v23 }
 0x59c   : > { %v4948_v5 = vsel %vm1462_vm2, %v13616_v39, %v8856_v13  ;;  %8247 = vmatpush1.bf16.msra.mxu0 %v8246_v40  ;;  %v12203_v36 = vpop.permute.xlu0 %9124  ;;  %v12205_v35 = vpop.permute.xlu1 %9134  ;;  %v8957_v13 = vunpack.i.h.bf16 %v11840_v52  ;;  %v13618_v24 = vpack.c.bf16 %v12013_v63, %v12028_v38  ;;  %v8270_v56 = vpack.c.bf16 %v12176_v50, %v12125_v22  ;;  %v13619_v52 = vld [vmem:[#allocation26_spill] sm:$0xff]  ;;  %v13620_v63 = vld [vmem:[#allocation71_spill] sm:$0xff] }
 0x59d   : > { %8203 = vmatpush1.bf16.msra.mxu1 %v13617_v0  ;;  %v8268_v55 = vpack.c.bf16 %v4950_v8, %v4948_v5  ;;  %v4265_v27 = vsel %vm1151_vm9, %v8926_v28, %v8927_v46  ;;  %v8976_v37 = vunpack.i.l.bf16 %v11866_v44  ;;  %v9061_v41 = vunpack.i.l.bf16 %v11916_v59  ;;  %v13621_v40 = vld [vmem:[#allocation46_spill] sm:$0xff] }
 0x59e   : > { %8205 = vmatprep.subr.bf16.mxu1 %v8204_v45  ;;  %8265 = vmatprep.subr.bf16.mxu0 %v13618_v24  ;;  %v4266_v12 = vsel %vm1151_vm9, %v8927_v46, %v8956_v58  ;;  %v8937_v38 = vunpack.i.h.bf16 %v13620_v63  ;;  %v4267_v43 = vsel %vm1151_vm9, %v8957_v13, %v9001_v54  ;;  %v4954_v32 = vsel %vm1462_vm2, %v9021_v30, %v9022_v14 }
 0x59f   : > { %9409 = vrot.lane.b32.xlu0 %v11460_v51, %s13615_s14  ;;  %9404 = vrot.lane.b32.xlu1 %v13619_v52, %s13615_s14  ;;  %v8208_v22 = vpack.c.bf16 %v4268_v57, %v4266_v12  ;;  %v13622_v50 = vmov 0.0   ;;  %v9037_v28 = vunpack.i.h.bf16 %v13623_v34  ;;  %v9132_v8 = vunpack.i.h.bf16 %v12170_v47  ;;  %v13627_v12 = vld [vmem:[#allocation67_spill] sm:$0xff] }
 0x5a0   : > { %8085 = vmatmul.mubr.msk.f32.vlgmr.msra.gmra.mrb[32].mxu0 %vm1728_vm1, %v13621_v40  ;;  %4355 = vmatprep.mubr.f32.mxu1 %v13622_v50  ;;  %v9131_v2 = vunpack.i.l.bf16 %v12170_v47  ;;  %v13624_v46 = vpack.c.bf16 %v12049_v11, %v11958_v6  ;;  %v12236_v54 = vpop.permute.xlu0 %9144  ;;  %v12238_v58 = vpop.permute.xlu1 %9139  ;;  %v4272_v45 = vsel %vm1151_vm9, %v9106_v26, %v9107_v16  ;;  %v8936_v14 = vunpack.i.l.bf16 %v13620_v63  ;;  %v13625_v6 = vld [vmem:[#allocation40_spill] sm:$0xff]  ;;  %v13628_v40 = vld [vmem:[#allocation83_spill] sm:$0xff] }
 0x5a1   : > { %8207 = vmatpush1.bf16.msra.mxu1 %v8206_v61  ;;  %v8977_v39 = vunpack.i.h.bf16 %v11866_v44  ;;  %v9036_v5 = vunpack.i.l.bf16 %v13623_v34  ;;  %v9062_v0 = vunpack.i.h.bf16 %v11916_v59  ;;  %v9081_v47 = vunpack.i.l.bf16 %v12036_v21  ;;  %v13626_v11 = vld [vmem:[#allocation36_spill] sm:$0xff]  ;;  %5041 = vmatprep.mubr.f32.mxu0 %v13622_v50 }
 0x5a2   : > { %8267 = vmatpush1.bf16.msra.mxu0 %v13624_v46  ;;  %8209 = vmatprep.subr.bf16.mxu1 %v8208_v22  ;;  %v8210_v61 = vpack.c.bf16 %v4267_v43, %v4265_v27  ;;  %v4270_v16 = vsel %vm1151_vm9, %v9037_v28, %v9061_v41  ;;  %v4952_v57 = vsel %vm1462_vm2, %v8937_v38, %v8976_v37  ;;  %v8917_v63 = vunpack.i.h.bf16 %v13627_v12  ;;  %v13630_v46 = vld [vmem:[#allocation43_spill] sm:$0xff] }
 0x5a3   : > { %8269 = vmatprep.subr.bf16.mxu0 %v8268_v55  ;;  %9419 = vrot.lane.b32.xlu0 %v13625_v6, %s13615_s14  ;;  %v4953_v44 = vsel %vm1462_vm2, %v8977_v39, %v9021_v30  ;;  %v4271_v13 = vsel %vm1151_vm9, %v9062_v0, %v9106_v26  ;;  %v8212_v59 = vpack.c.bf16 %v4272_v45, %v4270_v16  ;;  %v8891_v55 = vunpack.i.l.bf16 %v11796_v23 }
 0x5a4   : > { %9414 = vrot.lane.b32.xlu1 %v13626_v11, %s13615_s14  ;;  %v8272_v24 = vpack.c.bf16 %v4954_v32, %v4952_v57  ;;  %v9047_v22 = vunpack.i.h.bf16 %v13628_v40  ;;  %v12258_v27 = vpop.permute.xlu0 %9154  ;;  %v12260_v41 = vpop.permute.xlu1 %9149  ;;  %v4958_v30 = vsel %vm1462_vm2, %v9131_v2, %v9132_v8  ;;  %v4951_v26 = vsel %vm1462_vm2, %v8936_v14, %v8937_v38 }
 0x5a5   : > { %8211 = vmatpush1.bf16.msra.mxu1 %v8210_v61  ;;  %v4269_v37 = vsel %vm1151_vm9, %v9036_v5, %v9037_v28  ;;  %v9046_v43 = vunpack.i.l.bf16 %v13628_v40  ;;  %v9082_v32 = vunpack.i.h.bf16 %v12036_v21  ;;  %v8916_v34 = vunpack.i.l.bf16 %v13627_v12  ;;  %v13632_v61 = vld [vmem:[#allocation77_spill] sm:$0xff]  ;;  %v13637_v12 = vld [vmem:[#allocation51_spill] sm:$0xff]  ;;  %v13638_v40 = vld [vmem:[#allocation50_spill] sm:$0xff] }
 0x5a6   : > { %8271 = vmatpush1.bf16.msra.mxu0 %v8270_v56  ;;  %8213 = vmatprep.subr.bf16.mxu1 %v8212_v59  ;;  %v13629_v56 = vld [vmem:[#allocation21_spill] sm:$0xff]  ;;  %v8214_v45 = vpack.c.bf16 %v4271_v13, %v4269_v37  ;;  %v8274_v8 = vpack.c.bf16 %v4953_v44, %v4951_v26  ;;  %v4956_v38 = vsel %vm1462_vm2, %v9047_v22, %v9081_v47  ;;  %v8867_v28 = vunpack.i.h.bf16 %v13613_v20 }
 0x5a7   : > { %8273 = vmatprep.subr.bf16.mxu0 %v8272_v24  ;;  %9429 = vrot.lane.b32.xlu0 %v13629_v56, %s13615_s14  ;;  %v4957_v14 = vsel %vm1462_vm2, %v9082_v32, %v9131_v2  ;;  %v8276_v39 = vpack.c.bf16 %v4958_v30, %v4956_v38  ;;  %v13631_v21 = vunpack.i.h.bf16 %v13600_v33  ;;  %v4421_v0 = vsel %vm1190_vm10, %v8842_v15, %v8891_v55  ;;  %v13633_v44 = vld [vmem:[#allocation69_spill] sm:$0xff] }
 0x5a8   : > { %9424 = vrot.lane.b32.xlu1 %v13630_v46, %s13615_s14  ;;  %v9007_v16 = vunpack.i.h.bf16 %v13632_v61  ;;  %v9006_v57 = vunpack.i.l.bf16 %v13632_v61  ;;  %v12285_v47 = vpop.permute.xlu0 %9164  ;;  %v12287_v2 = vpop.permute.xlu1 %9159  ;;  %v4422_v33 = vsel %vm1190_vm10, %v8891_v55, %v8892_v19  ;;  %v8931_v60 = vunpack.i.l.bf16 %v13633_v44  ;;  %v13636_v19 = vld [vmem:[#allocation73_spill] sm:$0xff] }
 0x5a9   : > { %v4420_v5 = vsel %vm1190_vm10, %v13631_v21, %v8841_v1  ;;  %8215 = vmatpush1.bf16.msra.mxu1 %v8214_v45  ;;  %v8932_v1 = vunpack.i.h.bf16 %v13633_v44  ;;  %v4955_v15 = vsel %vm1462_vm2, %v9046_v43, %v9047_v22  ;;  %v13634_v13 = vpack.c.bf16 %v12016_v3, %v11988_v4  ;;  %v13639_v22 = vld [vmem:[#allocation47_spill] sm:$0xff] }
 0x5aa   : > { %8275 = vmatpush1.bf16.msra.mxu0 %v8274_v8  ;;  %v13635_v59 = vunpack.i.h.bf16 %v11732_v29  ;;  %v12304_v23 = vsel %vm1540_vm4, %v8867_v28, %v8916_v34  ;;  %v8961_v55 = vunpack.i.l.bf16 %v13636_v19  ;;  %v8278_v4 = vpack.c.bf16 %v4957_v14, %v4955_v15  ;;  %v13643_v28 = vld [vmem:[#allocation96_spill] sm:$0xff]  ;;  %v13644_v14 = vld [vmem:[#allocation82_spill] sm:$0xff] }
 0x5ab   : > { %8217 = vmatprep.subr.bf16.mxu1 %v13634_v13  ;;  %8277 = vmatprep.subr.bf16.mxu0 %v8276_v39  ;;  %v5268_v3 = vsel %vm1540_vm4, %v8916_v34, %v8917_v63  ;;  %v9112_v20 = vunpack.i.h.bf16 %v12144_v25  ;;  %v9111_v29 = vunpack.i.l.bf16 %v12144_v25  ;;  %v8222_v30 = vpack.c.bf16 %v4421_v0, %v12118_v7  ;;  %v13641_v7 = vld [vmem:[#allocation70_spill] sm:$0xff]  ;;  %v13646_v0 = vld [vmem:[#allocation28_spill] sm:$0xff] }
 0x5ac   : > { %v5266_v24 = vsel %vm1540_vm4, %v13635_v59, %v8866_v42  ;;  %9439 = vrot.lane.b32.xlu0 %v13637_v12, %s13615_s14  ;;  %9434 = vrot.lane.b32.xlu1 %v13638_v40, %s13615_s14  ;;  %v8220_v42 = vpack.c.bf16 %v4422_v33, %v4420_v5  ;;  %v8962_v26 = vunpack.i.h.bf16 %v13636_v19  ;;  %v9142_v37 = vunpack.i.h.bf16 %v12238_v58  ;;  %v12323_v63 = vpop.permute.xlu0 %9174  ;;  %v12325_v25 = vpop.permute.xlu1 %9169  ;;  %v13645_v5 = vld [vmem:[#allocation53_spill] sm:$0xff]  ;;  %v13650_v59 = vld [vmem:[#allocation84_spill] sm:$0xff] }
 0x5ad   : > { %8083 = vmatmul.mubr.msk.f32.vlgmr.msra.gmra.mrb[18].mxu1 %vm1728_vm1, %v13639_v22  ;;  %v9141_v43 = vunpack.i.l.bf16 %v12238_v58  ;;  %v13640_v32 = vpack.c.bf16 %v12001_v48, %v11944_v62  ;;  %v4426_v34 = vsel %vm1190_vm10, %v9006_v57, %v9007_v16  ;;  %v4423_v45 = vsel %vm1190_vm10, %v8931_v60, %v8932_v1  ;;  %v13648_v33 = vld [vmem:[#allocation49_spill] sm:$0xff] }
 0x5ae   : > { %8279 = vmatpush1.bf16.msra.mxu0 %v8278_v4  ;;  %v8947_v8 = vunpack.i.h.bf16 %v13641_v7  ;;  %v13642_v38 = vpack.c.bf16 %v12068_v17, %v11994_v18  ;;  %v8300_v58 = vpack.c.bf16 %v5268_v3, %v5266_v24  ;;  %v8302_v62 = vpack.c.bf16 %v12304_v23, %v13643_v28  ;;  %v13647_v18 = vld [vmem:[#allocation81_spill] sm:$0xff]  ;;  %4514 = vmatprep.mubr.f32.mxu1 %v13622_v50 }
 0x5af   : > { %8219 = vmatpush1.bf16.msra.mxu1 %v13640_v32  ;;  %v4425_v48 = vsel %vm1190_vm10, %v8962_v26, %v9006_v57  ;;  %v9066_v39 = vunpack.i.l.bf16 %v13644_v14  ;;  %v9126_v21 = vunpack.i.l.bf16 %v12203_v36  ;;  %v4424_v61 = vsel %vm1190_vm10, %v8932_v1, %v8961_v55  ;;  %v13649_v1 = vld [vmem:[#allocation93_spill] sm:$0xff] }
 0x5b0   : > { %8221 = vmatprep.subr.bf16.mxu1 %v8220_v42  ;;  %8297 = vmatprep.subr.bf16.mxu0 %v13642_v38  ;;  %v9042_v17 = vunpack.i.h.bf16 %v13647_v18  ;;  %v9067_v16 = vunpack.i.h.bf16 %v13644_v14  ;;  %v8224_v57 = vpack.c.bf16 %v4426_v34, %v4424_v61  ;;  %v4430_v44 = vsel %vm1190_vm10, %v9111_v29, %v9112_v20  ;;  %v12355_v23 = vpop.permute.xlu0 %9184  ;;  %v12357_v19 = vpop.permute.xlu1 %9179  ;;  %v13655_v14 = vld [vmem:[#allocation59_spill] sm:$0xff] }
 0x5b1   : > { %9449 = vrot.lane.b32.xlu0 %v13645_v5, %s13615_s14  ;;  %9444 = vrot.lane.b32.xlu1 %v13646_v0, %s13615_s14  ;;  %v9157_v60 = vunpack.i.h.bf16 %v12258_v27  ;;  %v9156_v15 = vunpack.i.l.bf16 %v12258_v27  ;;  %v9151_v13 = vunpack.i.l.bf16 %v12260_v41  ;;  %v13651_v24 = vpack.c.bf16 %v13649_v1, %v13650_v59  ;;  %v13659_v59 = vld [vmem:[#allocation79_spill] sm:$0xff] }
 0x5b2   : > { %8087 = vmatmul.mubr.msk.f32.vlgmr.msra.gmra.mrb[34].mxu0 %vm1728_vm1, %v13648_v33  ;;  %v5272_v55 = vsel %vm1540_vm4, %v9141_v43, %v9142_v37  ;;  %v8946_v4 = vunpack.i.l.bf16 %v13641_v7  ;;  %v9041_v3 = vunpack.i.l.bf16 %v13647_v18  ;;  %v9127_v20 = vunpack.i.h.bf16 %v12203_v36  ;;  %v13656_v18 = vld [vmem:[#allocation64_spill] sm:$0xff] }
 0x5b3   : > { %8223 = vmatpush1.bf16.msra.mxu1 %v8222_v30  ;;  %8299 = vmatpush1.bf16.msra.mxu0 %v13651_v24  ;;  %v8226_v27 = vpack.c.bf16 %v4425_v48, %v4423_v45  ;;  %v4429_v22 = vsel %vm1190_vm10, %v9067_v16, %v9111_v29  ;;  %v9147_v42 = vunpack.i.h.bf16 %v12236_v54  ;;  %v13653_v30 = vld [vmem:[#allocation57_spill] sm:$0xff]  ;;  %v4428_v26 = vsel %vm1190_vm10, %v9042_v17, %v9066_v39  ;;  %v13654_v29 = vld [vmem:[#allocation66_spill] sm:$0xff] }
 0x5b4   : > { %8225 = vmatprep.subr.bf16.mxu1 %v8224_v57  ;;  %8301 = vmatprep.subr.bf16.mxu0 %v8300_v58  ;;  %v5270_v37 = vsel %vm1540_vm4, %v8947_v8, %v9126_v21  ;;  %v5271_v32 = vsel %vm1540_vm4, %v9127_v20, %v9141_v43  ;;  %v9152_v36 = vunpack.i.h.bf16 %v12260_v41  ;;  %v8228_v34 = vpack.c.bf16 %v4430_v44, %v4428_v26  ;;  %v12376_v58 = vpop.permute.xlu0 %9194  ;;  %v12378_v28 = vpop.permute.xlu1 %9189  ;;  %v13657_v44 = vld [vmem:[#allocation68_spill] sm:$0xff] }
 0x5b5   : > { %9459 = vrot.lane.b32.xlu0 %v11396_v31, %s13652_s17  ;;  %9454 = vrot.lane.b32.xlu1 %v13653_v30, %s13615_s14  ;;  %v8304_v45 = vpack.c.bf16 %v5272_v55, %v5270_v37  ;;  %v8902_v7 = vunpack.i.h.bf16 %v13654_v29  ;;  %v8901_v38 = vunpack.i.l.bf16 %v13654_v29  ;;  %v5274_v48 = vsel %vm1540_vm4, %v9147_v42, %v9151_v13  ;;  %v13658_v13 = vld [vmem:[#allocation60_spill] sm:$0xff]  ;;  %v13661_v37 = vld [vmem:[#allocation89_spill] sm:$0xff]  ;;  %v13665_v29 = vld [vmem:[#allocation63_spill] sm:$0xff] }
 0x5b6   : > { %5359 = vmatprep.mubr.f32.mxu0 %v13622_v50  ;;  %v5276_v43 = vsel %vm1540_vm4, %v9156_v15, %v9157_v60  ;;  %v8822_v41 = vunpack.i.h.bf16 %v13655_v14  ;;  %v5269_v39 = vsel %vm1540_vm4, %v8946_v4, %v8947_v8  ;;  %v4427_v21 = vsel %vm1190_vm10, %v9041_v3, %v9042_v17  ;;  %v13660_v26 = vld [vmem:[#allocation92_spill] sm:$0xff] }
 0x5b7   : > { %8227 = vmatpush1.bf16.msra.mxu1 %v8226_v27  ;;  %8303 = vmatpush1.bf16.msra.mxu0 %v8302_v62  ;;  %v9146_v61 = vunpack.i.l.bf16 %v12236_v54  ;;  %v8821_v62 = vunpack.i.l.bf16 %v13655_v14  ;;  %v8876_v16 = vunpack.i.l.bf16 %v13656_v18  ;;  %v8230_v33 = vpack.c.bf16 %v4429_v22, %v4427_v21 }
 0x5b8   : > { %8229 = vmatprep.subr.bf16.mxu1 %v8228_v34  ;;  %8305 = vmatprep.subr.bf16.mxu0 %v8304_v45  ;;  %v8306_v57 = vpack.c.bf16 %v5271_v32, %v5269_v39  ;;  %v8912_v8 = vunpack.i.h.bf16 %v13657_v44  ;;  %v8911_v17 = vunpack.i.l.bf16 %v13657_v44  ;;  %v5275_v54 = vsel %vm1540_vm4, %v9152_v36, %v9156_v15  ;;  %v12398_v4 = vpop.permute.xlu0 %9204  ;;  %v12400_v3 = vpop.permute.xlu1 %9199  ;;  %v13663_v36 = vld [vmem:[#allocation86_spill] sm:$0xff]  ;;  %v13664_v34 = vld [vmem:[#allocation95_spill] sm:$0xff] }
 0x5b9   : > { %9469 = vrot.lane.b32.xlu0 %v11460_v51, %s13652_s17  ;;  %9464 = vrot.lane.b32.xlu1 %v13619_v52, %s13652_s17  ;;  %v8308_v60 = vpack.c.bf16 %v5276_v43, %v5274_v48  ;;  %v8852_v1 = vunpack.i.h.bf16 %v13658_v13  ;;  %v9017_v24 = vunpack.i.h.bf16 %v13659_v59  ;;  %v9016_v55 = vunpack.i.l.bf16 %v13659_v59  ;;  %v13666_v43 = vld [vmem:[#allocation75_spill] sm:$0xff] }
 0x5ba   : > { %v4790_v20 = vsel %vm1268_vm12, %v8901_v38, %v8902_v7  ;;  %v8851_v27 = vunpack.i.l.bf16 %v13658_v13  ;;  %v8877_v22 = vunpack.i.h.bf16 %v13656_v18  ;;  %v5273_v15 = vsel %vm1540_vm4, %v9146_v61, %v9147_v42  ;;  %v10199_v61 = vld [vmem:[%s13333_s5 + $0x28] sm:$0xff] }
 0x5bb   : > { %8231 = vmatpush1.bf16.msra.mxu1 %v8230_v33  ;;  %8307 = vmatpush1.bf16.msra.mxu0 %v8306_v57  ;;  %v13662_v32 = vpack.c.bf16 %v13660_v26, %v13661_v37  ;;  %v8861_v48 = vunpack.i.l.bf16 %v13665_v29  ;;  %v8991_v14 = vunpack.i.l.bf16 %v13666_v43  ;;  %v8310_v7 = vpack.c.bf16 %v5275_v54, %v5273_v15  ;;  %v13667_v57 = vld [vmem:[#allocation74_spill] sm:$0xff] }
 0x5bc   : > { %8309 = vmatprep.subr.bf16.mxu0 %v8308_v60  ;;  %v4788_v42 = vsel %vm1268_vm12, %v8852_v1, %v8876_v16  ;;  %v12419_v39 = vsel %vm1501_vm3, %v8821_v62, %v8822_v41  ;;  %v4789_v21 = vsel %vm1268_vm12, %v8877_v22, %v8901_v38  ;;  %v12427_v33 = vsel %vm1501_vm3, %v8911_v17, %v8912_v8  ;;  %v13668_v62 = vld [vmem:[#allocation91_spill] sm:$0xff]  ;;  %v12435_v38 = vpop.permute.xlu0 %9214  ;;  %v12437_v59 = vpop.permute.xlu1 %9209 }
 0x5bd   : > { %8249 = vmatprep.subr.bf16.mxu1 %v13662_v32  ;;  %9479 = vrot.lane.b32.xlu0 %v13625_v6, %s13652_s17  ;;  %v8252_v18 = vpack.c.bf16 %v4790_v20, %v4788_v42  ;;  %v8972_v44 = vunpack.i.h.bf16 %v13667_v57  ;;  %v9122_v54 = vunpack.i.h.bf16 %v12168_v53  ;;  %v9121_v16 = vunpack.i.l.bf16 %v12168_v53  ;;  %v13669_v60 = vld [vmem:[#allocation87_spill] sm:$0xff]  ;;  %v13671_v53 = vld [vmem:[#allocation56_spill] sm:$0xff] }
 0x5be   : > { %9474 = vrot.lane.b32.xlu1 %v13626_v11, %s13652_s17  ;;  %8084 = vmatmul.mubr.msk.f32.vlgmr.msra.gmra.mrb[20].mxu1 %vm1728_vm1, %v10199_v61  ;;  %v13670_v13 = vpack.c.bf16 %v13668_v62, %v13669_v60  ;;  %v4794_v20 = vsel %vm1268_vm12, %v9016_v55, %v9017_v24  ;;  %v4787_v8 = vsel %vm1268_vm12, %v8851_v27, %v8852_v1  ;;  %v8862_v22 = vunpack.i.h.bf16 %v13665_v29  ;;  %v13673_v61 = vld [vmem:[#allocation72_spill] sm:$0xff] }
 0x5bf   : > { %8311 = vmatpush1.bf16.msra.mxu0 %v8310_v7  ;;  %v8971_v15 = vunpack.i.l.bf16 %v13667_v57  ;;  %v8992_v26 = vunpack.i.h.bf16 %v13666_v43  ;;  %4882 = vmatprep.mubr.f32.mxu1 %v13622_v50  ;;  %v9096_v37 = vunpack.i.l.bf16 %v13671_v53  ;;  %v8254_v24 = vpack.c.bf16 %v4789_v21, %v4787_v8  ;;  %v13672_v43 = vld [vmem:[#allocation48_spill] sm:$0xff]  ;;  %v13676_v8 = vld [vmem:[#allocation78_spill] sm:$0xff] }
 0x5c0   : > { %8251 = vmatpush1.bf16.msra.mxu1 %v13670_v13  ;;  %v4792_v1 = vsel %vm1268_vm12, %v8972_v44, %v8991_v14  ;;  %v12452_v27 = vsel %vm1501_vm3, %v8822_v41, %v8861_v48  ;;  %v12455_v32 = vsel %vm1501_vm3, %v8862_v22, %v8911_v17  ;;  %v13674_v21 = vld [vmem:[#allocation88_spill] sm:$0xff]  ;;  %v9220_v41 = vpop.permute.xlu0 %9219  ;;  %v12465_v48 = vpop.permute.xlu1 %5529  ;;  %v4798_v17 = vsel %vm1268_vm12, %v9121_v16, %v9122_v54 }
 0x5c1   : > { %8253 = vmatprep.subr.bf16.mxu1 %v8252_v18  ;;  %9489 = vrot.lane.b32.xlu0 %v13629_v56, %s13652_s17  ;;  %v4793_v29 = vsel %vm1268_vm12, %v8992_v26, %v9016_v55  ;;  %v8256_v7 = vpack.c.bf16 %v4794_v20, %v4792_v1  ;;  %v8942_v18 = vunpack.i.h.bf16 %v13673_v61  ;;  %v9077_v57 = vunpack.i.h.bf16 %v13674_v21  ;;  %v13675_v60 = vld [vmem:[#allocation76_spill] sm:$0xff] }
 0x5c2   : > { %9484 = vrot.lane.b32.xlu1 %v13630_v46, %s13652_s17  ;;  %8089 = vmatmul.mubr.msk.f32.vlgmr.msra.gmra.mrb[36].mxu0 %vm1728_vm1, %v13672_v43  ;;  %v9076_v14 = vunpack.i.l.bf16 %v13674_v21  ;;  %v8941_v55 = vunpack.i.l.bf16 %v13673_v61  ;;  %v4791_v62 = vsel %vm1268_vm12, %v8971_v15, %v8972_v44  ;;  %v8982_v13 = vunpack.i.h.bf16 %v13675_v60 }
 0x5c3   : > { %5677 = vmatprep.mubr.f32.mxu0 %v13622_v50  ;;  %v9097_v20 = vunpack.i.h.bf16 %v13671_v53  ;;  %v9027_v22 = vunpack.i.h.bf16 %v13676_v8  ;;  %v9026_v26 = vunpack.i.l.bf16 %v13676_v8  ;;  %v8258_v54 = vpack.c.bf16 %v4793_v29, %v4791_v62 }
 0x5c4   : > { %8255 = vmatpush1.bf16.msra.mxu1 %v8254_v24  ;;  %v4796_v24 = vsel %vm1268_vm12, %v9077_v57, %v9096_v37  ;;  %v9222_v15 = vunpack.i.h.bf16 %v9220_v41  ;;  %v9221_v1 = vunpack.i.l.bf16 %v9220_v41  ;;  %v8981_v53 = vunpack.i.l.bf16 %v13675_v60  ;;  %v9230_v8 = vpop.permute.xlu0 %9229  ;;  %v9225_v42 = vpop.permute.xlu1 %9224  ;;  %v13677_v41 = vld [vmem:[#allocation54_spill] sm:$0xff]  ;;  %v12501_v60 = vld [vmem:[%s13333_s5 + $0x8] sm:$0xff] }
 0x5c5   : > { %8257 = vmatprep.subr.bf16.mxu1 %v8256_v7  ;;  %9499 = vrot.lane.b32.xlu0 %v13637_v12, %s13652_s17  ;;  %v4797_v44 = vsel %vm1268_vm12, %v9097_v20, %v9121_v16  ;;  %v8260_v43 = vpack.c.bf16 %v4798_v17, %v4796_v24  ;;  %v4795_v7 = vsel %vm1268_vm12, %v9076_v14, %v9077_v57  ;;  %v9137_v61 = vunpack.i.h.bf16 %v12205_v35 }
 0x5c6   : > { %9494 = vrot.lane.b32.xlu1 %v13638_v40, %s13652_s17  ;;  %v9136_v21 = vunpack.i.l.bf16 %v12205_v35  ;;  %v9232_v45 = vunpack.i.h.bf16 %v9230_v8  ;;  %v9231_v29 = vunpack.i.l.bf16 %v9230_v8  ;;  %v9227_v62 = vunpack.i.h.bf16 %v9225_v42  ;;  %v13679_v8 = vld [vmem:[#allocation94_spill] sm:$0xff] }
 0x5c7   : > { %v9226_v37 = vunpack.i.l.bf16 %v9225_v42  ;;  %v12486_v16 = vsel %vm1501_vm3, %v8982_v13, %v9026_v26  ;;  %v9086_v17 = vunpack.i.l.bf16 %v13677_v41  ;;  %v8262_v35 = vpack.c.bf16 %v4797_v44, %v4795_v7 }
 0x5c8   : > { %8259 = vmatpush1.bf16.msra.mxu1 %v8258_v54  ;;  %v12494_v57 = vsel %vm1501_vm3, %v9026_v26, %v9027_v22  ;;  %v5579_v14 = vsel %vm1612_vm13, %v9221_v1, %v9222_v15  ;;  %v5581_v42 = vsel %vm1612_vm13, %v9227_v62, %v9231_v29  ;;  %v5582_v20 = vsel %vm1612_vm13, %v9231_v29, %v9232_v45  ;;  %v13678_v54 = vld [vmem:[#allocation85_spill] sm:$0xff]  ;;  %v9240_v22 = vpop.permute.xlu0 %9239  ;;  %v9235_v26 = vpop.permute.xlu1 %9234  ;;  %v13680_v62 = vld [vmem:[#allocation90_spill] sm:$0xff] }
 0x5c9   : > { %8261 = vmatprep.subr.bf16.mxu1 %v8260_v43  ;;  %9509 = vrot.lane.b32.xlu0 %v13645_v5, %s13652_s17  ;;  %v5580_v13 = vsel %vm1612_vm13, %v9222_v15, %v9226_v37  ;;  %v9052_v24 = vunpack.i.h.bf16 %v13678_v54  ;;  %v9051_v44 = vunpack.i.l.bf16 %v13678_v54  ;;  %v8330_v1 = vpack.c.bf16 %v5581_v42, %v5579_v14 }
 0x5ca   : > { %9504 = vrot.lane.b32.xlu1 %v13646_v0, %s13652_s17  ;;  %v8328_v43 = vpack.c.bf16 %v5582_v20, %v5580_v13  ;;  %v12508_v7 = vsel %vm1501_vm3, %v8941_v55, %v8942_v18  ;;  %v13681_v0 = vpack.c.bf16 %v13679_v8, %v13680_v62  ;;  %v8286_v15 = vpack.c.bf16 %v12455_v32, %v12419_v39 }
 0x5cb   : > { %v5110_v45 = vsel %vm1501_vm3, %v8942_v18, %v8981_v53  ;;  %v12517_v29 = vsel %vm1501_vm3, %v9136_v21, %v9137_v61  ;;  %v9087_v37 = vunpack.i.h.bf16 %v13677_v41  ;;  %v9237_v13 = vunpack.i.h.bf16 %v9235_v26 }
 0x5cc   : > { %8263 = vmatpush1.bf16.msra.mxu1 %v8262_v35  ;;  %v9241_v35 = vunpack.i.l.bf16 %v9240_v22  ;;  %v9236_v14 = vunpack.i.l.bf16 %v9235_v26  ;;  %8329 = vmatprep.subr.bf16.mxu0 %v8328_v43  ;;  %v8288_v39 = vpack.c.bf16 %v12494_v57, %v5110_v45  ;;  %v8290_v32 = vpack.c.bf16 %v12486_v16, %v12508_v7  ;;  %v9250_v42 = vpop.permute.xlu0 %9249  ;;  %v9245_v57 = vpop.permute.xlu1 %9244  ;;  %v13685_v26 = vld [vmem:[#allocation16_spill] sm:$0xff] }
 0x5cd   : > { %8281 = vmatprep.subr.bf16.mxu1 %v13681_v0  ;;  %6393 = vrot.lane.b32.xlu0 %v12501_v60, %s10246_s19  ;;  %v10200_v0 = vld [vmem:[%s13333_s5 + $0x50] sm:$0xff]  ;;  %v5114_v18 = vsel %vm1501_vm3, %v9052_v24, %v9086_v17  ;;  %v12533_v55 = vsel %vm1501_vm3, %v9051_v44, %v9052_v24  ;;  %v12536_v53 = vsel %vm1501_vm3, %v9087_v37, %v9136_v21  ;;  %v9167_v61 = vunpack.i.h.bf16 %v12285_v47 }
 0x5ce   : > { %9514 = vrot.lane.b32.xlu1 %v13653_v30, %s13652_s17  ;;  %v13682_v41 = vpack.c.bf16 %v13664_v34, %v13663_v36  ;;  %8331 = vmatpush1.bf16.msra.mxu0 %v8330_v1  ;;  %v8292_v20 = vpack.c.bf16 %v12517_v29, %v5114_v18  ;;  %v9166_v16 = vunpack.i.l.bf16 %v12285_v47  ;;  %v9242_v17 = vunpack.i.h.bf16 %v9240_v22  ;;  %v13686_v47 = vld [vmem:[#allocation14_spill] sm:$0xff]  ;;  %s13828_s17 = smov 126  }
 0x5cf   : > { %8086 = vmatmul.mubr.msk.f32.vlgmr.msra.gmra.mrb[22].mxu1 %vm1728_vm1, %v10200_v0  ;;  %v9247_v54 = vunpack.i.h.bf16 %v9245_v57  ;;  %v9246_v24 = vunpack.i.l.bf16 %v9245_v57  ;;  %v13683_v21 = vpack.c.bf16 %v12427_v33, %v12452_v27  ;;  %v9162_v44 = vunpack.i.h.bf16 %v12287_v2 }
 0x5d0   : > { %8283 = vmatpush1.bf16.msra.mxu1 %v13682_v41  ;;  %5200 = vmatprep.mubr.f32.mxu1 %v13622_v50  ;;  %v9161_v36 = vunpack.i.l.bf16 %v12287_v2  ;;  %v5583_v34 = vsel %vm1612_vm13, %v9236_v14, %v9237_v13  ;;  %v5584_v22 = vsel %vm1612_vm13, %v9237_v13, %v9241_v35  ;;  %v9252_v43 = vunpack.i.h.bf16 %v9250_v42  ;;  %v9260_v8 = vpop.permute.xlu0 %9259  ;;  %v9255_v62 = vpop.permute.xlu1 %9254 }
 0x5d1   : > { %8285 = vmatprep.subr.bf16.mxu1 %v13683_v21  ;;  %9524 = vrot.lane.b32.xlu0 %v13685_v26, %s13684_s10  ;;  %v9251_v1 = vunpack.i.l.bf16 %v9250_v42  ;;  %v5585_v33 = vsel %vm1612_vm13, %v9242_v17, %v9246_v24  ;;  %v5586_v27 = vsel %vm1612_vm13, %v9246_v24, %v9247_v54  ;;  %v9172_v7 = vunpack.i.h.bf16 %v12325_v25 }
 0x5d2   : > { %9519 = vrot.lane.b32.xlu1 %v13686_v47, %s13684_s10  ;;  %v9171_v2 = vunpack.i.l.bf16 %v12325_v25  ;;  %v8332_v45 = vpack.c.bf16 %v5586_v27, %v5584_v22  ;;  %v8334_v29 = vpack.c.bf16 %v5585_v33, %v5583_v34  ;;  %v9262_v37 = vunpack.i.h.bf16 %v9260_v8  ;;  %v13687_v25 = vld [vmem:[#allocation33_spill] sm:$0xff] }
 0x5d3   : > { %v9261_v14 = vunpack.i.l.bf16 %v9260_v8  ;;  %v9257_v0 = vunpack.i.h.bf16 %v9255_v62  ;;  %v9256_v18 = vunpack.i.l.bf16 %v9255_v62  ;;  %v9177_v35 = vunpack.i.h.bf16 %v12323_v63  ;;  %v13693_v62 = vld [vmem:[#allocation42_spill] sm:$0xff] }
 0x5d4   : > { %8287 = vmatpush1.bf16.msra.mxu1 %v8286_v15  ;;  %v9187_v13 = vunpack.i.h.bf16 %v12355_v23  ;;  %v9186_v41 = vunpack.i.l.bf16 %v12355_v23  ;;  %v9181_v42 = vunpack.i.l.bf16 %v12357_v19  ;;  %v13688_v15 = vld [vmem:[#allocation31_spill] sm:$0xff]  ;;  %v5587_v57 = vsel %vm1612_vm13, %v9251_v1, %v9252_v43  ;;  %8333 = vmatprep.subr.bf16.mxu0 %v8332_v45  ;;  %v9270_v23 = vpop.permute.xlu0 %9269  ;;  %v9265_v21 = vpop.permute.xlu1 %9264 }
 0x5d5   : > { %8289 = vmatprep.subr.bf16.mxu1 %v8288_v39  ;;  %9534 = vrot.lane.b32.xlu0 %v13687_v25, %s13684_s10  ;;  %v5589_v17 = vsel %vm1612_vm13, %v9257_v0, %v9261_v14  ;;  %v5588_v39 = vsel %vm1612_vm13, %v9252_v43, %v9256_v18  ;;  %v5590_v54 = vsel %vm1612_vm13, %v9261_v14, %v9262_v37  ;;  %v9182_v24 = vunpack.i.h.bf16 %v12357_v19  ;;  %v13694_v45 = vld [vmem:[#allocation35_spill] sm:$0xff] }
 0x5d6   : > { %9529 = vrot.lane.b32.xlu1 %v13688_v15, %s13684_s10  ;;  %8335 = vmatpush1.bf16.msra.mxu0 %v8334_v29  ;;  %v8336_v34 = vpack.c.bf16 %v5590_v54, %v5588_v39  ;;  %v8338_v22 = vpack.c.bf16 %v5589_v17, %v5587_v57  ;;  %vm13689_vm8 = vcmask 924672   ;;  %v8294_v43 = vpack.c.bf16 %v12536_v53, %v12533_v55  ;;  %v13698_v17 = vld [vmem:[#allocation45_spill] sm:$0xff] }
 0x5d7   : > { %v5422_v33 = vsel %vm13689_vm8, %v9171_v2, %v9172_v7  ;;  %vm13690_vm9 = vmmov %vm13689_vm8  ;;  %v9202_v19 = vunpack.i.h.bf16 %v12400_v3  ;;  %v9267_v55 = vunpack.i.h.bf16 %v9265_v21  ;;  %v9266_v53 = vunpack.i.l.bf16 %v9265_v21 }
 0x5d8   : > { %8291 = vmatpush1.bf16.msra.mxu1 %v8290_v32  ;;  %v5419_v27 = vsel %vm13690_vm9, %v9161_v36, %v9162_v44  ;;  %vm13691_vm10 = vmmov %vm13689_vm8  ;;  %v9201_v32 = vunpack.i.l.bf16 %v12400_v3  ;;  %v9271_v36 = vunpack.i.l.bf16 %v9270_v23  ;;  %8337 = vmatprep.subr.bf16.mxu0 %v8336_v34  ;;  %v12591_v7 = vpop.permute.xlu0 %9279  ;;  %v9272_v37 = vunpack.i.h.bf16 %v9270_v23  ;;  %v10201_v23 = vld [vmem:[%s13333_s5 + $0x18] sm:$0xff] }
 0x5d9   : > { %v5421_v1 = vsel %vm13691_vm10, %v9167_v61, %v9171_v2  ;;  %8293 = vmatprep.subr.bf16.mxu1 %v8292_v20  ;;  %vm13692_vm11 = vmmov %vm13689_vm8  ;;  %9544 = vrot.lane.b32.xlu0 %v13693_v62, %s13684_s10  ;;  %v9275_v2 = vpop.permute.xlu1 %9274  ;;  %v9211_v57 = vunpack.i.l.bf16 %v12437_v59  ;;  %v5591_v54 = vsel %vm1612_vm13, %v9266_v53, %v9267_v55 }
 0x5da   : > { %v5420_v8 = vsel %vm13692_vm11, %v9162_v44, %v9166_v16  ;;  %9539 = vrot.lane.b32.xlu1 %v13694_v45, %s13684_s10  ;;  %vm13695_vm12 = vmmov %vm13689_vm8  ;;  %v9176_v44 = vunpack.i.l.bf16 %v12323_v63  ;;  %8339 = vmatpush1.bf16.msra.mxu0 %v8338_v22  ;;  %v8314_v29 = vpack.c.bf16 %v5421_v1, %v5419_v27  ;;  %v9277_v14 = vunpack.i.h.bf16 %v9275_v2 }
 0x5db   : > { %v5424_v61 = vsel %vm13695_vm12, %v9177_v35, %v9181_v42  ;;  %vm13696_vm2 = vmmov %vm13689_vm8  ;;  %v8312_v16 = vpack.c.bf16 %v5422_v33, %v5420_v8  ;;  %v9276_v0 = vunpack.i.l.bf16 %v9275_v2  ;;  %v9192_v42 = vunpack.i.h.bf16 %v12378_v28 }
 0x5dc   : > { %v5426_v20 = vsel %vm13696_vm2, %v9186_v41, %v9187_v13  ;;  %vm13697_vm3 = vmmov %vm13696_vm2  ;;  %8295 = vmatpush1.bf16.msra.mxu1 %v8294_v43  ;;  %v9196_v13 = vunpack.i.l.bf16 %v12376_v58  ;;  %v5592_v21 = vsel %vm1612_vm13, %v9267_v55, %v9271_v36  ;;  %v9217_v22 = vunpack.i.h.bf16 %v12435_v38  ;;  %v9290_v27 = vpop.permute.xlu0 %9289  ;;  %v13703_v55 = vld [vmem:[#allocation23_spill] sm:$0xff] }
 0x5dd   : > { %v5425_v3 = vsel %vm13697_vm3, %v9182_v24, %v9186_v41  ;;  %8313 = vmatprep.subr.bf16.mxu1 %v8312_v16  ;;  %v8316_v18 = vpack.c.bf16 %v5426_v20, %v5424_v61  ;;  %9554 = vrot.lane.b32.xlu0 %v13698_v17, %s13684_s10  ;;  %v13699_v41 = vld [vmem:[#allocation44_spill] sm:$0xff]  ;;  %vm13700_vm4 = vmmov %vm13696_vm2  ;;  %v5593_v24 = vsel %vm1612_vm13, %v9272_v37, %v9276_v0  ;;  %v9216_v33 = vunpack.i.l.bf16 %v12435_v38  ;;  %v9285_v1 = vpop.permute.xlu1 %9284 }
 0x5de   : > { %9549 = vrot.lane.b32.xlu1 %v13699_v41, %s13684_s10  ;;  %v5430_v39 = vsel %vm13700_vm4, %v9201_v32, %v9202_v19  ;;  %v5594_v34 = vsel %vm1612_vm13, %v9276_v0, %v9277_v14  ;;  %v8342_v8 = vpack.c.bf16 %v5593_v24, %v5591_v54  ;;  %vm13701_vm0 = vmmov %vm13696_vm2  ;;  %v9197_v61 = vunpack.i.h.bf16 %v12376_v58  ;;  %v13702_v38 = vld [vmem:[#allocation52_spill] sm:$0xff] }
 0x5df   : > { %8088 = vmatmul.mubr.msk.f32.vlgmr.msra.gmra.mrb[24].mxu1 %vm1728_vm1, %v10201_v23  ;;  %v8340_v43 = vpack.c.bf16 %v5594_v34, %v5592_v21  ;;  %v5423_v19 = vsel %vm13701_vm0, %v9176_v44, %v9177_v35  ;;  %v9191_v20 = vunpack.i.l.bf16 %v12378_v28  ;;  %v9207_v36 = vunpack.i.h.bf16 %v12398_v4  ;;  %vm13704_vm13 = vmmov %vm13701_vm0 }
 0x5e0   : > { %8315 = vmatpush1.bf16.msra.mxu1 %v8314_v29  ;;  %5518 = vmatprep.mubr.f32.mxu1 %v13622_v50  ;;  %v8318_v53 = vpack.c.bf16 %v5425_v3, %v5423_v19  ;;  %v5428_v16 = vsel %vm13704_vm13, %v9192_v42, %v9196_v13  ;;  %vm13705_vm15 = vmmov %vm13701_vm0  ;;  %v9212_v35 = vunpack.i.h.bf16 %v12437_v59  ;;  %v9292_v44 = vunpack.i.h.bf16 %v9290_v27  ;;  %v9300_v37 = vpop.permute.xlu0 %9299 }
 0x5e1   : > { %8317 = vmatprep.subr.bf16.mxu1 %v8316_v18  ;;  %9564 = vrot.lane.b32.xlu0 %v13702_v38, %s13684_s10  ;;  %v5429_v63 = vsel %vm13705_vm15, %v9197_v61, %v9201_v32  ;;  %v8320_v58 = vpack.c.bf16 %v5430_v39, %v5428_v16  ;;  %vm13706_vm14 = vmmov %vm13701_vm0  ;;  %v9291_v2 = vunpack.i.l.bf16 %v9290_v27  ;;  %v9286_v29 = vunpack.i.l.bf16 %v9285_v1  ;;  %v9295_v14 = vpop.permute.xlu1 %9294 }
 0x5e2   : > { %9559 = vrot.lane.b32.xlu1 %v13703_v55, %s13684_s10  ;;  %8341 = vmatprep.subr.bf16.mxu0 %v8340_v43  ;;  %v5432_v28 = vsel %vm13706_vm14, %v9207_v36, %v9211_v57  ;;  %vm13707_vm6 = vmmov %vm13701_vm0  ;;  %v9206_v18 = vunpack.i.l.bf16 %v12398_v4  ;;  %v9282_v59 = vunpack.i.h.bf16 %v12591_v7  ;;  %v9287_v57 = vunpack.i.h.bf16 %v9285_v1 }
 0x5e3   : > { %8343 = vmatpush1.bf16.msra.mxu0 %v8342_v8  ;;  %v5434_v0 = vsel %vm13707_vm6, %v9216_v33, %v9217_v22  ;;  %vm13708_vm5 = vmmov %vm13701_vm0  ;;  %vm13710_vm8 = vcmask 261120   ;;  %v9297_v27 = vunpack.i.h.bf16 %v9295_v14  ;;  %v9302_v8 = vunpack.i.h.bf16 %v9300_v37 }
 0x5e4   : > { %8319 = vmatpush1.bf16.msra.mxu1 %v8318_v53  ;;  %v5427_v3 = vsel %vm13708_vm5, %v9191_v20, %v9192_v42  ;;  %vm13709_vm7 = vmmov %vm13701_vm0  ;;  %v8324_v39 = vpack.c.bf16 %v5434_v0, %v5432_v28  ;;  %v9281_v42 = vunpack.i.l.bf16 %v12591_v7  ;;  %v9310_v4 = vpop.permute.xlu0 %9309  ;;  %v5738_v24 = vsel %vm13710_vm8, %v9282_v59, %v9286_v29 }
 0x5e5   : > { %8321 = vmatprep.subr.bf16.mxu1 %v8320_v58  ;;  %9574 = vrot.lane.b32.xlu0 %v11444_v10, %s13684_s10  ;;  %v8322_v32 = vpack.c.bf16 %v5429_v63, %v5427_v3  ;;  %v5433_v13 = vsel %vm13709_vm7, %v9212_v35, %v9216_v33  ;;  %v9305_v54 = vpop.permute.xlu1 %9304  ;;  %vm13711_vm9 = vmmov %vm13710_vm8  ;;  %v9301_v33 = vunpack.i.l.bf16 %v9300_v37  ;;  %v9312_v35 = vunpack.i.h.bf16 %v9310_v4 }
 0x5e6   : > { %9569 = vrot.lane.b32.xlu1 %v11680_v49, %s13684_s10  ;;  %8091 = vmatmul.mubr.msk.f32.vlgmr.msra.gmra.mrb[38].mxu0 %vm1728_vm1, %v12465_v48  ;;  %v5740_v23 = vsel %vm13711_vm9, %v9291_v2, %v9292_v44  ;;  %vm13712_vm10 = vmmov %vm13701_vm0  ;;  %v9307_v34 = vunpack.i.h.bf16 %v9305_v54  ;;  %v9306_v22 = vunpack.i.l.bf16 %v9305_v54  ;;  %v9311_v3 = vunpack.i.l.bf16 %v9310_v4 }
 0x5e7   : > { %6541 = vmatprep.mubr.f32.mxu0 %v13622_v50  ;;  %v5431_v21 = vsel %vm13712_vm10, %v9206_v18, %v9207_v36  ;;  %vm13714_vm11 = vmmov %vm13710_vm8  ;;  %v8344_v1 = vpack.c.bf16 %v5740_v23, %v5738_v24  ;;  %v9296_v36 = vunpack.i.l.bf16 %v9295_v14  ;;  %vm13728_vm10 = vcmask 130048  }
 0x5e8   : > { %8323 = vmatpush1.bf16.msra.mxu1 %v8322_v32  ;;  %v8326_v48 = vpack.c.bf16 %v5433_v13, %v5431_v21  ;;  %v5739_v7 = vsel %vm13714_vm11, %v9287_v57, %v9291_v2  ;;  %vm13715_vm12 = vmmov %vm13710_vm8  ;;  %v9320_v19 = vpop.permute.xlu0 %9319 }
 0x5e9   : > { %8325 = vmatprep.subr.bf16.mxu1 %v8324_v39  ;;  %9584 = vrot.lane.b32.xlu0 %v13685_v26, %s13713_s12  ;;  %v5737_v43 = vsel %vm13715_vm12, %v9281_v42, %v9282_v59  ;;  %v9315_v61 = vpop.permute.xlu1 %9314  ;;  %vm13716_vm2 = vmmov %vm13710_vm8  ;;  %v9322_v53 = vunpack.i.h.bf16 %v9320_v19  ;;  %v9321_v16 = vunpack.i.l.bf16 %v9320_v19 }
 0x5ea   : > { %9579 = vrot.lane.b32.xlu1 %v13686_v47, %s13713_s12  ;;  %v5744_v20 = vsel %vm13716_vm2, %v9306_v22, %v9307_v34  ;;  %v9316_v63 = vunpack.i.l.bf16 %v9315_v61  ;;  %v9317_v58 = vunpack.i.h.bf16 %v9315_v61  ;;  %v8346_v47 = vpack.c.bf16 %v5739_v7, %v5737_v43  ;;  %vm13717_vm3 = vmmov %vm13716_vm2 }
 0x5eb   : > { %v5742_v28 = vsel %vm13717_vm3, %v9297_v27, %v9301_v33  ;;  %vm13718_vm4 = vmmov %vm13716_vm2 }
 0x5ec   : > { %8327 = vmatpush1.bf16.msra.mxu1 %v8326_v48  ;;  %v5743_v44 = vsel %vm13718_vm4, %v9302_v8, %v9306_v22  ;;  %v8348_v2 = vpack.c.bf16 %v5744_v20, %v5742_v28  ;;  %v9330_v29 = vpop.permute.xlu0 %9329  ;;  %vm13719_vm0 = vmmov %vm13716_vm2  ;;  %v12691_v28 = vld [vmem:[%s13333_s5 + $0x30] sm:$0xff] }
 0x5ed   : > { %8345 = vmatprep.subr.bf16.mxu1 %v8344_v1  ;;  %9594 = vrot.lane.b32.xlu0 %v13687_v25, %s13713_s12  ;;  %v9325_v37 = vpop.permute.xlu1 %9324  ;;  %v5746_v14 = vsel %vm13719_vm0, %v9312_v35, %v9316_v63  ;;  %vm13720_vm13 = vmmov %vm13719_vm0  ;;  %v9331_v59 = vunpack.i.l.bf16 %v9330_v29  ;;  %v9332_v54 = vunpack.i.h.bf16 %v9330_v29 }
 0x5ee   : > { %9589 = vrot.lane.b32.xlu1 %v13688_v15, %s13713_s12  ;;  %v5748_v0 = vsel %vm13720_vm13, %v9321_v16, %v9322_v53  ;;  %vm13721_vm15 = vmmov %vm13719_vm0  ;;  %v9327_v32 = vunpack.i.h.bf16 %v9325_v37  ;;  %v9326_v13 = vunpack.i.l.bf16 %v9325_v37 }
 0x5ef   : > { %8090 = vmatmul.mubr.msk.f32.vlgmr.msra.gmra.mrb[26].mxu1 %vm1728_vm1, %v12162_v9  ;;  %v5741_v25 = vsel %vm13721_vm15, %v9296_v36, %v9297_v27  ;;  %vm13722_vm14 = vmmov %vm13719_vm0  ;;  %v8352_v57 = vpack.c.bf16 %v5748_v0, %v5746_v14 }
 0x5f0   : > { %8347 = vmatpush1.bf16.msra.mxu1 %v8346_v47  ;;  %5836 = vmatprep.mubr.f32.mxu1 %v13622_v50  ;;  %v5747_v18 = vsel %vm13722_vm14, %v9317_v58, %v9321_v16  ;;  %v8350_v9 = vpack.c.bf16 %v5743_v44, %v5741_v25  ;;  %v12666_v39 = vpop.permute.xlu0 %5845  ;;  %vm13723_vm6 = vmmov %vm13719_vm0 }
 0x5f1   : > { %8349 = vmatprep.subr.bf16.mxu1 %v8348_v2  ;;  %9604 = vrot.lane.b32.xlu0 %v13693_v62, %s13713_s12  ;;  %v9335_v42 = vpop.permute.xlu1 %9334  ;;  %v5745_v4 = vsel %vm13723_vm6, %v9311_v3, %v9312_v35  ;;  %vm13724_vm5 = vmmov %vm13719_vm0 }
 0x5f2   : > { %9599 = vrot.lane.b32.xlu1 %v13694_v45, %s13713_s12  ;;  %v9337_v24 = vunpack.i.h.bf16 %v9335_v42  ;;  %v9336_v23 = vunpack.i.l.bf16 %v9335_v42  ;;  %v8354_v21 = vpack.c.bf16 %v5747_v18, %v5745_v4  ;;  %v5749_v34 = vsel %vm13724_vm5, %v9326_v13, %v9327_v32  ;;  %vm13725_vm7 = vmmov %vm13719_vm0 }
 0x5f3   : > { %vm13726_vm8 = vmmov %vm13719_vm0 }
 0x5f4   : > { %8351 = vmatpush1.bf16.msra.mxu1 %v8350_v9  ;;  %v5751_v22 = vsel %vm13725_vm7, %v9332_v54, %v9336_v23  ;;  %v5750_v33 = vsel %vm13726_vm8, %v9327_v32, %v9331_v59  ;;  %vm13727_vm9 = vmmov %vm13719_vm0  ;;  %v9345_v48 = vpop.permute.xlu0 %9344 }
 0x5f5   : > { %8353 = vmatprep.subr.bf16.mxu1 %v8352_v57  ;;  %9614 = vrot.lane.b32.xlu0 %v13698_v17, %s13713_s12  ;;  %v5752_v27 = vsel %vm13727_vm9, %v9336_v23, %v9337_v24  ;;  %v9340_v7 = vpop.permute.xlu1 %9339  ;;  %v8358_v43 = vpack.c.bf16 %v5751_v22, %v5749_v34  ;;  %v9346_v8 = vunpack.i.l.bf16 %v9345_v48  ;;  %v9347_v36 = vunpack.i.h.bf16 %v9345_v48  ;;  %vm13729_vm11 = vmmov %vm13728_vm10 }
 0x5f6   : > { %9609 = vrot.lane.b32.xlu1 %v13699_v41, %s13713_s12  ;;  %v8356_v1 = vpack.c.bf16 %v5752_v27, %v5750_v33  ;;  %v9342_v19 = vunpack.i.h.bf16 %v9340_v7  ;;  %v9341_v61 = vunpack.i.l.bf16 %v9340_v7  ;;  %vm13730_vm12 = vmmov %vm13728_vm10 }
 0x5f7   : > { %vm13731_vm2 = vmmov %vm13728_vm10 }
 0x5f8   : > { %8355 = vmatpush1.bf16.msra.mxu1 %v8354_v21  ;;  %v9355_v41 = vpop.permute.xlu0 %9354  ;;  %v5895_v63 = vsel %vm13728_vm10, %v9341_v61, %v9342_v19  ;;  %vm13733_vm3 = vmmov %vm13731_vm2 }
 0x5f9   : > { %9624 = vrot.lane.b32.xlu0 %v13702_v38, %s13713_s12  ;;  %8357 = vmatprep.subr.bf16.mxu1 %v8356_v1  ;;  %v9350_v20 = vpop.permute.xlu1 %9349  ;;  %v5896_v38 = vsel %vm13729_vm11, %v9342_v19, %v9346_v8  ;;  %v9357_v35 = vunpack.i.h.bf16 %v9355_v41  ;;  %v9356_v58 = vunpack.i.l.bf16 %v9355_v41  ;;  %vm13734_vm4 = vmmov %vm13731_vm2  ;;  %vm13761_vm11 = vcmask 916480  }
 0x5fa   : > { %9619 = vrot.lane.b32.xlu1 %v13703_v55, %s13713_s12  ;;  %v9352_v53 = vunpack.i.h.bf16 %v9350_v20  ;;  %v9351_v16 = vunpack.i.l.bf16 %v9350_v20  ;;  %vm13735_vm0 = vmmov %vm13731_vm2 }
 0x5fb   : > { %v5899_v9 = vsel %vm13733_vm3, %v9356_v58, %v9357_v35  ;;  %vm13736_vm13 = vmmov %vm13735_vm0 }
 0x5fc   : > { %8359 = vmatpush1.bf16.msra.mxu1 %v8358_v43  ;;  %v5897_v47 = vsel %vm13730_vm12, %v9347_v36, %v9351_v16  ;;  %v5898_v44 = vsel %vm13731_vm2, %v9351_v16, %v9352_v53  ;;  %v9365_v2 = vpop.permute.xlu0 %9364  ;;  %vm13737_vm15 = vmmov %vm13735_vm0 }
 0x5fd   : > { %9634 = vrot.lane.b32.xlu0 %v11444_v10, %s13713_s12  ;;  %v9360_v29 = vpop.permute.xlu1 %9359  ;;  %v8360_v37 = vpack.c.bf16 %v5898_v44, %v5896_v38  ;;  %v8362_v14 = vpack.c.bf16 %v5897_v47, %v5895_v63  ;;  %v9367_v0 = vunpack.i.h.bf16 %v9365_v2  ;;  %v9366_v25 = vunpack.i.l.bf16 %v9365_v2  ;;  %vm13738_vm14 = vmmov %vm13735_vm0 }
 0x5fe   : > { %9629 = vrot.lane.b32.xlu1 %v11680_v49, %s13713_s12  ;;  %v9362_v3 = vunpack.i.h.bf16 %v9360_v29  ;;  %v9361_v18 = vunpack.i.l.bf16 %v9360_v29  ;;  %vm13739_vm6 = vmmov %vm13735_vm0 }
 0x5ff   : > { %8092 = vmatmul.mubr.msk.f32.vlgmr.msra.gmra.mrb[28].mxu1 %vm1728_vm1, %v12501_v60  ;;  %8361 = vmatprep.subr.bf16.mxu1 %v8360_v37  ;;  %v5902_v32 = vsel %vm13736_vm13, %v9366_v25, %v9367_v0  ;;  %vm13740_vm5 = vmmov %vm13735_vm0  ;;  %v13745_v37 = vld [vmem:[#allocation15_spill] sm:$0xff] }
 0x600   : > { %5993 = vmatprep.mubr.f32.mxu1 %v13622_v50  ;;  %v5901_v60 = vsel %vm13734_vm4, %v9362_v3, %v9366_v25  ;;  %v5900_v59 = vsel %vm13735_vm0, %v9357_v35, %v9361_v18  ;;  %8363 = vmatpush1.bf16.msra.mxu1 %v8362_v14  ;;  %v9375_v13 = vpop.permute.xlu0 %9374  ;;  %vm13741_vm7 = vmmov %vm13735_vm0  ;;  %v13746_v14 = vld [vmem:[#allocation30_spill] sm:$0xff]  ;;  %v13747_v18 = vld [vmem:[#allocation28_spill] sm:$0xff] }
 0x601   : > { %9639 = vrot.lane.b32.xlu0 %v11396_v31, %s13732_s30  ;;  %v9370_v57 = vpop.permute.xlu1 %9369  ;;  %v8364_v42 = vpack.c.bf16 %v5902_v32, %v5900_v59  ;;  %v8366_v4 = vpack.c.bf16 %v5901_v60, %v5899_v9  ;;  %v9376_v54 = vunpack.i.l.bf16 %v9375_v13  ;;  %v9377_v22 = vunpack.i.h.bf16 %v9375_v13  ;;  %vm13742_vm8 = vmmov %vm13735_vm0  ;;  %v13748_v9 = vld [vmem:[#allocation13_spill] sm:$0xff]  ;;  %v13749_v60 = vld [vmem:[#allocation22_spill] sm:$0xff] }
 0x602   : > { %6711 = vrot.lane.b32.xlu1 %v12691_v28, %s10246_s19  ;;  %v9372_v24 = vunpack.i.h.bf16 %v9370_v57  ;;  %v9371_v23 = vunpack.i.l.bf16 %v9370_v57  ;;  %vm13743_vm9 = vmmov %vm13735_vm0  ;;  %v8376_v0 = vpack.c.bf16 %v13746_v14, %v13745_v37  ;;  %v8378_v59 = vpack.c.bf16 %v13749_v60, %v13748_v9  ;;  %v13751_v32 = vld [vmem:[#allocation41_spill] sm:$0xff] }
 0x603   : > { %8365 = vmatprep.subr.bf16.mxu1 %v8364_v42  ;;  %vm13744_vm10 = vmmov %vm13735_vm0 }
 0x604   : > { %8367 = vmatpush1.bf16.msra.mxu1 %v8366_v4  ;;  %v9385_v21 = vpop.permute.xlu0 %9384  ;;  %v5903_v48 = vsel %vm13737_vm15, %v9371_v23, %v9372_v24  ;;  %v5904_v7 = vsel %vm13738_vm14, %v9372_v24, %v9376_v54  ;;  %v13754_v4 = vld [vmem:[#allocation39_spill] sm:$0xff]  ;;  %vm13762_vm12 = vmmov %vm13761_vm11 }
 0x605   : > { %9649 = vrot.lane.b32.xlu0 %v11460_v51, %s13732_s30  ;;  %v9380_v34 = vpop.permute.xlu1 %9379  ;;  %v9387_v1 = vunpack.i.h.bf16 %v9385_v21  ;;  %v9386_v43 = vunpack.i.l.bf16 %v9385_v21  ;;  %vm13766_vm2 = vmmov %vm13761_vm11 }
 0x606   : > { %9644 = vrot.lane.b32.xlu1 %v13619_v52, %s13732_s30  ;;  %v9382_v33 = vunpack.i.h.bf16 %v9380_v34  ;;  %v9381_v27 = vunpack.i.l.bf16 %v9380_v34  ;;  %vm13770_vm3 = vmmov %vm13766_vm2 }
 0x607   : > { %vm13771_vm4 = vmmov %vm13766_vm2 }
 0x608   : > { %v5905_v52 = vsel %vm13739_vm6, %v9377_v22, %v9381_v27  ;;  %v5906_v8 = vsel %vm13740_vm5, %v9381_v27, %v9382_v33  ;;  %v9395_v19 = vpop.permute.xlu0 %9394  ;;  %v13755_v33 = vld [vmem:[#allocation20_spill] sm:$0xff]  ;;  %v13756_v27 = vld [vmem:[#allocation18_spill] sm:$0xff]  ;;  %vm13772_vm0 = vmmov %vm13766_vm2 }
 0x609   : > { %9659 = vrot.lane.b32.xlu0 %v13625_v6, %s13732_s30  ;;  %v9390_v61 = vpop.permute.xlu1 %9389  ;;  %v8368_v41 = vpack.c.bf16 %v5906_v8, %v5904_v7  ;;  %v8370_v20 = vpack.c.bf16 %v5905_v52, %v5903_v48  ;;  %v9397_v36 = vunpack.i.h.bf16 %v9395_v19  ;;  %v9396_v53 = vunpack.i.l.bf16 %v9395_v19  ;;  %v13758_v8 = vld [vmem:[#allocation19_spill] sm:$0xff]  ;;  %v13759_v19 = vld [vmem:[#allocation17_spill] sm:$0xff]  ;;  %vm13773_vm13 = vmmov %vm13772_vm0 }
 0x60a   : > { %9654 = vrot.lane.b32.xlu1 %v13626_v11, %s13732_s30  ;;  %v9392_v16 = vunpack.i.h.bf16 %v9390_v61  ;;  %v9391_v63 = vunpack.i.l.bf16 %v9390_v61  ;;  %v5907_v6 = vsel %vm13741_vm7, %v9386_v43, %v9387_v1  ;;  %v13757_v48 = vpack.c.bf16 %v13755_v33, %v13756_v27  ;;  %vm13774_vm15 = vmmov %vm13772_vm0 }
 0x60b   : > { %8369 = vmatprep.subr.bf16.mxu1 %v8368_v41  ;;  %v5910_v58 = vsel %vm13744_vm10, %v9396_v53, %v9397_v36  ;;  %v13760_v61 = vpack.c.bf16 %v13758_v8, %v13759_v19  ;;  %vm13775_vm14 = vmmov %vm13772_vm0 }
 0x60c   : > { %v5909_v38 = vsel %vm13742_vm8, %v9392_v16, %v9396_v53  ;;  %v5908_v35 = vsel %vm13743_vm9, %v9387_v1, %v9391_v63  ;;  %8371 = vmatpush1.bf16.msra.mxu1 %v8370_v20  ;;  %v9400_v47 = vpop.permute.xlu0 %9399  ;;  %v13763_v63 = vld [vmem:[#allocation29_spill] sm:$0xff]  ;;  %vm13776_vm6 = vmmov %vm13772_vm0 }
 0x60d   : > { %9669 = vrot.lane.b32.xlu0 %v13629_v56, %s13732_s30  ;;  %v12725_v44 = vpop.permute.xlu1 %6079  ;;  %v8372_v2 = vpack.c.bf16 %v5910_v58, %v5908_v35  ;;  %v8374_v29 = vpack.c.bf16 %v5909_v38, %v5907_v6  ;;  %v9402_v7 = vunpack.i.h.bf16 %v9400_v47  ;;  %v9401_v16 = vunpack.i.l.bf16 %v9400_v47  ;;  %v13764_v6 = vld [vmem:[#allocation25_spill] sm:$0xff]  ;;  %vm13778_vm5 = vmmov %vm13772_vm0 }
 0x60e   : > { %9664 = vrot.lane.b32.xlu1 %v13630_v46, %s13732_s30  ;;  %v13765_v38 = vpack.c.bf16 %v13763_v63, %v13764_v6  ;;  %vm13779_vm7 = vmmov %vm13772_vm0 }
 0x60f   : > { %8373 = vmatprep.subr.bf16.mxu1 %v8372_v2  ;;  %vm13780_vm8 = vmmov %vm13772_vm0 }
 0x610   : > { %8375 = vmatpush1.bf16.msra.mxu1 %v8374_v29  ;;  %vm13781_vm9 = vmmov %vm13772_vm0 }
 0x611   : > { %9679 = vrot.lane.b32.xlu0 %v13637_v12, %s13732_s30  ;;  %v9410_v25 = vpop.permute.xlu0 %9409  ;;  %v9405_v3 = vpop.permute.xlu1 %9404  ;;  %8377 = vmatprep.subr.bf16.mxu1 %v8376_v0  ;;  %vm13782_vm10 = vmmov %vm13772_vm0 }
 0x612   : > { %9674 = vrot.lane.b32.xlu1 %v13638_v40, %s13732_s30  ;;  %v13750_v40 = vld [vmem:[#allocation34_spill] sm:$0xff]  ;;  %v9412_v24 = vunpack.i.h.bf16 %v9410_v25  ;;  %v9411_v23 = vunpack.i.l.bf16 %v9410_v25  ;;  %v9406_v21 = vunpack.i.l.bf16 %v9405_v3  ;;  %v9407_v1 = vunpack.i.h.bf16 %v9405_v3  ;;  %v13767_v25 = vld [vmem:[#allocation27_spill] sm:$0xff]  ;;  %v13768_v3 = vld [vmem:[#allocation24_spill] sm:$0xff] }
 0x613   : > { %8093 = vmatmul.mubr.msk.f32.vlgmr.msra.gmra.mrb[28].mxu1 %vm1728_vm1, %v12666_v39  ;;  %v8380_v13 = vpack.c.bf16 %v13751_v32, %v13750_v40  ;;  %v12754_v39 = vpack.i.bf16 %v13749_v60, %v13748_v9  ;;  %v13769_v9 = vpack.c.bf16 %v13767_v25, %v13768_v3  ;;  %v6129_v32 = vsel %vm13771_vm4, %v9401_v16, %v9402_v7 }
 0x614   : > { %8379 = vmatpush1.bf16.msra.mxu1 %v8378_v59  ;;  %6070 = vmatprep.mubr.f32.mxu1 %v13622_v50  ;;  %v6130_v36 = vsel %vm13761_vm11, %v9402_v7, %v9406_v21  ;;  %v6132_v53 = vsel %vm13762_vm12, %v9411_v23, %v9412_v24  ;;  %v6131_v2 = vsel %vm13766_vm2, %v9407_v1, %v9411_v23  ;;  %vm13783_vm11 = vcmask 785408   ;;  %vm13785_vm2 = vmmov %vm13772_vm0 }
 0x615   : > { %9689 = vrot.lane.b32.xlu0 %v13645_v5, %s13732_s30  ;;  %v9420_v57 = vpop.permute.xlu0 %9419  ;;  %8381 = vmatprep.subr.bf16.mxu1 %v8380_v13  ;;  %v13753_v5 = vld [vmem:[#allocation32_spill] sm:$0xff]  ;;  %v8392_v29 = vpack.c.bf16 %v6132_v53, %v6130_v36  ;;  %vm13784_vm12 = vmmov %vm13783_vm11 }
 0x616   : > { %9684 = vrot.lane.b32.xlu1 %v13747_v18, %s13732_s30  ;;  %v12743_v42 = vpop.permute.xlu1 %9414  ;;  %v8382_v54 = vpack.c.bf16 %v13754_v4, %v13753_v5  ;;  %v9421_v35 = vunpack.i.l.bf16 %v9420_v57  ;;  %v12781_v37 = vpack.i.bf16 %v13754_v4, %v13753_v5  ;;  %v9422_v13 = vunpack.i.h.bf16 %v9420_v57 }
 0x617   : > { %v9417_v58 = vunpack.i.h.bf16 %v12743_v42  ;;  %v8394_v4 = vpack.c.bf16 %v6131_v2, %v6129_v32 }
 0x618   : > { %8383 = vmatpush1.bf16.msra.mxu1 %v8382_v54  ;;  %v9416_v54 = vunpack.i.l.bf16 %v12743_v42 }
 0x619   : > { %9699 = vrot.lane.b32.xlu0 %v13685_v26, %s13752_s8  ;;  %v12756_v34 = vpop.permute.xlu0 %9429  ;;  %8385 = vmatprep.subr.bf16.mxu1 %v13757_v48  ;;  %v6134_v24 = vsel %vm13772_vm0, %v9417_v58, %v9421_v35 }
 0x61a   : > { %9694 = vrot.lane.b32.xlu1 %v13653_v30, %s13732_s30  ;;  %v9425_v22 = vpop.permute.xlu1 %9424  ;;  %v9432_v5 = vunpack.i.h.bf16 %v12756_v34  ;;  %v9431_v42 = vunpack.i.l.bf16 %v12756_v34  ;;  %v6133_v7 = vsel %vm13776_vm6, %v9416_v54, %v9417_v58 }
 0x61b   : > { %v9427_v43 = vunpack.i.h.bf16 %v9425_v22  ;;  %v9426_v52 = vunpack.i.l.bf16 %v9425_v22 }
 0x61c   : > { %8387 = vmatpush1.bf16.msra.mxu1 %v13760_v61 }
 0x61d   : > { %9709 = vrot.lane.b32.xlu0 %v12754_v39, %s13752_s8  ;;  %8389 = vmatprep.subr.bf16.mxu1 %v13765_v38  ;;  %v6136_v40 = vsel %vm13770_vm3, %v9426_v52, %v9427_v43  ;;  %v6135_v23 = vsel %vm13773_vm13, %v9422_v13, %v9426_v52  ;;  %vm13788_vm3 = vmmov %vm13783_vm11 }
 0x61e   : > { %9704 = vrot.lane.b32.xlu1 %v11460_v51, %s13752_s8  ;;  %v9440_v41 = vpop.permute.xlu0 %9439  ;;  %v9435_v20 = vpop.permute.xlu1 %9434  ;;  %v8396_v57 = vpack.c.bf16 %v6136_v40, %v6134_v24  ;;  %v8398_v34 = vpack.c.bf16 %v6135_v23, %v6133_v7  ;;  %vm13789_vm4 = vmmov %vm13788_vm3 }
 0x61f   : > { %v9442_v47 = vunpack.i.h.bf16 %v9440_v41  ;;  %v9441_v14 = vunpack.i.l.bf16 %v9440_v41  ;;  %v9436_v0 = vunpack.i.l.bf16 %v9435_v20  ;;  %v9437_v21 = vunpack.i.h.bf16 %v9435_v20  ;;  %vm13790_vm0 = vmmov %vm13788_vm3 }
 0x620   : > { %8391 = vmatpush1.bf16.msra.mxu1 %v13769_v9  ;;  %v6137_v41 = vsel %vm13779_vm7, %v9431_v42, %v9432_v5  ;;  %vm13791_vm13 = vmmov %vm13790_vm0 }
 0x621   : > { %9719 = vrot.lane.b32.xlu0 %v13630_v46, %s13752_s8  ;;  %8393 = vmatprep.subr.bf16.mxu1 %v8392_v29  ;;  %v6138_v27 = vsel %vm13774_vm15, %v9432_v5, %v9436_v0  ;;  %v6140_v48 = vsel %vm13775_vm14, %v9441_v14, %v9442_v47  ;;  %v6139_v19 = vsel %vm13778_vm5, %v9437_v21, %v9441_v14  ;;  %v13787_v5 = vld [vmem:[#allocation38_spill] sm:$0xff]  ;;  %vm13792_vm15 = vmmov %vm13790_vm0 }
 0x622   : > { %9714 = vrot.lane.b32.xlu1 %v13694_v45, %s13752_s8  ;;  %v8400_v61 = vpack.c.bf16 %v6140_v48, %v6138_v27  ;;  %v8402_v2 = vpack.c.bf16 %v6139_v19, %v6137_v41  ;;  %vm13793_vm14 = vmmov %vm13790_vm0 }
 0x623   : > { %v9450_v60 = vpop.permute.xlu0 %9449  ;;  %v9445_v59 = vpop.permute.xlu1 %9444  ;;  %8094 = vmatmul.mubr.msk.f32.vlgmr.msra.gmra.mrb[28].mxu1 %vm1728_vm1, %v12691_v28  ;;  %v13777_v28 = vld [vmem:[#allocation37_spill] sm:$0xff]  ;;  %vm13795_vm6 = vmmov %vm13790_vm0 }
 0x624   : > { %8395 = vmatpush1.bf16.msra.mxu1 %v8394_v4  ;;  %6227 = vmatprep.mubr.f32.mxu1 %v13622_v50  ;;  %v9451_v52 = vunpack.i.l.bf16 %v9450_v60  ;;  %v9447_v8 = vunpack.i.h.bf16 %v9445_v59  ;;  %v9452_v20 = vunpack.i.h.bf16 %v9450_v60  ;;  %v9446_v63 = vunpack.i.l.bf16 %v9445_v59  ;;  %vm13796_vm5 = vmmov %vm13790_vm0 }
 0x625   : > { %9729 = vrot.lane.b32.xlu0 %v13698_v17, %s13752_s8  ;;  %8397 = vmatprep.subr.bf16.mxu1 %v8396_v57  ;;  %vm13797_vm7 = vmmov %vm13790_vm0 }
 0x626   : > { %9724 = vrot.lane.b32.xlu1 %v12781_v37, %s13752_s8  ;;  %v6142_v29 = vsel %vm13781_vm9, %v9447_v8, %v9451_v52  ;;  %v6141_v59 = vsel %vm13785_vm2, %v9446_v63, %v9447_v8  ;;  %vm13799_vm9 = vmmov %vm13790_vm0  ;;  %vm13803_vm2 = vcmask 252928  }
 0x627   : > { %v9460_v22 = vpop.permute.xlu0 %9459  ;;  %v9455_v33 = vpop.permute.xlu1 %9454 }
 0x628   : > { %v9457_v1 = vunpack.i.h.bf16 %v9455_v33  ;;  %v9456_v43 = vunpack.i.l.bf16 %v9455_v33  ;;  %8399 = vmatpush1.bf16.msra.mxu1 %v8398_v34  ;;  %v9462_v58 = vunpack.i.h.bf16 %v9460_v22  ;;  %v9461_v40 = vunpack.i.l.bf16 %v9460_v22 }
 0x629   : > { %9739 = vrot.lane.b32.xlu0 %v13777_v28, %s13752_s8  ;;  %8401 = vmatprep.subr.bf16.mxu1 %v8400_v61 }
 0x62a   : > { %9734 = vrot.lane.b32.xlu1 %v13637_v12, %s13752_s8  ;;  %v6144_v16 = vsel %vm13780_vm8, %v9456_v43, %v9457_v1  ;;  %v6143_v47 = vsel %vm13782_vm10, %v9452_v20, %v9456_v43  ;;  %v6285_v42 = vsel %vm13789_vm4, %v9461_v40, %v9462_v58  ;;  %vm13798_vm8 = vmmov %vm13790_vm0 }
 0x62b   : > { %v9470_v36 = vpop.permute.xlu0 %9469  ;;  %v9465_v53 = vpop.permute.xlu1 %9464  ;;  %v8404_v0 = vpack.c.bf16 %v6144_v16, %v6142_v29  ;;  %v8406_v4 = vpack.c.bf16 %v6143_v47, %v6141_v59  ;;  %vm13800_vm10 = vmmov %vm13790_vm0 }
 0x62c   : > { %v9472_v6 = vunpack.i.h.bf16 %v9470_v36  ;;  %v9471_v38 = vunpack.i.l.bf16 %v9470_v36  ;;  %v9466_v35 = vunpack.i.l.bf16 %v9465_v53  ;;  %v9467_v14 = vunpack.i.h.bf16 %v9465_v53  ;;  %8403 = vmatpush1.bf16.msra.mxu1 %v8402_v2  ;;  %vm13805_vm4 = vmmov %vm13803_vm2 }
 0x62d   : > { %9749 = vrot.lane.b32.xlu0 %v13653_v30, %s13752_s8  ;;  %8405 = vmatprep.subr.bf16.mxu1 %v8404_v0 }
 0x62e   : > { %9744 = vrot.lane.b32.xlu1 %v11680_v49, %s13752_s8  ;;  %v6286_v9 = vsel %vm13783_vm11, %v9462_v58, %v9466_v35  ;;  %v6288_v60 = vsel %vm13784_vm12, %v9471_v38, %v9472_v6  ;;  %v6287_v24 = vsel %vm13788_vm3, %v9467_v14, %v9471_v38  ;;  %vm13801_vm11 = vmmov %vm13790_vm0 }
 0x62f   : > { %v9480_v25 = vpop.permute.xlu0 %9479  ;;  %v8408_v23 = vpack.c.bf16 %v6288_v60, %v6286_v9  ;;  %v8410_v7 = vpack.c.bf16 %v6287_v24, %v6285_v42  ;;  %vm13802_vm12 = vmmov %vm13790_vm0 }
 0x630   : > { %v9475_v3 = vpop.permute.xlu1 %9474  ;;  %v9481_v32 = vunpack.i.l.bf16 %v9480_v25  ;;  %8407 = vmatpush1.bf16.msra.mxu1 %v8406_v4  ;;  %v9482_v22 = vunpack.i.h.bf16 %v9480_v25  ;;  %vm13804_vm3 = vmmov %vm13803_vm2 }
 0x631   : > { %v9477_v13 = vunpack.i.h.bf16 %v9475_v3  ;;  %v9476_v54 = vunpack.i.l.bf16 %v9475_v3  ;;  %9759 = vrot.lane.b32.xlu0 %v13685_v26, %s13786_s9  ;;  %8409 = vmatprep.subr.bf16.mxu1 %v8408_v23 }
 0x632   : > { %9754 = vrot.lane.b32.xlu1 %v13787_v5, %s13752_s8  ;;  %s14008_s8 = sshll.u32 %s14010_s25, 2 }
 0x633   : > { %v9490_v21 = vpop.permute.xlu0 %9489  ;;  %v6289_v48 = vsel %vm13790_vm0, %v9476_v54, %v9477_v13  ;;  %v6290_v1 = vsel %vm13791_vm13, %v9477_v13, %v9481_v32  ;;  %8095 = vmatmul.mubr.msk.f32.vlgmr.msra.gmra.mrb[28].mxu1 %vm1728_vm1, %v12725_v44  ;;  %vm13806_vm0 = vmmov %vm13803_vm2  ;;  %s278_s14 = scalar_lea.vmem %s13335_s7, %s14008_s8 }
 0x634   : > { %v9485_v57 = vpop.permute.xlu1 %9484  ;;  %v9492_v43 = vunpack.i.h.bf16 %v9490_v21  ;;  %v9491_v52 = vunpack.i.l.bf16 %v9490_v21  ;;  %8411 = vmatpush1.bf16.msra.mxu1 %v8410_v7  ;;  %6384 = vmatprep.mubr.f32.mxu1 %v13622_v50  ;;  %v12865_v7 = vld [vmem:[%s13333_s5 + $0x58] sm:$0xff]  ;;  %vm13807_vm13 = vmmov %vm13806_vm0 }
 0x635   : > { %v9487_v33 = vunpack.i.h.bf16 %v9485_v57  ;;  %v9486_v27 = vunpack.i.l.bf16 %v9485_v57  ;;  %9769 = vrot.lane.b32.xlu0 %v12754_v39, %s13786_s9 }
 0x636   : > { %9764 = vrot.lane.b32.xlu1 %v11460_v51, %s13786_s9  ;;  %v6293_v44 = vsel %vm13795_vm6, %v9491_v52, %v9492_v43  ;;  %vm13810_vm6 = vmmov %vm13806_vm0 }
 0x637   : > { %v6291_v8 = vsel %vm13792_vm15, %v9482_v22, %v9486_v27  ;;  %v6292_v34 = vsel %vm13793_vm14, %v9486_v27, %v9487_v33  ;;  %v9500_v19 = vpop.permute.xlu0 %9499  ;;  %vm13808_vm15 = vmmov %vm13806_vm0 }
 0x638   : > { %v9495_v61 = vpop.permute.xlu1 %9494  ;;  %v8412_v41 = vpack.c.bf16 %v6292_v34, %v6290_v1  ;;  %v8414_v20 = vpack.c.bf16 %v6291_v8, %v6289_v48  ;;  %v9502_v36 = vunpack.i.h.bf16 %v9500_v19  ;;  %v9501_v53 = vunpack.i.l.bf16 %v9500_v19  ;;  %vm13809_vm14 = vmmov %vm13806_vm0 }
 0x639   : > { %v9497_v16 = vunpack.i.h.bf16 %v9495_v61  ;;  %v9496_v63 = vunpack.i.l.bf16 %v9495_v61  ;;  %9779 = vrot.lane.b32.xlu0 %v13688_v15, %s13794_s13 }
 0x63a   : > { %9774 = vrot.lane.b32.xlu1 %v11396_v31, %s13794_s13  ;;  %8413 = vmatprep.subr.bf16.mxu1 %v8412_v41  ;;  %v6296_v35 = vsel %vm13798_vm8, %v9501_v53, %v9502_v36  ;;  %vm13813_vm8 = vmmov %vm13806_vm0 }
 0x63b   : > { %v6295_v6 = vsel %vm13796_vm5, %v9497_v16, %v9501_v53  ;;  %v6294_v38 = vsel %vm13797_vm7, %v9492_v43, %v9496_v63  ;;  %8415 = vmatpush1.bf16.msra.mxu1 %v8414_v20  ;;  %v9510_v58 = vpop.permute.xlu0 %9509  ;;  %vm13811_vm5 = vmmov %vm13806_vm0 }
 0x63c   : > { %v9505_v2 = vpop.permute.xlu1 %9504  ;;  %v8416_v29 = vpack.c.bf16 %v6296_v35, %v6294_v38  ;;  %v8418_v47 = vpack.c.bf16 %v6295_v6, %v6293_v44  ;;  %v9511_v14 = vunpack.i.l.bf16 %v9510_v58  ;;  %v9512_v60 = vunpack.i.h.bf16 %v9510_v58  ;;  %vm13812_vm7 = vmmov %vm13806_vm0 }
 0x63d   : > { %9789 = vrot.lane.b32.xlu0 %v13694_v45, %s13786_s9  ;;  %v9507_v0 = vunpack.i.h.bf16 %v9505_v2  ;;  %v9506_v25 = vunpack.i.l.bf16 %v9505_v2 }
 0x63e   : > { %9784 = vrot.lane.b32.xlu1 %v13622_v50, %s13794_s13  ;;  %8417 = vmatprep.subr.bf16.mxu1 %v8416_v29 }
 0x63f   : > { %8419 = vmatpush1.bf16.msra.mxu1 %v8418_v47  ;;  %v12848_v3 = vpop.permute.xlu0 %6393  ;;  %v6297_v32 = vsel %vm13799_vm9, %v9506_v25, %v9507_v0  ;;  %v6298_v54 = vsel %vm13801_vm11, %v9507_v0, %v9511_v14  ;;  %vm13814_vm9 = vmmov %vm13806_vm0 }
 0x640   : > { %v9515_v9 = vpop.permute.xlu1 %9514  ;;  %vm13816_vm11 = vmmov %vm13806_vm0 }
 0x641   : > { %v9517_v59 = vunpack.i.h.bf16 %v9515_v9  ;;  %v9516_v40 = vunpack.i.l.bf16 %v9515_v9  ;;  %9799 = vrot.lane.b32.xlu0 %v12781_v37, %s13786_s9 }
 0x642   : > { %9794 = vrot.lane.b32.xlu1 %v13630_v46, %s13786_s9 }
 0x643   : > { %v6299_v13 = vsel %vm13800_vm10, %v9512_v60, %v9516_v40  ;;  %v6300_v4 = vsel %vm13802_vm12, %v9516_v40, %v9517_v59  ;;  %v9525_v24 = vpop.permute.xlu0 %9524  ;;  %vm13815_vm10 = vmmov %vm13806_vm0 }
 0x644   : > { %v9520_v23 = vpop.permute.xlu1 %9519  ;;  %v8420_v21 = vpack.c.bf16 %v6300_v4, %v6298_v54  ;;  %v8422_v57 = vpack.c.bf16 %v6299_v13, %v6297_v32  ;;  %v9526_v42 = vunpack.i.l.bf16 %v9525_v24  ;;  %v9527_v1 = vunpack.i.h.bf16 %v9525_v24  ;;  %vm13817_vm12 = vmmov %vm13806_vm0 }
 0x645   : > { %v9522_v22 = vunpack.i.h.bf16 %v9520_v23  ;;  %v9521_v33 = vunpack.i.l.bf16 %v9520_v23  ;;  %9809 = vrot.lane.b32.xlu0 %v13693_v62, %s13794_s13 }
 0x646   : > { %9804 = vrot.lane.b32.xlu1 %v13626_v11, %s13794_s13  ;;  %8421 = vmatprep.subr.bf16.mxu1 %v8420_v21 }
 0x647   : > { %8423 = vmatpush1.bf16.msra.mxu1 %v8422_v57  ;;  %v9535_v27 = vpop.permute.xlu0 %9534  ;;  %v6443_v8 = vsel %vm13803_vm2, %v9521_v33, %v9522_v22  ;;  %v6444_v34 = vsel %vm13804_vm3, %v9522_v22, %v9526_v42  ;;  %vm13818_vm2 = vmmov %vm13806_vm0  ;;  %vm13819_vm3 = vcmask 121856  }
 0x648   : > { %v9530_v48 = vpop.permute.xlu1 %9529  ;;  %v9537_v19 = vunpack.i.h.bf16 %v9535_v27  ;;  %v9536_v61 = vunpack.i.l.bf16 %v9535_v27 }
 0x649   : > { %v9532_v43 = vunpack.i.h.bf16 %v9530_v48  ;;  %v9531_v52 = vunpack.i.l.bf16 %v9530_v48  ;;  %9819 = vrot.lane.b32.xlu0 %v13698_v17, %s13786_s9 }
 0x64a   : > { %9814 = vrot.lane.b32.xlu1 %v13622_v50, %s13794_s13  ;;  %8096 = vmatmul.mubr.msk.f32.vlgmr.msra.gmra.mrb[28].mxu1 %vm1728_vm1, %v12865_v7  ;;  %v6447_v58 = vsel %vm13807_vm13, %v9536_v61, %v9537_v19 }
 0x64b   : > { %v6445_v41 = vsel %vm13805_vm4, %v9527_v1, %v9531_v52  ;;  %v6446_v20 = vsel %vm13806_vm0, %v9531_v52, %v9532_v43  ;;  %v9545_v36 = vpop.permute.xlu0 %9544  ;;  %7334 = vmatprep.mubr.f32.mxu1 %v13622_v50  ;;  %vm13821_vm4 = vmmov %vm13819_vm3 }
 0x64c   : > { %v9540_v53 = vpop.permute.xlu1 %9539  ;;  %v8424_v16 = vpack.c.bf16 %v6446_v20, %v6444_v34  ;;  %v8426_v63 = vpack.c.bf16 %v6445_v41, %v6443_v8  ;;  %v9547_v44 = vunpack.i.h.bf16 %v9545_v36  ;;  %v9546_v6 = vunpack.i.l.bf16 %v9545_v36  ;;  %vm13822_vm0 = vmmov %vm13819_vm3 }
 0x64d   : > { %v9542_v38 = vunpack.i.h.bf16 %v9540_v53  ;;  %v9541_v35 = vunpack.i.l.bf16 %v9540_v53  ;;  %9829 = vrot.lane.b32.xlu0 %v13777_v28, %s13786_s9  ;;  %vm13823_vm13 = vmmov %vm13822_vm0 }
 0x64e   : > { %9824 = vrot.lane.b32.xlu1 %v13637_v12, %s13786_s9  ;;  %8425 = vmatprep.subr.bf16.mxu0 %v8424_v16  ;;  %v6450_v47 = vsel %vm13810_vm6, %v9546_v6, %v9547_v44  ;;  %vm13826_vm6 = vmmov %vm13822_vm0 }
 0x64f   : > { %v6449_v2 = vsel %vm13808_vm15, %v9542_v38, %v9546_v6  ;;  %v6448_v29 = vsel %vm13809_vm14, %v9537_v19, %v9541_v35  ;;  %8427 = vmatpush1.bf16.msra.mxu0 %v8426_v63  ;;  %v9555_v14 = vpop.permute.xlu0 %9554  ;;  %vm13824_vm15 = vmmov %vm13822_vm0 }
 0x650   : > { %v9550_v0 = vpop.permute.xlu1 %9549  ;;  %v8428_v25 = vpack.c.bf16 %v6450_v47, %v6448_v29  ;;  %v8430_v9 = vpack.c.bf16 %v6449_v2, %v6447_v58  ;;  %v9556_v60 = vunpack.i.l.bf16 %v9555_v14  ;;  %v9557_v54 = vunpack.i.h.bf16 %v9555_v14  ;;  %vm13825_vm14 = vmmov %vm13822_vm0 }
 0x651   : > { %v9552_v59 = vunpack.i.h.bf16 %v9550_v0  ;;  %v9551_v40 = vunpack.i.l.bf16 %v9550_v0  ;;  %9839 = vrot.lane.b32.xlu0 %v13703_v55, %s13794_s13 }
 0x652   : > { %9834 = vrot.lane.b32.xlu1 %v13629_v56, %s13794_s13  ;;  %8429 = vmatprep.subr.bf16.mxu0 %v8428_v25 }
 0x653   : > { %8431 = vmatpush1.bf16.msra.mxu0 %v8430_v9  ;;  %v9565_v32 = vpop.permute.xlu0 %9564  ;;  %v6451_v23 = vsel %vm13811_vm5, %v9551_v40, %v9552_v59  ;;  %v6452_v21 = vsel %vm13812_vm7, %v9552_v59, %v9556_v60  ;;  %vm13827_vm5 = vmmov %vm13822_vm0 }
 0x654   : > { %v9560_v13 = vpop.permute.xlu1 %9559  ;;  %v9567_v57 = vunpack.i.h.bf16 %v9565_v32  ;;  %v9566_v42 = vunpack.i.l.bf16 %v9565_v32  ;;  %vm13829_vm7 = vmmov %vm13822_vm0 }
 0x655   : > { %v9562_v4 = vunpack.i.h.bf16 %v9560_v13  ;;  %v9561_v24 = vunpack.i.l.bf16 %v9560_v13  ;;  %9849 = vrot.lane.b32.xlu0 %v11680_v49, %s13786_s9 }
 0x656   : > { %9844 = vrot.lane.b32.xlu1 %v13622_v50, %s13794_s13  ;;  %v6455_v61 = vsel %vm13815_vm10, %v9566_v42, %v9567_v57  ;;  %vm13832_vm10 = vmmov %vm13822_vm0 }
 0x657   : > { %v6453_v22 = vsel %vm13813_vm8, %v9557_v54, %v9561_v24  ;;  %v6454_v33 = vsel %vm13814_vm9, %v9561_v24, %v9562_v4  ;;  %v9575_v27 = vpop.permute.xlu0 %9574  ;;  %vm13830_vm8 = vmmov %vm13822_vm0 }
 0x658   : > { %v9570_v48 = vpop.permute.xlu1 %9569  ;;  %v8432_v1 = vpack.c.bf16 %v6454_v33, %v6452_v21  ;;  %v8434_v43 = vpack.c.bf16 %v6453_v22, %v6451_v23  ;;  %v9577_v52 = vunpack.i.h.bf16 %v9575_v27  ;;  %v9576_v8 = vunpack.i.l.bf16 %v9575_v27  ;;  %vm13831_vm9 = vmmov %vm13822_vm0 }
 0x659   : > { %v9572_v34 = vunpack.i.h.bf16 %v9570_v48  ;;  %v9571_v19 = vunpack.i.l.bf16 %v9570_v48  ;;  %9859 = vrot.lane.b32.xlu0 %v13787_v5, %s13786_s9 }
 0x65a   : > { %9854 = vrot.lane.b32.xlu1 %v13653_v30, %s13786_s9  ;;  %8433 = vmatprep.subr.bf16.mxu0 %v8432_v1  ;;  %v6458_v36 = vsel %vm13818_vm2, %v9576_v8, %v9577_v52  ;;  %vm13835_vm2 = vmmov %vm13822_vm0 }
 0x65b   : > { %v6457_v41 = vsel %vm13816_vm11, %v9572_v34, %v9576_v8  ;;  %v6456_v20 = vsel %vm13817_vm12, %v9567_v57, %v9571_v19  ;;  %8435 = vmatpush1.bf16.msra.mxu0 %v8434_v43  ;;  %v9585_v53 = vpop.permute.xlu0 %9584  ;;  %vm13833_vm11 = vmmov %vm13822_vm0 }
 0x65c   : > { %v9580_v16 = vpop.permute.xlu1 %9579  ;;  %v8436_v63 = vpack.c.bf16 %v6458_v36, %v6456_v20  ;;  %v8438_v44 = vpack.c.bf16 %v6457_v41, %v6455_v61  ;;  %v9586_v6 = vunpack.i.l.bf16 %v9585_v53  ;;  %v9587_v29 = vunpack.i.h.bf16 %v9585_v53  ;;  %vm13834_vm12 = vmmov %vm13822_vm0 }
 0x65d   : > { %v9582_v38 = vunpack.i.h.bf16 %v9580_v16  ;;  %v9581_v35 = vunpack.i.l.bf16 %v9580_v16  ;;  %9869 = vrot.lane.b32.xlu0 %v11444_v10, %s13794_s13 }
 0x65e   : > { %9864 = vrot.lane.b32.xlu1 %v13747_v18, %s13794_s13  ;;  %8437 = vmatprep.subr.bf16.mxu0 %v8436_v63 }
 0x65f   : > { %8439 = vmatpush1.bf16.msra.mxu0 %v8438_v44  ;;  %v9595_v58 = vpop.permute.xlu0 %9594  ;;  %v6601_v0 = vsel %vm13819_vm3, %v9581_v35, %v9582_v38  ;;  %v6602_v25 = vsel %vm13821_vm4, %v9582_v38, %v9586_v6  ;;  %vm13836_vm3 = vmmov %vm13822_vm0  ;;  %vm13837_vm4 = vcmask 1039360  }
 0x660   : > { %v9590_v2 = vpop.permute.xlu1 %9589  ;;  %v9597_v9 = vunpack.i.h.bf16 %v9595_v58  ;;  %v9596_v60 = vunpack.i.l.bf16 %v9595_v58 }
 0x661   : > { %v9592_v47 = vunpack.i.h.bf16 %v9590_v2  ;;  %v9591_v14 = vunpack.i.l.bf16 %v9590_v2  ;;  %9879 = vrot.lane.b32.xlu0 %v11396_v31, %s13820_s16 }
 0x662   : > { %9874 = vrot.lane.b32.xlu1 %v13622_v50, %s13794_s13  ;;  %8097 = vmatmul.mubr.msk.f32.vlgmr.msra.gmra.mrb[40].mxu0 %vm1728_vm1, %v12848_v3  ;;  %v6605_v3 = vsel %vm13824_vm15, %v9596_v60, %v9597_v9 }
 0x663   : > { %v6603_v59 = vsel %vm13822_vm0, %v9587_v29, %v9591_v14  ;;  %v6604_v40 = vsel %vm13823_vm13, %v9591_v14, %v9592_v47  ;;  %v9605_v32 = vpop.permute.xlu0 %9604  ;;  %6700 = vmatprep.mubr.f32.mxu0 %v13622_v50  ;;  %vm13838_vm0 = vmmov %vm13837_vm4 }
 0x664   : > { %v9600_v13 = vpop.permute.xlu1 %9599  ;;  %v8440_v54 = vpack.c.bf16 %v6604_v40, %v6602_v25  ;;  %v8442_v4 = vpack.c.bf16 %v6603_v59, %v6601_v0  ;;  %v9607_v31 = vunpack.i.h.bf16 %v9605_v32  ;;  %v9606_v24 = vunpack.i.l.bf16 %v9605_v32  ;;  %vm13839_vm13 = vmmov %vm13838_vm0 }
 0x665   : > { %v9602_v23 = vunpack.i.h.bf16 %v9600_v13  ;;  %v9601_v21 = vunpack.i.l.bf16 %v9600_v13  ;;  %9889 = vrot.lane.b32.xlu0 %v13622_v50, %s13820_s16  ;;  %vm13840_vm15 = vmmov %vm13838_vm0 }
 0x666   : > { %9884 = vrot.lane.b32.xlu1 %v13688_v15, %s13820_s16  ;;  %8441 = vmatprep.subr.bf16.mxu0 %v8440_v54  ;;  %v6608_v22 = vsel %vm13827_vm5, %v9606_v24, %v9607_v31 }
 0x667   : > { %v6607_v57 = vsel %vm13825_vm14, %v9602_v23, %v9606_v24  ;;  %v6606_v42 = vsel %vm13826_vm6, %v9597_v9, %v9601_v21  ;;  %8443 = vmatpush1.bf16.msra.mxu0 %v8442_v4  ;;  %v9615_v33 = vpop.permute.xlu0 %9614  ;;  %v12962_v21 = vld [vmem:[%s13333_s5 + $0x20] sm:$0xff]  ;;  %vm13843_vm6 = vmmov %vm13838_vm0 }
 0x668   : > { %v9610_v27 = vpop.permute.xlu1 %9609  ;;  %v8444_v48 = vpack.c.bf16 %v6608_v22, %v6606_v42  ;;  %v8446_v1 = vpack.c.bf16 %v6607_v57, %v6605_v3  ;;  %v9616_v43 = vunpack.i.l.bf16 %v9615_v33  ;;  %v9617_v19 = vunpack.i.h.bf16 %v9615_v33 }
 0x669   : > { %v9612_v52 = vunpack.i.h.bf16 %v9610_v27  ;;  %v9611_v8 = vunpack.i.l.bf16 %v9610_v27  ;;  %9899 = vrot.lane.b32.xlu0 %v11460_v51, %s13828_s17 }
 0x66a   : > { %9894 = vrot.lane.b32.xlu1 %v13685_v26, %s13828_s17  ;;  %8445 = vmatprep.subr.bf16.mxu0 %v8444_v48 }
 0x66b   : > { %8447 = vmatpush1.bf16.msra.mxu0 %v8446_v1  ;;  %v9625_v15 = vpop.permute.xlu0 %9624  ;;  %v6609_v20 = vsel %vm13829_vm7, %v9611_v8, %v9612_v52  ;;  %v6610_v36 = vsel %vm13830_vm8, %v9612_v52, %v9616_v43  ;;  %vm13846_vm7 = vmmov %vm13838_vm0 }
 0x66c   : > { %v9620_v34 = vpop.permute.xlu1 %9619  ;;  %v9627_v53 = vunpack.i.h.bf16 %v9625_v15  ;;  %v9626_v16 = vunpack.i.l.bf16 %v9625_v15  ;;  %vm13847_vm8 = vmmov %vm13838_vm0 }
 0x66d   : > { %v9622_v61 = vunpack.i.h.bf16 %v9620_v34  ;;  %v9621_v41 = vunpack.i.l.bf16 %v9620_v34  ;;  %7029 = vrot.lane.b32.xlu0 %v12865_v7, %s10246_s19 }
 0x66e   : > { %9904 = vrot.lane.b32.xlu1 %v12754_v39, %s13828_s17  ;;  %v4196_v7 = vpop.f32.mrb[16].mxu1  ;;  %v6613_v0 = vsel %vm13833_vm11, %v9626_v16, %v9627_v53 }
 0x66f   : > { %v6611_v63 = vsel %vm13831_vm9, %v9617_v19, %v9621_v41  ;;  %v6612_v44 = vsel %vm13832_vm10, %v9621_v41, %v9622_v61  ;;  %v9635_v6 = vpop.permute.xlu0 %9634  ;;  %v4198_v59 = vpop.f32.mrb[17].mxu1  ;;  %vm13849_vm10 = vmmov %vm13838_vm0 }
 0x670   : > { %v9630_v38 = vpop.permute.xlu1 %9629  ;;  %v8448_v35 = vpack.c.bf16 %v6612_v44, %v6610_v36  ;;  %v8450_v58 = vpack.c.bf16 %v6611_v63, %v6609_v20  ;;  %v9637_v2 = vunpack.i.h.bf16 %v9635_v6  ;;  %v9636_v29 = vunpack.i.l.bf16 %v9635_v6 }
 0x671   : > { %v9632_v47 = vunpack.i.h.bf16 %v9630_v38  ;;  %v9631_v14 = vunpack.i.l.bf16 %v9630_v38  ;;  %9914 = vrot.lane.b32.xlu0 %v13693_v62, %s13820_s16 }
 0x672   : > { %9909 = vrot.lane.b32.xlu1 %v13626_v11, %s13820_s16  ;;  %8449 = vmatprep.subr.bf16.mxu0 %v8448_v35  ;;  %v6616_v60 = vsel %vm13836_vm3, %v9636_v29, %v9637_v2  ;;  %v13844_v35 = vld [vmem:[#allocation6_spill] sm:$0xff]  ;;  %vm13853_vm3 = vmmov %vm13838_vm0 }
 0x673   : > { %v6615_v25 = vsel %vm13834_vm12, %v9632_v47, %v9636_v29  ;;  %v6614_v9 = vsel %vm13835_vm2, %v9627_v53, %v9631_v14  ;;  %8451 = vmatpush1.bf16.msra.mxu0 %v8450_v58  ;;  %v9640_v40 = vpop.permute.xlu0 %9639  ;;  %v12951_v54 = vpop.f32.mrb[32].mxu0  ;;  %v13841_v53 = vld [vmem:[#allocation5_spill] sm:$0xff]  ;;  %vm13845_vm5 = vcmp.ge.s32.totalorder %v13844_v35, 0  ;;  %vm13851_vm12 = vmmov %vm13838_vm0 }
 0x674   : > { %v12949_v32 = vpop.permute.xlu1 %6711  ;;  %v8452_v13 = vpack.c.bf16 %v6616_v60, %v6614_v9  ;;  %v8454_v62 = vpack.c.bf16 %v6615_v25, %v6613_v0  ;;  %v9642_v11 = vunpack.i.h.bf16 %v9640_v40  ;;  %v9641_v4 = vunpack.i.l.bf16 %v9640_v40  ;;  %v12957_v31 = vpop.f32.mrb[33].mxu0  ;;  %vm13850_vm11 = vmmov %vm13845_vm5 }
 0x675   : > { %9924 = vrot.lane.b32.xlu0 %v13694_v45, %s13828_s17  ;;  %vm13842_vm14 = vcmp.ge.s32.totalorder %v13841_v53, 0  ;;  %v4202_v58 = vsel %vm13845_vm5, %v4198_v59, 0.0  ;;  %vm13852_vm2 = vmmov %vm13838_vm0  ;;  %vm13859_vm5 = vcmask 908288  }
 0x676   : > { %9919 = vrot.lane.b32.xlu1 %v13622_v50, %s13820_s16  ;;  %8453 = vmatprep.subr.bf16.mxu0 %v8452_v13  ;;  %v6761_v33 = vsel %vm13837_vm4, %v9641_v4, %v9642_v11  ;;  %v4201_v16 = vsel %vm13842_vm14, %v4196_v7, 0.0  ;;  %vm13848_vm9 = vmmov %vm13842_vm14 }
 0x677   : > { %8455 = vmatpush1.bf16.msra.mxu0 %v8454_v62  ;;  %v9650_v24 = vpop.permute.xlu0 %9649  ;;  %vm13854_vm4 = vmmov %vm13838_vm0 }
 0x678   : > { %v9645_v23 = vpop.permute.xlu1 %9644  ;;  %v9652_v3 = vunpack.i.h.bf16 %v9650_v24  ;;  %v9651_v57 = vunpack.i.l.bf16 %v9650_v24  ;;  %vm13857_vm14 = vmmov %vm13838_vm0 }
 0x679   : > { %v9647_v42 = vunpack.i.h.bf16 %v9645_v23  ;;  %v9646_v22 = vunpack.i.l.bf16 %v9645_v23  ;;  %9934 = vrot.lane.b32.xlu0 %v12781_v37, %s13828_s17 }
 0x67a   : > { %9929 = vrot.lane.b32.xlu1 %v13630_v46, %s13828_s17  ;;  %8098 = vmatmul.mubr.msk.f32.vlgmr.msra.gmra.mrb[42].mxu0 %vm1728_vm1, %v12962_v21  ;;  %v6764_v1 = vsel %vm13840_vm15, %v9651_v57, %v9652_v3  ;;  %vm13856_vm15 = vmmov %vm13838_vm0 }
 0x67b   : > { %v6763_v27 = vsel %vm13838_vm0, %v9647_v42, %v9651_v57  ;;  %v6762_v48 = vsel %vm13839_vm13, %v9642_v11, %v9646_v22  ;;  %v9660_v43 = vpop.permute.xlu0 %9659  ;;  %6859 = vmatprep.mubr.f32.mxu0 %v13622_v50  ;;  %vm13855_vm13 = vmmov %vm13838_vm0 }
 0x67c   : > { %v9655_v52 = vpop.permute.xlu1 %9654  ;;  %v8456_v8 = vpack.c.bf16 %v6764_v1, %v6762_v48  ;;  %v8458_v15 = vpack.c.bf16 %v6763_v27, %v6761_v33  ;;  %v9661_v34 = vunpack.i.l.bf16 %v9660_v43  ;;  %v9662_v36 = vunpack.i.h.bf16 %v9660_v43 }
 0x67d   : > { %v9657_v19 = vunpack.i.h.bf16 %v9655_v52  ;;  %v9656_v61 = vunpack.i.l.bf16 %v9655_v52  ;;  %9944 = vrot.lane.b32.xlu0 %v13703_v55, %s13820_s16 }
 0x67e   : > { %9939 = vrot.lane.b32.xlu1 %v13629_v56, %s13820_s16  ;;  %8457 = vmatprep.subr.bf16.mxu0 %v8456_v8 }
 0x67f   : > { %8459 = vmatpush1.bf16.msra.mxu0 %v8458_v15  ;;  %v9670_v41 = vpop.permute.xlu0 %9669  ;;  %v6765_v6 = vsel %vm13843_vm6, %v9656_v61, %v9657_v19  ;;  %v6766_v56 = vsel %vm13846_vm7, %v9657_v19, %v9661_v34  ;;  %vm13858_vm6 = vmmov %vm13848_vm9 }
 0x680   : > { %v9665_v20 = vpop.permute.xlu1 %9664  ;;  %v9672_v38 = vunpack.i.h.bf16 %v9670_v41  ;;  %v4357_v55 = vpop.f32.mrb[18].mxu1  ;;  %v9671_v2 = vunpack.i.l.bf16 %v9670_v41  ;;  %vm13860_vm7 = vmmov %vm13859_vm5 }
 0x681   : > { %v9667_v63 = vunpack.i.h.bf16 %v9665_v20  ;;  %v9666_v44 = vunpack.i.l.bf16 %v9665_v20  ;;  %9954 = vrot.lane.b32.xlu0 %v13698_v17, %s13828_s17  ;;  %v4362_v47 = vsel %vm13848_vm9, %v4357_v55, 0.0  ;;  %v4359_v14 = vpop.f32.mrb[19].mxu1  ;;  %vm13862_vm9 = vmmov %vm13858_vm6 }
 0x682   : > { %9949 = vrot.lane.b32.xlu1 %v13622_v50, %s13820_s16  ;;  %v12993_v25 = vadd.f32 %v4362_v47, %v4201_v16  ;;  %v4363_v9 = vsel %vm13850_vm11, %v4359_v14, 0.0  ;;  %v6769_v22 = vsel %vm13853_vm3, %v9671_v2, %v9672_v38  ;;  %v4730_v14 = vsel %vm13858_vm6, %v12951_v54, 0.0 }
 0x683   : > { %v6767_v29 = vsel %vm13847_vm8, %v9662_v36, %v9666_v44  ;;  %v6768_v7 = vsel %vm13849_vm10, %v9666_v44, %v9667_v63  ;;  %v9680_v60 = vpop.permute.xlu0 %9679  ;;  %v12997_v13 = vadd.f32 %v4363_v9, %v4202_v58  ;;  %vm13861_vm8 = vmmov %vm13859_vm5 }
 0x684   : > { %v8462_v0 = vpack.c.bf16 %v6767_v29, %v6765_v6  ;;  %v9675_v59 = vpop.permute.xlu1 %9674  ;;  %v8460_v40 = vpack.c.bf16 %v6768_v7, %v6766_v56  ;;  %v9682_v62 = vunpack.i.h.bf16 %v9680_v60  ;;  %v9681_v11 = vunpack.i.l.bf16 %v9680_v60  ;;  %vm13863_vm10 = vmmov %vm13859_vm5 }
 0x685   : > { %v9677_v4 = vunpack.i.h.bf16 %v9675_v59  ;;  %v9676_v24 = vunpack.i.l.bf16 %v9675_v59  ;;  %v12999_v23 = vpop.f32.mrb[34].mxu0  ;;  %9964 = vrot.lane.b32.xlu0 %v13777_v28, %s13828_s17 }
 0x686   : > { %9959 = vrot.lane.b32.xlu1 %v13637_v12, %s13828_s17  ;;  %v13006_v57 = vpop.f32.mrb[35].mxu0  ;;  %8461 = vmatprep.subr.bf16.mxu0 %v8460_v40  ;;  %v6772_v42 = vsel %vm13852_vm2, %v9681_v11, %v9682_v62  ;;  %vm13866_vm2 = vmmov %vm13859_vm5 }
 0x687   : > { %v6771_v3 = vsel %vm13851_vm12, %v9677_v4, %v9681_v11  ;;  %8463 = vmatpush1.bf16.msra.mxu0 %v8462_v0  ;;  %v9690_v33 = vpop.permute.xlu0 %9689  ;;  %v6770_v48 = vsel %vm13854_vm4, %v9672_v38, %v9676_v24  ;;  %vm13864_vm12 = vmmov %vm13850_vm11 }
 0x688   : > { %v9685_v27 = vpop.permute.xlu1 %9684  ;;  %v8466_v1 = vpack.c.bf16 %v6771_v3, %v6769_v22  ;;  %v8464_v43 = vpack.c.bf16 %v6772_v42, %v6770_v48  ;;  %v9691_v52 = vunpack.i.l.bf16 %v9690_v33  ;;  %v9692_v61 = vunpack.i.h.bf16 %v9690_v33  ;;  %vm13867_vm3 = vmmov %vm13866_vm2 }
 0x689   : > { %9974 = vrot.lane.b32.xlu0 %v11444_v10, %s13820_s16  ;;  %v9687_v8 = vunpack.i.h.bf16 %v9685_v27  ;;  %v9686_v15 = vunpack.i.l.bf16 %v9685_v27  ;;  %vm13869_vm4 = vmmov %vm13866_vm2 }
 0x68a   : > { %9969 = vrot.lane.b32.xlu1 %v13747_v18, %s13820_s16  ;;  %8465 = vmatprep.subr.bf16.mxu0 %v8464_v43 }
 0x68b   : > { %v9700_v34 = vpop.permute.xlu0 %9699  ;;  %8467 = vmatpush1.bf16.msra.mxu0 %v8466_v1  ;;  %v6773_v10 = vsel %vm13838_vm0, %v9686_v15, %v9687_v8  ;;  %v6774_v63 = vsel %vm13856_vm15, %v9687_v8, %v9691_v52  ;;  %v4731_v1 = vsel %vm13864_vm12, %v12957_v31, 0.0  ;;  %vm13870_vm0 = vmmov %vm13866_vm2 }
 0x68c   : > { %v9695_v19 = vpop.permute.xlu1 %9694  ;;  %v9702_v36 = vunpack.i.h.bf16 %v9700_v34  ;;  %v9701_v16 = vunpack.i.l.bf16 %v9700_v34  ;;  %vm13872_vm15 = vmmov %vm13870_vm0 }
 0x68d   : > { %v9697_v41 = vunpack.i.h.bf16 %v9695_v19  ;;  %v9696_v20 = vunpack.i.l.bf16 %v9695_v19  ;;  %9984 = vrot.lane.b32.xlu0 %v11680_v49, %s13828_s17  ;;  %vm13874_vm6 = vmmov %vm13870_vm0 }
 0x68e   : > { %9979 = vrot.lane.b32.xlu1 %v13622_v50, %s13820_s16  ;;  %v6920_v0 = vsel %vm13859_vm5, %v9701_v16, %v9702_v36  ;;  %vm13875_vm5 = vmmov %vm13862_vm9 }
 0x68f   : > { %v6775_v18 = vsel %vm13855_vm13, %v9692_v61, %v9696_v20  ;;  %v6776_v44 = vsel %vm13857_vm14, %v9696_v20, %v9697_v41  ;;  %v9710_v38 = vpop.permute.xlu0 %9709  ;;  %vm13871_vm13 = vmmov %vm13870_vm0 }
 0x690   : > { %v8470_v6 = vpack.c.bf16 %v6775_v18, %v6773_v10  ;;  %v9705_v58 = vpop.permute.xlu1 %9704  ;;  %v8468_v55 = vpack.c.bf16 %v6776_v44, %v6774_v63  ;;  %v9712_v56 = vunpack.i.h.bf16 %v9710_v38  ;;  %v9711_v2 = vunpack.i.l.bf16 %v9710_v38  ;;  %vm13873_vm14 = vmmov %vm13870_vm0 }
 0x691   : > { %v9707_v29 = vunpack.i.h.bf16 %v9705_v58  ;;  %v9706_v47 = vunpack.i.l.bf16 %v9705_v58  ;;  %v4516_v7 = vpop.f32.mrb[20].mxu1  ;;  %9994 = vrot.lane.b32.xlu0 %v13787_v5, %s13828_s17  ;;  %vm13883_vm12 = vmmov %vm13870_vm0 }
 0x692   : > { %9989 = vrot.lane.b32.xlu1 %v13653_v30, %s13828_s17  ;;  %v6919_v9 = vsel %vm13860_vm7, %v9711_v2, %v9701_v16  ;;  %v4521_v59 = vsel %vm13862_vm9, %v4516_v7, 0.0  ;;  %v4518_v40 = vpop.f32.mrb[21].mxu1  ;;  %8469 = vmatprep.subr.bf16.mxu0 %v8468_v55  ;;  %vm13876_vm7 = vmmov %vm13870_vm0 }
 0x693   : > { %v6921_v60 = vsel %vm13861_vm8, %v9712_v56, %v9706_v47  ;;  %v6922_v54 = vsel %vm13863_vm10, %v9706_v47, %v9707_v29  ;;  %v4523_v11 = vadd.f32 %v4521_v59, %v12993_v25  ;;  %v4522_v4 = vsel %vm13850_vm11, %v4518_v40, 0.0  ;;  %8471 = vmatpush1.bf16.msra.mxu0 %v8470_v6  ;;  %v9720_v24 = vpop.permute.xlu0 %9719  ;;  %vm13877_vm8 = vmmov %vm13870_vm0 }
 0x694   : > { %v8474_v62 = vpack.c.bf16 %v6921_v60, %v6919_v9  ;;  %v9715_v3 = vpop.permute.xlu1 %9714  ;;  %v8472_v42 = vpack.c.bf16 %v6922_v54, %v6920_v0  ;;  %v4524_v22 = vadd.f32 %v4522_v4, %v12997_v13  ;;  %v9722_v33 = vunpack.i.h.bf16 %v9720_v24  ;;  %vm13878_vm9 = vmmov %vm13850_vm11 }
 0x695   : > { %v9721_v27 = vunpack.i.l.bf16 %v9720_v24  ;;  %v9717_v48 = vunpack.i.h.bf16 %v9715_v3  ;;  %v9716_v43 = vunpack.i.l.bf16 %v9715_v3  ;;  %v13043_v52 = vpop.f32.mrb[36].mxu0  ;;  %10004 = vrot.lane.b32.xlu0 %v11460_v51, %s13865_s23  ;;  %v4732_v25 = vadd.f32 %v4730_v14, %v4523_v11 }
 0x696   : > { %9999 = vrot.lane.b32.xlu1 %v13685_v26, %s13865_s23  ;;  %v13049_v8 = vpop.f32.mrb[37].mxu0  ;;  %8099 = vmatmul.mubr.msk.f32.vlgmr.msra.gmra.mrb[44].mxu0 %vm1728_vm1, %v12949_v32  ;;  %v4733_v15 = vadd.f32 %v4731_v1, %v4524_v22 }
 0x697   : > { %8473 = vmatprep.subr.bf16.mxu0 %v8472_v42  ;;  %v6926_v13 = vsel %vm13866_vm2, %v9721_v27, %v9722_v33  ;;  %v9730_v31 = vpop.permute.xlu0 %9729  ;;  %v6924_v19 = vsel %vm13867_vm3, %v9716_v43, %v9717_v48  ;;  %7018 = vmatprep.mubr.f32.mxu0 %v13622_v50  ;;  %v13879_v33 = vld [vmem:[#allocation7_spill] sm:$0xff]  ;;  %v13881_v48 = vld [vmem:[#allocation8_spill] sm:$0xff]  ;;  %vm13884_vm2 = vmmov %vm13870_vm0  ;;  %vm13885_vm3 = vcmask 777216  }
 0x698   : > { %8475 = vmatpush1.bf16.msra.mxu0 %v8474_v62  ;;  %v9725_v34 = vpop.permute.xlu1 %9724  ;;  %v8476_v32 = vpack.c.bf16 %v6926_v13, %v6924_v19  ;;  %v9732_v20 = vunpack.i.h.bf16 %v9730_v31  ;;  %v9731_v36 = vunpack.i.l.bf16 %v9730_v31  ;;  %vm13880_vm10 = vcmp.ge.s32.totalorder %v13879_v33, 0 }
 0x699   : > { %v9727_v61 = vunpack.i.h.bf16 %v9725_v34  ;;  %v9726_v41 = vunpack.i.l.bf16 %v9725_v34  ;;  %10014 = vrot.lane.b32.xlu0 %v13685_v26, %s13868_s27  ;;  %vm13882_vm11 = vcmp.ge.s32.totalorder %v13881_v48, 0  ;;  %v7979_v48 = vld [vmem:[%s13334_s6] sm:$0xff] }
 0x69a   : > { %10009 = vrot.lane.b32.xlu1 %v12754_v39, %s13865_s23  ;;  %8477 = vmatprep.subr.bf16.mxu0 %v8476_v32  ;;  %v6928_v2 = vsel %vm13873_vm14, %v9731_v36, %v9732_v20  ;;  %v5049_v1 = vsel %vm13882_vm11, %v13006_v57, 0.0 }
 0x69b   : > { %v6925_v16 = vsel %vm13869_vm4, %v9727_v61, %v9721_v27  ;;  %v6923_v10 = vsel %vm13870_vm0, %v9726_v41, %v9716_v43  ;;  %v9740_v63 = vpop.permute.xlu0 %9739  ;;  %vm13886_vm4 = vmmov %vm13885_vm3 }
 0x69c   : > { %v8478_v18 = vpack.c.bf16 %v6925_v16, %v6923_v10  ;;  %v9735_v44 = vpop.permute.xlu1 %9734  ;;  %v9742_v6 = vunpack.i.h.bf16 %v9740_v63  ;;  %v9741_v38 = vunpack.i.l.bf16 %v9740_v63  ;;  %v13100_v16 = vld [vmem:[%s13333_s5 + $0x48] sm:$0xff]  ;;  %vm13887_vm0 = vmmov %vm13885_vm3 }
 0x69d   : > { %v9737_v58 = vunpack.i.h.bf16 %v9735_v44  ;;  %v9736_v55 = vunpack.i.l.bf16 %v9735_v44  ;;  %10024 = vrot.lane.b32.xlu0 %v12754_v39, %s13868_s27 }
 0x69e   : > { %10019 = vrot.lane.b32.xlu1 %v11460_v51, %s13868_s27  ;;  %v6927_v26 = vsel %vm13871_vm13, %v9741_v38, %v9731_v36  ;;  %8479 = vmatpush1.bf16.msra.mxu0 %v8478_v18  ;;  %vm13888_vm13 = vmmov %vm13887_vm0 }
 0x69f   : > { %v6929_v56 = vsel %vm13872_vm15, %v9742_v6, %v9736_v55  ;;  %v6930_v29 = vsel %vm13874_vm6, %v9736_v55, %v9737_v58  ;;  %v9750_v14 = vpop.permute.xlu0 %9749  ;;  %vm13889_vm15 = vcmask 244736   ;;  %vm13891_vm6 = vmmov %vm13880_vm10 }
 0x6a0   : > { %v8482_v47 = vpack.c.bf16 %v6929_v56, %v6927_v26  ;;  %v9745_v7 = vpop.permute.xlu1 %9744  ;;  %v8480_v0 = vpack.c.bf16 %v6930_v29, %v6928_v2  ;;  %v9752_v9 = vunpack.i.h.bf16 %v9750_v14  ;;  %v9751_v60 = vunpack.i.l.bf16 %v9750_v14  ;;  %vm13890_vm14 = vmmov %vm13889_vm15 }
 0x6a1   : > { %v9747_v59 = vunpack.i.h.bf16 %v9745_v7  ;;  %v9746_v39 = vunpack.i.l.bf16 %v9745_v7  ;;  %10029 = vrot.lane.b32.xlu0 %v13694_v45, %s13865_s23 }
 0x6a2   : > { %v4884_v40 = vpop.f32.mrb[22].mxu1  ;;  %7345 = vrot.lane.b32.xlu1 %v12962_v21, %s10246_s19  ;;  %8481 = vmatprep.subr.bf16.mxu0 %v8480_v0  ;;  %v6934_v11 = vsel %vm13877_vm8, %v9751_v60, %v9752_v9  ;;  %v5048_v21 = vsel %vm13880_vm10, %v12999_v23, 0.0  ;;  %v5366_v0 = vsel %vm13891_vm6, %v13043_v52, 0.0  ;;  %vm13894_vm8 = vmmov %vm13891_vm6 }
 0x6a3   : > { %v4889_v51 = vsel %vm13875_vm5, %v4884_v40, 0.0  ;;  %v4886_v54 = vpop.f32.mrb[23].mxu1  ;;  %v6932_v62 = vsel %vm13876_vm7, %v9746_v39, %v9747_v59  ;;  %8483 = vmatpush1.bf16.msra.mxu0 %v8482_v47  ;;  %v9760_v3 = vpop.permute.xlu0 %9759  ;;  %vm13892_vm5 = vmmov %vm13890_vm14 }
 0x6a4   : > { %v4891_v4 = vadd.f32 %v4889_v51, %v4732_v25  ;;  %v4890_v24 = vsel %vm13878_vm9, %v4886_v54, 0.0  ;;  %v9755_v42 = vpop.permute.xlu1 %9754  ;;  %v8484_v22 = vpack.c.bf16 %v6934_v11, %v6932_v62  ;;  %v9762_v31 = vunpack.i.h.bf16 %v9760_v3  ;;  %vm13893_vm7 = vmmov %vm13892_vm5 }
 0x6a5   : > { %v4892_v53 = vadd.f32 %v4890_v24, %v4733_v15  ;;  %v9757_v27 = vunpack.i.h.bf16 %v9755_v42  ;;  %v9756_v43 = vunpack.i.l.bf16 %v9755_v42  ;;  %10039 = vrot.lane.b32.xlu0 %v12781_v37, %s13865_s23  ;;  %v9761_v23 = vunpack.i.l.bf16 %v9760_v3  ;;  %vm13895_vm9 = vmmov %vm13882_vm11 }
 0x6a6   : > { %10034 = vrot.lane.b32.xlu1 %v13630_v46, %s13865_s23  ;;  %v5050_v35 = vadd.f32 %v5048_v21, %v4891_v4  ;;  %8485 = vmatprep.subr.bf16.mxu0 %v8484_v22  ;;  %vm13896_vm10 = vmmov %vm13895_vm9 }
 0x6a7   : > { %v6933_v25 = vsel %vm13883_vm12, %v9757_v27, %v9751_v60  ;;  %v5051_v13 = vadd.f32 %v5049_v1, %v4892_v53  ;;  %v6931_v15 = vsel %vm13884_vm2, %v9756_v43, %v9746_v39  ;;  %v9770_v34 = vpop.permute.xlu0 %9769  ;;  %v7080_v44 = vsel %vm13887_vm0, %v9761_v23, %v9762_v31  ;;  %vm13897_vm11 = vmmov %vm13887_vm0 }
 0x6a8   : > { %v9765_v19 = vpop.permute.xlu1 %9764  ;;  %v8486_v61 = vpack.c.bf16 %v6933_v25, %v6931_v15  ;;  %v9772_v57 = vunpack.i.h.bf16 %v9770_v34  ;;  %v9771_v41 = vunpack.i.l.bf16 %v9770_v34  ;;  %v5367_v53 = vsel %vm13896_vm10, %v13049_v8, 0.0  ;;  %vm13898_vm12 = vmmov %vm13887_vm0 }
 0x6a9   : > { %v9767_v32 = vunpack.i.h.bf16 %v9765_v19  ;;  %v9766_v20 = vunpack.i.l.bf16 %v9765_v19  ;;  %10049 = vrot.lane.b32.xlu0 %v13630_v46, %s13868_s27  ;;  %vm13899_vm2 = vmmov %vm13887_vm0 }
 0x6aa   : > { %10044 = vrot.lane.b32.xlu1 %v13694_v45, %s13868_s27  ;;  %v7079_v36 = vsel %vm13885_vm3, %v9771_v41, %v9761_v23  ;;  %8487 = vmatpush1.bf16.msra.mxu0 %v8486_v61  ;;  %vm13900_vm3 = vmmov %vm13887_vm0 }
 0x6ab   : > { %v7081_v10 = vsel %vm13886_vm4, %v9772_v57, %v9766_v20  ;;  %v9780_v18 = vpop.permute.xlu0 %9779  ;;  %v7082_v6 = vsel %vm13888_vm13, %v9766_v20, %v9767_v32  ;;  %vm13901_vm4 = vmmov %vm13892_vm5 }
 0x6ac   : > { %v9775_v63 = vpop.permute.xlu1 %9774  ;;  %v8490_v46 = vpack.c.bf16 %v7081_v10, %v7079_v36  ;;  %v9782_v38 = vunpack.i.h.bf16 %v9780_v18  ;;  %v9781_v58 = vunpack.i.l.bf16 %v9780_v18  ;;  %v8488_v26 = vpack.c.bf16 %v7082_v6, %v7080_v44  ;;  %vm13902_vm0 = vmmov %vm13901_vm4 }
 0x6ad   : > { %v9777_v45 = vunpack.i.h.bf16 %v9775_v63  ;;  %v9776_v55 = vunpack.i.l.bf16 %v9775_v63  ;;  %8100 = vmatmul.mubr.msk.f32.vlgmr.msra.gmra.mrb[46].mxu0 %vm1728_vm1, %v13100_v16  ;;  %10059 = vrot.lane.b32.xlu0 %v13698_v17, %s13865_s23  ;;  %vm13903_vm13 = vmmov %vm13902_vm0 }
 0x6ae   : > { %10054 = vrot.lane.b32.xlu1 %v12781_v37, %s13868_s27  ;;  %v7239_v56 = vsel %vm13889_vm15, %v9781_v58, %v9782_v38  ;;  %7177 = vmatprep.mubr.f32.mxu0 %v13622_v50  ;;  %vm13904_vm15 = vmmov %vm13902_vm0 }
 0x6af   : > { %8489 = vmatprep.subr.bf16.mxu0 %v8488_v26  ;;  %v9790_v2 = vpop.permute.xlu0 %9789  ;;  %v7237_v47 = vsel %vm13890_vm14, %v9776_v55, %v9777_v45  ;;  %vm13905_vm14 = vmmov %vm13891_vm6 }
 0x6b0   : > { %v9785_v29 = vpop.permute.xlu1 %9784  ;;  %8491 = vmatpush1.bf16.msra.mxu0 %v8490_v46  ;;  %v8504_v37 = vpack.c.bf16 %v7239_v56, %v7237_v47  ;;  %v9792_v60 = vunpack.i.h.bf16 %v9790_v2  ;;  %v9791_v54 = vunpack.i.l.bf16 %v9790_v2  ;;  %vm13906_vm6 = vmmov %vm13899_vm2 }
 0x6b1   : > { %v9787_v14 = vunpack.i.h.bf16 %v9785_v29  ;;  %v9786_v7 = vunpack.i.l.bf16 %v9785_v29  ;;  %10069 = vrot.lane.b32.xlu0 %v13777_v28, %s13865_s23 }
 0x6b2   : > { %v5202_v9 = vpop.f32.mrb[24].mxu1  ;;  %10064 = vrot.lane.b32.xlu1 %v13637_v12, %s13865_s23  ;;  %8505 = vmatprep.subr.bf16.mxu1 %v8504_v37  ;;  %v7084_v23 = vsel %vm13899_vm2, %v9791_v54, %v9792_v60 }
 0x6b3   : > { %v7238_v59 = vsel %vm13892_vm5, %v9787_v14, %v9781_v58  ;;  %v7236_v39 = vsel %vm13893_vm7, %v9786_v7, %v9776_v55  ;;  %v5207_v40 = vsel %vm13894_vm8, %v5202_v9, 0.0  ;;  %v5204_v51 = vpop.f32.mrb[25].mxu1  ;;  %v9800_v4 = vpop.permute.xlu0 %9799  ;;  %vm13907_vm5 = vmmov %vm13899_vm2 }
 0x6b4   : > { %v8506_v62 = vpack.c.bf16 %v7238_v59, %v7236_v39  ;;  %v5209_v52 = vadd.f32 %v5207_v40, %v5050_v35  ;;  %v5208_v11 = vsel %vm13895_vm9, %v5204_v51, 0.0  ;;  %v9795_v24 = vpop.permute.xlu1 %9794  ;;  %v9802_v42 = vunpack.i.h.bf16 %v9800_v4  ;;  %vm13908_vm7 = vmmov %vm13899_vm2 }
 0x6b5   : > { %v5210_v3 = vadd.f32 %v5208_v11, %v5051_v13  ;;  %v9801_v22 = vunpack.i.l.bf16 %v9800_v4  ;;  %v9797_v21 = vunpack.i.h.bf16 %v9795_v24  ;;  %v9796_v27 = vunpack.i.l.bf16 %v9795_v24  ;;  %10079 = vrot.lane.b32.xlu0 %v13637_v12, %s13868_s27  ;;  %vm13909_vm9 = vmmov %vm13899_vm2 }
 0x6b6   : > { %8507 = vmatpush1.bf16.msra.mxu1 %v8506_v62  ;;  %v5368_v1 = vadd.f32 %v5366_v0, %v5209_v52  ;;  %10074 = vrot.lane.b32.xlu1 %v13698_v17, %s13868_s27  ;;  %vm13912_vm2 = vmmov %vm13902_vm0 }
 0x6b7   : > { %v7083_v43 = vsel %vm13897_vm11, %v9801_v22, %v9791_v54  ;;  %v5369_v35 = vadd.f32 %v5367_v53, %v5210_v3  ;;  %v7085_v25 = vsel %vm13898_vm12, %v9802_v42, %v9796_v27  ;;  %v9810_v13 = vpop.permute.xlu0 %9809  ;;  %v7086_v8 = vsel %vm13900_vm3, %v9796_v27, %v9797_v21  ;;  %vm13910_vm11 = vmmov %vm13896_vm10 }
 0x6b8   : > { %v9805_v31 = vpop.permute.xlu1 %9804  ;;  %v8494_v15 = vpack.c.bf16 %v7085_v25, %v7083_v43  ;;  %v9812_v34 = vunpack.i.h.bf16 %v9810_v13  ;;  %v9811_v19 = vunpack.i.l.bf16 %v9810_v13  ;;  %v8492_v41 = vpack.c.bf16 %v7086_v8, %v7084_v23  ;;  %vm13911_vm12 = vmmov %vm13902_vm0 }
 0x6b9   : > { %v9807_v12 = vunpack.i.h.bf16 %v9805_v31  ;;  %v9806_v61 = vunpack.i.l.bf16 %v9805_v31  ;;  %v5679_v57 = vpop.f32.mrb[38].mxu0  ;;  %10089 = vrot.lane.b32.xlu0 %v11680_v49, %s13865_s23  ;;  %vm13913_vm3 = vmmov %vm13902_vm0 }
 0x6ba   : > { %10084 = vrot.lane.b32.xlu1 %v13777_v28, %s13868_s27  ;;  %v5681_v17 = vpop.f32.mrb[39].mxu0  ;;  %v7243_v32 = vsel %vm13901_vm4, %v9811_v19, %v9812_v34  ;;  %8493 = vmatprep.subr.bf16.mxu0 %v8492_v41  ;;  %v5684_v47 = vsel %vm13905_vm14, %v5679_v57, 0.0  ;;  %vm13914_vm4 = vmmov %vm13902_vm0 }
 0x6bb   : > { %v9820_v20 = vpop.permute.xlu0 %9819  ;;  %v7241_v10 = vsel %vm13902_vm0, %v9806_v61, %v9807_v12  ;;  %8495 = vmatpush1.bf16.msra.mxu0 %v8494_v15  ;;  %v5685_v33 = vsel %vm13910_vm11, %v5681_v17, 0.0  ;;  %vm13915_vm0 = vmmov %vm13907_vm5 }
 0x6bc   : > { %v9815_v36 = vpop.permute.xlu1 %9814  ;;  %v9822_v44 = vunpack.i.h.bf16 %v9820_v20  ;;  %v9821_v6 = vunpack.i.l.bf16 %v9820_v20  ;;  %v8508_v46 = vpack.c.bf16 %v7243_v32, %v7241_v10  ;;  %vm13918_vm14 = vmmov %vm13915_vm0 }
 0x6bd   : > { %v9817_v18 = vunpack.i.h.bf16 %v9815_v36  ;;  %v9816_v63 = vunpack.i.l.bf16 %v9815_v36  ;;  %10099 = vrot.lane.b32.xlu0 %v13787_v5, %s13865_s23 }
 0x6be   : > { %10094 = vrot.lane.b32.xlu1 %v13653_v30, %s13865_s23  ;;  %8509 = vmatprep.subr.bf16.mxu1 %v8508_v46  ;;  %v7088_v7 = vsel %vm13906_vm6, %v9821_v6, %v9822_v44  ;;  %vm13919_vm6 = vmmov %vm13912_vm2 }
 0x6bf   : > { %v7242_v38 = vsel %vm13903_vm13, %v9817_v18, %v9811_v19  ;;  %v7240_v28 = vsel %vm13904_vm15, %v9816_v63, %v9806_v61  ;;  %v9830_v45 = vpop.permute.xlu0 %9829  ;;  %vm13916_vm13 = vmmov %vm13915_vm0 }
 0x6c0   : > { %v8510_v58 = vpack.c.bf16 %v7242_v38, %v7240_v28  ;;  %v9825_v55 = vpop.permute.xlu1 %9824  ;;  %v9832_v26 = vunpack.i.h.bf16 %v9830_v45  ;;  %v9831_v56 = vunpack.i.l.bf16 %v9830_v45  ;;  %vm13917_vm15 = vmmov %vm13915_vm0 }
 0x6c1   : > { %v9827_v2 = vunpack.i.h.bf16 %v9825_v55  ;;  %v9826_v29 = vunpack.i.l.bf16 %v9825_v55  ;;  %10109 = vrot.lane.b32.xlu0 %v13653_v30, %s13868_s27 }
 0x6c2   : > { %v5520_v14 = vpop.f32.mrb[26].mxu1  ;;  %8511 = vmatpush1.bf16.msra.mxu1 %v8510_v58  ;;  %v7087_v0 = vsel %vm13907_vm5, %v9831_v56, %v9821_v6  ;;  %10104 = vrot.lane.b32.xlu1 %v11680_v49, %s13868_s27  ;;  %vm13920_vm5 = vmmov %vm13912_vm2 }
 0x6c3   : > { %v7089_v9 = vsel %vm13908_vm7, %v9832_v26, %v9826_v29  ;;  %v5525_v37 = vsel %vm13894_vm8, %v5520_v14, 0.0  ;;  %v5522_v60 = vpop.f32.mrb[27].mxu1  ;;  %v7090_v59 = vsel %vm13909_vm9, %v9826_v29, %v9827_v2  ;;  %v9840_v51 = vpop.permute.xlu0 %9839  ;;  %vm13921_vm7 = vmmov %vm13912_vm2  ;;  %vm13923_vm9 = vcmask 113664  }
 0x6c4   : > { %v8498_v39 = vpack.c.bf16 %v7089_v9, %v7087_v0  ;;  %v5527_v40 = vadd.f32 %v5525_v37, %v5368_v1  ;;  %v5526_v30 = vsel %vm13896_vm10, %v5522_v60, 0.0  ;;  %v9835_v54 = vpop.permute.xlu1 %9834  ;;  %v8496_v62 = vpack.c.bf16 %v7090_v59, %v7088_v7  ;;  %vm13922_vm8 = vmmov %vm13912_vm2 }
 0x6c5   : > { %v5528_v52 = vadd.f32 %v5526_v30, %v5369_v35  ;;  %v9842_v11 = vunpack.i.h.bf16 %v9840_v51  ;;  %v9841_v4 = vunpack.i.l.bf16 %v9840_v51  ;;  %v9837_v24 = vunpack.i.h.bf16 %v9835_v54  ;;  %7661 = vrot.lane.b32.xlu0 %v13100_v16, %s10246_s19  ;;  %vm13924_vm10 = vmmov %vm13923_vm9 }
 0x6c6   : > { %v9836_v3 = vunpack.i.l.bf16 %v9835_v54  ;;  %8497 = vmatprep.subr.bf16.mxu0 %v8496_v62  ;;  %v13168_v49 = vadd.f32 %v5684_v47, %v5527_v40  ;;  %10114 = vrot.lane.b32.xlu1 %v13787_v5, %s13868_s27  ;;  %vm13925_vm11 = vmmov %vm13923_vm9 }
 0x6c7   : > { %8499 = vmatpush1.bf16.msra.mxu0 %v8498_v39  ;;  %v7247_v42 = vsel %vm13911_vm12, %v9841_v4, %v9842_v11  ;;  %v13173_v22 = vadd.f32 %v5685_v33, %v5528_v52  ;;  %v9850_v21 = vpop.permute.xlu0 %9849  ;;  %vm13926_vm12 = vmmov %vm13923_vm9 }
 0x6c8   : > { %v9845_v53 = vpop.permute.xlu1 %9844  ;;  %v7245_v27 = vsel %vm13912_vm2, %v9836_v3, %v9837_v24  ;;  %v9852_v35 = vunpack.i.h.bf16 %v9850_v21  ;;  %v9851_v25 = vunpack.i.l.bf16 %v9850_v21  ;;  %vm13927_vm2 = vcmask 1031168  }
 0x6c9   : > { %v9847_v1 = vunpack.i.h.bf16 %v9845_v53  ;;  %v9846_v16 = vunpack.i.l.bf16 %v9845_v53  ;;  %v8512_v43 = vpack.c.bf16 %v7247_v42, %v7245_v27 }
 0x6ca   : > { %7982 = vperm.xlu1 %8677, %v7979_v48   ;;  %v7092_v41 = vsel %vm13917_vm15, %v9851_v25, %v9852_v35  ;;  %vm13932_vm15 = vmmov %vm13923_vm9 }
 0x6cb   : > { %v7246_v5 = vsel %vm13913_vm3, %v9847_v1, %v9841_v4  ;;  %v7244_v13 = vsel %vm13914_vm4, %v9846_v16, %v9836_v3  ;;  %8513 = vmatprep.subr.bf16.mxu1 %v8512_v43  ;;  %v9860_v23 = vpop.permute.xlu0 %9859  ;;  %v10202_v3 = vld [vmem:[%s13333_s5 + $0x10] sm:$0xff]  ;;  %vm13928_vm3 = vmmov %vm13927_vm2 }
 0x6cc   : > { %v8514_v31 = vpack.c.bf16 %v7246_v5, %v7244_v13  ;;  %v9855_v8 = vpop.permute.xlu1 %9854  ;;  %v9862_v15 = vunpack.i.h.bf16 %v9860_v23  ;;  %v9861_v34 = vunpack.i.l.bf16 %v9860_v23  ;;  %vm13929_vm4 = vmmov %vm13927_vm2 }
 0x6cd   : > { %v9857_v19 = vunpack.i.h.bf16 %v9855_v8  ;;  %v9856_v12 = vunpack.i.l.bf16 %v9855_v8 }
 0x6ce   : > { %8515 = vmatpush1.bf16.msra.mxu1 %v8514_v31  ;;  %v7091_v61 = vsel %vm13915_vm0, %v9861_v34, %v9851_v25  ;;  %vm13930_vm0 = vmmov %vm13927_vm2 }
 0x6cf   : > { %v7093_v57 = vsel %vm13916_vm13, %v9862_v15, %v9856_v12  ;;  %v7094_v17 = vsel %vm13918_vm14, %v9856_v12, %v9857_v19  ;;  %v9870_v20 = vpop.permute.xlu0 %9869  ;;  %vm13931_vm13 = vmmov %vm13923_vm9 }
 0x6d0   : > { %v8502_v32 = vpack.c.bf16 %v7093_v57, %v7091_v61  ;;  %v9865_v36 = vpop.permute.xlu1 %9864  ;;  %v8500_v10 = vpack.c.bf16 %v7094_v17, %v7092_v41  ;;  %v9872_v18 = vunpack.i.h.bf16 %v9870_v20  ;;  %v9871_v63 = vunpack.i.l.bf16 %v9870_v20  ;;  %vm13933_vm14 = vmmov %vm13923_vm9 }
 0x6d1   : > { %v9867_v44 = vunpack.i.h.bf16 %v9865_v36  ;;  %v9866_v6 = vunpack.i.l.bf16 %v9865_v36 }
 0x6d2   : > { %8501 = vmatprep.subr.bf16.mxu0 %v8500_v10  ;;  %v7251_v38 = vsel %vm13920_vm5, %v9871_v63, %v9872_v18  ;;  %vm13935_vm5 = vmmov %vm13930_vm0 }
 0x6d3   : > { %8503 = vmatpush1.bf16.msra.mxu0 %v8502_v32  ;;  %v7249_v46 = vsel %vm13919_vm6, %v9866_v6, %v9867_v44  ;;  %v9880_v28 = vpop.permute.xlu0 %9879  ;;  %vm13934_vm6 = vmmov %vm13923_vm9 }
 0x6d4   : > { %v9875_v58 = vpop.permute.xlu1 %9874  ;;  %v8516_v45 = vpack.c.bf16 %v7251_v38, %v7249_v46  ;;  %v9882_v56 = vunpack.i.h.bf16 %v9880_v28  ;;  %v9881_v2 = vunpack.i.l.bf16 %v9880_v28 }
 0x6d5   : > { %v9877_v55 = vunpack.i.h.bf16 %v9875_v58  ;;  %v9876_v26 = vunpack.i.l.bf16 %v9875_v58 }
 0x6d6   : > { %8517 = vmatprep.subr.bf16.mxu1 %v8516_v45  ;;  %v7396_v39 = vsel %vm13923_vm9, %v9881_v2, %v9882_v56  ;;  %vm13938_vm9 = vmmov %vm13930_vm0 }
 0x6d7   : > { %v7250_v29 = vsel %vm13921_vm7, %v9877_v55, %v9871_v63  ;;  %v7248_v47 = vsel %vm13922_vm8, %v9876_v26, %v9866_v6  ;;  %v9890_v7 = vpop.permute.xlu0 %9889  ;;  %vm13936_vm7 = vmmov %vm13930_vm0 }
 0x6d8   : > { %v8518_v14 = vpack.c.bf16 %v7250_v29, %v7248_v47  ;;  %v9885_v0 = vpop.permute.xlu1 %9884  ;;  %v9892_v9 = vunpack.i.h.bf16 %v9890_v7  ;;  %v9891_v37 = vunpack.i.l.bf16 %v9890_v7  ;;  %vm13937_vm8 = vmmov %vm13930_vm0 }
 0x6d9   : > { %v9887_v60 = vunpack.i.h.bf16 %v9885_v0  ;;  %v9886_v59 = vunpack.i.l.bf16 %v9885_v0 }
 0x6da   : > { %8519 = vmatpush1.bf16.msra.mxu1 %v8518_v14  ;;  %v7395_v30 = vsel %vm13925_vm11, %v9891_v37, %v9881_v2  ;;  %vm13940_vm11 = vmmov %vm13934_vm6 }
 0x6db   : > { %v7398_v40 = vsel %vm13924_vm10, %v9886_v59, %v9887_v60  ;;  %v7397_v51 = vsel %vm13926_vm12, %v9892_v9, %v9886_v59  ;;  %v9900_v54 = vpop.permute.xlu0 %9899  ;;  %vm13939_vm10 = vmmov %vm13934_vm6 }
 0x6dc   : > { %v9895_v62 = vpop.permute.xlu1 %9894  ;;  %v8520_v52 = vpack.c.bf16 %v7398_v40, %v7396_v39  ;;  %v9902_v11 = vunpack.i.h.bf16 %v9900_v54  ;;  %v9901_v4 = vunpack.i.l.bf16 %v9900_v54  ;;  %v8522_v53 = vpack.c.bf16 %v7397_v51, %v7395_v30  ;;  %vm13941_vm12 = vmmov %vm13934_vm6 }
 0x6dd   : > { %v9897_v24 = vunpack.i.h.bf16 %v9895_v62  ;;  %v9896_v33 = vunpack.i.l.bf16 %v9895_v62  ;;  %8102 = vmatmul.mubr.msk.f32.vlgmr.msra.gmra.mrb[30].mxu1 %vm1728_vm1, %v10202_v3 }
 0x6de   : > { %8521 = vmatprep.subr.bf16.mxu0 %v8520_v52  ;;  %7650 = vmatprep.mubr.f32.mxu1 %v13622_v50  ;;  %v7555_v21 = vsel %vm13928_vm3, %v9901_v4, %v9902_v11  ;;  %vm13943_vm3 = vmmov %vm13930_vm0 }
 0x6df   : > { %v7553_v42 = vsel %vm13927_vm2, %v9896_v33, %v9897_v24  ;;  %v7030_v48 = vpop.permute.xlu0 %7029  ;;  %vm13942_vm2 = vmmov %vm13934_vm6 }
 0x6e0   : > { %v9905_v27 = vpop.permute.xlu1 %9904  ;;  %v8536_v1 = vpack.c.bf16 %v7555_v21, %v7553_v42  ;;  %8101 = vmatmul.mubr.msk.f32.vlgmr.msra.gmra.mrb[48].mxu0 %vm1728_vm1, %v7030_v48 }
 0x6e1   : > { %v9907_v16 = vunpack.i.h.bf16 %v9905_v27  ;;  %v9906_v43 = vunpack.i.l.bf16 %v9905_v27  ;;  %8523 = vmatpush1.bf16.msra.mxu0 %v8522_v53  ;;  %7493 = vmatprep.mubr.f32.mxu0 %v13622_v50 }
 0x6e2   : > { %8537 = vmatprep.subr.bf16.mxu1 %v8536_v1 }
 0x6e3   : > { %v7554_v35 = vsel %vm13929_vm4, %v9907_v16, %v9901_v4  ;;  %v7552_v25 = vsel %vm13930_vm0, %v9906_v43, %v9896_v33  ;;  %v9915_v13 = vpop.permute.xlu0 %9914  ;;  %vm13944_vm4 = vmmov %vm13930_vm0 }
 0x6e4   : > { %v8538_v5 = vpack.c.bf16 %v7554_v35, %v7552_v25  ;;  %v9910_v31 = vpop.permute.xlu1 %9909  ;;  %v9917_v23 = vunpack.i.h.bf16 %v9915_v13  ;;  %v9916_v8 = vunpack.i.l.bf16 %v9915_v13 }
 0x6e5   : > { %v9912_v15 = vunpack.i.h.bf16 %v9910_v31  ;;  %v9911_v34 = vunpack.i.l.bf16 %v9910_v31 }
 0x6e6   : > { %8539 = vmatpush1.bf16.msra.mxu1 %v8538_v5  ;;  %v7402_v12 = vsel %vm13932_vm15, %v9916_v8, %v9917_v23  ;;  %vm13946_vm15 = vmmov %vm13942_vm2 }
 0x6e7   : > { %v7400_v19 = vsel %vm13931_vm13, %v9911_v34, %v9912_v15  ;;  %v9925_v61 = vpop.permute.xlu0 %9924  ;;  %vm13945_vm13 = vmmov %vm13930_vm0 }
 0x6e8   : > { %v9920_v57 = vpop.permute.xlu1 %9919  ;;  %v8524_v41 = vpack.c.bf16 %v7402_v12, %v7400_v19  ;;  %v9927_v20 = vunpack.i.h.bf16 %v9925_v61  ;;  %v9926_v36 = vunpack.i.l.bf16 %v9925_v61 }
 0x6e9   : > { %v9922_v17 = vunpack.i.h.bf16 %v9920_v57  ;;  %v9921_v32 = vunpack.i.l.bf16 %v9920_v57 }
 0x6ea   : > { %8525 = vmatprep.subr.bf16.mxu0 %v8524_v41  ;;  %v7557_v26 = vsel %vm13937_vm8, %v9926_v36, %v9927_v20  ;;  %vm13951_vm8 = vmmov %vm13930_vm0 }
 0x6eb   : > { %v7401_v10 = vsel %vm13933_vm14, %v9922_v17, %v9916_v8  ;;  %v7399_v18 = vsel %vm13934_vm6, %v9921_v32, %v9911_v34  ;;  %v9935_v44 = vpop.permute.xlu0 %9934  ;;  %vm13947_vm14 = vmmov %vm13942_vm2 }
 0x6ec   : > { %v8526_v63 = vpack.c.bf16 %v7401_v10, %v7399_v18  ;;  %v9930_v6 = vpop.permute.xlu1 %9929  ;;  %v9937_v46 = vunpack.i.h.bf16 %v9935_v44  ;;  %v9936_v38 = vunpack.i.l.bf16 %v9935_v44  ;;  %vm13948_vm6 = vmmov %vm13942_vm2 }
 0x6ed   : > { %v9932_v28 = vunpack.i.h.bf16 %v9930_v6  ;;  %v9931_v58 = vunpack.i.l.bf16 %v9930_v6 }
 0x6ee   : > { %8527 = vmatpush1.bf16.msra.mxu0 %v8526_v63  ;;  %v7556_v45 = vsel %vm13935_vm5, %v9936_v38, %v9926_v36  ;;  %vm13949_vm5 = vmmov %vm13942_vm2 }
 0x6ef   : > { %v7558_v55 = vsel %vm13936_vm7, %v9937_v46, %v9931_v58  ;;  %v7559_v56 = vsel %vm13938_vm9, %v9931_v58, %v9932_v28  ;;  %v9945_v29 = vpop.permute.xlu0 %9944  ;;  %vm13950_vm7 = vmmov %vm13930_vm0 }
 0x6f0   : > { %v8542_v2 = vpack.c.bf16 %v7558_v55, %v7556_v45  ;;  %v9940_v47 = vpop.permute.xlu1 %9939  ;;  %v8540_v14 = vpack.c.bf16 %v7559_v56, %v7557_v26  ;;  %v9947_v7 = vunpack.i.h.bf16 %v9945_v29  ;;  %v9946_v0 = vunpack.i.l.bf16 %v9945_v29  ;;  %vm13952_vm9 = vmmov %vm13930_vm0 }
 0x6f1   : > { %v9942_v9 = vunpack.i.h.bf16 %v9940_v47  ;;  %v9941_v37 = vunpack.i.l.bf16 %v9940_v47 }
 0x6f2   : > { %8541 = vmatprep.subr.bf16.mxu1 %v8540_v14  ;;  %v7406_v59 = vsel %vm13940_vm11, %v9946_v0, %v9947_v7  ;;  %vm13954_vm11 = vcmask 900096  }
 0x6f3   : > { %8543 = vmatpush1.bf16.msra.mxu1 %v8542_v2  ;;  %v7404_v60 = vsel %vm13939_vm10, %v9941_v37, %v9942_v9  ;;  %v9955_v39 = vpop.permute.xlu0 %9954  ;;  %vm13953_vm10 = vmmov %vm13930_vm0 }
 0x6f4   : > { %v9950_v40 = vpop.permute.xlu1 %9949  ;;  %v8528_v30 = vpack.c.bf16 %v7406_v59, %v7404_v60  ;;  %v9957_v62 = vunpack.i.h.bf16 %v9955_v39  ;;  %v9956_v52 = vunpack.i.l.bf16 %v9955_v39 }
 0x6f5   : > { %v9952_v51 = vunpack.i.h.bf16 %v9950_v40  ;;  %v9951_v54 = vunpack.i.l.bf16 %v9950_v40 }
 0x6f6   : > { %8529 = vmatprep.subr.bf16.mxu0 %v8528_v30  ;;  %v7561_v16 = vsel %vm13930_vm0, %v9956_v52, %v9957_v62 }
 0x6f7   : > { %v7405_v11 = vsel %vm13941_vm12, %v9952_v51, %v9946_v0  ;;  %v7403_v4 = vsel %vm13942_vm2, %v9951_v54, %v9941_v37  ;;  %v9965_v33 = vpop.permute.xlu0 %9964  ;;  %vm13955_vm12 = vmmov %vm13954_vm11  ;;  %v10203_v54 = vld [vmem:[%s13333_s5 + $0x38] sm:$0xff] }
 0x6f8   : > { %v8530_v24 = vpack.c.bf16 %v7405_v11, %v7403_v4  ;;  %v9960_v3 = vpop.permute.xlu1 %9959  ;;  %v9967_v42 = vunpack.i.h.bf16 %v9965_v33  ;;  %v9966_v21 = vunpack.i.l.bf16 %v9965_v33  ;;  %vm13956_vm2 = vmmov %vm13954_vm11 }
 0x6f9   : > { %v9962_v53 = vunpack.i.h.bf16 %v9960_v3  ;;  %v9961_v48 = vunpack.i.l.bf16 %v9960_v3 }
 0x6fa   : > { %8531 = vmatpush1.bf16.msra.mxu0 %v8530_v24  ;;  %v7560_v27 = vsel %vm13943_vm3, %v9966_v21, %v9956_v52  ;;  %vm13957_vm3 = vmmov %vm13956_vm2 }
 0x6fb   : > { %v7562_v1 = vsel %vm13944_vm4, %v9967_v42, %v9961_v48  ;;  %v7563_v43 = vsel %vm13945_vm13, %v9961_v48, %v9962_v53  ;;  %v9975_v25 = vpop.permute.xlu0 %9974  ;;  %vm13958_vm4 = vcmask 769024  }
 0x6fc   : > { %v8546_v35 = vpack.c.bf16 %v7562_v1, %v7560_v27  ;;  %v9970_v5 = vpop.permute.xlu1 %9969  ;;  %v8544_v13 = vpack.c.bf16 %v7563_v43, %v7561_v16  ;;  %v9977_v31 = vunpack.i.h.bf16 %v9975_v25  ;;  %v9976_v23 = vunpack.i.l.bf16 %v9975_v25  ;;  %vm13959_vm0 = vmmov %vm13958_vm4 }
 0x6fd   : > { %v9972_v8 = vunpack.i.h.bf16 %v9970_v5  ;;  %v9971_v15 = vunpack.i.l.bf16 %v9970_v5  ;;  %vm13960_vm13 = vmmov %vm13959_vm0 }
 0x6fe   : > { %8545 = vmatprep.subr.bf16.mxu1 %v8544_v13  ;;  %v7410_v19 = vsel %vm13947_vm14, %v9976_v23, %v9977_v31  ;;  %vm13962_vm14 = vmmov %vm13956_vm2 }
 0x6ff   : > { %8547 = vmatpush1.bf16.msra.mxu1 %v8546_v35  ;;  %v7408_v34 = vsel %vm13946_vm15, %v9971_v15, %v9972_v8  ;;  %v9985_v12 = vpop.permute.xlu0 %9984  ;;  %vm13961_vm15 = vmmov %vm13959_vm0 }
 0x700   : > { %v9980_v61 = vpop.permute.xlu1 %9979  ;;  %v8532_v57 = vpack.c.bf16 %v7410_v19, %v7408_v34  ;;  %v9987_v32 = vunpack.i.h.bf16 %v9985_v12  ;;  %v9986_v20 = vunpack.i.l.bf16 %v9985_v12 }
 0x701   : > { %v9982_v41 = vunpack.i.h.bf16 %v9980_v61  ;;  %v9981_v17 = vunpack.i.l.bf16 %v9980_v61 }
 0x702   : > { %8533 = vmatprep.subr.bf16.mxu0 %v8532_v57  ;;  %v7565_v55 = vsel %vm13952_vm9, %v9986_v20, %v9987_v32  ;;  %vm13967_vm9 = vmmov %vm13959_vm0 }
 0x703   : > { %v7409_v36 = vsel %vm13948_vm6, %v9982_v41, %v9976_v23  ;;  %v7407_v10 = vsel %vm13949_vm5, %v9981_v17, %v9971_v15  ;;  %v9995_v63 = vpop.permute.xlu0 %9994  ;;  %vm13963_vm6 = vmmov %vm13956_vm2 }
 0x704   : > { %v8534_v18 = vpack.c.bf16 %v7409_v36, %v7407_v10  ;;  %v9990_v44 = vpop.permute.xlu1 %9989  ;;  %v9997_v6 = vunpack.i.h.bf16 %v9995_v63  ;;  %v9996_v46 = vunpack.i.l.bf16 %v9995_v63  ;;  %vm13964_vm5 = vmmov %vm13956_vm2 }
 0x705   : > { %v9992_v38 = vunpack.i.h.bf16 %v9990_v44  ;;  %v9991_v28 = vunpack.i.l.bf16 %v9990_v44 }
 0x706   : > { %8535 = vmatpush1.bf16.msra.mxu0 %v8534_v18  ;;  %v7564_v58 = vsel %vm13950_vm7, %v9996_v46, %v9986_v20  ;;  %vm13965_vm7 = vmmov %vm13956_vm2 }
 0x707   : > { %v7566_v45 = vsel %vm13951_vm8, %v9997_v6, %v9991_v28  ;;  %v7567_v26 = vsel %vm13953_vm10, %v9991_v28, %v9992_v38  ;;  %v10005_v2 = vpop.permute.xlu0 %10004  ;;  %vm13966_vm8 = vmmov %vm13959_vm0 }
 0x708   : > { %v8550_v56 = vpack.c.bf16 %v7566_v45, %v7564_v58  ;;  %v10000_v29 = vpop.permute.xlu1 %9999  ;;  %v8548_v47 = vpack.c.bf16 %v7567_v26, %v7565_v55  ;;  %v10007_v14 = vunpack.i.h.bf16 %v10005_v2  ;;  %v10006_v7 = vunpack.i.l.bf16 %v10005_v2  ;;  %vm13968_vm10 = vmmov %vm13959_vm0 }
 0x709   : > { %v10002_v0 = vunpack.i.h.bf16 %v10000_v29  ;;  %v10001_v9 = vunpack.i.l.bf16 %v10000_v29 }
 0x70a   : > { %8549 = vmatprep.subr.bf16.mxu1 %v8548_v47  ;;  %v7714_v60 = vsel %vm13955_vm12, %v10006_v7, %v10007_v14  ;;  %vm13970_vm12 = vmmov %vm13956_vm2 }
 0x70b   : > { %8551 = vmatpush1.bf16.msra.mxu1 %v8550_v56  ;;  %v7712_v37 = vsel %vm13954_vm11, %v10001_v9, %v10002_v0  ;;  %v10015_v59 = vpop.permute.xlu0 %10014  ;;  %vm13969_vm11 = vmmov %vm13959_vm0 }
 0x70c   : > { %v10010_v39 = vpop.permute.xlu1 %10009  ;;  %v8552_v40 = vpack.c.bf16 %v7714_v60, %v7712_v37  ;;  %v10017_v62 = vunpack.i.h.bf16 %v10015_v59  ;;  %v10016_v52 = vunpack.i.l.bf16 %v10015_v59 }
 0x70d   : > { %v10012_v30 = vunpack.i.h.bf16 %v10010_v39  ;;  %v10011_v51 = vunpack.i.l.bf16 %v10010_v39 }
 0x70e   : > { %8553 = vmatprep.subr.bf16.mxu0 %v8552_v40  ;;  %8104 = vmatmul.mubr.msk.f32.vlgmr.msra.gmra.mrb[32].mxu1 %vm1728_vm1, %v10203_v54  ;;  %v7870_v1 = vsel %vm13960_vm13, %v10016_v52, %v10017_v62  ;;  %vm13973_vm13 = vmmov %vm13959_vm0 }
 0x70f   : > { %7968 = vmatprep.mubr.f32.mxu1 %v13622_v50  ;;  %v7713_v11 = vsel %vm13956_vm2, %v10012_v30, %v10006_v7  ;;  %v7711_v4 = vsel %vm13957_vm3, %v10011_v51, %v10001_v9  ;;  %v10025_v24 = vpop.permute.xlu0 %10024  ;;  %vm13971_vm3 = vmmov %vm13956_vm2 }
 0x710   : > { %v10020_v33 = vpop.permute.xlu1 %10019  ;;  %v10027_v3 = vunpack.i.h.bf16 %v10025_v24  ;;  %v10026_v42 = vunpack.i.l.bf16 %v10025_v24  ;;  %v8554_v43 = vpack.c.bf16 %v7713_v11, %v7711_v4 }
 0x711   : > { %v10022_v21 = vunpack.i.h.bf16 %v10020_v33  ;;  %v10021_v53 = vunpack.i.l.bf16 %v10020_v33 }
 0x712   : > { %v7869_v48 = vsel %vm13958_vm4, %v10026_v42, %v10016_v52  ;;  %vm13972_vm4 = vmmov %vm13956_vm2 }
 0x713   : > { %v7871_v27 = vsel %vm13959_vm0, %v10027_v3, %v10021_v53  ;;  %v7872_v16 = vsel %vm13961_vm15, %v10021_v53, %v10022_v21  ;;  %v10030_v25 = vpop.permute.xlu0 %10029  ;;  %vm13974_vm15 = vmmov %vm13959_vm0 }
 0x714   : > { %v8570_v35 = vpack.c.bf16 %v7871_v27, %v7869_v48  ;;  %v7346_v5 = vpop.permute.xlu1 %7345  ;;  %v8568_v13 = vpack.c.bf16 %v7872_v16, %v7870_v1  ;;  %v10032_v31 = vunpack.i.h.bf16 %v10030_v25  ;;  %v10031_v23 = vunpack.i.l.bf16 %v10030_v25 }
 0x715   : > { %8103 = vmatmul.mubr.msk.f32.vlgmr.msra.gmra.mrb[50].mxu0 %vm1728_vm1, %v7346_v5 }
 0x716   : > { %8555 = vmatpush1.bf16.msra.mxu0 %v8554_v43  ;;  %8569 = vmatprep.subr.bf16.mxu1 %v8568_v13  ;;  %v7716_v17 = vsel %vm13964_vm5, %v10031_v23, %v10032_v31  ;;  %vm13977_vm5 = vmmov %vm13956_vm2 }
 0x717   : > { %8571 = vmatpush1.bf16.msra.mxu1 %v8570_v35  ;;  %7809 = vmatprep.mubr.f32.mxu0 %v13622_v50  ;;  %v10040_v8 = vpop.permute.xlu0 %10039 }
 0x718   : > { %v10035_v15 = vpop.permute.xlu1 %10034  ;;  %v10042_v34 = vunpack.i.h.bf16 %v10040_v8  ;;  %v10041_v19 = vunpack.i.l.bf16 %v10040_v8 }
 0x719   : > { %v10037_v12 = vunpack.i.h.bf16 %v10035_v15  ;;  %v10036_v61 = vunpack.i.l.bf16 %v10035_v15 }
 0x71a   : > { %v7715_v57 = vsel %vm13962_vm14, %v10041_v19, %v10031_v23  ;;  %vm13975_vm14 = vmmov %vm13959_vm0 }
 0x71b   : > { %v7717_v41 = vsel %vm13963_vm6, %v10042_v34, %v10036_v61  ;;  %v7718_v32 = vsel %vm13965_vm7, %v10036_v61, %v10037_v12  ;;  %v10050_v36 = vpop.permute.xlu0 %10049  ;;  %vm13976_vm6 = vmmov %vm13956_vm2 }
 0x71c   : > { %v8558_v20 = vpack.c.bf16 %v7717_v41, %v7715_v57  ;;  %v10045_v10 = vpop.permute.xlu1 %10044  ;;  %v8556_v18 = vpack.c.bf16 %v7718_v32, %v7716_v17  ;;  %v10052_v63 = vunpack.i.h.bf16 %v10050_v36  ;;  %v10051_v50 = vunpack.i.l.bf16 %v10050_v36  ;;  %vm13978_vm7 = vmmov %vm13956_vm2 }
 0x71d   : > { %v10047_v44 = vunpack.i.h.bf16 %v10045_v10  ;;  %v10046_v6 = vunpack.i.l.bf16 %v10045_v10  ;;  %v6386_v46 = vpop.f32.mrb[28].mxu1 }
 0x71e   : > { %8557 = vmatprep.subr.bf16.mxu0 %v8556_v18  ;;  %v13248_v38 = vadd.f32 %v6386_v46, %v13168_v49  ;;  %v6388_v28 = vpop.f32.mrb[29].mxu1  ;;  %v7876_v45 = vsel %vm13967_vm9, %v10051_v50, %v10052_v63 }
 0x71f   : > { %8559 = vmatpush1.bf16.msra.mxu0 %v8558_v20  ;;  %v7874_v58 = vsel %vm13966_vm8, %v10046_v6, %v10047_v44  ;;  %v13253_v55 = vadd.f32 %v6388_v28, %v13173_v22  ;;  %v10060_v26 = vpop.permute.xlu0 %10059  ;;  %vm13979_vm8 = vmmov %vm13956_vm2  ;;  %v13980_v28 = vld [vmem:[#allocation9_spill] sm:$0xff] }
 0x720   : > { %v8572_v56 = vpack.c.bf16 %v7876_v45, %v7874_v58  ;;  %v10055_v2 = vpop.permute.xlu1 %10054  ;;  %v10062_v14 = vunpack.i.h.bf16 %v10060_v26  ;;  %v10061_v7 = vunpack.i.l.bf16 %v10060_v26  ;;  %vm13981_vm9 = vcmp.lt.s32.totalorder %v13980_v28, 16 }
 0x721   : > { %v10057_v29 = vunpack.i.h.bf16 %v10055_v2  ;;  %v10056_v47 = vunpack.i.l.bf16 %v10055_v2  ;;  %v13983_v2 = vld [vmem:[#allocation10_spill] sm:$0xff] }
 0x722   : > { %8573 = vmatprep.subr.bf16.mxu1 %v8572_v56  ;;  %v7720_v62 = vsel %vm13971_vm3, %v10061_v7, %v10062_v14  ;;  %vm13987_vm3 = vmmov %vm13959_vm0 }
 0x723   : > { %v7875_v49 = vsel %vm13968_vm10, %v10057_v29, %v10051_v50  ;;  %v7873_v0 = vsel %vm13969_vm11, %v10056_v47, %v10046_v6  ;;  %v10070_v9 = vpop.permute.xlu0 %10069  ;;  %vm13982_vm10 = vmmov %vm13959_vm0  ;;  %vm13984_vm11 = vcmp.lt.s32.totalorder %v13983_v2, 16 }
 0x724   : > { %v8574_v37 = vpack.c.bf16 %v7875_v49, %v7873_v0  ;;  %v10072_v60 = vunpack.i.h.bf16 %v10070_v9  ;;  %v10071_v59 = vunpack.i.l.bf16 %v10070_v9  ;;  %v10065_v39 = vpop.permute.xlu1 %10064 }
 0x725   : > { %v10067_v40 = vunpack.i.h.bf16 %v10065_v39  ;;  %v10066_v22 = vunpack.i.l.bf16 %v10065_v39  ;;  %v7820_v39 = vld [vmem:[%s13333_s5 + $0x60] sm:$0xff] }
 0x726   : > { %v7719_v30 = vsel %vm13970_vm12, %v10071_v59, %v10061_v7  ;;  %8575 = vmatpush1.bf16.msra.mxu1 %v8574_v37  ;;  %vm13985_vm12 = vmmov %vm13959_vm0 }
 0x727   : > { %v7721_v51 = vsel %vm13956_vm2, %v10072_v60, %v10066_v22  ;;  %v10080_v54 = vpop.permute.xlu0 %10079  ;;  %v7722_v52 = vsel %vm13972_vm4, %v10066_v22, %v10067_v40  ;;  %vm13986_vm2 = vmmov %vm13959_vm0 }
 0x728   : > { %v8562_v11 = vpack.c.bf16 %v7721_v51, %v7719_v30  ;;  %v10082_v4 = vunpack.i.h.bf16 %v10080_v54  ;;  %v10081_v24 = vunpack.i.l.bf16 %v10080_v54  ;;  %v10075_v33 = vpop.permute.xlu1 %10074  ;;  %v8560_v3 = vpack.c.bf16 %v7722_v52, %v7720_v62  ;;  %vm13988_vm4 = vmmov %vm13981_vm9 }
 0x729   : > { %v10077_v42 = vunpack.i.h.bf16 %v10075_v33  ;;  %v10076_v21 = vunpack.i.l.bf16 %v10075_v33 }
 0x72a   : > { %8561 = vmatprep.subr.bf16.mxu0 %v8560_v3  ;;  %v7880_v53 = vsel %vm13959_vm0, %v10081_v24, %v10082_v4  ;;  %vm13989_vm0 = vmmov %vm13984_vm11 }
 0x72b   : > { %8563 = vmatpush1.bf16.msra.mxu0 %v8562_v11  ;;  %v10090_v48 = vpop.permute.xlu0 %10089  ;;  %v7878_v27 = vsel %vm13973_vm13, %v10076_v21, %v10077_v42  ;;  %vm13990_vm13 = vmmov %vm13988_vm4 }
 0x72c   : > { %v10085_v1 = vpop.permute.xlu1 %10084  ;;  %v8576_v16 = vpack.c.bf16 %v7880_v53, %v7878_v27  ;;  %v10092_v25 = vunpack.i.h.bf16 %v10090_v48  ;;  %v10091_v5 = vunpack.i.l.bf16 %v10090_v48 }
 0x72d   : > { %v10087_v43 = vunpack.i.h.bf16 %v10085_v1  ;;  %v10086_v35 = vunpack.i.l.bf16 %v10085_v1 }
 0x72e   : > { %8577 = vmatprep.subr.bf16.mxu1 %v8576_v16  ;;  %v7724_v32 = vsel %vm13978_vm7, %v10091_v5, %v10092_v25  ;;  %vm13997_vm7 = vmmov %vm13989_vm0 }
 0x72f   : > { %v7879_v13 = vsel %vm13974_vm15, %v10087_v43, %v10081_v24  ;;  %v7877_v31 = vsel %vm13975_vm14, %v10086_v35, %v10076_v21  ;;  %v10100_v23 = vpop.permute.xlu0 %10099  ;;  %vm13991_vm15 = vmmov %vm13989_vm0 }
 0x730   : > { %v8578_v8 = vpack.c.bf16 %v7879_v13, %v7877_v31  ;;  %v10102_v15 = vunpack.i.h.bf16 %v10100_v23  ;;  %v10101_v34 = vunpack.i.l.bf16 %v10100_v23  ;;  %v10095_v19 = vpop.permute.xlu1 %10094  ;;  %vm13993_vm14 = vmmov %vm13989_vm0 }
 0x731   : > { %v10097_v12 = vunpack.i.h.bf16 %v10095_v19  ;;  %v10096_v61 = vunpack.i.l.bf16 %v10095_v19 }
 0x732   : > { %v7723_v57 = vsel %vm13976_vm6, %v10101_v34, %v10091_v5  ;;  %8579 = vmatpush1.bf16.msra.mxu1 %v8578_v8  ;;  %v13995_v5 = vld [vmem:[#allocation11_spill] sm:$0xff]  ;;  %v13998_v8 = vld [vmem:[#allocation12_spill] sm:$0xff] }
 0x733   : > { %v7725_v41 = vsel %vm13977_vm5, %v10102_v15, %v10096_v61  ;;  %v10110_v17 = vpop.permute.xlu0 %10109  ;;  %v7726_v20 = vsel %vm13979_vm8, %v10096_v61, %v10097_v12  ;;  %vm13996_vm5 = vcmp.lt.s32.totalorder %v13995_v5, 16  ;;  %vm13999_vm8 = vcmp.lt.s32.totalorder %v13998_v8, 16 }
 0x734   : > { %v8566_v36 = vpack.c.bf16 %v7725_v41, %v7723_v57  ;;  %v10112_v10 = vunpack.i.h.bf16 %v10110_v17  ;;  %v10111_v18 = vunpack.i.l.bf16 %v10110_v17  ;;  %v10105_v63 = vpop.permute.xlu1 %10104  ;;  %v8564_v50 = vpack.c.bf16 %v7726_v20, %v7724_v32 }
 0x735   : > { %v10107_v44 = vunpack.i.h.bf16 %v10105_v63  ;;  %v10106_v6 = vunpack.i.l.bf16 %v10105_v63  ;;  %v6543_v46 = vpop.f32.mrb[40].mxu0 }
 0x736   : > { %v6548_v58 = vsel %vm13981_vm9, %v6543_v46, 0.0  ;;  %v6545_v45 = vpop.f32.mrb[41].mxu0  ;;  %8565 = vmatprep.subr.bf16.mxu0 %v8564_v50  ;;  %v7884_v26 = vsel %vm13982_vm10, %v10111_v18, %v10112_v10  ;;  %vm14000_vm9 = vmmov %vm13996_vm5 }
 0x737   : > { %v6550_v56 = vadd.f32 %v13248_v38, %v6548_v58  ;;  %v6549_v29 = vsel %vm13984_vm11, %v6545_v45, 0.0  ;;  %8567 = vmatpush1.bf16.msra.mxu0 %v8566_v36  ;;  %v7662_v47 = vpop.permute.xlu0 %7661  ;;  %v7882_v14 = vsel %vm13985_vm12, %v10106_v6, %v10107_v44  ;;  %vm14001_vm10 = vmmov %vm13996_vm5 }
 0x738   : > { %v6551_v7 = vadd.f32 %v13253_v55, %v6549_v29  ;;  %v10115_v49 = vpop.permute.xlu1 %10114  ;;  %v8580_v0 = vpack.c.bf16 %v7884_v26, %v7882_v14  ;;  %vm14002_vm11 = vmmov %vm13999_vm8 }
 0x739   : > { %v10117_v9 = vunpack.i.h.bf16 %v10115_v49  ;;  %v10116_v37 = vunpack.i.l.bf16 %v10115_v49  ;;  %vm14003_vm12 = vmmov %vm13999_vm8 }
 0x73a   : > { %8105 = vmatmul.mubr.msk.f32.vlgmr.msra.gmra.mrb[52].mxu0 %vm1728_vm1, %v7662_v47  ;;  %8581 = vmatprep.subr.bf16.mxu1 %v8580_v0 }
 0x73b   : > { %v7883_v60 = vsel %vm13986_vm2, %v10117_v9, %v10111_v18  ;;  %v7881_v38 = vsel %vm13987_vm3, %v10116_v37, %v10106_v6  ;;  %vm14004_vm2 = vmmov %vm13996_vm5 }
 0x73c   : > { %v8582_v59 = vpack.c.bf16 %v7883_v60, %v7881_v38  ;;  %vm14005_vm3 = vmmov %vm13999_vm8 }
 0x73e   : > { %8583 = vmatpush1.bf16.msra.mxu1 %v8582_v59 }
 0x741   : > { %8106 = vmatmul.mubr.msk.f32.vlgmr.msra.gmra.mrb[34].mxu1 %vm1728_vm1, %v7820_v39  ;;  %vm13992_vm1 = vmmov %vm13988_vm4 }
 0x742   : > { %vm13994_vm6 = vmmov %vm13992_vm1 }
 0x74d   : > { %v6702_v55 = vpop.f32.mrb[42].mxu0 }
 0x74e   : > { %v6707_v40 = vsel %vm13988_vm4, %v6702_v55, 0.0  ;;  %v6704_v22 = vpop.f32.mrb[43].mxu0  ;;  %vm14006_vm4 = vmmov %vm14004_vm2 }
 0x74f   : > { %v6709_v30 = vadd.f32 %v6707_v40, %v6550_v56  ;;  %v6708_v51 = vsel %vm13989_vm0, %v6704_v22, 0.0  ;;  %vm14007_vm0 = vmmov %vm14005_vm3 }
 0x750   : > { %v6710_v54 = vadd.f32 %v6708_v51, %v6551_v7  ;;  %v7983_v7 = vpop.permute.xlu1 %7982 }
 0x769   : > { %v6861_v62 = vpop.f32.mrb[44].mxu0 }
 0x76a   : > { %v6866_v52 = vsel %vm13990_vm13, %v6861_v62, 0.0  ;;  %v6863_v11 = vpop.f32.mrb[45].mxu0 }
 0x76b   : > { %v6868_v4 = vadd.f32 %v6866_v52, %v6709_v30  ;;  %v6867_v24 = vsel %vm13991_vm15, %v6863_v11, 0.0 }
 0x76c   : > { %v6869_v33 = vadd.f32 %v6867_v24, %v6710_v54 }
 0x780   : > { %v7020_v3 = vpop.f32.mrb[46].mxu0 }
 0x781   : > { %v7025_v42 = vsel %vm13992_vm1, %v7020_v3, 0.0  ;;  %v7022_v21 = vpop.f32.mrb[47].mxu0 }
 0x782   : > { %v7027_v53 = vadd.f32 %v7025_v42, %v6868_v4  ;;  %v7026_v48 = vsel %vm13993_vm14, %v7022_v21, 0.0 }
 0x783   : > { %v7028_v27 = vadd.f32 %v7026_v48, %v6869_v33 }
 0x7b0   : > { %v7336_v1 = vpop.f32.mrb[30].mxu1 }
 0x7b1   : > { %v7338_v16 = vpop.f32.mrb[31].mxu1  ;;  %v7341_v13 = vsel %vm13996_vm5, %v7336_v1, 0.0 }
 0x7b2   : > { %v7342_v15 = vsel %vm13999_vm8, %v7338_v16, 0.0 }
 0x7b3   : > { %v7179_v43 = vpop.f32.mrb[48].mxu0 }
 0x7b4   : > { %v7184_v35 = vsel %vm13994_vm6, %v7179_v43, 0.0  ;;  %v7181_v25 = vpop.f32.mrb[49].mxu0 }
 0x7b5   : > { %v7186_v31 = vadd.f32 %v7184_v35, %v7027_v53  ;;  %v7185_v23 = vsel %vm13997_vm7, %v7181_v25, 0.0 }
 0x7b6   : > { %v7187_v34 = vadd.f32 %v7185_v23, %v7028_v27 }
 0x7b7   : > { %v7343_v19 = vadd.f32 %v7341_v13, %v7186_v31 }
 0x7b8   : > { %v7344_v12 = vadd.f32 %v7342_v15, %v7187_v34 }
 0x7e1   : > { %v7652_v61 = vpop.f32.mrb[32].mxu1 }
 0x7e2   : > { %v7654_v57 = vpop.f32.mrb[33].mxu1  ;;  %v7657_v20 = vsel %vm14001_vm10, %v7652_v61, 0.0 }
 0x7e3   : > { %v7658_v18 = vsel %vm14003_vm12, %v7654_v57, 0.0 }
 0x7e8   : > { %v7495_v41 = vpop.f32.mrb[50].mxu0 }
 0x7e9   : > { %v7500_v17 = vsel %vm14000_vm9, %v7495_v41, 0.0  ;;  %v7497_v32 = vpop.f32.mrb[51].mxu0 }
 0x7ea   : > { %v7502_v36 = vadd.f32 %v7500_v17, %v7343_v19  ;;  %v7501_v10 = vsel %vm14002_vm11, %v7497_v32, 0.0 }
 0x7eb   : > { %v7503_v63 = vadd.f32 %v7501_v10, %v7344_v12 }
 0x7ec   : > { %v7659_v50 = vadd.f32 %v7657_v20, %v7502_v36 }
 0x7ed   : > { %v7660_v44 = vadd.f32 %v7658_v18, %v7503_v63 }
 0x80d   : > { %v7811_v6 = vpop.f32.mrb[52].mxu0 }
 0x80e   : > { %v7816_v46 = vsel %vm14004_vm2, %v7811_v6, 0.0  ;;  %v7813_v28 = vpop.f32.mrb[53].mxu0 }
 0x80f   : > { %v7818_v58 = vadd.f32 %v7816_v46, %v7659_v50  ;;  %v7817_v45 = vsel %vm14005_vm3, %v7813_v28, 0.0 }
 0x810   : > { %v7819_v26 = vadd.f32 %v7817_v45, %v7660_v44 }
 0x814   : > { %v7970_v56 = vpop.f32.mrb[34].mxu1 }
 0x815   : > { %v7975_v2 = vsel %vm14006_vm4, %v7970_v56, 0.0  ;;  %v7972_v29 = vpop.f32.mrb[35].mxu1 }
 0x816   : > { %v7977_v47 = vadd.f32 %v7975_v2, %v7818_v58  ;;  %v7976_v14 = vsel %vm14007_vm0, %v7972_v29, 0.0 }
 0x817   : > { %v7978_v49 = vadd.f32 %v7976_v14, %v7819_v26 }
 0x818   : > { %v7985_v0 = vadd.f32 %v7983_v7, %v7977_v47 }
 0x819   : > { %v7986_v9 = vadd.f32 %v7983_v7, %v7978_v49 }
 0x81b   : > { %v7989_v37 = vcombine.low %v7985_v0, %v7986_v9 }
 0x81d   : > { %8107 = vst.sshfl [vmem:[%s278_s14] sm:$0x33 pattern:$0x76325410] %v7989_v37 }
 0x81e PF: > { %s17_s24 = sadd.s32 1, %s10210_s24  }
 0x81f   : > { %p14_p4 = scmp.ge.s32.totalorder %s17_s24, 4  }
 0x821   :  { %16 = sbr.rel (!%p14_p4) target bundleno = 1 (0x1), region = 78 }

</bundles_post_ra>
